<compile_context>
chip_gen: v5e
topology: v5e:2x2
jax: 0.10.0
libtpu: 0.0.40
codegen_flags: <defaults>
</compile_context>

<pallas_src>
import functools
import math

import jax
import jax.numpy as jnp
from jax.experimental import pallas as pl
from jax.experimental.pallas import tpu as pltpu

HIDDEN = 100
HP = 128                     # padded hidden (lane-aligned)
HEADS = 10
HEAD_DIM = HIDDEN // HEADS
INTERMEDIATE = 768
LAYERS = 4
EPS = 1e-12


# ----------------------------- fused Pallas kernel ---------------------------

def _bert_kernel(emb_ref, mask_ref, eln_g_ref, eln_b_ref,
                 qkv_w_ref, qkv_b_ref, ao_w_ref, ao_b_ref,
                 aln_g_ref, aln_b_ref, i_w_ref, i_b_ref,
                 o_w_ref, o_b_ref, oln_g_ref, oln_b_ref,
                 pool_w_ref, pool_b_ref, cls_w_ref, cls_b_ref,
                 out_ref):
    lane = jax.lax.broadcasted_iota(jnp.int32, (1, HP), 1)
    feat_mask = (lane < HIDDEN).astype(jnp.float32)                      # (1, 128)
    head_masks = [((lane >= h * HEAD_DIM) & (lane < (h + 1) * HEAD_DIM)
                   ).astype(jnp.float32) for h in range(HEADS)]

    def layernorm(x, g, b):
        # mean/var over the real 100 features only; padded lanes stay exactly 0.
        mu = jnp.sum(x * feat_mask, axis=-1, keepdims=True) * (1.0 / HIDDEN)
        d = (x - mu) * feat_mask
        var = jnp.sum(d * d, axis=-1, keepdims=True) * (1.0 / HIDDEN)
        return d * jax.lax.rsqrt(var + EPS) * g + b

    h = emb_ref[0]                                                       # (S, 128)
    h = layernorm(h, eln_g_ref[...], eln_b_ref[...])
    am = mask_ref[0]                                                     # (1, S) additive mask
    scale = 1.0 / math.sqrt(HEAD_DIM)
    inv_sqrt2 = 1.0 / math.sqrt(2.0)

    for l in range(LAYERS):
        # fused Q/K/V projection: one MXU pass over N = 3*128
        qkv = jnp.dot(h, qkv_w_ref[l], preferred_element_type=jnp.float32) + qkv_b_ref[l]
        q = qkv[:, 0:HP]
        k = qkv[:, HP:2 * HP]
        v = qkv[:, 2 * HP:3 * HP]

        # per-head attention via lane masks (disjoint 10-lane windows of the 100 real dims)
        ctx = jnp.zeros_like(h)
        for hh in range(HEADS):
            hm = head_masks[hh]
            s = jax.lax.dot_general(q * hm, k, (((1,), (1,)), ((), ())),
                                    preferred_element_type=jnp.float32) * scale   # (S, S)
            s = s + am
            s = s - jnp.max(s, axis=-1, keepdims=True)
            p = jnp.exp(s)
            p = p * pl.reciprocal(jnp.sum(p, axis=-1, keepdims=True), approx=True)
            ctx = ctx + jnp.dot(p, v, preferred_element_type=jnp.float32) * hm

        attn_out = jnp.dot(ctx, ao_w_ref[l], preferred_element_type=jnp.float32) + ao_b_ref[l]
        h = layernorm(attn_out + h, aln_g_ref[l], aln_b_ref[l])

        inter = jnp.dot(h, i_w_ref[l], preferred_element_type=jnp.float32) + i_b_ref[l]
        inter = 0.5 * inter * (1.0 + jax.lax.erf(inter * inv_sqrt2))     # exact (erf) gelu
        ffn = jnp.dot(inter, o_w_ref[l], preferred_element_type=jnp.float32) + o_b_ref[l]
        h = layernorm(ffn + h, oln_g_ref[l], oln_b_ref[l])

    # pooler (tanh dense on first token) + classifier, fused into the kernel tail
    first = h[0:1, :]                                                    # (1, 128)
    pooled = jnp.tanh(jnp.dot(first, pool_w_ref[...],
                              preferred_element_type=jnp.float32) + pool_b_ref[...])
    logits = jnp.dot(pooled, cls_w_ref[...],
                     preferred_element_type=jnp.float32) + cls_b_ref[...]
    out_ref[0] = logits                                                  # (1, 128); cols 0..1 real


def bert_forward(packed, input_ids, attention_mask):
    S = input_ids.shape[-1]
    flat_ids = input_ids.reshape(-1, S)
    flat_mask = attention_mask.reshape(-1, S).astype(jnp.float32)
    B = flat_ids.shape[0]

    # Embedding gathers stay in XLA; tables are pre-padded to 128 lanes.
    words = jnp.take(packed["word_emb"], flat_ids, axis=0)               # (B, S, 128)
    emb = words + packed["pos_emb"][:S][None] + packed["type_emb"][0][None, None]
    mask_add = ((1.0 - flat_mask) * -10000.0).reshape(B, 1, S)           # additive, per batch

    const2 = lambda b: (0, 0)
    const3 = lambda b: (0, 0, 0)
    out = pl.pallas_call(
        _bert_kernel,
        out_shape=jax.ShapeDtypeStruct((B, 1, HP), jnp.float32),
        grid=(B,),
        in_specs=[
            pl.BlockSpec((1, S, HP), lambda b: (b, 0, 0)),               # emb
            pl.BlockSpec((1, 1, S), lambda b: (b, 0, 0)),                # additive mask
            pl.BlockSpec((1, HP), const2),                               # emb LN gamma
            pl.BlockSpec((1, HP), const2),                               # emb LN beta
            pl.BlockSpec((LAYERS, HP, 3 * HP), const3),                  # qkv_w
            pl.BlockSpec((LAYERS, 1, 3 * HP), const3),                   # qkv_b
            pl.BlockSpec((LAYERS, HP, HP), const3),                      # ao_w
            pl.BlockSpec((LAYERS, 1, HP), const3),                       # ao_b
            pl.BlockSpec((LAYERS, 1, HP), const3),                       # attn LN gamma
            pl.BlockSpec((LAYERS, 1, HP), const3),                       # attn LN beta
            pl.BlockSpec((LAYERS, HP, INTERMEDIATE), const3),            # i_w
            pl.BlockSpec((LAYERS, 1, INTERMEDIATE), const3),             # i_b
            pl.BlockSpec((LAYERS, INTERMEDIATE, HP), const3),            # o_w
            pl.BlockSpec((LAYERS, 1, HP), const3),                       # o_b
            pl.BlockSpec((LAYERS, 1, HP), const3),                       # out LN gamma
            pl.BlockSpec((LAYERS, 1, HP), const3),                       # out LN beta
            pl.BlockSpec((HP, HP), const2),                              # pool_w
            pl.BlockSpec((1, HP), const2),                               # pool_b
            pl.BlockSpec((HP, HP), const2),                              # cls_w (2 real cols)
            pl.BlockSpec((1, HP), const2),                               # cls_b
        ],
        out_specs=pl.BlockSpec((1, 1, HP), lambda b: (b, 0, 0)),
        compiler_params=pltpu.CompilerParams(
            dimension_semantics=("parallel",),
            vmem_limit_bytes=32 * 1024 * 1024,
        ),
    )(emb, mask_add, packed["eln_g"], packed["eln_b"],
      packed["qkv_w"], packed["qkv_b"], packed["ao_w"], packed["ao_b"],
      packed["aln_g"], packed["aln_b"], packed["i_w"], packed["i_b"],
      packed["o_w"], packed["o_b"], packed["oln_g"], packed["oln_b"],
      packed["pool_w"], packed["pool_b"], packed["cls_w"], packed["cls_b"])
    return out.reshape(B, HP)[:, :2]
    # TODO(synk): CrossEntropyLoss branch (labels is not None) not implemented; module returns logits when labels=None.


# ------------------------------ parameters -----------------------------------

def init_params(key, vocab_size, max_pos, type_vocab=2):
    keys = iter(jax.random.split(key, 8 + LAYERS * 16))

    def nrm(shape):
        return 0.02 * jax.random.normal(next(keys), shape, jnp.float32)

    params = {
        "word_emb": nrm((vocab_size, HIDDEN)),
        "pos_emb": nrm((max_pos, HIDDEN)),
        "type_emb": nrm((type_vocab, HIDDEN)),
        "emb_ln_g": jnp.ones((HIDDEN,), jnp.float32),
        "emb_ln_b": jnp.zeros((HIDDEN,), jnp.float32),
        "pool_w": nrm((HIDDEN, HIDDEN)),
        "pool_b": jnp.zeros((HIDDEN,), jnp.float32),
        "cls_w": nrm((HIDDEN, 2)),
        "cls_b": jnp.zeros((2,), jnp.float32),
        "layers": [],
    }
    for _ in range(LAYERS):
        params["layers"].append({
            "q_w": nrm((HIDDEN, HIDDEN)), "q_b": jnp.zeros((HIDDEN,), jnp.float32),
            "k_w": nrm((HIDDEN, HIDDEN)), "k_b": jnp.zeros((HIDDEN,), jnp.float32),
            "v_w": nrm((HIDDEN, HIDDEN)), "v_b": jnp.zeros((HIDDEN,), jnp.float32),
            "ao_w": nrm((HIDDEN, HIDDEN)), "ao_b": jnp.zeros((HIDDEN,), jnp.float32),
            "attn_ln_g": jnp.ones((HIDDEN,), jnp.float32),
            "attn_ln_b": jnp.zeros((HIDDEN,), jnp.float32),
            "i_w": nrm((HIDDEN, INTERMEDIATE)), "i_b": jnp.zeros((INTERMEDIATE,), jnp.float32),
            "o_w": nrm((INTERMEDIATE, HIDDEN)), "o_b": jnp.zeros((HIDDEN,), jnp.float32),
            "out_ln_g": jnp.ones((HIDDEN,), jnp.float32),
            "out_ln_b": jnp.zeros((HIDDEN,), jnp.float32),
        })
    return params


def pack_params(params):
    """Zero-pad hidden 100->128, merge Q/K/V, and stack per-layer weights for the kernel."""
    def pad_to(x, shape):
        out = jnp.zeros(shape, jnp.float32)
        return out.at[tuple(slice(0, s) for s in x.shape)].set(x)

    row = lambda x: x.reshape(1, -1)
    packed = {
        "word_emb": pad_to(params["word_emb"], (params["word_emb"].shape[0], HP)),
        "pos_emb": pad_to(params["pos_emb"], (params["pos_emb"].shape[0], HP)),
        "type_emb": pad_to(params["type_emb"], (params["type_emb"].shape[0], HP)),
        "eln_g": pad_to(row(params["emb_ln_g"]), (1, HP)),
        "eln_b": pad_to(row(params["emb_ln_b"]), (1, HP)),
        "pool_w": pad_to(params["pool_w"], (HP, HP)),
        "pool_b": pad_to(row(params["pool_b"]), (1, HP)),
        "cls_w": pad_to(params["cls_w"], (HP, HP)),
        "cls_b": pad_to(row(params["cls_b"]), (1, HP)),
    }
    acc = {k: [] for k in ("qkv_w", "qkv_b", "ao_w", "ao_b", "aln_g", "aln_b",
                           "i_w", "i_b", "o_w", "o_b", "oln_g", "oln_b")}
    for lp in params["layers"]:
        acc["qkv_w"].append(jnp.concatenate(
            [pad_to(lp["q_w"], (HP, HP)), pad_to(lp["k_w"], (HP, HP)),
             pad_to(lp["v_w"], (HP, HP))], axis=1))
        acc["qkv_b"].append(jnp.concatenate(
            [pad_to(row(lp["q_b"]), (1, HP)), pad_to(row(lp["k_b"]), (1, HP)),
             pad_to(row(lp["v_b"]), (1, HP))], axis=1))
        acc["ao_w"].append(pad_to(lp["ao_w"], (HP, HP)))
        acc["ao_b"].append(pad_to(row(lp["ao_b"]), (1, HP)))
        acc["aln_g"].append(pad_to(row(lp["attn_ln_g"]), (1, HP)))
        acc["aln_b"].append(pad_to(row(lp["attn_ln_b"]), (1, HP)))
        acc["i_w"].append(pad_to(lp["i_w"], (HP, INTERMEDIATE)))
        acc["i_b"].append(row(lp["i_b"]))
        acc["o_w"].append(pad_to(lp["o_w"], (INTERMEDIATE, HP)))
        acc["o_b"].append(pad_to(row(lp["o_b"]), (1, HP)))
        acc["oln_g"].append(pad_to(row(lp["out_ln_g"]), (1, HP)))
        acc["oln_b"].append(pad_to(row(lp["out_ln_b"]), (1, HP)))
    packed.update({k: jnp.stack(v) for k, v in acc.items()})
    return packed


# ------------------------- plain-JAX reference (check) ------------------------

def bert_forward_ref(params, input_ids, attention_mask):
    S = input_ids.shape[-1]
    flat_ids = input_ids.reshape(-1, S)
    flat_mask = attention_mask.reshape(-1, S).astype(jnp.float32)
    B = flat_ids.shape[0]
    words = jnp.take(params["word_emb"], flat_ids, axis=0)
    emb = words + params["pos_emb"][:S][None] + params["type_emb"][0][None, None]

    def ln(x, g, b):
        mu = x.mean(-1, keepdims=True)
        var = ((x - mu) ** 2).mean(-1, keepdims=True)
        return (x - mu) / jnp.sqrt(var + EPS) * g + b

    h = ln(emb, params["emb_ln_g"], params["emb_ln_b"])
    ext = (1.0 - flat_mask)[:, None, None, :] * -10000.0
    for lp in params["layers"]:
        heads = lambda x: x.reshape(B, S, HEADS, HEAD_DIM).transpose(0, 2, 1, 3)
        q = heads(h @ lp["q_w"] + lp["q_b"])
        k = heads(h @ lp["k_w"] + lp["k_b"])
        v = heads(h @ lp["v_w"] + lp["v_b"])
        s = jnp.einsum("bhqd,bhkd->bhqk", q, k) / math.sqrt(HEAD_DIM) + ext
        p = jax.nn.softmax(s, axis=-1)
        ctx = jnp.einsum("bhqk,bhkd->bhqd", p, v).transpose(0, 2, 1, 3).reshape(B, S, HIDDEN)
        h = ln(ctx @ lp["ao_w"] + lp["ao_b"] + h, lp["attn_ln_g"], lp["attn_ln_b"])
        inter = h @ lp["i_w"] + lp["i_b"]
        inter = 0.5 * inter * (1.0 + jax.lax.erf(inter / math.sqrt(2.0)))
        h = ln(inter @ lp["o_w"] + lp["o_b"] + h, lp["out_ln_g"], lp["out_ln_b"])
    pooled = jnp.tanh(h[:, 0, :] @ params["pool_w"] + params["pool_b"])
    return pooled @ params["cls_w"] + params["cls_b"]


# --------------------------------- main ---------------------------------------

if __name__ == "__main__":
    key = jax.random.PRNGKey(0)
    vocab_size = 50
    B, S = 2, 8
    pkey, ikey = jax.random.split(key)

    params = init_params(pkey, vocab_size, max_pos=16)
    packed = pack_params(params)
    input_ids = jax.random.randint(ikey, (B, S), 0, vocab_size, dtype=jnp.int32)
    attention_mask = jnp.ones((B, S), jnp.int32).at[1, 6:].set(0)  # pad last 2 tokens of seq 1

    fwd = jax.jit(bert_forward)
    logits = jax.block_until_ready(fwd(packed, input_ids, attention_mask))
    assert logits.shape == (B, 2) and logits.dtype == jnp.float32

    ref = bert_forward_ref(params, input_ids, attention_mask)
    assert jnp.allclose(logits, ref, rtol=5e-3, atol=5e-3), (logits, ref)
    print("KERNEL_OK")
</pallas_src>

<mosaic_0001>
module attributes {stable_mosaic.version = 11 : i64} {
  func.func @_bert_kernel(%arg0: i32, %arg1: memref<1x8x128xf32, #tpu.memory_space<vmem>>, %arg2: memref<1x1x8xf32, #tpu.memory_space<vmem>>, %arg3: memref<1x128xf32, #tpu.memory_space<vmem>>, %arg4: memref<1x128xf32, #tpu.memory_space<vmem>>, %arg5: memref<4x128x384xf32, #tpu.memory_space<vmem>>, %arg6: memref<4x1x384xf32, #tpu.memory_space<vmem>>, %arg7: memref<4x128x128xf32, #tpu.memory_space<vmem>>, %arg8: memref<4x1x128xf32, #tpu.memory_space<vmem>>, %arg9: memref<4x1x128xf32, #tpu.memory_space<vmem>>, %arg10: memref<4x1x128xf32, #tpu.memory_space<vmem>>, %arg11: memref<4x128x768xf32, #tpu.memory_space<vmem>>, %arg12: memref<4x1x768xf32, #tpu.memory_space<vmem>>, %arg13: memref<4x768x128xf32, #tpu.memory_space<vmem>>, %arg14: memref<4x1x128xf32, #tpu.memory_space<vmem>>, %arg15: memref<4x1x128xf32, #tpu.memory_space<vmem>>, %arg16: memref<4x1x128xf32, #tpu.memory_space<vmem>>, %arg17: memref<128x128xf32, #tpu.memory_space<vmem>>, %arg18: memref<1x128xf32, #tpu.memory_space<vmem>>, %arg19: memref<128x128xf32, #tpu.memory_space<vmem>>, %arg20: memref<1x128xf32, #tpu.memory_space<vmem>>, %arg21: memref<1x1x128xf32, #tpu.memory_space<vmem>>) attributes {dimension_semantics = [#tpu.dimension_semantics<parallel>], iteration_bounds = array<i64: 2>, scalar_prefetch = 0 : i64, scratch_operands = 0 : i64, tpu.core_type = #tpu.core_type<tc>, window_params = [{transform_indices = @transform_0, window_bounds = array<i64: 1, 8, 128>}, {transform_indices = @transform_1, window_bounds = array<i64: 1, 1, 8>}, {pipeline_mode = #tpu.pipeline_mode<synchronous>, transform_indices = @transform_2, window_bounds = array<i64: 1, 128>}, {pipeline_mode = #tpu.pipeline_mode<synchronous>, transform_indices = @transform_3, window_bounds = array<i64: 1, 128>}, {pipeline_mode = #tpu.pipeline_mode<synchronous>, transform_indices = @transform_4, window_bounds = array<i64: 4, 128, 384>}, {pipeline_mode = #tpu.pipeline_mode<synchronous>, transform_indices = @transform_5, window_bounds = array<i64: 4, 1, 384>}, {pipeline_mode = #tpu.pipeline_mode<synchronous>, transform_indices = @transform_6, window_bounds = array<i64: 4, 128, 128>}, {pipeline_mode = #tpu.pipeline_mode<synchronous>, transform_indices = @transform_7, window_bounds = array<i64: 4, 1, 128>}, {pipeline_mode = #tpu.pipeline_mode<synchronous>, transform_indices = @transform_8, window_bounds = array<i64: 4, 1, 128>}, {pipeline_mode = #tpu.pipeline_mode<synchronous>, transform_indices = @transform_9, window_bounds = array<i64: 4, 1, 128>}, {pipeline_mode = #tpu.pipeline_mode<synchronous>, transform_indices = @transform_10, window_bounds = array<i64: 4, 128, 768>}, {pipeline_mode = #tpu.pipeline_mode<synchronous>, transform_indices = @transform_11, window_bounds = array<i64: 4, 1, 768>}, {pipeline_mode = #tpu.pipeline_mode<synchronous>, transform_indices = @transform_12, window_bounds = array<i64: 4, 768, 128>}, {pipeline_mode = #tpu.pipeline_mode<synchronous>, transform_indices = @transform_13, window_bounds = array<i64: 4, 1, 128>}, {pipeline_mode = #tpu.pipeline_mode<synchronous>, transform_indices = @transform_14, window_bounds = array<i64: 4, 1, 128>}, {pipeline_mode = #tpu.pipeline_mode<synchronous>, transform_indices = @transform_15, window_bounds = array<i64: 4, 1, 128>}, {pipeline_mode = #tpu.pipeline_mode<synchronous>, transform_indices = @transform_16, window_bounds = array<i64: 128, 128>}, {pipeline_mode = #tpu.pipeline_mode<synchronous>, transform_indices = @transform_17, window_bounds = array<i64: 1, 128>}, {pipeline_mode = #tpu.pipeline_mode<synchronous>, transform_indices = @transform_18, window_bounds = array<i64: 128, 128>}, {pipeline_mode = #tpu.pipeline_mode<synchronous>, transform_indices = @transform_19, window_bounds = array<i64: 1, 128>}, {transform_indices = @transform_20, window_bounds = array<i64: 1, 1, 128>}]} {
    %0 = tpu.iota {dimensions = array<i32: 1>} : vector<1x128xi32>
    %c100_i32 = arith.constant 100 : i32
    %1 = vector.broadcast %c100_i32 : i32 to vector<1x128xi32>
    %2 = arith.cmpi slt, %0, %1 : vector<1x128xi32>
    %3 = arith.extui %2 : vector<1x128xi1> to vector<1x128xi32>
    %4 = arith.sitofp %3 : vector<1x128xi32> to vector<1x128xf32>
    %c0_i32 = arith.constant 0 : i32
    %5 = vector.broadcast %c0_i32 : i32 to vector<1x128xi32>
    %6 = arith.cmpi sge, %0, %5 : vector<1x128xi32>
    %c10_i32 = arith.constant 10 : i32
    %7 = vector.broadcast %c10_i32 : i32 to vector<1x128xi32>
    %8 = arith.cmpi slt, %0, %7 : vector<1x128xi32>
    %9 = arith.andi %6, %8 : vector<1x128xi1>
    %10 = arith.extui %9 : vector<1x128xi1> to vector<1x128xi32>
    %11 = arith.sitofp %10 : vector<1x128xi32> to vector<1x128xf32>
    %c10_i32_0 = arith.constant 10 : i32
    %12 = vector.broadcast %c10_i32_0 : i32 to vector<1x128xi32>
    %13 = arith.cmpi sge, %0, %12 : vector<1x128xi32>
    %c20_i32 = arith.constant 20 : i32
    %14 = vector.broadcast %c20_i32 : i32 to vector<1x128xi32>
    %15 = arith.cmpi slt, %0, %14 : vector<1x128xi32>
    %16 = arith.andi %13, %15 : vector<1x128xi1>
    %17 = arith.extui %16 : vector<1x128xi1> to vector<1x128xi32>
    %18 = arith.sitofp %17 : vector<1x128xi32> to vector<1x128xf32>
    %c20_i32_1 = arith.constant 20 : i32
    %19 = vector.broadcast %c20_i32_1 : i32 to vector<1x128xi32>
    %20 = arith.cmpi sge, %0, %19 : vector<1x128xi32>
    %c30_i32 = arith.constant 30 : i32
    %21 = vector.broadcast %c30_i32 : i32 to vector<1x128xi32>
    %22 = arith.cmpi slt, %0, %21 : vector<1x128xi32>
    %23 = arith.andi %20, %22 : vector<1x128xi1>
    %24 = arith.extui %23 : vector<1x128xi1> to vector<1x128xi32>
    %25 = arith.sitofp %24 : vector<1x128xi32> to vector<1x128xf32>
    %c30_i32_2 = arith.constant 30 : i32
    %26 = vector.broadcast %c30_i32_2 : i32 to vector<1x128xi32>
    %27 = arith.cmpi sge, %0, %26 : vector<1x128xi32>
    %c40_i32 = arith.constant 40 : i32
    %28 = vector.broadcast %c40_i32 : i32 to vector<1x128xi32>
    %29 = arith.cmpi slt, %0, %28 : vector<1x128xi32>
    %30 = arith.andi %27, %29 : vector<1x128xi1>
    %31 = arith.extui %30 : vector<1x128xi1> to vector<1x128xi32>
    %32 = arith.sitofp %31 : vector<1x128xi32> to vector<1x128xf32>
    %c40_i32_3 = arith.constant 40 : i32
    %33 = vector.broadcast %c40_i32_3 : i32 to vector<1x128xi32>
    %34 = arith.cmpi sge, %0, %33 : vector<1x128xi32>
    %c50_i32 = arith.constant 50 : i32
    %35 = vector.broadcast %c50_i32 : i32 to vector<1x128xi32>
    %36 = arith.cmpi slt, %0, %35 : vector<1x128xi32>
    %37 = arith.andi %34, %36 : vector<1x128xi1>
    %38 = arith.extui %37 : vector<1x128xi1> to vector<1x128xi32>
    %39 = arith.sitofp %38 : vector<1x128xi32> to vector<1x128xf32>
    %c50_i32_4 = arith.constant 50 : i32
    %40 = vector.broadcast %c50_i32_4 : i32 to vector<1x128xi32>
    %41 = arith.cmpi sge, %0, %40 : vector<1x128xi32>
    %c60_i32 = arith.constant 60 : i32
    %42 = vector.broadcast %c60_i32 : i32 to vector<1x128xi32>
    %43 = arith.cmpi slt, %0, %42 : vector<1x128xi32>
    %44 = arith.andi %41, %43 : vector<1x128xi1>
    %45 = arith.extui %44 : vector<1x128xi1> to vector<1x128xi32>
    %46 = arith.sitofp %45 : vector<1x128xi32> to vector<1x128xf32>
    %c60_i32_5 = arith.constant 60 : i32
    %47 = vector.broadcast %c60_i32_5 : i32 to vector<1x128xi32>
    %48 = arith.cmpi sge, %0, %47 : vector<1x128xi32>
    %c70_i32 = arith.constant 70 : i32
    %49 = vector.broadcast %c70_i32 : i32 to vector<1x128xi32>
    %50 = arith.cmpi slt, %0, %49 : vector<1x128xi32>
    %51 = arith.andi %48, %50 : vector<1x128xi1>
    %52 = arith.extui %51 : vector<1x128xi1> to vector<1x128xi32>
    %53 = arith.sitofp %52 : vector<1x128xi32> to vector<1x128xf32>
    %c70_i32_6 = arith.constant 70 : i32
    %54 = vector.broadcast %c70_i32_6 : i32 to vector<1x128xi32>
    %55 = arith.cmpi sge, %0, %54 : vector<1x128xi32>
    %c80_i32 = arith.constant 80 : i32
    %56 = vector.broadcast %c80_i32 : i32 to vector<1x128xi32>
    %57 = arith.cmpi slt, %0, %56 : vector<1x128xi32>
    %58 = arith.andi %55, %57 : vector<1x128xi1>
    %59 = arith.extui %58 : vector<1x128xi1> to vector<1x128xi32>
    %60 = arith.sitofp %59 : vector<1x128xi32> to vector<1x128xf32>
    %c80_i32_7 = arith.constant 80 : i32
    %61 = vector.broadcast %c80_i32_7 : i32 to vector<1x128xi32>
    %62 = arith.cmpi sge, %0, %61 : vector<1x128xi32>
    %c90_i32 = arith.constant 90 : i32
    %63 = vector.broadcast %c90_i32 : i32 to vector<1x128xi32>
    %64 = arith.cmpi slt, %0, %63 : vector<1x128xi32>
    %65 = arith.andi %62, %64 : vector<1x128xi1>
    %66 = arith.extui %65 : vector<1x128xi1> to vector<1x128xi32>
    %67 = arith.sitofp %66 : vector<1x128xi32> to vector<1x128xf32>
    %c90_i32_8 = arith.constant 90 : i32
    %68 = vector.broadcast %c90_i32_8 : i32 to vector<1x128xi32>
    %69 = arith.cmpi sge, %0, %68 : vector<1x128xi32>
    %c100_i32_9 = arith.constant 100 : i32
    %70 = vector.broadcast %c100_i32_9 : i32 to vector<1x128xi32>
    %71 = arith.cmpi slt, %0, %70 : vector<1x128xi32>
    %72 = arith.andi %69, %71 : vector<1x128xi1>
    %73 = arith.extui %72 : vector<1x128xi1> to vector<1x128xi32>
    %74 = arith.sitofp %73 : vector<1x128xi32> to vector<1x128xf32>
    %c0 = arith.constant 0 : index
    %c0_10 = arith.constant 0 : index
    %c0_11 = arith.constant 0 : index
    %75 = vector.load %arg1[%c0, %c0_10, %c0_11] : memref<1x8x128xf32, #tpu.memory_space<vmem>>, vector<1x8x128xf32>
    %76 = vector.shape_cast %75 : vector<1x8x128xf32> to vector<8x128xf32>
    %c0_12 = arith.constant 0 : index
    %c0_13 = arith.constant 0 : index
    %77 = vector.load %arg3[%c0_12, %c0_13] : memref<1x128xf32, #tpu.memory_space<vmem>>, vector<1x128xf32>
    %c0_14 = arith.constant 0 : index
    %c0_15 = arith.constant 0 : index
    %78 = vector.load %arg4[%c0_14, %c0_15] : memref<1x128xf32, #tpu.memory_space<vmem>>, vector<1x128xf32>
    %79 = vector.broadcast %4 : vector<1x128xf32> to vector<8x128xf32>
    %80 = arith.mulf %76, %79 : vector<8x128xf32>
    %cst = arith.constant dense<0.000000e+00> : vector<8xf32>
    %81 = vector.multi_reduction <add>, %80, %cst [1] : vector<8x128xf32> to vector<8xf32>
    %82 = vector.shape_cast %81 : vector<8xf32> to vector<8x1xf32>
    %cst_16 = arith.constant 0.00999999977 : f32
    %83 = vector.broadcast %cst_16 : f32 to vector<8x1xf32>
    %84 = arith.mulf %82, %83 : vector<8x1xf32>
    %85 = vector.broadcast %84 : vector<8x1xf32> to vector<8x128xf32>
    %86 = arith.subf %76, %85 : vector<8x128xf32>
    %87 = vector.broadcast %4 : vector<1x128xf32> to vector<8x128xf32>
    %88 = arith.mulf %86, %87 : vector<8x128xf32>
    %89 = arith.mulf %88, %88 : vector<8x128xf32>
    %cst_17 = arith.constant dense<0.000000e+00> : vector<8xf32>
    %90 = vector.multi_reduction <add>, %89, %cst_17 [1] : vector<8x128xf32> to vector<8xf32>
    %91 = vector.shape_cast %90 : vector<8xf32> to vector<8x1xf32>
    %cst_18 = arith.constant 0.00999999977 : f32
    %92 = vector.broadcast %cst_18 : f32 to vector<8x1xf32>
    %93 = arith.mulf %91, %92 : vector<8x1xf32>
    %cst_19 = arith.constant 9.99999996E-13 : f32
    %94 = vector.broadcast %cst_19 : f32 to vector<8x1xf32>
    %95 = arith.addf %93, %94 : vector<8x1xf32>
    %96 = math.rsqrt %95 : vector<8x1xf32>
    %97 = vector.broadcast %96 : vector<8x1xf32> to vector<8x128xf32>
    %98 = arith.mulf %88, %97 : vector<8x128xf32>
    %99 = vector.broadcast %77 : vector<1x128xf32> to vector<8x128xf32>
    %100 = arith.mulf %98, %99 : vector<8x128xf32>
    %101 = vector.broadcast %78 : vector<1x128xf32> to vector<8x128xf32>
    %102 = arith.addf %100, %101 : vector<8x128xf32>
    %c0_20 = arith.constant 0 : index
    %c0_21 = arith.constant 0 : index
    %c0_22 = arith.constant 0 : index
    %103 = vector.load %arg2[%c0_20, %c0_21, %c0_22] : memref<1x1x8xf32, #tpu.memory_space<vmem>>, vector<1x1x8xf32>
    %104 = vector.shape_cast %103 : vector<1x1x8xf32> to vector<1x8xf32>
    %c0_23 = arith.constant 0 : index
    %c0_24 = arith.constant 0 : index
    %c0_25 = arith.constant 0 : index
    %105 = vector.load %arg5[%c0_23, %c0_24, %c0_25] : memref<4x128x384xf32, #tpu.memory_space<vmem>>, vector<1x128x384xf32>
    %106 = vector.shape_cast %105 : vector<1x128x384xf32> to vector<128x384xf32>
    %cst_26 = arith.constant dense<0.000000e+00> : vector<8x384xf32>
    %107 = tpu.matmul %102, %106, %cst_26 {dimension_numbers = #tpu.dot_dimension_numbers<[1], [0], [0], [1], [0, 0, 1, 1], [], []>} : vector<8x128xf32>, vector<128x384xf32>, vector<8x384xf32> -> vector<8x384xf32>
    %c0_27 = arith.constant 0 : index
    %c0_28 = arith.constant 0 : index
    %c0_29 = arith.constant 0 : index
    %108 = vector.load %arg6[%c0_27, %c0_28, %c0_29] : memref<4x1x384xf32, #tpu.memory_space<vmem>>, vector<1x1x384xf32>
    %109 = vector.shape_cast %108 : vector<1x1x384xf32> to vector<1x384xf32>
    %110 = vector.broadcast %109 : vector<1x384xf32> to vector<8x384xf32>
    %111 = arith.addf %107, %110 : vector<8x384xf32>
    %112 = vector.extract_strided_slice %111 {offsets = [0, 0], sizes = [8, 128], strides = [1, 1]} : vector<8x384xf32> to vector<8x128xf32>
    %113 = vector.extract_strided_slice %111 {offsets = [0, 128], sizes = [8, 128], strides = [1, 1]} : vector<8x384xf32> to vector<8x128xf32>
    %114 = vector.extract_strided_slice %111 {offsets = [0, 256], sizes = [8, 128], strides = [1, 1]} : vector<8x384xf32> to vector<8x128xf32>
    %cst_30 = arith.constant 0.000000e+00 : f32
    %115 = vector.broadcast %cst_30 : f32 to vector<8x128xf32>
    %116 = vector.broadcast %11 : vector<1x128xf32> to vector<8x128xf32>
    %117 = arith.mulf %112, %116 : vector<8x128xf32>
    %cst_31 = arith.constant dense<0.000000e+00> : vector<8x8xf32>
    %118 = tpu.matmul %117, %113, %cst_31 {dimension_numbers = #tpu.dot_dimension_numbers<[1], [1], [0], [0], [0, 0, 1, 0], [], []>} : vector<8x128xf32>, vector<8x128xf32>, vector<8x8xf32> -> vector<8x8xf32>
    %cst_32 = arith.constant 0.316227764 : f32
    %119 = vector.broadcast %cst_32 : f32 to vector<8x8xf32>
    %120 = arith.mulf %118, %119 : vector<8x8xf32>
    %121 = vector.broadcast %104 : vector<1x8xf32> to vector<8x8xf32>
    %122 = arith.addf %120, %121 : vector<8x8xf32>
    %cst_33 = arith.constant dense<0xFF800000> : vector<8xf32>
    %123 = vector.multi_reduction <maximumf>, %122, %cst_33 [1] : vector<8x8xf32> to vector<8xf32>
    %124 = vector.shape_cast %123 : vector<8xf32> to vector<8x1xf32>
    %125 = vector.broadcast %124 : vector<8x1xf32> to vector<8x8xf32>
    %126 = arith.subf %122, %125 : vector<8x8xf32>
    %127 = math.exp %126 : vector<8x8xf32>
    %cst_34 = arith.constant dense<0.000000e+00> : vector<8xf32>
    %128 = vector.multi_reduction <add>, %127, %cst_34 [1] : vector<8x8xf32> to vector<8xf32>
    %129 = vector.shape_cast %128 : vector<8xf32> to vector<8x1xf32>
    %130 = tpu.reciprocal %129 {approx = true} : vector<8x1xf32> -> vector<8x1xf32>
    %131 = vector.broadcast %130 : vector<8x1xf32> to vector<8x8xf32>
    %132 = arith.mulf %127, %131 : vector<8x8xf32>
    %cst_35 = arith.constant dense<0.000000e+00> : vector<8x128xf32>
    %133 = tpu.matmul %132, %114, %cst_35 {dimension_numbers = #tpu.dot_dimension_numbers<[1], [0], [0], [1], [0, 0, 1, 1], [], []>} : vector<8x8xf32>, vector<8x128xf32>, vector<8x128xf32> -> vector<8x128xf32>
    %134 = vector.broadcast %11 : vector<1x128xf32> to vector<8x128xf32>
    %135 = arith.mulf %133, %134 : vector<8x128xf32>
    %136 = arith.addf %115, %135 : vector<8x128xf32>
    %137 = vector.broadcast %18 : vector<1x128xf32> to vector<8x128xf32>
    %138 = arith.mulf %112, %137 : vector<8x128xf32>
    %cst_36 = arith.constant dense<0.000000e+00> : vector<8x8xf32>
    %139 = tpu.matmul %138, %113, %cst_36 {dimension_numbers = #tpu.dot_dimension_numbers<[1], [1], [0], [0], [0, 0, 1, 0], [], []>} : vector<8x128xf32>, vector<8x128xf32>, vector<8x8xf32> -> vector<8x8xf32>
    %cst_37 = arith.constant 0.316227764 : f32
    %140 = vector.broadcast %cst_37 : f32 to vector<8x8xf32>
    %141 = arith.mulf %139, %140 : vector<8x8xf32>
    %142 = vector.broadcast %104 : vector<1x8xf32> to vector<8x8xf32>
    %143 = arith.addf %141, %142 : vector<8x8xf32>
    %cst_38 = arith.constant dense<0xFF800000> : vector<8xf32>
    %144 = vector.multi_reduction <maximumf>, %143, %cst_38 [1] : vector<8x8xf32> to vector<8xf32>
    %145 = vector.shape_cast %144 : vector<8xf32> to vector<8x1xf32>
    %146 = vector.broadcast %145 : vector<8x1xf32> to vector<8x8xf32>
    %147 = arith.subf %143, %146 : vector<8x8xf32>
    %148 = math.exp %147 : vector<8x8xf32>
    %cst_39 = arith.constant dense<0.000000e+00> : vector<8xf32>
    %149 = vector.multi_reduction <add>, %148, %cst_39 [1] : vector<8x8xf32> to vector<8xf32>
    %150 = vector.shape_cast %149 : vector<8xf32> to vector<8x1xf32>
    %151 = tpu.reciprocal %150 {approx = true} : vector<8x1xf32> -> vector<8x1xf32>
    %152 = vector.broadcast %151 : vector<8x1xf32> to vector<8x8xf32>
    %153 = arith.mulf %148, %152 : vector<8x8xf32>
    %cst_40 = arith.constant dense<0.000000e+00> : vector<8x128xf32>
    %154 = tpu.matmul %153, %114, %cst_40 {dimension_numbers = #tpu.dot_dimension_numbers<[1], [0], [0], [1], [0, 0, 1, 1], [], []>} : vector<8x8xf32>, vector<8x128xf32>, vector<8x128xf32> -> vector<8x128xf32>
    %155 = vector.broadcast %18 : vector<1x128xf32> to vector<8x128xf32>
    %156 = arith.mulf %154, %155 : vector<8x128xf32>
    %157 = arith.addf %136, %156 : vector<8x128xf32>
    %158 = vector.broadcast %25 : vector<1x128xf32> to vector<8x128xf32>
    %159 = arith.mulf %112, %158 : vector<8x128xf32>
    %cst_41 = arith.constant dense<0.000000e+00> : vector<8x8xf32>
    %160 = tpu.matmul %159, %113, %cst_41 {dimension_numbers = #tpu.dot_dimension_numbers<[1], [1], [0], [0], [0, 0, 1, 0], [], []>} : vector<8x128xf32>, vector<8x128xf32>, vector<8x8xf32> -> vector<8x8xf32>
    %cst_42 = arith.constant 0.316227764 : f32
    %161 = vector.broadcast %cst_42 : f32 to vector<8x8xf32>
    %162 = arith.mulf %160, %161 : vector<8x8xf32>
    %163 = vector.broadcast %104 : vector<1x8xf32> to vector<8x8xf32>
    %164 = arith.addf %162, %163 : vector<8x8xf32>
    %cst_43 = arith.constant dense<0xFF800000> : vector<8xf32>
    %165 = vector.multi_reduction <maximumf>, %164, %cst_43 [1] : vector<8x8xf32> to vector<8xf32>
    %166 = vector.shape_cast %165 : vector<8xf32> to vector<8x1xf32>
    %167 = vector.broadcast %166 : vector<8x1xf32> to vector<8x8xf32>
    %168 = arith.subf %164, %167 : vector<8x8xf32>
    %169 = math.exp %168 : vector<8x8xf32>
    %cst_44 = arith.constant dense<0.000000e+00> : vector<8xf32>
    %170 = vector.multi_reduction <add>, %169, %cst_44 [1] : vector<8x8xf32> to vector<8xf32>
    %171 = vector.shape_cast %170 : vector<8xf32> to vector<8x1xf32>
    %172 = tpu.reciprocal %171 {approx = true} : vector<8x1xf32> -> vector<8x1xf32>
    %173 = vector.broadcast %172 : vector<8x1xf32> to vector<8x8xf32>
    %174 = arith.mulf %169, %173 : vector<8x8xf32>
    %cst_45 = arith.constant dense<0.000000e+00> : vector<8x128xf32>
    %175 = tpu.matmul %174, %114, %cst_45 {dimension_numbers = #tpu.dot_dimension_numbers<[1], [0], [0], [1], [0, 0, 1, 1], [], []>} : vector<8x8xf32>, vector<8x128xf32>, vector<8x128xf32> -> vector<8x128xf32>
    %176 = vector.broadcast %25 : vector<1x128xf32> to vector<8x128xf32>
    %177 = arith.mulf %175, %176 : vector<8x128xf32>
    %178 = arith.addf %157, %177 : vector<8x128xf32>
    %179 = vector.broadcast %32 : vector<1x128xf32> to vector<8x128xf32>
    %180 = arith.mulf %112, %179 : vector<8x128xf32>
    %cst_46 = arith.constant dense<0.000000e+00> : vector<8x8xf32>
    %181 = tpu.matmul %180, %113, %cst_46 {dimension_numbers = #tpu.dot_dimension_numbers<[1], [1], [0], [0], [0, 0, 1, 0], [], []>} : vector<8x128xf32>, vector<8x128xf32>, vector<8x8xf32> -> vector<8x8xf32>
    %cst_47 = arith.constant 0.316227764 : f32
    %182 = vector.broadcast %cst_47 : f32 to vector<8x8xf32>
    %183 = arith.mulf %181, %182 : vector<8x8xf32>
    %184 = vector.broadcast %104 : vector<1x8xf32> to vector<8x8xf32>
    %185 = arith.addf %183, %184 : vector<8x8xf32>
    %cst_48 = arith.constant dense<0xFF800000> : vector<8xf32>
    %186 = vector.multi_reduction <maximumf>, %185, %cst_48 [1] : vector<8x8xf32> to vector<8xf32>
    %187 = vector.shape_cast %186 : vector<8xf32> to vector<8x1xf32>
    %188 = vector.broadcast %187 : vector<8x1xf32> to vector<8x8xf32>
    %189 = arith.subf %185, %188 : vector<8x8xf32>
    %190 = math.exp %189 : vector<8x8xf32>
    %cst_49 = arith.constant dense<0.000000e+00> : vector<8xf32>
    %191 = vector.multi_reduction <add>, %190, %cst_49 [1] : vector<8x8xf32> to vector<8xf32>
    %192 = vector.shape_cast %191 : vector<8xf32> to vector<8x1xf32>
    %193 = tpu.reciprocal %192 {approx = true} : vector<8x1xf32> -> vector<8x1xf32>
    %194 = vector.broadcast %193 : vector<8x1xf32> to vector<8x8xf32>
    %195 = arith.mulf %190, %194 : vector<8x8xf32>
    %cst_50 = arith.constant dense<0.000000e+00> : vector<8x128xf32>
    %196 = tpu.matmul %195, %114, %cst_50 {dimension_numbers = #tpu.dot_dimension_numbers<[1], [0], [0], [1], [0, 0, 1, 1], [], []>} : vector<8x8xf32>, vector<8x128xf32>, vector<8x128xf32> -> vector<8x128xf32>
    %197 = vector.broadcast %32 : vector<1x128xf32> to vector<8x128xf32>
    %198 = arith.mulf %196, %197 : vector<8x128xf32>
    %199 = arith.addf %178, %198 : vector<8x128xf32>
    %200 = vector.broadcast %39 : vector<1x128xf32> to vector<8x128xf32>
    %201 = arith.mulf %112, %200 : vector<8x128xf32>
    %cst_51 = arith.constant dense<0.000000e+00> : vector<8x8xf32>
    %202 = tpu.matmul %201, %113, %cst_51 {dimension_numbers = #tpu.dot_dimension_numbers<[1], [1], [0], [0], [0, 0, 1, 0], [], []>} : vector<8x128xf32>, vector<8x128xf32>, vector<8x8xf32> -> vector<8x8xf32>
    %cst_52 = arith.constant 0.316227764 : f32
    %203 = vector.broadcast %cst_52 : f32 to vector<8x8xf32>
    %204 = arith.mulf %202, %203 : vector<8x8xf32>
    %205 = vector.broadcast %104 : vector<1x8xf32> to vector<8x8xf32>
    %206 = arith.addf %204, %205 : vector<8x8xf32>
    %cst_53 = arith.constant dense<0xFF800000> : vector<8xf32>
    %207 = vector.multi_reduction <maximumf>, %206, %cst_53 [1] : vector<8x8xf32> to vector<8xf32>
    %208 = vector.shape_cast %207 : vector<8xf32> to vector<8x1xf32>
    %209 = vector.broadcast %208 : vector<8x1xf32> to vector<8x8xf32>
    %210 = arith.subf %206, %209 : vector<8x8xf32>
    %211 = math.exp %210 : vector<8x8xf32>
    %cst_54 = arith.constant dense<0.000000e+00> : vector<8xf32>
    %212 = vector.multi_reduction <add>, %211, %cst_54 [1] : vector<8x8xf32> to vector<8xf32>
    %213 = vector.shape_cast %212 : vector<8xf32> to vector<8x1xf32>
    %214 = tpu.reciprocal %213 {approx = true} : vector<8x1xf32> -> vector<8x1xf32>
    %215 = vector.broadcast %214 : vector<8x1xf32> to vector<8x8xf32>
    %216 = arith.mulf %211, %215 : vector<8x8xf32>
    %cst_55 = arith.constant dense<0.000000e+00> : vector<8x128xf32>
    %217 = tpu.matmul %216, %114, %cst_55 {dimension_numbers = #tpu.dot_dimension_numbers<[1], [0], [0], [1], [0, 0, 1, 1], [], []>} : vector<8x8xf32>, vector<8x128xf32>, vector<8x128xf32> -> vector<8x128xf32>
    %218 = vector.broadcast %39 : vector<1x128xf32> to vector<8x128xf32>
    %219 = arith.mulf %217, %218 : vector<8x128xf32>
    %220 = arith.addf %199, %219 : vector<8x128xf32>
    %221 = vector.broadcast %46 : vector<1x128xf32> to vector<8x128xf32>
    %222 = arith.mulf %112, %221 : vector<8x128xf32>
    %cst_56 = arith.constant dense<0.000000e+00> : vector<8x8xf32>
    %223 = tpu.matmul %222, %113, %cst_56 {dimension_numbers = #tpu.dot_dimension_numbers<[1], [1], [0], [0], [0, 0, 1, 0], [], []>} : vector<8x128xf32>, vector<8x128xf32>, vector<8x8xf32> -> vector<8x8xf32>
    %cst_57 = arith.constant 0.316227764 : f32
    %224 = vector.broadcast %cst_57 : f32 to vector<8x8xf32>
    %225 = arith.mulf %223, %224 : vector<8x8xf32>
    %226 = vector.broadcast %104 : vector<1x8xf32> to vector<8x8xf32>
    %227 = arith.addf %225, %226 : vector<8x8xf32>
    %cst_58 = arith.constant dense<0xFF800000> : vector<8xf32>
    %228 = vector.multi_reduction <maximumf>, %227, %cst_58 [1] : vector<8x8xf32> to vector<8xf32>
    %229 = vector.shape_cast %228 : vector<8xf32> to vector<8x1xf32>
    %230 = vector.broadcast %229 : vector<8x1xf32> to vector<8x8xf32>
    %231 = arith.subf %227, %230 : vector<8x8xf32>
    %232 = math.exp %231 : vector<8x8xf32>
    %cst_59 = arith.constant dense<0.000000e+00> : vector<8xf32>
    %233 = vector.multi_reduction <add>, %232, %cst_59 [1] : vector<8x8xf32> to vector<8xf32>
    %234 = vector.shape_cast %233 : vector<8xf32> to vector<8x1xf32>
    %235 = tpu.reciprocal %234 {approx = true} : vector<8x1xf32> -> vector<8x1xf32>
    %236 = vector.broadcast %235 : vector<8x1xf32> to vector<8x8xf32>
    %237 = arith.mulf %232, %236 : vector<8x8xf32>
    %cst_60 = arith.constant dense<0.000000e+00> : vector<8x128xf32>
    %238 = tpu.matmul %237, %114, %cst_60 {dimension_numbers = #tpu.dot_dimension_numbers<[1], [0], [0], [1], [0, 0, 1, 1], [], []>} : vector<8x8xf32>, vector<8x128xf32>, vector<8x128xf32> -> vector<8x128xf32>
    %239 = vector.broadcast %46 : vector<1x128xf32> to vector<8x128xf32>
    %240 = arith.mulf %238, %239 : vector<8x128xf32>
    %241 = arith.addf %220, %240 : vector<8x128xf32>
    %242 = vector.broadcast %53 : vector<1x128xf32> to vector<8x128xf32>
    %243 = arith.mulf %112, %242 : vector<8x128xf32>
    %cst_61 = arith.constant dense<0.000000e+00> : vector<8x8xf32>
    %244 = tpu.matmul %243, %113, %cst_61 {dimension_numbers = #tpu.dot_dimension_numbers<[1], [1], [0], [0], [0, 0, 1, 0], [], []>} : vector<8x128xf32>, vector<8x128xf32>, vector<8x8xf32> -> vector<8x8xf32>
    %cst_62 = arith.constant 0.316227764 : f32
    %245 = vector.broadcast %cst_62 : f32 to vector<8x8xf32>
    %246 = arith.mulf %244, %245 : vector<8x8xf32>
    %247 = vector.broadcast %104 : vector<1x8xf32> to vector<8x8xf32>
    %248 = arith.addf %246, %247 : vector<8x8xf32>
    %cst_63 = arith.constant dense<0xFF800000> : vector<8xf32>
    %249 = vector.multi_reduction <maximumf>, %248, %cst_63 [1] : vector<8x8xf32> to vector<8xf32>
    %250 = vector.shape_cast %249 : vector<8xf32> to vector<8x1xf32>
    %251 = vector.broadcast %250 : vector<8x1xf32> to vector<8x8xf32>
    %252 = arith.subf %248, %251 : vector<8x8xf32>
    %253 = math.exp %252 : vector<8x8xf32>
    %cst_64 = arith.constant dense<0.000000e+00> : vector<8xf32>
    %254 = vector.multi_reduction <add>, %253, %cst_64 [1] : vector<8x8xf32> to vector<8xf32>
    %255 = vector.shape_cast %254 : vector<8xf32> to vector<8x1xf32>
    %256 = tpu.reciprocal %255 {approx = true} : vector<8x1xf32> -> vector<8x1xf32>
    %257 = vector.broadcast %256 : vector<8x1xf32> to vector<8x8xf32>
    %258 = arith.mulf %253, %257 : vector<8x8xf32>
    %cst_65 = arith.constant dense<0.000000e+00> : vector<8x128xf32>
    %259 = tpu.matmul %258, %114, %cst_65 {dimension_numbers = #tpu.dot_dimension_numbers<[1], [0], [0], [1], [0, 0, 1, 1], [], []>} : vector<8x8xf32>, vector<8x128xf32>, vector<8x128xf32> -> vector<8x128xf32>
    %260 = vector.broadcast %53 : vector<1x128xf32> to vector<8x128xf32>
    %261 = arith.mulf %259, %260 : vector<8x128xf32>
    %262 = arith.addf %241, %261 : vector<8x128xf32>
    %263 = vector.broadcast %60 : vector<1x128xf32> to vector<8x128xf32>
    %264 = arith.mulf %112, %263 : vector<8x128xf32>
    %cst_66 = arith.constant dense<0.000000e+00> : vector<8x8xf32>
    %265 = tpu.matmul %264, %113, %cst_66 {dimension_numbers = #tpu.dot_dimension_numbers<[1], [1], [0], [0], [0, 0, 1, 0], [], []>} : vector<8x128xf32>, vector<8x128xf32>, vector<8x8xf32> -> vector<8x8xf32>
    %cst_67 = arith.constant 0.316227764 : f32
    %266 = vector.broadcast %cst_67 : f32 to vector<8x8xf32>
    %267 = arith.mulf %265, %266 : vector<8x8xf32>
    %268 = vector.broadcast %104 : vector<1x8xf32> to vector<8x8xf32>
    %269 = arith.addf %267, %268 : vector<8x8xf32>
    %cst_68 = arith.constant dense<0xFF800000> : vector<8xf32>
    %270 = vector.multi_reduction <maximumf>, %269, %cst_68 [1] : vector<8x8xf32> to vector<8xf32>
    %271 = vector.shape_cast %270 : vector<8xf32> to vector<8x1xf32>
    %272 = vector.broadcast %271 : vector<8x1xf32> to vector<8x8xf32>
    %273 = arith.subf %269, %272 : vector<8x8xf32>
    %274 = math.exp %273 : vector<8x8xf32>
    %cst_69 = arith.constant dense<0.000000e+00> : vector<8xf32>
    %275 = vector.multi_reduction <add>, %274, %cst_69 [1] : vector<8x8xf32> to vector<8xf32>
    %276 = vector.shape_cast %275 : vector<8xf32> to vector<8x1xf32>
    %277 = tpu.reciprocal %276 {approx = true} : vector<8x1xf32> -> vector<8x1xf32>
    %278 = vector.broadcast %277 : vector<8x1xf32> to vector<8x8xf32>
    %279 = arith.mulf %274, %278 : vector<8x8xf32>
    %cst_70 = arith.constant dense<0.000000e+00> : vector<8x128xf32>
    %280 = tpu.matmul %279, %114, %cst_70 {dimension_numbers = #tpu.dot_dimension_numbers<[1], [0], [0], [1], [0, 0, 1, 1], [], []>} : vector<8x8xf32>, vector<8x128xf32>, vector<8x128xf32> -> vector<8x128xf32>
    %281 = vector.broadcast %60 : vector<1x128xf32> to vector<8x128xf32>
    %282 = arith.mulf %280, %281 : vector<8x128xf32>
    %283 = arith.addf %262, %282 : vector<8x128xf32>
    %284 = vector.broadcast %67 : vector<1x128xf32> to vector<8x128xf32>
    %285 = arith.mulf %112, %284 : vector<8x128xf32>
    %cst_71 = arith.constant dense<0.000000e+00> : vector<8x8xf32>
    %286 = tpu.matmul %285, %113, %cst_71 {dimension_numbers = #tpu.dot_dimension_numbers<[1], [1], [0], [0], [0, 0, 1, 0], [], []>} : vector<8x128xf32>, vector<8x128xf32>, vector<8x8xf32> -> vector<8x8xf32>
    %cst_72 = arith.constant 0.316227764 : f32
    %287 = vector.broadcast %cst_72 : f32 to vector<8x8xf32>
    %288 = arith.mulf %286, %287 : vector<8x8xf32>
    %289 = vector.broadcast %104 : vector<1x8xf32> to vector<8x8xf32>
    %290 = arith.addf %288, %289 : vector<8x8xf32>
    %cst_73 = arith.constant dense<0xFF800000> : vector<8xf32>
    %291 = vector.multi_reduction <maximumf>, %290, %cst_73 [1] : vector<8x8xf32> to vector<8xf32>
    %292 = vector.shape_cast %291 : vector<8xf32> to vector<8x1xf32>
    %293 = vector.broadcast %292 : vector<8x1xf32> to vector<8x8xf32>
    %294 = arith.subf %290, %293 : vector<8x8xf32>
    %295 = math.exp %294 : vector<8x8xf32>
    %cst_74 = arith.constant dense<0.000000e+00> : vector<8xf32>
    %296 = vector.multi_reduction <add>, %295, %cst_74 [1] : vector<8x8xf32> to vector<8xf32>
    %297 = vector.shape_cast %296 : vector<8xf32> to vector<8x1xf32>
    %298 = tpu.reciprocal %297 {approx = true} : vector<8x1xf32> -> vector<8x1xf32>
    %299 = vector.broadcast %298 : vector<8x1xf32> to vector<8x8xf32>
    %300 = arith.mulf %295, %299 : vector<8x8xf32>
    %cst_75 = arith.constant dense<0.000000e+00> : vector<8x128xf32>
    %301 = tpu.matmul %300, %114, %cst_75 {dimension_numbers = #tpu.dot_dimension_numbers<[1], [0], [0], [1], [0, 0, 1, 1], [], []>} : vector<8x8xf32>, vector<8x128xf32>, vector<8x128xf32> -> vector<8x128xf32>
    %302 = vector.broadcast %67 : vector<1x128xf32> to vector<8x128xf32>
    %303 = arith.mulf %301, %302 : vector<8x128xf32>
    %304 = arith.addf %283, %303 : vector<8x128xf32>
    %305 = vector.broadcast %74 : vector<1x128xf32> to vector<8x128xf32>
    %306 = arith.mulf %112, %305 : vector<8x128xf32>
    %cst_76 = arith.constant dense<0.000000e+00> : vector<8x8xf32>
    %307 = tpu.matmul %306, %113, %cst_76 {dimension_numbers = #tpu.dot_dimension_numbers<[1], [1], [0], [0], [0, 0, 1, 0], [], []>} : vector<8x128xf32>, vector<8x128xf32>, vector<8x8xf32> -> vector<8x8xf32>
    %cst_77 = arith.constant 0.316227764 : f32
    %308 = vector.broadcast %cst_77 : f32 to vector<8x8xf32>
    %309 = arith.mulf %307, %308 : vector<8x8xf32>
    %310 = vector.broadcast %104 : vector<1x8xf32> to vector<8x8xf32>
    %311 = arith.addf %309, %310 : vector<8x8xf32>
    %cst_78 = arith.constant dense<0xFF800000> : vector<8xf32>
    %312 = vector.multi_reduction <maximumf>, %311, %cst_78 [1] : vector<8x8xf32> to vector<8xf32>
    %313 = vector.shape_cast %312 : vector<8xf32> to vector<8x1xf32>
    %314 = vector.broadcast %313 : vector<8x1xf32> to vector<8x8xf32>
    %315 = arith.subf %311, %314 : vector<8x8xf32>
    %316 = math.exp %315 : vector<8x8xf32>
    %cst_79 = arith.constant dense<0.000000e+00> : vector<8xf32>
    %317 = vector.multi_reduction <add>, %316, %cst_79 [1] : vector<8x8xf32> to vector<8xf32>
    %318 = vector.shape_cast %317 : vector<8xf32> to vector<8x1xf32>
    %319 = tpu.reciprocal %318 {approx = true} : vector<8x1xf32> -> vector<8x1xf32>
    %320 = vector.broadcast %319 : vector<8x1xf32> to vector<8x8xf32>
    %321 = arith.mulf %316, %320 : vector<8x8xf32>
    %cst_80 = arith.constant dense<0.000000e+00> : vector<8x128xf32>
    %322 = tpu.matmul %321, %114, %cst_80 {dimension_numbers = #tpu.dot_dimension_numbers<[1], [0], [0], [1], [0, 0, 1, 1], [], []>} : vector<8x8xf32>, vector<8x128xf32>, vector<8x128xf32> -> vector<8x128xf32>
    %323 = vector.broadcast %74 : vector<1x128xf32> to vector<8x128xf32>
    %324 = arith.mulf %322, %323 : vector<8x128xf32>
    %325 = arith.addf %304, %324 : vector<8x128xf32>
    %c0_81 = arith.constant 0 : index
    %c0_82 = arith.constant 0 : index
    %c0_83 = arith.constant 0 : index
    %326 = vector.load %arg7[%c0_81, %c0_82, %c0_83] : memref<4x128x128xf32, #tpu.memory_space<vmem>>, vector<1x128x128xf32>
    %327 = vector.shape_cast %326 : vector<1x128x128xf32> to vector<128x128xf32>
    %cst_84 = arith.constant dense<0.000000e+00> : vector<8x128xf32>
    %328 = tpu.matmul %325, %327, %cst_84 {dimension_numbers = #tpu.dot_dimension_numbers<[1], [0], [0], [1], [0, 0, 1, 1], [], []>} : vector<8x128xf32>, vector<128x128xf32>, vector<8x128xf32> -> vector<8x128xf32>
    %c0_85 = arith.constant 0 : index
    %c0_86 = arith.constant 0 : index
    %c0_87 = arith.constant 0 : index
    %329 = vector.load %arg8[%c0_85, %c0_86, %c0_87] : memref<4x1x128xf32, #tpu.memory_space<vmem>>, vector<1x1x128xf32>
    %330 = vector.shape_cast %329 : vector<1x1x128xf32> to vector<1x128xf32>
    %331 = vector.broadcast %330 : vector<1x128xf32> to vector<8x128xf32>
    %332 = arith.addf %328, %331 : vector<8x128xf32>
    %333 = arith.addf %332, %102 : vector<8x128xf32>
    %c0_88 = arith.constant 0 : index
    %c0_89 = arith.constant 0 : index
    %c0_90 = arith.constant 0 : index
    %334 = vector.load %arg9[%c0_88, %c0_89, %c0_90] : memref<4x1x128xf32, #tpu.memory_space<vmem>>, vector<1x1x128xf32>
    %335 = vector.shape_cast %334 : vector<1x1x128xf32> to vector<1x128xf32>
    %c0_91 = arith.constant 0 : index
    %c0_92 = arith.constant 0 : index
    %c0_93 = arith.constant 0 : index
    %336 = vector.load %arg10[%c0_91, %c0_92, %c0_93] : memref<4x1x128xf32, #tpu.memory_space<vmem>>, vector<1x1x128xf32>
    %337 = vector.shape_cast %336 : vector<1x1x128xf32> to vector<1x128xf32>
    %338 = vector.broadcast %4 : vector<1x128xf32> to vector<8x128xf32>
    %339 = arith.mulf %333, %338 : vector<8x128xf32>
    %cst_94 = arith.constant dense<0.000000e+00> : vector<8xf32>
    %340 = vector.multi_reduction <add>, %339, %cst_94 [1] : vector<8x128xf32> to vector<8xf32>
    %341 = vector.shape_cast %340 : vector<8xf32> to vector<8x1xf32>
    %cst_95 = arith.constant 0.00999999977 : f32
    %342 = vector.broadcast %cst_95 : f32 to vector<8x1xf32>
    %343 = arith.mulf %341, %342 : vector<8x1xf32>
    %344 = vector.broadcast %343 : vector<8x1xf32> to vector<8x128xf32>
    %345 = arith.subf %333, %344 : vector<8x128xf32>
    %346 = vector.broadcast %4 : vector<1x128xf32> to vector<8x128xf32>
    %347 = arith.mulf %345, %346 : vector<8x128xf32>
    %348 = arith.mulf %347, %347 : vector<8x128xf32>
    %cst_96 = arith.constant dense<0.000000e+00> : vector<8xf32>
    %349 = vector.multi_reduction <add>, %348, %cst_96 [1] : vector<8x128xf32> to vector<8xf32>
    %350 = vector.shape_cast %349 : vector<8xf32> to vector<8x1xf32>
    %cst_97 = arith.constant 0.00999999977 : f32
    %351 = vector.broadcast %cst_97 : f32 to vector<8x1xf32>
    %352 = arith.mulf %350, %351 : vector<8x1xf32>
    %cst_98 = arith.constant 9.99999996E-13 : f32
    %353 = vector.broadcast %cst_98 : f32 to vector<8x1xf32>
    %354 = arith.addf %352, %353 : vector<8x1xf32>
    %355 = math.rsqrt %354 : vector<8x1xf32>
    %356 = vector.broadcast %355 : vector<8x1xf32> to vector<8x128xf32>
    %357 = arith.mulf %347, %356 : vector<8x128xf32>
    %358 = vector.broadcast %335 : vector<1x128xf32> to vector<8x128xf32>
    %359 = arith.mulf %357, %358 : vector<8x128xf32>
    %360 = vector.broadcast %337 : vector<1x128xf32> to vector<8x128xf32>
    %361 = arith.addf %359, %360 : vector<8x128xf32>
    %c0_99 = arith.constant 0 : index
    %c0_100 = arith.constant 0 : index
    %c0_101 = arith.constant 0 : index
    %362 = vector.load %arg11[%c0_99, %c0_100, %c0_101] : memref<4x128x768xf32, #tpu.memory_space<vmem>>, vector<1x128x768xf32>
    %363 = vector.shape_cast %362 : vector<1x128x768xf32> to vector<128x768xf32>
    %cst_102 = arith.constant dense<0.000000e+00> : vector<8x768xf32>
    %364 = tpu.matmul %361, %363, %cst_102 {dimension_numbers = #tpu.dot_dimension_numbers<[1], [0], [0], [1], [0, 0, 1, 1], [], []>} : vector<8x128xf32>, vector<128x768xf32>, vector<8x768xf32> -> vector<8x768xf32>
    %c0_103 = arith.constant 0 : index
    %c0_104 = arith.constant 0 : index
    %c0_105 = arith.constant 0 : index
    %365 = vector.load %arg12[%c0_103, %c0_104, %c0_105] : memref<4x1x768xf32, #tpu.memory_space<vmem>>, vector<1x1x768xf32>
    %366 = vector.shape_cast %365 : vector<1x1x768xf32> to vector<1x768xf32>
    %367 = vector.broadcast %366 : vector<1x768xf32> to vector<8x768xf32>
    %368 = arith.addf %364, %367 : vector<8x768xf32>
    %cst_106 = arith.constant 5.000000e-01 : f32
    %369 = vector.broadcast %cst_106 : f32 to vector<8x768xf32>
    %370 = arith.mulf %369, %368 : vector<8x768xf32>
    %cst_107 = arith.constant 0.707106769 : f32
    %371 = vector.broadcast %cst_107 : f32 to vector<8x768xf32>
    %372 = arith.mulf %368, %371 : vector<8x768xf32>
    %373 = math.erf %372 : vector<8x768xf32>
    %cst_108 = arith.constant 1.000000e+00 : f32
    %374 = vector.broadcast %cst_108 : f32 to vector<8x768xf32>
    %375 = arith.addf %374, %373 : vector<8x768xf32>
    %376 = arith.mulf %370, %375 : vector<8x768xf32>
    %c0_109 = arith.constant 0 : index
    %c0_110 = arith.constant 0 : index
    %c0_111 = arith.constant 0 : index
    %377 = vector.load %arg13[%c0_109, %c0_110, %c0_111] : memref<4x768x128xf32, #tpu.memory_space<vmem>>, vector<1x768x128xf32>
    %378 = vector.shape_cast %377 : vector<1x768x128xf32> to vector<768x128xf32>
    %cst_112 = arith.constant dense<0.000000e+00> : vector<8x128xf32>
    %379 = tpu.matmul %376, %378, %cst_112 {dimension_numbers = #tpu.dot_dimension_numbers<[1], [0], [0], [1], [0, 0, 1, 1], [], []>} : vector<8x768xf32>, vector<768x128xf32>, vector<8x128xf32> -> vector<8x128xf32>
    %c0_113 = arith.constant 0 : index
    %c0_114 = arith.constant 0 : index
    %c0_115 = arith.constant 0 : index
    %380 = vector.load %arg14[%c0_113, %c0_114, %c0_115] : memref<4x1x128xf32, #tpu.memory_space<vmem>>, vector<1x1x128xf32>
    %381 = vector.shape_cast %380 : vector<1x1x128xf32> to vector<1x128xf32>
    %382 = vector.broadcast %381 : vector<1x128xf32> to vector<8x128xf32>
    %383 = arith.addf %379, %382 : vector<8x128xf32>
    %384 = arith.addf %383, %361 : vector<8x128xf32>
    %c0_116 = arith.constant 0 : index
    %c0_117 = arith.constant 0 : index
    %c0_118 = arith.constant 0 : index
    %385 = vector.load %arg15[%c0_116, %c0_117, %c0_118] : memref<4x1x128xf32, #tpu.memory_space<vmem>>, vector<1x1x128xf32>
    %386 = vector.shape_cast %385 : vector<1x1x128xf32> to vector<1x128xf32>
    %c0_119 = arith.constant 0 : index
    %c0_120 = arith.constant 0 : index
    %c0_121 = arith.constant 0 : index
    %387 = vector.load %arg16[%c0_119, %c0_120, %c0_121] : memref<4x1x128xf32, #tpu.memory_space<vmem>>, vector<1x1x128xf32>
    %388 = vector.shape_cast %387 : vector<1x1x128xf32> to vector<1x128xf32>
    %389 = vector.broadcast %4 : vector<1x128xf32> to vector<8x128xf32>
    %390 = arith.mulf %384, %389 : vector<8x128xf32>
    %cst_122 = arith.constant dense<0.000000e+00> : vector<8xf32>
    %391 = vector.multi_reduction <add>, %390, %cst_122 [1] : vector<8x128xf32> to vector<8xf32>
    %392 = vector.shape_cast %391 : vector<8xf32> to vector<8x1xf32>
    %cst_123 = arith.constant 0.00999999977 : f32
    %393 = vector.broadcast %cst_123 : f32 to vector<8x1xf32>
    %394 = arith.mulf %392, %393 : vector<8x1xf32>
    %395 = vector.broadcast %394 : vector<8x1xf32> to vector<8x128xf32>
    %396 = arith.subf %384, %395 : vector<8x128xf32>
    %397 = vector.broadcast %4 : vector<1x128xf32> to vector<8x128xf32>
    %398 = arith.mulf %396, %397 : vector<8x128xf32>
    %399 = arith.mulf %398, %398 : vector<8x128xf32>
    %cst_124 = arith.constant dense<0.000000e+00> : vector<8xf32>
    %400 = vector.multi_reduction <add>, %399, %cst_124 [1] : vector<8x128xf32> to vector<8xf32>
    %401 = vector.shape_cast %400 : vector<8xf32> to vector<8x1xf32>
    %cst_125 = arith.constant 0.00999999977 : f32
    %402 = vector.broadcast %cst_125 : f32 to vector<8x1xf32>
    %403 = arith.mulf %401, %402 : vector<8x1xf32>
    %cst_126 = arith.constant 9.99999996E-13 : f32
    %404 = vector.broadcast %cst_126 : f32 to vector<8x1xf32>
    %405 = arith.addf %403, %404 : vector<8x1xf32>
    %406 = math.rsqrt %405 : vector<8x1xf32>
    %407 = vector.broadcast %406 : vector<8x1xf32> to vector<8x128xf32>
    %408 = arith.mulf %398, %407 : vector<8x128xf32>
    %409 = vector.broadcast %386 : vector<1x128xf32> to vector<8x128xf32>
    %410 = arith.mulf %408, %409 : vector<8x128xf32>
    %411 = vector.broadcast %388 : vector<1x128xf32> to vector<8x128xf32>
    %412 = arith.addf %410, %411 : vector<8x128xf32>
    %c1 = arith.constant 1 : index
    %c0_127 = arith.constant 0 : index
    %c0_128 = arith.constant 0 : index
    %413 = vector.load %arg5[%c1, %c0_127, %c0_128] : memref<4x128x384xf32, #tpu.memory_space<vmem>>, vector<1x128x384xf32>
    %414 = vector.shape_cast %413 : vector<1x128x384xf32> to vector<128x384xf32>
    %cst_129 = arith.constant dense<0.000000e+00> : vector<8x384xf32>
    %415 = tpu.matmul %412, %414, %cst_129 {dimension_numbers = #tpu.dot_dimension_numbers<[1], [0], [0], [1], [0, 0, 1, 1], [], []>} : vector<8x128xf32>, vector<128x384xf32>, vector<8x384xf32> -> vector<8x384xf32>
    %c1_130 = arith.constant 1 : index
    %c0_131 = arith.constant 0 : index
    %c0_132 = arith.constant 0 : index
    %416 = vector.load %arg6[%c1_130, %c0_131, %c0_132] : memref<4x1x384xf32, #tpu.memory_space<vmem>>, vector<1x1x384xf32>
    %417 = vector.shape_cast %416 : vector<1x1x384xf32> to vector<1x384xf32>
    %418 = vector.broadcast %417 : vector<1x384xf32> to vector<8x384xf32>
    %419 = arith.addf %415, %418 : vector<8x384xf32>
    %420 = vector.extract_strided_slice %419 {offsets = [0, 0], sizes = [8, 128], strides = [1, 1]} : vector<8x384xf32> to vector<8x128xf32>
    %421 = vector.extract_strided_slice %419 {offsets = [0, 128], sizes = [8, 128], strides = [1, 1]} : vector<8x384xf32> to vector<8x128xf32>
    %422 = vector.extract_strided_slice %419 {offsets = [0, 256], sizes = [8, 128], strides = [1, 1]} : vector<8x384xf32> to vector<8x128xf32>
    %cst_133 = arith.constant 0.000000e+00 : f32
    %423 = vector.broadcast %cst_133 : f32 to vector<8x128xf32>
    %424 = vector.broadcast %11 : vector<1x128xf32> to vector<8x128xf32>
    %425 = arith.mulf %420, %424 : vector<8x128xf32>
    %cst_134 = arith.constant dense<0.000000e+00> : vector<8x8xf32>
    %426 = tpu.matmul %425, %421, %cst_134 {dimension_numbers = #tpu.dot_dimension_numbers<[1], [1], [0], [0], [0, 0, 1, 0], [], []>} : vector<8x128xf32>, vector<8x128xf32>, vector<8x8xf32> -> vector<8x8xf32>
    %cst_135 = arith.constant 0.316227764 : f32
    %427 = vector.broadcast %cst_135 : f32 to vector<8x8xf32>
    %428 = arith.mulf %426, %427 : vector<8x8xf32>
    %429 = vector.broadcast %104 : vector<1x8xf32> to vector<8x8xf32>
    %430 = arith.addf %428, %429 : vector<8x8xf32>
    %cst_136 = arith.constant dense<0xFF800000> : vector<8xf32>
    %431 = vector.multi_reduction <maximumf>, %430, %cst_136 [1] : vector<8x8xf32> to vector<8xf32>
    %432 = vector.shape_cast %431 : vector<8xf32> to vector<8x1xf32>
    %433 = vector.broadcast %432 : vector<8x1xf32> to vector<8x8xf32>
    %434 = arith.subf %430, %433 : vector<8x8xf32>
    %435 = math.exp %434 : vector<8x8xf32>
    %cst_137 = arith.constant dense<0.000000e+00> : vector<8xf32>
    %436 = vector.multi_reduction <add>, %435, %cst_137 [1] : vector<8x8xf32> to vector<8xf32>
    %437 = vector.shape_cast %436 : vector<8xf32> to vector<8x1xf32>
    %438 = tpu.reciprocal %437 {approx = true} : vector<8x1xf32> -> vector<8x1xf32>
    %439 = vector.broadcast %438 : vector<8x1xf32> to vector<8x8xf32>
    %440 = arith.mulf %435, %439 : vector<8x8xf32>
    %cst_138 = arith.constant dense<0.000000e+00> : vector<8x128xf32>
    %441 = tpu.matmul %440, %422, %cst_138 {dimension_numbers = #tpu.dot_dimension_numbers<[1], [0], [0], [1], [0, 0, 1, 1], [], []>} : vector<8x8xf32>, vector<8x128xf32>, vector<8x128xf32> -> vector<8x128xf32>
    %442 = vector.broadcast %11 : vector<1x128xf32> to vector<8x128xf32>
    %443 = arith.mulf %441, %442 : vector<8x128xf32>
    %444 = arith.addf %423, %443 : vector<8x128xf32>
    %445 = vector.broadcast %18 : vector<1x128xf32> to vector<8x128xf32>
    %446 = arith.mulf %420, %445 : vector<8x128xf32>
    %cst_139 = arith.constant dense<0.000000e+00> : vector<8x8xf32>
    %447 = tpu.matmul %446, %421, %cst_139 {dimension_numbers = #tpu.dot_dimension_numbers<[1], [1], [0], [0], [0, 0, 1, 0], [], []>} : vector<8x128xf32>, vector<8x128xf32>, vector<8x8xf32> -> vector<8x8xf32>
    %cst_140 = arith.constant 0.316227764 : f32
    %448 = vector.broadcast %cst_140 : f32 to vector<8x8xf32>
    %449 = arith.mulf %447, %448 : vector<8x8xf32>
    %450 = vector.broadcast %104 : vector<1x8xf32> to vector<8x8xf32>
    %451 = arith.addf %449, %450 : vector<8x8xf32>
    %cst_141 = arith.constant dense<0xFF800000> : vector<8xf32>
    %452 = vector.multi_reduction <maximumf>, %451, %cst_141 [1] : vector<8x8xf32> to vector<8xf32>
    %453 = vector.shape_cast %452 : vector<8xf32> to vector<8x1xf32>
    %454 = vector.broadcast %453 : vector<8x1xf32> to vector<8x8xf32>
    %455 = arith.subf %451, %454 : vector<8x8xf32>
    %456 = math.exp %455 : vector<8x8xf32>
    %cst_142 = arith.constant dense<0.000000e+00> : vector<8xf32>
    %457 = vector.multi_reduction <add>, %456, %cst_142 [1] : vector<8x8xf32> to vector<8xf32>
    %458 = vector.shape_cast %457 : vector<8xf32> to vector<8x1xf32>
    %459 = tpu.reciprocal %458 {approx = true} : vector<8x1xf32> -> vector<8x1xf32>
    %460 = vector.broadcast %459 : vector<8x1xf32> to vector<8x8xf32>
    %461 = arith.mulf %456, %460 : vector<8x8xf32>
    %cst_143 = arith.constant dense<0.000000e+00> : vector<8x128xf32>
    %462 = tpu.matmul %461, %422, %cst_143 {dimension_numbers = #tpu.dot_dimension_numbers<[1], [0], [0], [1], [0, 0, 1, 1], [], []>} : vector<8x8xf32>, vector<8x128xf32>, vector<8x128xf32> -> vector<8x128xf32>
    %463 = vector.broadcast %18 : vector<1x128xf32> to vector<8x128xf32>
    %464 = arith.mulf %462, %463 : vector<8x128xf32>
    %465 = arith.addf %444, %464 : vector<8x128xf32>
    %466 = vector.broadcast %25 : vector<1x128xf32> to vector<8x128xf32>
    %467 = arith.mulf %420, %466 : vector<8x128xf32>
    %cst_144 = arith.constant dense<0.000000e+00> : vector<8x8xf32>
    %468 = tpu.matmul %467, %421, %cst_144 {dimension_numbers = #tpu.dot_dimension_numbers<[1], [1], [0], [0], [0, 0, 1, 0], [], []>} : vector<8x128xf32>, vector<8x128xf32>, vector<8x8xf32> -> vector<8x8xf32>
    %cst_145 = arith.constant 0.316227764 : f32
    %469 = vector.broadcast %cst_145 : f32 to vector<8x8xf32>
    %470 = arith.mulf %468, %469 : vector<8x8xf32>
    %471 = vector.broadcast %104 : vector<1x8xf32> to vector<8x8xf32>
    %472 = arith.addf %470, %471 : vector<8x8xf32>
    %cst_146 = arith.constant dense<0xFF800000> : vector<8xf32>
    %473 = vector.multi_reduction <maximumf>, %472, %cst_146 [1] : vector<8x8xf32> to vector<8xf32>
    %474 = vector.shape_cast %473 : vector<8xf32> to vector<8x1xf32>
    %475 = vector.broadcast %474 : vector<8x1xf32> to vector<8x8xf32>
    %476 = arith.subf %472, %475 : vector<8x8xf32>
    %477 = math.exp %476 : vector<8x8xf32>
    %cst_147 = arith.constant dense<0.000000e+00> : vector<8xf32>
    %478 = vector.multi_reduction <add>, %477, %cst_147 [1] : vector<8x8xf32> to vector<8xf32>
    %479 = vector.shape_cast %478 : vector<8xf32> to vector<8x1xf32>
    %480 = tpu.reciprocal %479 {approx = true} : vector<8x1xf32> -> vector<8x1xf32>
    %481 = vector.broadcast %480 : vector<8x1xf32> to vector<8x8xf32>
    %482 = arith.mulf %477, %481 : vector<8x8xf32>
    %cst_148 = arith.constant dense<0.000000e+00> : vector<8x128xf32>
    %483 = tpu.matmul %482, %422, %cst_148 {dimension_numbers = #tpu.dot_dimension_numbers<[1], [0], [0], [1], [0, 0, 1, 1], [], []>} : vector<8x8xf32>, vector<8x128xf32>, vector<8x128xf32> -> vector<8x128xf32>
    %484 = vector.broadcast %25 : vector<1x128xf32> to vector<8x128xf32>
    %485 = arith.mulf %483, %484 : vector<8x128xf32>
    %486 = arith.addf %465, %485 : vector<8x128xf32>
    %487 = vector.broadcast %32 : vector<1x128xf32> to vector<8x128xf32>
    %488 = arith.mulf %420, %487 : vector<8x128xf32>
    %cst_149 = arith.constant dense<0.000000e+00> : vector<8x8xf32>
    %489 = tpu.matmul %488, %421, %cst_149 {dimension_numbers = #tpu.dot_dimension_numbers<[1], [1], [0], [0], [0, 0, 1, 0], [], []>} : vector<8x128xf32>, vector<8x128xf32>, vector<8x8xf32> -> vector<8x8xf32>
    %cst_150 = arith.constant 0.316227764 : f32
    %490 = vector.broadcast %cst_150 : f32 to vector<8x8xf32>
    %491 = arith.mulf %489, %490 : vector<8x8xf32>
    %492 = vector.broadcast %104 : vector<1x8xf32> to vector<8x8xf32>
    %493 = arith.addf %491, %492 : vector<8x8xf32>
    %cst_151 = arith.constant dense<0xFF800000> : vector<8xf32>
    %494 = vector.multi_reduction <maximumf>, %493, %cst_151 [1] : vector<8x8xf32> to vector<8xf32>
    %495 = vector.shape_cast %494 : vector<8xf32> to vector<8x1xf32>
    %496 = vector.broadcast %495 : vector<8x1xf32> to vector<8x8xf32>
    %497 = arith.subf %493, %496 : vector<8x8xf32>
    %498 = math.exp %497 : vector<8x8xf32>
    %cst_152 = arith.constant dense<0.000000e+00> : vector<8xf32>
    %499 = vector.multi_reduction <add>, %498, %cst_152 [1] : vector<8x8xf32> to vector<8xf32>
    %500 = vector.shape_cast %499 : vector<8xf32> to vector<8x1xf32>
    %501 = tpu.reciprocal %500 {approx = true} : vector<8x1xf32> -> vector<8x1xf32>
    %502 = vector.broadcast %501 : vector<8x1xf32> to vector<8x8xf32>
    %503 = arith.mulf %498, %502 : vector<8x8xf32>
    %cst_153 = arith.constant dense<0.000000e+00> : vector<8x128xf32>
    %504 = tpu.matmul %503, %422, %cst_153 {dimension_numbers = #tpu.dot_dimension_numbers<[1], [0], [0], [1], [0, 0, 1, 1], [], []>} : vector<8x8xf32>, vector<8x128xf32>, vector<8x128xf32> -> vector<8x128xf32>
    %505 = vector.broadcast %32 : vector<1x128xf32> to vector<8x128xf32>
    %506 = arith.mulf %504, %505 : vector<8x128xf32>
    %507 = arith.addf %486, %506 : vector<8x128xf32>
    %508 = vector.broadcast %39 : vector<1x128xf32> to vector<8x128xf32>
    %509 = arith.mulf %420, %508 : vector<8x128xf32>
    %cst_154 = arith.constant dense<0.000000e+00> : vector<8x8xf32>
    %510 = tpu.matmul %509, %421, %cst_154 {dimension_numbers = #tpu.dot_dimension_numbers<[1], [1], [0], [0], [0, 0, 1, 0], [], []>} : vector<8x128xf32>, vector<8x128xf32>, vector<8x8xf32> -> vector<8x8xf32>
    %cst_155 = arith.constant 0.316227764 : f32
    %511 = vector.broadcast %cst_155 : f32 to vector<8x8xf32>
    %512 = arith.mulf %510, %511 : vector<8x8xf32>
    %513 = vector.broadcast %104 : vector<1x8xf32> to vector<8x8xf32>
    %514 = arith.addf %512, %513 : vector<8x8xf32>
    %cst_156 = arith.constant dense<0xFF800000> : vector<8xf32>
    %515 = vector.multi_reduction <maximumf>, %514, %cst_156 [1] : vector<8x8xf32> to vector<8xf32>
    %516 = vector.shape_cast %515 : vector<8xf32> to vector<8x1xf32>
    %517 = vector.broadcast %516 : vector<8x1xf32> to vector<8x8xf32>
    %518 = arith.subf %514, %517 : vector<8x8xf32>
    %519 = math.exp %518 : vector<8x8xf32>
    %cst_157 = arith.constant dense<0.000000e+00> : vector<8xf32>
    %520 = vector.multi_reduction <add>, %519, %cst_157 [1] : vector<8x8xf32> to vector<8xf32>
    %521 = vector.shape_cast %520 : vector<8xf32> to vector<8x1xf32>
    %522 = tpu.reciprocal %521 {approx = true} : vector<8x1xf32> -> vector<8x1xf32>
    %523 = vector.broadcast %522 : vector<8x1xf32> to vector<8x8xf32>
    %524 = arith.mulf %519, %523 : vector<8x8xf32>
    %cst_158 = arith.constant dense<0.000000e+00> : vector<8x128xf32>
    %525 = tpu.matmul %524, %422, %cst_158 {dimension_numbers = #tpu.dot_dimension_numbers<[1], [0], [0], [1], [0, 0, 1, 1], [], []>} : vector<8x8xf32>, vector<8x128xf32>, vector<8x128xf32> -> vector<8x128xf32>
    %526 = vector.broadcast %39 : vector<1x128xf32> to vector<8x128xf32>
    %527 = arith.mulf %525, %526 : vector<8x128xf32>
    %528 = arith.addf %507, %527 : vector<8x128xf32>
    %529 = vector.broadcast %46 : vector<1x128xf32> to vector<8x128xf32>
    %530 = arith.mulf %420, %529 : vector<8x128xf32>
    %cst_159 = arith.constant dense<0.000000e+00> : vector<8x8xf32>
    %531 = tpu.matmul %530, %421, %cst_159 {dimension_numbers = #tpu.dot_dimension_numbers<[1], [1], [0], [0], [0, 0, 1, 0], [], []>} : vector<8x128xf32>, vector<8x128xf32>, vector<8x8xf32> -> vector<8x8xf32>
    %cst_160 = arith.constant 0.316227764 : f32
    %532 = vector.broadcast %cst_160 : f32 to vector<8x8xf32>
    %533 = arith.mulf %531, %532 : vector<8x8xf32>
    %534 = vector.broadcast %104 : vector<1x8xf32> to vector<8x8xf32>
    %535 = arith.addf %533, %534 : vector<8x8xf32>
    %cst_161 = arith.constant dense<0xFF800000> : vector<8xf32>
    %536 = vector.multi_reduction <maximumf>, %535, %cst_161 [1] : vector<8x8xf32> to vector<8xf32>
    %537 = vector.shape_cast %536 : vector<8xf32> to vector<8x1xf32>
    %538 = vector.broadcast %537 : vector<8x1xf32> to vector<8x8xf32>
    %539 = arith.subf %535, %538 : vector<8x8xf32>
    %540 = math.exp %539 : vector<8x8xf32>
    %cst_162 = arith.constant dense<0.000000e+00> : vector<8xf32>
    %541 = vector.multi_reduction <add>, %540, %cst_162 [1] : vector<8x8xf32> to vector<8xf32>
    %542 = vector.shape_cast %541 : vector<8xf32> to vector<8x1xf32>
    %543 = tpu.reciprocal %542 {approx = true} : vector<8x1xf32> -> vector<8x1xf32>
    %544 = vector.broadcast %543 : vector<8x1xf32> to vector<8x8xf32>
    %545 = arith.mulf %540, %544 : vector<8x8xf32>
    %cst_163 = arith.constant dense<0.000000e+00> : vector<8x128xf32>
    %546 = tpu.matmul %545, %422, %cst_163 {dimension_numbers = #tpu.dot_dimension_numbers<[1], [0], [0], [1], [0, 0, 1, 1], [], []>} : vector<8x8xf32>, vector<8x128xf32>, vector<8x128xf32> -> vector<8x128xf32>
    %547 = vector.broadcast %46 : vector<1x128xf32> to vector<8x128xf32>
    %548 = arith.mulf %546, %547 : vector<8x128xf32>
    %549 = arith.addf %528, %548 : vector<8x128xf32>
    %550 = vector.broadcast %53 : vector<1x128xf32> to vector<8x128xf32>
    %551 = arith.mulf %420, %550 : vector<8x128xf32>
    %cst_164 = arith.constant dense<0.000000e+00> : vector<8x8xf32>
    %552 = tpu.matmul %551, %421, %cst_164 {dimension_numbers = #tpu.dot_dimension_numbers<[1], [1], [0], [0], [0, 0, 1, 0], [], []>} : vector<8x128xf32>, vector<8x128xf32>, vector<8x8xf32> -> vector<8x8xf32>
    %cst_165 = arith.constant 0.316227764 : f32
    %553 = vector.broadcast %cst_165 : f32 to vector<8x8xf32>
    %554 = arith.mulf %552, %553 : vector<8x8xf32>
    %555 = vector.broadcast %104 : vector<1x8xf32> to vector<8x8xf32>
    %556 = arith.addf %554, %555 : vector<8x8xf32>
    %cst_166 = arith.constant dense<0xFF800000> : vector<8xf32>
    %557 = vector.multi_reduction <maximumf>, %556, %cst_166 [1] : vector<8x8xf32> to vector<8xf32>
    %558 = vector.shape_cast %557 : vector<8xf32> to vector<8x1xf32>
    %559 = vector.broadcast %558 : vector<8x1xf32> to vector<8x8xf32>
    %560 = arith.subf %556, %559 : vector<8x8xf32>
    %561 = math.exp %560 : vector<8x8xf32>
    %cst_167 = arith.constant dense<0.000000e+00> : vector<8xf32>
    %562 = vector.multi_reduction <add>, %561, %cst_167 [1] : vector<8x8xf32> to vector<8xf32>
    %563 = vector.shape_cast %562 : vector<8xf32> to vector<8x1xf32>
    %564 = tpu.reciprocal %563 {approx = true} : vector<8x1xf32> -> vector<8x1xf32>
    %565 = vector.broadcast %564 : vector<8x1xf32> to vector<8x8xf32>
    %566 = arith.mulf %561, %565 : vector<8x8xf32>
    %cst_168 = arith.constant dense<0.000000e+00> : vector<8x128xf32>
    %567 = tpu.matmul %566, %422, %cst_168 {dimension_numbers = #tpu.dot_dimension_numbers<[1], [0], [0], [1], [0, 0, 1, 1], [], []>} : vector<8x8xf32>, vector<8x128xf32>, vector<8x128xf32> -> vector<8x128xf32>
    %568 = vector.broadcast %53 : vector<1x128xf32> to vector<8x128xf32>
    %569 = arith.mulf %567, %568 : vector<8x128xf32>
    %570 = arith.addf %549, %569 : vector<8x128xf32>
    %571 = vector.broadcast %60 : vector<1x128xf32> to vector<8x128xf32>
    %572 = arith.mulf %420, %571 : vector<8x128xf32>
    %cst_169 = arith.constant dense<0.000000e+00> : vector<8x8xf32>
    %573 = tpu.matmul %572, %421, %cst_169 {dimension_numbers = #tpu.dot_dimension_numbers<[1], [1], [0], [0], [0, 0, 1, 0], [], []>} : vector<8x128xf32>, vector<8x128xf32>, vector<8x8xf32> -> vector<8x8xf32>
    %cst_170 = arith.constant 0.316227764 : f32
    %574 = vector.broadcast %cst_170 : f32 to vector<8x8xf32>
    %575 = arith.mulf %573, %574 : vector<8x8xf32>
    %576 = vector.broadcast %104 : vector<1x8xf32> to vector<8x8xf32>
    %577 = arith.addf %575, %576 : vector<8x8xf32>
    %cst_171 = arith.constant dense<0xFF800000> : vector<8xf32>
    %578 = vector.multi_reduction <maximumf>, %577, %cst_171 [1] : vector<8x8xf32> to vector<8xf32>
    %579 = vector.shape_cast %578 : vector<8xf32> to vector<8x1xf32>
    %580 = vector.broadcast %579 : vector<8x1xf32> to vector<8x8xf32>
    %581 = arith.subf %577, %580 : vector<8x8xf32>
    %582 = math.exp %581 : vector<8x8xf32>
    %cst_172 = arith.constant dense<0.000000e+00> : vector<8xf32>
    %583 = vector.multi_reduction <add>, %582, %cst_172 [1] : vector<8x8xf32> to vector<8xf32>
    %584 = vector.shape_cast %583 : vector<8xf32> to vector<8x1xf32>
    %585 = tpu.reciprocal %584 {approx = true} : vector<8x1xf32> -> vector<8x1xf32>
    %586 = vector.broadcast %585 : vector<8x1xf32> to vector<8x8xf32>
    %587 = arith.mulf %582, %586 : vector<8x8xf32>
    %cst_173 = arith.constant dense<0.000000e+00> : vector<8x128xf32>
    %588 = tpu.matmul %587, %422, %cst_173 {dimension_numbers = #tpu.dot_dimension_numbers<[1], [0], [0], [1], [0, 0, 1, 1], [], []>} : vector<8x8xf32>, vector<8x128xf32>, vector<8x128xf32> -> vector<8x128xf32>
    %589 = vector.broadcast %60 : vector<1x128xf32> to vector<8x128xf32>
    %590 = arith.mulf %588, %589 : vector<8x128xf32>
    %591 = arith.addf %570, %590 : vector<8x128xf32>
    %592 = vector.broadcast %67 : vector<1x128xf32> to vector<8x128xf32>
    %593 = arith.mulf %420, %592 : vector<8x128xf32>
    %cst_174 = arith.constant dense<0.000000e+00> : vector<8x8xf32>
    %594 = tpu.matmul %593, %421, %cst_174 {dimension_numbers = #tpu.dot_dimension_numbers<[1], [1], [0], [0], [0, 0, 1, 0], [], []>} : vector<8x128xf32>, vector<8x128xf32>, vector<8x8xf32> -> vector<8x8xf32>
    %cst_175 = arith.constant 0.316227764 : f32
    %595 = vector.broadcast %cst_175 : f32 to vector<8x8xf32>
    %596 = arith.mulf %594, %595 : vector<8x8xf32>
    %597 = vector.broadcast %104 : vector<1x8xf32> to vector<8x8xf32>
    %598 = arith.addf %596, %597 : vector<8x8xf32>
    %cst_176 = arith.constant dense<0xFF800000> : vector<8xf32>
    %599 = vector.multi_reduction <maximumf>, %598, %cst_176 [1] : vector<8x8xf32> to vector<8xf32>
    %600 = vector.shape_cast %599 : vector<8xf32> to vector<8x1xf32>
    %601 = vector.broadcast %600 : vector<8x1xf32> to vector<8x8xf32>
    %602 = arith.subf %598, %601 : vector<8x8xf32>
    %603 = math.exp %602 : vector<8x8xf32>
    %cst_177 = arith.constant dense<0.000000e+00> : vector<8xf32>
    %604 = vector.multi_reduction <add>, %603, %cst_177 [1] : vector<8x8xf32> to vector<8xf32>
    %605 = vector.shape_cast %604 : vector<8xf32> to vector<8x1xf32>
    %606 = tpu.reciprocal %605 {approx = true} : vector<8x1xf32> -> vector<8x1xf32>
    %607 = vector.broadcast %606 : vector<8x1xf32> to vector<8x8xf32>
    %608 = arith.mulf %603, %607 : vector<8x8xf32>
    %cst_178 = arith.constant dense<0.000000e+00> : vector<8x128xf32>
    %609 = tpu.matmul %608, %422, %cst_178 {dimension_numbers = #tpu.dot_dimension_numbers<[1], [0], [0], [1], [0, 0, 1, 1], [], []>} : vector<8x8xf32>, vector<8x128xf32>, vector<8x128xf32> -> vector<8x128xf32>
    %610 = vector.broadcast %67 : vector<1x128xf32> to vector<8x128xf32>
    %611 = arith.mulf %609, %610 : vector<8x128xf32>
    %612 = arith.addf %591, %611 : vector<8x128xf32>
    %613 = vector.broadcast %74 : vector<1x128xf32> to vector<8x128xf32>
    %614 = arith.mulf %420, %613 : vector<8x128xf32>
    %cst_179 = arith.constant dense<0.000000e+00> : vector<8x8xf32>
    %615 = tpu.matmul %614, %421, %cst_179 {dimension_numbers = #tpu.dot_dimension_numbers<[1], [1], [0], [0], [0, 0, 1, 0], [], []>} : vector<8x128xf32>, vector<8x128xf32>, vector<8x8xf32> -> vector<8x8xf32>
    %cst_180 = arith.constant 0.316227764 : f32
    %616 = vector.broadcast %cst_180 : f32 to vector<8x8xf32>
    %617 = arith.mulf %615, %616 : vector<8x8xf32>
    %618 = vector.broadcast %104 : vector<1x8xf32> to vector<8x8xf32>
    %619 = arith.addf %617, %618 : vector<8x8xf32>
    %cst_181 = arith.constant dense<0xFF800000> : vector<8xf32>
    %620 = vector.multi_reduction <maximumf>, %619, %cst_181 [1] : vector<8x8xf32> to vector<8xf32>
    %621 = vector.shape_cast %620 : vector<8xf32> to vector<8x1xf32>
    %622 = vector.broadcast %621 : vector<8x1xf32> to vector<8x8xf32>
    %623 = arith.subf %619, %622 : vector<8x8xf32>
    %624 = math.exp %623 : vector<8x8xf32>
    %cst_182 = arith.constant dense<0.000000e+00> : vector<8xf32>
    %625 = vector.multi_reduction <add>, %624, %cst_182 [1] : vector<8x8xf32> to vector<8xf32>
    %626 = vector.shape_cast %625 : vector<8xf32> to vector<8x1xf32>
    %627 = tpu.reciprocal %626 {approx = true} : vector<8x1xf32> -> vector<8x1xf32>
    %628 = vector.broadcast %627 : vector<8x1xf32> to vector<8x8xf32>
    %629 = arith.mulf %624, %628 : vector<8x8xf32>
    %cst_183 = arith.constant dense<0.000000e+00> : vector<8x128xf32>
    %630 = tpu.matmul %629, %422, %cst_183 {dimension_numbers = #tpu.dot_dimension_numbers<[1], [0], [0], [1], [0, 0, 1, 1], [], []>} : vector<8x8xf32>, vector<8x128xf32>, vector<8x128xf32> -> vector<8x128xf32>
    %631 = vector.broadcast %74 : vector<1x128xf32> to vector<8x128xf32>
    %632 = arith.mulf %630, %631 : vector<8x128xf32>
    %633 = arith.addf %612, %632 : vector<8x128xf32>
    %c1_184 = arith.constant 1 : index
    %c0_185 = arith.constant 0 : index
    %c0_186 = arith.constant 0 : index
    %634 = vector.load %arg7[%c1_184, %c0_185, %c0_186] : memref<4x128x128xf32, #tpu.memory_space<vmem>>, vector<1x128x128xf32>
    %635 = vector.shape_cast %634 : vector<1x128x128xf32> to vector<128x128xf32>
    %cst_187 = arith.constant dense<0.000000e+00> : vector<8x128xf32>
    %636 = tpu.matmul %633, %635, %cst_187 {dimension_numbers = #tpu.dot_dimension_numbers<[1], [0], [0], [1], [0, 0, 1, 1], [], []>} : vector<8x128xf32>, vector<128x128xf32>, vector<8x128xf32> -> vector<8x128xf32>
    %c1_188 = arith.constant 1 : index
    %c0_189 = arith.constant 0 : index
    %c0_190 = arith.constant 0 : index
    %637 = vector.load %arg8[%c1_188, %c0_189, %c0_190] : memref<4x1x128xf32, #tpu.memory_space<vmem>>, vector<1x1x128xf32>
    %638 = vector.shape_cast %637 : vector<1x1x128xf32> to vector<1x128xf32>
    %639 = vector.broadcast %638 : vector<1x128xf32> to vector<8x128xf32>
    %640 = arith.addf %636, %639 : vector<8x128xf32>
    %641 = arith.addf %640, %412 : vector<8x128xf32>
    %c1_191 = arith.constant 1 : index
    %c0_192 = arith.constant 0 : index
    %c0_193 = arith.constant 0 : index
    %642 = vector.load %arg9[%c1_191, %c0_192, %c0_193] : memref<4x1x128xf32, #tpu.memory_space<vmem>>, vector<1x1x128xf32>
    %643 = vector.shape_cast %642 : vector<1x1x128xf32> to vector<1x128xf32>
    %c1_194 = arith.constant 1 : index
    %c0_195 = arith.constant 0 : index
    %c0_196 = arith.constant 0 : index
    %644 = vector.load %arg10[%c1_194, %c0_195, %c0_196] : memref<4x1x128xf32, #tpu.memory_space<vmem>>, vector<1x1x128xf32>
    %645 = vector.shape_cast %644 : vector<1x1x128xf32> to vector<1x128xf32>
    %646 = vector.broadcast %4 : vector<1x128xf32> to vector<8x128xf32>
    %647 = arith.mulf %641, %646 : vector<8x128xf32>
    %cst_197 = arith.constant dense<0.000000e+00> : vector<8xf32>
    %648 = vector.multi_reduction <add>, %647, %cst_197 [1] : vector<8x128xf32> to vector<8xf32>
    %649 = vector.shape_cast %648 : vector<8xf32> to vector<8x1xf32>
    %cst_198 = arith.constant 0.00999999977 : f32
    %650 = vector.broadcast %cst_198 : f32 to vector<8x1xf32>
    %651 = arith.mulf %649, %650 : vector<8x1xf32>
    %652 = vector.broadcast %651 : vector<8x1xf32> to vector<8x128xf32>
    %653 = arith.subf %641, %652 : vector<8x128xf32>
    %654 = vector.broadcast %4 : vector<1x128xf32> to vector<8x128xf32>
    %655 = arith.mulf %653, %654 : vector<8x128xf32>
    %656 = arith.mulf %655, %655 : vector<8x128xf32>
    %cst_199 = arith.constant dense<0.000000e+00> : vector<8xf32>
    %657 = vector.multi_reduction <add>, %656, %cst_199 [1] : vector<8x128xf32> to vector<8xf32>
    %658 = vector.shape_cast %657 : vector<8xf32> to vector<8x1xf32>
    %cst_200 = arith.constant 0.00999999977 : f32
    %659 = vector.broadcast %cst_200 : f32 to vector<8x1xf32>
    %660 = arith.mulf %658, %659 : vector<8x1xf32>
    %cst_201 = arith.constant 9.99999996E-13 : f32
    %661 = vector.broadcast %cst_201 : f32 to vector<8x1xf32>
    %662 = arith.addf %660, %661 : vector<8x1xf32>
    %663 = math.rsqrt %662 : vector<8x1xf32>
    %664 = vector.broadcast %663 : vector<8x1xf32> to vector<8x128xf32>
    %665 = arith.mulf %655, %664 : vector<8x128xf32>
    %666 = vector.broadcast %643 : vector<1x128xf32> to vector<8x128xf32>
    %667 = arith.mulf %665, %666 : vector<8x128xf32>
    %668 = vector.broadcast %645 : vector<1x128xf32> to vector<8x128xf32>
    %669 = arith.addf %667, %668 : vector<8x128xf32>
    %c1_202 = arith.constant 1 : index
    %c0_203 = arith.constant 0 : index
    %c0_204 = arith.constant 0 : index
    %670 = vector.load %arg11[%c1_202, %c0_203, %c0_204] : memref<4x128x768xf32, #tpu.memory_space<vmem>>, vector<1x128x768xf32>
    %671 = vector.shape_cast %670 : vector<1x128x768xf32> to vector<128x768xf32>
    %cst_205 = arith.constant dense<0.000000e+00> : vector<8x768xf32>
    %672 = tpu.matmul %669, %671, %cst_205 {dimension_numbers = #tpu.dot_dimension_numbers<[1], [0], [0], [1], [0, 0, 1, 1], [], []>} : vector<8x128xf32>, vector<128x768xf32>, vector<8x768xf32> -> vector<8x768xf32>
    %c1_206 = arith.constant 1 : index
    %c0_207 = arith.constant 0 : index
    %c0_208 = arith.constant 0 : index
    %673 = vector.load %arg12[%c1_206, %c0_207, %c0_208] : memref<4x1x768xf32, #tpu.memory_space<vmem>>, vector<1x1x768xf32>
    %674 = vector.shape_cast %673 : vector<1x1x768xf32> to vector<1x768xf32>
    %675 = vector.broadcast %674 : vector<1x768xf32> to vector<8x768xf32>
    %676 = arith.addf %672, %675 : vector<8x768xf32>
    %cst_209 = arith.constant 5.000000e-01 : f32
    %677 = vector.broadcast %cst_209 : f32 to vector<8x768xf32>
    %678 = arith.mulf %677, %676 : vector<8x768xf32>
    %cst_210 = arith.constant 0.707106769 : f32
    %679 = vector.broadcast %cst_210 : f32 to vector<8x768xf32>
    %680 = arith.mulf %676, %679 : vector<8x768xf32>
    %681 = math.erf %680 : vector<8x768xf32>
    %cst_211 = arith.constant 1.000000e+00 : f32
    %682 = vector.broadcast %cst_211 : f32 to vector<8x768xf32>
    %683 = arith.addf %682, %681 : vector<8x768xf32>
    %684 = arith.mulf %678, %683 : vector<8x768xf32>
    %c1_212 = arith.constant 1 : index
    %c0_213 = arith.constant 0 : index
    %c0_214 = arith.constant 0 : index
    %685 = vector.load %arg13[%c1_212, %c0_213, %c0_214] : memref<4x768x128xf32, #tpu.memory_space<vmem>>, vector<1x768x128xf32>
    %686 = vector.shape_cast %685 : vector<1x768x128xf32> to vector<768x128xf32>
    %cst_215 = arith.constant dense<0.000000e+00> : vector<8x128xf32>
    %687 = tpu.matmul %684, %686, %cst_215 {dimension_numbers = #tpu.dot_dimension_numbers<[1], [0], [0], [1], [0, 0, 1, 1], [], []>} : vector<8x768xf32>, vector<768x128xf32>, vector<8x128xf32> -> vector<8x128xf32>
    %c1_216 = arith.constant 1 : index
    %c0_217 = arith.constant 0 : index
    %c0_218 = arith.constant 0 : index
    %688 = vector.load %arg14[%c1_216, %c0_217, %c0_218] : memref<4x1x128xf32, #tpu.memory_space<vmem>>, vector<1x1x128xf32>
    %689 = vector.shape_cast %688 : vector<1x1x128xf32> to vector<1x128xf32>
    %690 = vector.broadcast %689 : vector<1x128xf32> to vector<8x128xf32>
    %691 = arith.addf %687, %690 : vector<8x128xf32>
    %692 = arith.addf %691, %669 : vector<8x128xf32>
    %c1_219 = arith.constant 1 : index
    %c0_220 = arith.constant 0 : index
    %c0_221 = arith.constant 0 : index
    %693 = vector.load %arg15[%c1_219, %c0_220, %c0_221] : memref<4x1x128xf32, #tpu.memory_space<vmem>>, vector<1x1x128xf32>
    %694 = vector.shape_cast %693 : vector<1x1x128xf32> to vector<1x128xf32>
    %c1_222 = arith.constant 1 : index
    %c0_223 = arith.constant 0 : index
    %c0_224 = arith.constant 0 : index
    %695 = vector.load %arg16[%c1_222, %c0_223, %c0_224] : memref<4x1x128xf32, #tpu.memory_space<vmem>>, vector<1x1x128xf32>
    %696 = vector.shape_cast %695 : vector<1x1x128xf32> to vector<1x128xf32>
    %697 = vector.broadcast %4 : vector<1x128xf32> to vector<8x128xf32>
    %698 = arith.mulf %692, %697 : vector<8x128xf32>
    %cst_225 = arith.constant dense<0.000000e+00> : vector<8xf32>
    %699 = vector.multi_reduction <add>, %698, %cst_225 [1] : vector<8x128xf32> to vector<8xf32>
    %700 = vector.shape_cast %699 : vector<8xf32> to vector<8x1xf32>
    %cst_226 = arith.constant 0.00999999977 : f32
    %701 = vector.broadcast %cst_226 : f32 to vector<8x1xf32>
    %702 = arith.mulf %700, %701 : vector<8x1xf32>
    %703 = vector.broadcast %702 : vector<8x1xf32> to vector<8x128xf32>
    %704 = arith.subf %692, %703 : vector<8x128xf32>
    %705 = vector.broadcast %4 : vector<1x128xf32> to vector<8x128xf32>
    %706 = arith.mulf %704, %705 : vector<8x128xf32>
    %707 = arith.mulf %706, %706 : vector<8x128xf32>
    %cst_227 = arith.constant dense<0.000000e+00> : vector<8xf32>
    %708 = vector.multi_reduction <add>, %707, %cst_227 [1] : vector<8x128xf32> to vector<8xf32>
    %709 = vector.shape_cast %708 : vector<8xf32> to vector<8x1xf32>
    %cst_228 = arith.constant 0.00999999977 : f32
    %710 = vector.broadcast %cst_228 : f32 to vector<8x1xf32>
    %711 = arith.mulf %709, %710 : vector<8x1xf32>
    %cst_229 = arith.constant 9.99999996E-13 : f32
    %712 = vector.broadcast %cst_229 : f32 to vector<8x1xf32>
    %713 = arith.addf %711, %712 : vector<8x1xf32>
    %714 = math.rsqrt %713 : vector<8x1xf32>
    %715 = vector.broadcast %714 : vector<8x1xf32> to vector<8x128xf32>
    %716 = arith.mulf %706, %715 : vector<8x128xf32>
    %717 = vector.broadcast %694 : vector<1x128xf32> to vector<8x128xf32>
    %718 = arith.mulf %716, %717 : vector<8x128xf32>
    %719 = vector.broadcast %696 : vector<1x128xf32> to vector<8x128xf32>
    %720 = arith.addf %718, %719 : vector<8x128xf32>
    %c2 = arith.constant 2 : index
    %c0_230 = arith.constant 0 : index
    %c0_231 = arith.constant 0 : index
    %721 = vector.load %arg5[%c2, %c0_230, %c0_231] : memref<4x128x384xf32, #tpu.memory_space<vmem>>, vector<1x128x384xf32>
    %722 = vector.shape_cast %721 : vector<1x128x384xf32> to vector<128x384xf32>
    %cst_232 = arith.constant dense<0.000000e+00> : vector<8x384xf32>
    %723 = tpu.matmul %720, %722, %cst_232 {dimension_numbers = #tpu.dot_dimension_numbers<[1], [0], [0], [1], [0, 0, 1, 1], [], []>} : vector<8x128xf32>, vector<128x384xf32>, vector<8x384xf32> -> vector<8x384xf32>
    %c2_233 = arith.constant 2 : index
    %c0_234 = arith.constant 0 : index
    %c0_235 = arith.constant 0 : index
    %724 = vector.load %arg6[%c2_233, %c0_234, %c0_235] : memref<4x1x384xf32, #tpu.memory_space<vmem>>, vector<1x1x384xf32>
    %725 = vector.shape_cast %724 : vector<1x1x384xf32> to vector<1x384xf32>
    %726 = vector.broadcast %725 : vector<1x384xf32> to vector<8x384xf32>
    %727 = arith.addf %723, %726 : vector<8x384xf32>
    %728 = vector.extract_strided_slice %727 {offsets = [0, 0], sizes = [8, 128], strides = [1, 1]} : vector<8x384xf32> to vector<8x128xf32>
    %729 = vector.extract_strided_slice %727 {offsets = [0, 128], sizes = [8, 128], strides = [1, 1]} : vector<8x384xf32> to vector<8x128xf32>
    %730 = vector.extract_strided_slice %727 {offsets = [0, 256], sizes = [8, 128], strides = [1, 1]} : vector<8x384xf32> to vector<8x128xf32>
    %cst_236 = arith.constant 0.000000e+00 : f32
    %731 = vector.broadcast %cst_236 : f32 to vector<8x128xf32>
    %732 = vector.broadcast %11 : vector<1x128xf32> to vector<8x128xf32>
    %733 = arith.mulf %728, %732 : vector<8x128xf32>
    %cst_237 = arith.constant dense<0.000000e+00> : vector<8x8xf32>
    %734 = tpu.matmul %733, %729, %cst_237 {dimension_numbers = #tpu.dot_dimension_numbers<[1], [1], [0], [0], [0, 0, 1, 0], [], []>} : vector<8x128xf32>, vector<8x128xf32>, vector<8x8xf32> -> vector<8x8xf32>
    %cst_238 = arith.constant 0.316227764 : f32
    %735 = vector.broadcast %cst_238 : f32 to vector<8x8xf32>
    %736 = arith.mulf %734, %735 : vector<8x8xf32>
    %737 = vector.broadcast %104 : vector<1x8xf32> to vector<8x8xf32>
    %738 = arith.addf %736, %737 : vector<8x8xf32>
    %cst_239 = arith.constant dense<0xFF800000> : vector<8xf32>
    %739 = vector.multi_reduction <maximumf>, %738, %cst_239 [1] : vector<8x8xf32> to vector<8xf32>
    %740 = vector.shape_cast %739 : vector<8xf32> to vector<8x1xf32>
    %741 = vector.broadcast %740 : vector<8x1xf32> to vector<8x8xf32>
    %742 = arith.subf %738, %741 : vector<8x8xf32>
    %743 = math.exp %742 : vector<8x8xf32>
    %cst_240 = arith.constant dense<0.000000e+00> : vector<8xf32>
    %744 = vector.multi_reduction <add>, %743, %cst_240 [1] : vector<8x8xf32> to vector<8xf32>
    %745 = vector.shape_cast %744 : vector<8xf32> to vector<8x1xf32>
    %746 = tpu.reciprocal %745 {approx = true} : vector<8x1xf32> -> vector<8x1xf32>
    %747 = vector.broadcast %746 : vector<8x1xf32> to vector<8x8xf32>
    %748 = arith.mulf %743, %747 : vector<8x8xf32>
    %cst_241 = arith.constant dense<0.000000e+00> : vector<8x128xf32>
    %749 = tpu.matmul %748, %730, %cst_241 {dimension_numbers = #tpu.dot_dimension_numbers<[1], [0], [0], [1], [0, 0, 1, 1], [], []>} : vector<8x8xf32>, vector<8x128xf32>, vector<8x128xf32> -> vector<8x128xf32>
    %750 = vector.broadcast %11 : vector<1x128xf32> to vector<8x128xf32>
    %751 = arith.mulf %749, %750 : vector<8x128xf32>
    %752 = arith.addf %731, %751 : vector<8x128xf32>
    %753 = vector.broadcast %18 : vector<1x128xf32> to vector<8x128xf32>
    %754 = arith.mulf %728, %753 : vector<8x128xf32>
    %cst_242 = arith.constant dense<0.000000e+00> : vector<8x8xf32>
    %755 = tpu.matmul %754, %729, %cst_242 {dimension_numbers = #tpu.dot_dimension_numbers<[1], [1], [0], [0], [0, 0, 1, 0], [], []>} : vector<8x128xf32>, vector<8x128xf32>, vector<8x8xf32> -> vector<8x8xf32>
    %cst_243 = arith.constant 0.316227764 : f32
    %756 = vector.broadcast %cst_243 : f32 to vector<8x8xf32>
    %757 = arith.mulf %755, %756 : vector<8x8xf32>
    %758 = vector.broadcast %104 : vector<1x8xf32> to vector<8x8xf32>
    %759 = arith.addf %757, %758 : vector<8x8xf32>
    %cst_244 = arith.constant dense<0xFF800000> : vector<8xf32>
    %760 = vector.multi_reduction <maximumf>, %759, %cst_244 [1] : vector<8x8xf32> to vector<8xf32>
    %761 = vector.shape_cast %760 : vector<8xf32> to vector<8x1xf32>
    %762 = vector.broadcast %761 : vector<8x1xf32> to vector<8x8xf32>
    %763 = arith.subf %759, %762 : vector<8x8xf32>
    %764 = math.exp %763 : vector<8x8xf32>
    %cst_245 = arith.constant dense<0.000000e+00> : vector<8xf32>
    %765 = vector.multi_reduction <add>, %764, %cst_245 [1] : vector<8x8xf32> to vector<8xf32>
    %766 = vector.shape_cast %765 : vector<8xf32> to vector<8x1xf32>
    %767 = tpu.reciprocal %766 {approx = true} : vector<8x1xf32> -> vector<8x1xf32>
    %768 = vector.broadcast %767 : vector<8x1xf32> to vector<8x8xf32>
    %769 = arith.mulf %764, %768 : vector<8x8xf32>
    %cst_246 = arith.constant dense<0.000000e+00> : vector<8x128xf32>
    %770 = tpu.matmul %769, %730, %cst_246 {dimension_numbers = #tpu.dot_dimension_numbers<[1], [0], [0], [1], [0, 0, 1, 1], [], []>} : vector<8x8xf32>, vector<8x128xf32>, vector<8x128xf32> -> vector<8x128xf32>
    %771 = vector.broadcast %18 : vector<1x128xf32> to vector<8x128xf32>
    %772 = arith.mulf %770, %771 : vector<8x128xf32>
    %773 = arith.addf %752, %772 : vector<8x128xf32>
    %774 = vector.broadcast %25 : vector<1x128xf32> to vector<8x128xf32>
    %775 = arith.mulf %728, %774 : vector<8x128xf32>
    %cst_247 = arith.constant dense<0.000000e+00> : vector<8x8xf32>
    %776 = tpu.matmul %775, %729, %cst_247 {dimension_numbers = #tpu.dot_dimension_numbers<[1], [1], [0], [0], [0, 0, 1, 0], [], []>} : vector<8x128xf32>, vector<8x128xf32>, vector<8x8xf32> -> vector<8x8xf32>
    %cst_248 = arith.constant 0.316227764 : f32
    %777 = vector.broadcast %cst_248 : f32 to vector<8x8xf32>
    %778 = arith.mulf %776, %777 : vector<8x8xf32>
    %779 = vector.broadcast %104 : vector<1x8xf32> to vector<8x8xf32>
    %780 = arith.addf %778, %779 : vector<8x8xf32>
    %cst_249 = arith.constant dense<0xFF800000> : vector<8xf32>
    %781 = vector.multi_reduction <maximumf>, %780, %cst_249 [1] : vector<8x8xf32> to vector<8xf32>
    %782 = vector.shape_cast %781 : vector<8xf32> to vector<8x1xf32>
    %783 = vector.broadcast %782 : vector<8x1xf32> to vector<8x8xf32>
    %784 = arith.subf %780, %783 : vector<8x8xf32>
    %785 = math.exp %784 : vector<8x8xf32>
    %cst_250 = arith.constant dense<0.000000e+00> : vector<8xf32>
    %786 = vector.multi_reduction <add>, %785, %cst_250 [1] : vector<8x8xf32> to vector<8xf32>
    %787 = vector.shape_cast %786 : vector<8xf32> to vector<8x1xf32>
    %788 = tpu.reciprocal %787 {approx = true} : vector<8x1xf32> -> vector<8x1xf32>
    %789 = vector.broadcast %788 : vector<8x1xf32> to vector<8x8xf32>
    %790 = arith.mulf %785, %789 : vector<8x8xf32>
    %cst_251 = arith.constant dense<0.000000e+00> : vector<8x128xf32>
    %791 = tpu.matmul %790, %730, %cst_251 {dimension_numbers = #tpu.dot_dimension_numbers<[1], [0], [0], [1], [0, 0, 1, 1], [], []>} : vector<8x8xf32>, vector<8x128xf32>, vector<8x128xf32> -> vector<8x128xf32>
    %792 = vector.broadcast %25 : vector<1x128xf32> to vector<8x128xf32>
    %793 = arith.mulf %791, %792 : vector<8x128xf32>
    %794 = arith.addf %773, %793 : vector<8x128xf32>
    %795 = vector.broadcast %32 : vector<1x128xf32> to vector<8x128xf32>
    %796 = arith.mulf %728, %795 : vector<8x128xf32>
    %cst_252 = arith.constant dense<0.000000e+00> : vector<8x8xf32>
    %797 = tpu.matmul %796, %729, %cst_252 {dimension_numbers = #tpu.dot_dimension_numbers<[1], [1], [0], [0], [0, 0, 1, 0], [], []>} : vector<8x128xf32>, vector<8x128xf32>, vector<8x8xf32> -> vector<8x8xf32>
    %cst_253 = arith.constant 0.316227764 : f32
    %798 = vector.broadcast %cst_253 : f32 to vector<8x8xf32>
    %799 = arith.mulf %797, %798 : vector<8x8xf32>
    %800 = vector.broadcast %104 : vector<1x8xf32> to vector<8x8xf32>
    %801 = arith.addf %799, %800 : vector<8x8xf32>
    %cst_254 = arith.constant dense<0xFF800000> : vector<8xf32>
    %802 = vector.multi_reduction <maximumf>, %801, %cst_254 [1] : vector<8x8xf32> to vector<8xf32>
    %803 = vector.shape_cast %802 : vector<8xf32> to vector<8x1xf32>
    %804 = vector.broadcast %803 : vector<8x1xf32> to vector<8x8xf32>
    %805 = arith.subf %801, %804 : vector<8x8xf32>
    %806 = math.exp %805 : vector<8x8xf32>
    %cst_255 = arith.constant dense<0.000000e+00> : vector<8xf32>
    %807 = vector.multi_reduction <add>, %806, %cst_255 [1] : vector<8x8xf32> to vector<8xf32>
    %808 = vector.shape_cast %807 : vector<8xf32> to vector<8x1xf32>
    %809 = tpu.reciprocal %808 {approx = true} : vector<8x1xf32> -> vector<8x1xf32>
    %810 = vector.broadcast %809 : vector<8x1xf32> to vector<8x8xf32>
    %811 = arith.mulf %806, %810 : vector<8x8xf32>
    %cst_256 = arith.constant dense<0.000000e+00> : vector<8x128xf32>
    %812 = tpu.matmul %811, %730, %cst_256 {dimension_numbers = #tpu.dot_dimension_numbers<[1], [0], [0], [1], [0, 0, 1, 1], [], []>} : vector<8x8xf32>, vector<8x128xf32>, vector<8x128xf32> -> vector<8x128xf32>
    %813 = vector.broadcast %32 : vector<1x128xf32> to vector<8x128xf32>
    %814 = arith.mulf %812, %813 : vector<8x128xf32>
    %815 = arith.addf %794, %814 : vector<8x128xf32>
    %816 = vector.broadcast %39 : vector<1x128xf32> to vector<8x128xf32>
    %817 = arith.mulf %728, %816 : vector<8x128xf32>
    %cst_257 = arith.constant dense<0.000000e+00> : vector<8x8xf32>
    %818 = tpu.matmul %817, %729, %cst_257 {dimension_numbers = #tpu.dot_dimension_numbers<[1], [1], [0], [0], [0, 0, 1, 0], [], []>} : vector<8x128xf32>, vector<8x128xf32>, vector<8x8xf32> -> vector<8x8xf32>
    %cst_258 = arith.constant 0.316227764 : f32
    %819 = vector.broadcast %cst_258 : f32 to vector<8x8xf32>
    %820 = arith.mulf %818, %819 : vector<8x8xf32>
    %821 = vector.broadcast %104 : vector<1x8xf32> to vector<8x8xf32>
    %822 = arith.addf %820, %821 : vector<8x8xf32>
    %cst_259 = arith.constant dense<0xFF800000> : vector<8xf32>
    %823 = vector.multi_reduction <maximumf>, %822, %cst_259 [1] : vector<8x8xf32> to vector<8xf32>
    %824 = vector.shape_cast %823 : vector<8xf32> to vector<8x1xf32>
    %825 = vector.broadcast %824 : vector<8x1xf32> to vector<8x8xf32>
    %826 = arith.subf %822, %825 : vector<8x8xf32>
    %827 = math.exp %826 : vector<8x8xf32>
    %cst_260 = arith.constant dense<0.000000e+00> : vector<8xf32>
    %828 = vector.multi_reduction <add>, %827, %cst_260 [1] : vector<8x8xf32> to vector<8xf32>
    %829 = vector.shape_cast %828 : vector<8xf32> to vector<8x1xf32>
    %830 = tpu.reciprocal %829 {approx = true} : vector<8x1xf32> -> vector<8x1xf32>
    %831 = vector.broadcast %830 : vector<8x1xf32> to vector<8x8xf32>
    %832 = arith.mulf %827, %831 : vector<8x8xf32>
    %cst_261 = arith.constant dense<0.000000e+00> : vector<8x128xf32>
    %833 = tpu.matmul %832, %730, %cst_261 {dimension_numbers = #tpu.dot_dimension_numbers<[1], [0], [0], [1], [0, 0, 1, 1], [], []>} : vector<8x8xf32>, vector<8x128xf32>, vector<8x128xf32> -> vector<8x128xf32>
    %834 = vector.broadcast %39 : vector<1x128xf32> to vector<8x128xf32>
    %835 = arith.mulf %833, %834 : vector<8x128xf32>
    %836 = arith.addf %815, %835 : vector<8x128xf32>
    %837 = vector.broadcast %46 : vector<1x128xf32> to vector<8x128xf32>
    %838 = arith.mulf %728, %837 : vector<8x128xf32>
    %cst_262 = arith.constant dense<0.000000e+00> : vector<8x8xf32>
    %839 = tpu.matmul %838, %729, %cst_262 {dimension_numbers = #tpu.dot_dimension_numbers<[1], [1], [0], [0], [0, 0, 1, 0], [], []>} : vector<8x128xf32>, vector<8x128xf32>, vector<8x8xf32> -> vector<8x8xf32>
    %cst_263 = arith.constant 0.316227764 : f32
    %840 = vector.broadcast %cst_263 : f32 to vector<8x8xf32>
    %841 = arith.mulf %839, %840 : vector<8x8xf32>
    %842 = vector.broadcast %104 : vector<1x8xf32> to vector<8x8xf32>
    %843 = arith.addf %841, %842 : vector<8x8xf32>
    %cst_264 = arith.constant dense<0xFF800000> : vector<8xf32>
    %844 = vector.multi_reduction <maximumf>, %843, %cst_264 [1] : vector<8x8xf32> to vector<8xf32>
    %845 = vector.shape_cast %844 : vector<8xf32> to vector<8x1xf32>
    %846 = vector.broadcast %845 : vector<8x1xf32> to vector<8x8xf32>
    %847 = arith.subf %843, %846 : vector<8x8xf32>
    %848 = math.exp %847 : vector<8x8xf32>
    %cst_265 = arith.constant dense<0.000000e+00> : vector<8xf32>
    %849 = vector.multi_reduction <add>, %848, %cst_265 [1] : vector<8x8xf32> to vector<8xf32>
    %850 = vector.shape_cast %849 : vector<8xf32> to vector<8x1xf32>
    %851 = tpu.reciprocal %850 {approx = true} : vector<8x1xf32> -> vector<8x1xf32>
    %852 = vector.broadcast %851 : vector<8x1xf32> to vector<8x8xf32>
    %853 = arith.mulf %848, %852 : vector<8x8xf32>
    %cst_266 = arith.constant dense<0.000000e+00> : vector<8x128xf32>
    %854 = tpu.matmul %853, %730, %cst_266 {dimension_numbers = #tpu.dot_dimension_numbers<[1], [0], [0], [1], [0, 0, 1, 1], [], []>} : vector<8x8xf32>, vector<8x128xf32>, vector<8x128xf32> -> vector<8x128xf32>
    %855 = vector.broadcast %46 : vector<1x128xf32> to vector<8x128xf32>
    %856 = arith.mulf %854, %855 : vector<8x128xf32>
    %857 = arith.addf %836, %856 : vector<8x128xf32>
    %858 = vector.broadcast %53 : vector<1x128xf32> to vector<8x128xf32>
    %859 = arith.mulf %728, %858 : vector<8x128xf32>
    %cst_267 = arith.constant dense<0.000000e+00> : vector<8x8xf32>
    %860 = tpu.matmul %859, %729, %cst_267 {dimension_numbers = #tpu.dot_dimension_numbers<[1], [1], [0], [0], [0, 0, 1, 0], [], []>} : vector<8x128xf32>, vector<8x128xf32>, vector<8x8xf32> -> vector<8x8xf32>
    %cst_268 = arith.constant 0.316227764 : f32
    %861 = vector.broadcast %cst_268 : f32 to vector<8x8xf32>
    %862 = arith.mulf %860, %861 : vector<8x8xf32>
    %863 = vector.broadcast %104 : vector<1x8xf32> to vector<8x8xf32>
    %864 = arith.addf %862, %863 : vector<8x8xf32>
    %cst_269 = arith.constant dense<0xFF800000> : vector<8xf32>
    %865 = vector.multi_reduction <maximumf>, %864, %cst_269 [1] : vector<8x8xf32> to vector<8xf32>
    %866 = vector.shape_cast %865 : vector<8xf32> to vector<8x1xf32>
    %867 = vector.broadcast %866 : vector<8x1xf32> to vector<8x8xf32>
    %868 = arith.subf %864, %867 : vector<8x8xf32>
    %869 = math.exp %868 : vector<8x8xf32>
    %cst_270 = arith.constant dense<0.000000e+00> : vector<8xf32>
    %870 = vector.multi_reduction <add>, %869, %cst_270 [1] : vector<8x8xf32> to vector<8xf32>
    %871 = vector.shape_cast %870 : vector<8xf32> to vector<8x1xf32>
    %872 = tpu.reciprocal %871 {approx = true} : vector<8x1xf32> -> vector<8x1xf32>
    %873 = vector.broadcast %872 : vector<8x1xf32> to vector<8x8xf32>
    %874 = arith.mulf %869, %873 : vector<8x8xf32>
    %cst_271 = arith.constant dense<0.000000e+00> : vector<8x128xf32>
    %875 = tpu.matmul %874, %730, %cst_271 {dimension_numbers = #tpu.dot_dimension_numbers<[1], [0], [0], [1], [0, 0, 1, 1], [], []>} : vector<8x8xf32>, vector<8x128xf32>, vector<8x128xf32> -> vector<8x128xf32>
    %876 = vector.broadcast %53 : vector<1x128xf32> to vector<8x128xf32>
    %877 = arith.mulf %875, %876 : vector<8x128xf32>
    %878 = arith.addf %857, %877 : vector<8x128xf32>
    %879 = vector.broadcast %60 : vector<1x128xf32> to vector<8x128xf32>
    %880 = arith.mulf %728, %879 : vector<8x128xf32>
    %cst_272 = arith.constant dense<0.000000e+00> : vector<8x8xf32>
    %881 = tpu.matmul %880, %729, %cst_272 {dimension_numbers = #tpu.dot_dimension_numbers<[1], [1], [0], [0], [0, 0, 1, 0], [], []>} : vector<8x128xf32>, vector<8x128xf32>, vector<8x8xf32> -> vector<8x8xf32>
    %cst_273 = arith.constant 0.316227764 : f32
    %882 = vector.broadcast %cst_273 : f32 to vector<8x8xf32>
    %883 = arith.mulf %881, %882 : vector<8x8xf32>
    %884 = vector.broadcast %104 : vector<1x8xf32> to vector<8x8xf32>
    %885 = arith.addf %883, %884 : vector<8x8xf32>
    %cst_274 = arith.constant dense<0xFF800000> : vector<8xf32>
    %886 = vector.multi_reduction <maximumf>, %885, %cst_274 [1] : vector<8x8xf32> to vector<8xf32>
    %887 = vector.shape_cast %886 : vector<8xf32> to vector<8x1xf32>
    %888 = vector.broadcast %887 : vector<8x1xf32> to vector<8x8xf32>
    %889 = arith.subf %885, %888 : vector<8x8xf32>
    %890 = math.exp %889 : vector<8x8xf32>
    %cst_275 = arith.constant dense<0.000000e+00> : vector<8xf32>
    %891 = vector.multi_reduction <add>, %890, %cst_275 [1] : vector<8x8xf32> to vector<8xf32>
    %892 = vector.shape_cast %891 : vector<8xf32> to vector<8x1xf32>
    %893 = tpu.reciprocal %892 {approx = true} : vector<8x1xf32> -> vector<8x1xf32>
    %894 = vector.broadcast %893 : vector<8x1xf32> to vector<8x8xf32>
    %895 = arith.mulf %890, %894 : vector<8x8xf32>
    %cst_276 = arith.constant dense<0.000000e+00> : vector<8x128xf32>
    %896 = tpu.matmul %895, %730, %cst_276 {dimension_numbers = #tpu.dot_dimension_numbers<[1], [0], [0], [1], [0, 0, 1, 1], [], []>} : vector<8x8xf32>, vector<8x128xf32>, vector<8x128xf32> -> vector<8x128xf32>
    %897 = vector.broadcast %60 : vector<1x128xf32> to vector<8x128xf32>
    %898 = arith.mulf %896, %897 : vector<8x128xf32>
    %899 = arith.addf %878, %898 : vector<8x128xf32>
    %900 = vector.broadcast %67 : vector<1x128xf32> to vector<8x128xf32>
    %901 = arith.mulf %728, %900 : vector<8x128xf32>
    %cst_277 = arith.constant dense<0.000000e+00> : vector<8x8xf32>
    %902 = tpu.matmul %901, %729, %cst_277 {dimension_numbers = #tpu.dot_dimension_numbers<[1], [1], [0], [0], [0, 0, 1, 0], [], []>} : vector<8x128xf32>, vector<8x128xf32>, vector<8x8xf32> -> vector<8x8xf32>
    %cst_278 = arith.constant 0.316227764 : f32
    %903 = vector.broadcast %cst_278 : f32 to vector<8x8xf32>
    %904 = arith.mulf %902, %903 : vector<8x8xf32>
    %905 = vector.broadcast %104 : vector<1x8xf32> to vector<8x8xf32>
    %906 = arith.addf %904, %905 : vector<8x8xf32>
    %cst_279 = arith.constant dense<0xFF800000> : vector<8xf32>
    %907 = vector.multi_reduction <maximumf>, %906, %cst_279 [1] : vector<8x8xf32> to vector<8xf32>
    %908 = vector.shape_cast %907 : vector<8xf32> to vector<8x1xf32>
    %909 = vector.broadcast %908 : vector<8x1xf32> to vector<8x8xf32>
    %910 = arith.subf %906, %909 : vector<8x8xf32>
    %911 = math.exp %910 : vector<8x8xf32>
    %cst_280 = arith.constant dense<0.000000e+00> : vector<8xf32>
    %912 = vector.multi_reduction <add>, %911, %cst_280 [1] : vector<8x8xf32> to vector<8xf32>
    %913 = vector.shape_cast %912 : vector<8xf32> to vector<8x1xf32>
    %914 = tpu.reciprocal %913 {approx = true} : vector<8x1xf32> -> vector<8x1xf32>
    %915 = vector.broadcast %914 : vector<8x1xf32> to vector<8x8xf32>
    %916 = arith.mulf %911, %915 : vector<8x8xf32>
    %cst_281 = arith.constant dense<0.000000e+00> : vector<8x128xf32>
    %917 = tpu.matmul %916, %730, %cst_281 {dimension_numbers = #tpu.dot_dimension_numbers<[1], [0], [0], [1], [0, 0, 1, 1], [], []>} : vector<8x8xf32>, vector<8x128xf32>, vector<8x128xf32> -> vector<8x128xf32>
    %918 = vector.broadcast %67 : vector<1x128xf32> to vector<8x128xf32>
    %919 = arith.mulf %917, %918 : vector<8x128xf32>
    %920 = arith.addf %899, %919 : vector<8x128xf32>
    %921 = vector.broadcast %74 : vector<1x128xf32> to vector<8x128xf32>
    %922 = arith.mulf %728, %921 : vector<8x128xf32>
    %cst_282 = arith.constant dense<0.000000e+00> : vector<8x8xf32>
    %923 = tpu.matmul %922, %729, %cst_282 {dimension_numbers = #tpu.dot_dimension_numbers<[1], [1], [0], [0], [0, 0, 1, 0], [], []>} : vector<8x128xf32>, vector<8x128xf32>, vector<8x8xf32> -> vector<8x8xf32>
    %cst_283 = arith.constant 0.316227764 : f32
    %924 = vector.broadcast %cst_283 : f32 to vector<8x8xf32>
    %925 = arith.mulf %923, %924 : vector<8x8xf32>
    %926 = vector.broadcast %104 : vector<1x8xf32> to vector<8x8xf32>
    %927 = arith.addf %925, %926 : vector<8x8xf32>
    %cst_284 = arith.constant dense<0xFF800000> : vector<8xf32>
    %928 = vector.multi_reduction <maximumf>, %927, %cst_284 [1] : vector<8x8xf32> to vector<8xf32>
    %929 = vector.shape_cast %928 : vector<8xf32> to vector<8x1xf32>
    %930 = vector.broadcast %929 : vector<8x1xf32> to vector<8x8xf32>
    %931 = arith.subf %927, %930 : vector<8x8xf32>
    %932 = math.exp %931 : vector<8x8xf32>
    %cst_285 = arith.constant dense<0.000000e+00> : vector<8xf32>
    %933 = vector.multi_reduction <add>, %932, %cst_285 [1] : vector<8x8xf32> to vector<8xf32>
    %934 = vector.shape_cast %933 : vector<8xf32> to vector<8x1xf32>
    %935 = tpu.reciprocal %934 {approx = true} : vector<8x1xf32> -> vector<8x1xf32>
    %936 = vector.broadcast %935 : vector<8x1xf32> to vector<8x8xf32>
    %937 = arith.mulf %932, %936 : vector<8x8xf32>
    %cst_286 = arith.constant dense<0.000000e+00> : vector<8x128xf32>
    %938 = tpu.matmul %937, %730, %cst_286 {dimension_numbers = #tpu.dot_dimension_numbers<[1], [0], [0], [1], [0, 0, 1, 1], [], []>} : vector<8x8xf32>, vector<8x128xf32>, vector<8x128xf32> -> vector<8x128xf32>
    %939 = vector.broadcast %74 : vector<1x128xf32> to vector<8x128xf32>
    %940 = arith.mulf %938, %939 : vector<8x128xf32>
    %941 = arith.addf %920, %940 : vector<8x128xf32>
    %c2_287 = arith.constant 2 : index
    %c0_288 = arith.constant 0 : index
    %c0_289 = arith.constant 0 : index
    %942 = vector.load %arg7[%c2_287, %c0_288, %c0_289] : memref<4x128x128xf32, #tpu.memory_space<vmem>>, vector<1x128x128xf32>
    %943 = vector.shape_cast %942 : vector<1x128x128xf32> to vector<128x128xf32>
    %cst_290 = arith.constant dense<0.000000e+00> : vector<8x128xf32>
    %944 = tpu.matmul %941, %943, %cst_290 {dimension_numbers = #tpu.dot_dimension_numbers<[1], [0], [0], [1], [0, 0, 1, 1], [], []>} : vector<8x128xf32>, vector<128x128xf32>, vector<8x128xf32> -> vector<8x128xf32>
    %c2_291 = arith.constant 2 : index
    %c0_292 = arith.constant 0 : index
    %c0_293 = arith.constant 0 : index
    %945 = vector.load %arg8[%c2_291, %c0_292, %c0_293] : memref<4x1x128xf32, #tpu.memory_space<vmem>>, vector<1x1x128xf32>
    %946 = vector.shape_cast %945 : vector<1x1x128xf32> to vector<1x128xf32>
    %947 = vector.broadcast %946 : vector<1x128xf32> to vector<8x128xf32>
    %948 = arith.addf %944, %947 : vector<8x128xf32>
    %949 = arith.addf %948, %720 : vector<8x128xf32>
    %c2_294 = arith.constant 2 : index
    %c0_295 = arith.constant 0 : index
    %c0_296 = arith.constant 0 : index
    %950 = vector.load %arg9[%c2_294, %c0_295, %c0_296] : memref<4x1x128xf32, #tpu.memory_space<vmem>>, vector<1x1x128xf32>
    %951 = vector.shape_cast %950 : vector<1x1x128xf32> to vector<1x128xf32>
    %c2_297 = arith.constant 2 : index
    %c0_298 = arith.constant 0 : index
    %c0_299 = arith.constant 0 : index
    %952 = vector.load %arg10[%c2_297, %c0_298, %c0_299] : memref<4x1x128xf32, #tpu.memory_space<vmem>>, vector<1x1x128xf32>
    %953 = vector.shape_cast %952 : vector<1x1x128xf32> to vector<1x128xf32>
    %954 = vector.broadcast %4 : vector<1x128xf32> to vector<8x128xf32>
    %955 = arith.mulf %949, %954 : vector<8x128xf32>
    %cst_300 = arith.constant dense<0.000000e+00> : vector<8xf32>
    %956 = vector.multi_reduction <add>, %955, %cst_300 [1] : vector<8x128xf32> to vector<8xf32>
    %957 = vector.shape_cast %956 : vector<8xf32> to vector<8x1xf32>
    %cst_301 = arith.constant 0.00999999977 : f32
    %958 = vector.broadcast %cst_301 : f32 to vector<8x1xf32>
    %959 = arith.mulf %957, %958 : vector<8x1xf32>
    %960 = vector.broadcast %959 : vector<8x1xf32> to vector<8x128xf32>
    %961 = arith.subf %949, %960 : vector<8x128xf32>
    %962 = vector.broadcast %4 : vector<1x128xf32> to vector<8x128xf32>
    %963 = arith.mulf %961, %962 : vector<8x128xf32>
    %964 = arith.mulf %963, %963 : vector<8x128xf32>
    %cst_302 = arith.constant dense<0.000000e+00> : vector<8xf32>
    %965 = vector.multi_reduction <add>, %964, %cst_302 [1] : vector<8x128xf32> to vector<8xf32>
    %966 = vector.shape_cast %965 : vector<8xf32> to vector<8x1xf32>
    %cst_303 = arith.constant 0.00999999977 : f32
    %967 = vector.broadcast %cst_303 : f32 to vector<8x1xf32>
    %968 = arith.mulf %966, %967 : vector<8x1xf32>
    %cst_304 = arith.constant 9.99999996E-13 : f32
    %969 = vector.broadcast %cst_304 : f32 to vector<8x1xf32>
    %970 = arith.addf %968, %969 : vector<8x1xf32>
    %971 = math.rsqrt %970 : vector<8x1xf32>
    %972 = vector.broadcast %971 : vector<8x1xf32> to vector<8x128xf32>
    %973 = arith.mulf %963, %972 : vector<8x128xf32>
    %974 = vector.broadcast %951 : vector<1x128xf32> to vector<8x128xf32>
    %975 = arith.mulf %973, %974 : vector<8x128xf32>
    %976 = vector.broadcast %953 : vector<1x128xf32> to vector<8x128xf32>
    %977 = arith.addf %975, %976 : vector<8x128xf32>
    %c2_305 = arith.constant 2 : index
    %c0_306 = arith.constant 0 : index
    %c0_307 = arith.constant 0 : index
    %978 = vector.load %arg11[%c2_305, %c0_306, %c0_307] : memref<4x128x768xf32, #tpu.memory_space<vmem>>, vector<1x128x768xf32>
    %979 = vector.shape_cast %978 : vector<1x128x768xf32> to vector<128x768xf32>
    %cst_308 = arith.constant dense<0.000000e+00> : vector<8x768xf32>
    %980 = tpu.matmul %977, %979, %cst_308 {dimension_numbers = #tpu.dot_dimension_numbers<[1], [0], [0], [1], [0, 0, 1, 1], [], []>} : vector<8x128xf32>, vector<128x768xf32>, vector<8x768xf32> -> vector<8x768xf32>
    %c2_309 = arith.constant 2 : index
    %c0_310 = arith.constant 0 : index
    %c0_311 = arith.constant 0 : index
    %981 = vector.load %arg12[%c2_309, %c0_310, %c0_311] : memref<4x1x768xf32, #tpu.memory_space<vmem>>, vector<1x1x768xf32>
    %982 = vector.shape_cast %981 : vector<1x1x768xf32> to vector<1x768xf32>
    %983 = vector.broadcast %982 : vector<1x768xf32> to vector<8x768xf32>
    %984 = arith.addf %980, %983 : vector<8x768xf32>
    %cst_312 = arith.constant 5.000000e-01 : f32
    %985 = vector.broadcast %cst_312 : f32 to vector<8x768xf32>
    %986 = arith.mulf %985, %984 : vector<8x768xf32>
    %cst_313 = arith.constant 0.707106769 : f32
    %987 = vector.broadcast %cst_313 : f32 to vector<8x768xf32>
    %988 = arith.mulf %984, %987 : vector<8x768xf32>
    %989 = math.erf %988 : vector<8x768xf32>
    %cst_314 = arith.constant 1.000000e+00 : f32
    %990 = vector.broadcast %cst_314 : f32 to vector<8x768xf32>
    %991 = arith.addf %990, %989 : vector<8x768xf32>
    %992 = arith.mulf %986, %991 : vector<8x768xf32>
    %c2_315 = arith.constant 2 : index
    %c0_316 = arith.constant 0 : index
    %c0_317 = arith.constant 0 : index
    %993 = vector.load %arg13[%c2_315, %c0_316, %c0_317] : memref<4x768x128xf32, #tpu.memory_space<vmem>>, vector<1x768x128xf32>
    %994 = vector.shape_cast %993 : vector<1x768x128xf32> to vector<768x128xf32>
    %cst_318 = arith.constant dense<0.000000e+00> : vector<8x128xf32>
    %995 = tpu.matmul %992, %994, %cst_318 {dimension_numbers = #tpu.dot_dimension_numbers<[1], [0], [0], [1], [0, 0, 1, 1], [], []>} : vector<8x768xf32>, vector<768x128xf32>, vector<8x128xf32> -> vector<8x128xf32>
    %c2_319 = arith.constant 2 : index
    %c0_320 = arith.constant 0 : index
    %c0_321 = arith.constant 0 : index
    %996 = vector.load %arg14[%c2_319, %c0_320, %c0_321] : memref<4x1x128xf32, #tpu.memory_space<vmem>>, vector<1x1x128xf32>
    %997 = vector.shape_cast %996 : vector<1x1x128xf32> to vector<1x128xf32>
    %998 = vector.broadcast %997 : vector<1x128xf32> to vector<8x128xf32>
    %999 = arith.addf %995, %998 : vector<8x128xf32>
    %1000 = arith.addf %999, %977 : vector<8x128xf32>
    %c2_322 = arith.constant 2 : index
    %c0_323 = arith.constant 0 : index
    %c0_324 = arith.constant 0 : index
    %1001 = vector.load %arg15[%c2_322, %c0_323, %c0_324] : memref<4x1x128xf32, #tpu.memory_space<vmem>>, vector<1x1x128xf32>
    %1002 = vector.shape_cast %1001 : vector<1x1x128xf32> to vector<1x128xf32>
    %c2_325 = arith.constant 2 : index
    %c0_326 = arith.constant 0 : index
    %c0_327 = arith.constant 0 : index
    %1003 = vector.load %arg16[%c2_325, %c0_326, %c0_327] : memref<4x1x128xf32, #tpu.memory_space<vmem>>, vector<1x1x128xf32>
    %1004 = vector.shape_cast %1003 : vector<1x1x128xf32> to vector<1x128xf32>
    %1005 = vector.broadcast %4 : vector<1x128xf32> to vector<8x128xf32>
    %1006 = arith.mulf %1000, %1005 : vector<8x128xf32>
    %cst_328 = arith.constant dense<0.000000e+00> : vector<8xf32>
    %1007 = vector.multi_reduction <add>, %1006, %cst_328 [1] : vector<8x128xf32> to vector<8xf32>
    %1008 = vector.shape_cast %1007 : vector<8xf32> to vector<8x1xf32>
    %cst_329 = arith.constant 0.00999999977 : f32
    %1009 = vector.broadcast %cst_329 : f32 to vector<8x1xf32>
    %1010 = arith.mulf %1008, %1009 : vector<8x1xf32>
    %1011 = vector.broadcast %1010 : vector<8x1xf32> to vector<8x128xf32>
    %1012 = arith.subf %1000, %1011 : vector<8x128xf32>
    %1013 = vector.broadcast %4 : vector<1x128xf32> to vector<8x128xf32>
    %1014 = arith.mulf %1012, %1013 : vector<8x128xf32>
    %1015 = arith.mulf %1014, %1014 : vector<8x128xf32>
    %cst_330 = arith.constant dense<0.000000e+00> : vector<8xf32>
    %1016 = vector.multi_reduction <add>, %1015, %cst_330 [1] : vector<8x128xf32> to vector<8xf32>
    %1017 = vector.shape_cast %1016 : vector<8xf32> to vector<8x1xf32>
    %cst_331 = arith.constant 0.00999999977 : f32
    %1018 = vector.broadcast %cst_331 : f32 to vector<8x1xf32>
    %1019 = arith.mulf %1017, %1018 : vector<8x1xf32>
    %cst_332 = arith.constant 9.99999996E-13 : f32
    %1020 = vector.broadcast %cst_332 : f32 to vector<8x1xf32>
    %1021 = arith.addf %1019, %1020 : vector<8x1xf32>
    %1022 = math.rsqrt %1021 : vector<8x1xf32>
    %1023 = vector.broadcast %1022 : vector<8x1xf32> to vector<8x128xf32>
    %1024 = arith.mulf %1014, %1023 : vector<8x128xf32>
    %1025 = vector.broadcast %1002 : vector<1x128xf32> to vector<8x128xf32>
    %1026 = arith.mulf %1024, %1025 : vector<8x128xf32>
    %1027 = vector.broadcast %1004 : vector<1x128xf32> to vector<8x128xf32>
    %1028 = arith.addf %1026, %1027 : vector<8x128xf32>
    %c3 = arith.constant 3 : index
    %c0_333 = arith.constant 0 : index
    %c0_334 = arith.constant 0 : index
    %1029 = vector.load %arg5[%c3, %c0_333, %c0_334] : memref<4x128x384xf32, #tpu.memory_space<vmem>>, vector<1x128x384xf32>
    %1030 = vector.shape_cast %1029 : vector<1x128x384xf32> to vector<128x384xf32>
    %cst_335 = arith.constant dense<0.000000e+00> : vector<8x384xf32>
    %1031 = tpu.matmul %1028, %1030, %cst_335 {dimension_numbers = #tpu.dot_dimension_numbers<[1], [0], [0], [1], [0, 0, 1, 1], [], []>} : vector<8x128xf32>, vector<128x384xf32>, vector<8x384xf32> -> vector<8x384xf32>
    %c3_336 = arith.constant 3 : index
    %c0_337 = arith.constant 0 : index
    %c0_338 = arith.constant 0 : index
    %1032 = vector.load %arg6[%c3_336, %c0_337, %c0_338] : memref<4x1x384xf32, #tpu.memory_space<vmem>>, vector<1x1x384xf32>
    %1033 = vector.shape_cast %1032 : vector<1x1x384xf32> to vector<1x384xf32>
    %1034 = vector.broadcast %1033 : vector<1x384xf32> to vector<8x384xf32>
    %1035 = arith.addf %1031, %1034 : vector<8x384xf32>
    %1036 = vector.extract_strided_slice %1035 {offsets = [0, 0], sizes = [8, 128], strides = [1, 1]} : vector<8x384xf32> to vector<8x128xf32>
    %1037 = vector.extract_strided_slice %1035 {offsets = [0, 128], sizes = [8, 128], strides = [1, 1]} : vector<8x384xf32> to vector<8x128xf32>
    %1038 = vector.extract_strided_slice %1035 {offsets = [0, 256], sizes = [8, 128], strides = [1, 1]} : vector<8x384xf32> to vector<8x128xf32>
    %cst_339 = arith.constant 0.000000e+00 : f32
    %1039 = vector.broadcast %cst_339 : f32 to vector<8x128xf32>
    %1040 = vector.broadcast %11 : vector<1x128xf32> to vector<8x128xf32>
    %1041 = arith.mulf %1036, %1040 : vector<8x128xf32>
    %cst_340 = arith.constant dense<0.000000e+00> : vector<8x8xf32>
    %1042 = tpu.matmul %1041, %1037, %cst_340 {dimension_numbers = #tpu.dot_dimension_numbers<[1], [1], [0], [0], [0, 0, 1, 0], [], []>} : vector<8x128xf32>, vector<8x128xf32>, vector<8x8xf32> -> vector<8x8xf32>
    %cst_341 = arith.constant 0.316227764 : f32
    %1043 = vector.broadcast %cst_341 : f32 to vector<8x8xf32>
    %1044 = arith.mulf %1042, %1043 : vector<8x8xf32>
    %1045 = vector.broadcast %104 : vector<1x8xf32> to vector<8x8xf32>
    %1046 = arith.addf %1044, %1045 : vector<8x8xf32>
    %cst_342 = arith.constant dense<0xFF800000> : vector<8xf32>
    %1047 = vector.multi_reduction <maximumf>, %1046, %cst_342 [1] : vector<8x8xf32> to vector<8xf32>
    %1048 = vector.shape_cast %1047 : vector<8xf32> to vector<8x1xf32>
    %1049 = vector.broadcast %1048 : vector<8x1xf32> to vector<8x8xf32>
    %1050 = arith.subf %1046, %1049 : vector<8x8xf32>
    %1051 = math.exp %1050 : vector<8x8xf32>
    %cst_343 = arith.constant dense<0.000000e+00> : vector<8xf32>
    %1052 = vector.multi_reduction <add>, %1051, %cst_343 [1] : vector<8x8xf32> to vector<8xf32>
    %1053 = vector.shape_cast %1052 : vector<8xf32> to vector<8x1xf32>
    %1054 = tpu.reciprocal %1053 {approx = true} : vector<8x1xf32> -> vector<8x1xf32>
    %1055 = vector.broadcast %1054 : vector<8x1xf32> to vector<8x8xf32>
    %1056 = arith.mulf %1051, %1055 : vector<8x8xf32>
    %cst_344 = arith.constant dense<0.000000e+00> : vector<8x128xf32>
    %1057 = tpu.matmul %1056, %1038, %cst_344 {dimension_numbers = #tpu.dot_dimension_numbers<[1], [0], [0], [1], [0, 0, 1, 1], [], []>} : vector<8x8xf32>, vector<8x128xf32>, vector<8x128xf32> -> vector<8x128xf32>
    %1058 = vector.broadcast %11 : vector<1x128xf32> to vector<8x128xf32>
    %1059 = arith.mulf %1057, %1058 : vector<8x128xf32>
    %1060 = arith.addf %1039, %1059 : vector<8x128xf32>
    %1061 = vector.broadcast %18 : vector<1x128xf32> to vector<8x128xf32>
    %1062 = arith.mulf %1036, %1061 : vector<8x128xf32>
    %cst_345 = arith.constant dense<0.000000e+00> : vector<8x8xf32>
    %1063 = tpu.matmul %1062, %1037, %cst_345 {dimension_numbers = #tpu.dot_dimension_numbers<[1], [1], [0], [0], [0, 0, 1, 0], [], []>} : vector<8x128xf32>, vector<8x128xf32>, vector<8x8xf32> -> vector<8x8xf32>
    %cst_346 = arith.constant 0.316227764 : f32
    %1064 = vector.broadcast %cst_346 : f32 to vector<8x8xf32>
    %1065 = arith.mulf %1063, %1064 : vector<8x8xf32>
    %1066 = vector.broadcast %104 : vector<1x8xf32> to vector<8x8xf32>
    %1067 = arith.addf %1065, %1066 : vector<8x8xf32>
    %cst_347 = arith.constant dense<0xFF800000> : vector<8xf32>
    %1068 = vector.multi_reduction <maximumf>, %1067, %cst_347 [1] : vector<8x8xf32> to vector<8xf32>
    %1069 = vector.shape_cast %1068 : vector<8xf32> to vector<8x1xf32>
    %1070 = vector.broadcast %1069 : vector<8x1xf32> to vector<8x8xf32>
    %1071 = arith.subf %1067, %1070 : vector<8x8xf32>
    %1072 = math.exp %1071 : vector<8x8xf32>
    %cst_348 = arith.constant dense<0.000000e+00> : vector<8xf32>
    %1073 = vector.multi_reduction <add>, %1072, %cst_348 [1] : vector<8x8xf32> to vector<8xf32>
    %1074 = vector.shape_cast %1073 : vector<8xf32> to vector<8x1xf32>
    %1075 = tpu.reciprocal %1074 {approx = true} : vector<8x1xf32> -> vector<8x1xf32>
    %1076 = vector.broadcast %1075 : vector<8x1xf32> to vector<8x8xf32>
    %1077 = arith.mulf %1072, %1076 : vector<8x8xf32>
    %cst_349 = arith.constant dense<0.000000e+00> : vector<8x128xf32>
    %1078 = tpu.matmul %1077, %1038, %cst_349 {dimension_numbers = #tpu.dot_dimension_numbers<[1], [0], [0], [1], [0, 0, 1, 1], [], []>} : vector<8x8xf32>, vector<8x128xf32>, vector<8x128xf32> -> vector<8x128xf32>
    %1079 = vector.broadcast %18 : vector<1x128xf32> to vector<8x128xf32>
    %1080 = arith.mulf %1078, %1079 : vector<8x128xf32>
    %1081 = arith.addf %1060, %1080 : vector<8x128xf32>
    %1082 = vector.broadcast %25 : vector<1x128xf32> to vector<8x128xf32>
    %1083 = arith.mulf %1036, %1082 : vector<8x128xf32>
    %cst_350 = arith.constant dense<0.000000e+00> : vector<8x8xf32>
    %1084 = tpu.matmul %1083, %1037, %cst_350 {dimension_numbers = #tpu.dot_dimension_numbers<[1], [1], [0], [0], [0, 0, 1, 0], [], []>} : vector<8x128xf32>, vector<8x128xf32>, vector<8x8xf32> -> vector<8x8xf32>
    %cst_351 = arith.constant 0.316227764 : f32
    %1085 = vector.broadcast %cst_351 : f32 to vector<8x8xf32>
    %1086 = arith.mulf %1084, %1085 : vector<8x8xf32>
    %1087 = vector.broadcast %104 : vector<1x8xf32> to vector<8x8xf32>
    %1088 = arith.addf %1086, %1087 : vector<8x8xf32>
    %cst_352 = arith.constant dense<0xFF800000> : vector<8xf32>
    %1089 = vector.multi_reduction <maximumf>, %1088, %cst_352 [1] : vector<8x8xf32> to vector<8xf32>
    %1090 = vector.shape_cast %1089 : vector<8xf32> to vector<8x1xf32>
    %1091 = vector.broadcast %1090 : vector<8x1xf32> to vector<8x8xf32>
    %1092 = arith.subf %1088, %1091 : vector<8x8xf32>
    %1093 = math.exp %1092 : vector<8x8xf32>
    %cst_353 = arith.constant dense<0.000000e+00> : vector<8xf32>
    %1094 = vector.multi_reduction <add>, %1093, %cst_353 [1] : vector<8x8xf32> to vector<8xf32>
    %1095 = vector.shape_cast %1094 : vector<8xf32> to vector<8x1xf32>
    %1096 = tpu.reciprocal %1095 {approx = true} : vector<8x1xf32> -> vector<8x1xf32>
    %1097 = vector.broadcast %1096 : vector<8x1xf32> to vector<8x8xf32>
    %1098 = arith.mulf %1093, %1097 : vector<8x8xf32>
    %cst_354 = arith.constant dense<0.000000e+00> : vector<8x128xf32>
    %1099 = tpu.matmul %1098, %1038, %cst_354 {dimension_numbers = #tpu.dot_dimension_numbers<[1], [0], [0], [1], [0, 0, 1, 1], [], []>} : vector<8x8xf32>, vector<8x128xf32>, vector<8x128xf32> -> vector<8x128xf32>
    %1100 = vector.broadcast %25 : vector<1x128xf32> to vector<8x128xf32>
    %1101 = arith.mulf %1099, %1100 : vector<8x128xf32>
    %1102 = arith.addf %1081, %1101 : vector<8x128xf32>
    %1103 = vector.broadcast %32 : vector<1x128xf32> to vector<8x128xf32>
    %1104 = arith.mulf %1036, %1103 : vector<8x128xf32>
    %cst_355 = arith.constant dense<0.000000e+00> : vector<8x8xf32>
    %1105 = tpu.matmul %1104, %1037, %cst_355 {dimension_numbers = #tpu.dot_dimension_numbers<[1], [1], [0], [0], [0, 0, 1, 0], [], []>} : vector<8x128xf32>, vector<8x128xf32>, vector<8x8xf32> -> vector<8x8xf32>
    %cst_356 = arith.constant 0.316227764 : f32
    %1106 = vector.broadcast %cst_356 : f32 to vector<8x8xf32>
    %1107 = arith.mulf %1105, %1106 : vector<8x8xf32>
    %1108 = vector.broadcast %104 : vector<1x8xf32> to vector<8x8xf32>
    %1109 = arith.addf %1107, %1108 : vector<8x8xf32>
    %cst_357 = arith.constant dense<0xFF800000> : vector<8xf32>
    %1110 = vector.multi_reduction <maximumf>, %1109, %cst_357 [1] : vector<8x8xf32> to vector<8xf32>
    %1111 = vector.shape_cast %1110 : vector<8xf32> to vector<8x1xf32>
    %1112 = vector.broadcast %1111 : vector<8x1xf32> to vector<8x8xf32>
    %1113 = arith.subf %1109, %1112 : vector<8x8xf32>
    %1114 = math.exp %1113 : vector<8x8xf32>
    %cst_358 = arith.constant dense<0.000000e+00> : vector<8xf32>
    %1115 = vector.multi_reduction <add>, %1114, %cst_358 [1] : vector<8x8xf32> to vector<8xf32>
    %1116 = vector.shape_cast %1115 : vector<8xf32> to vector<8x1xf32>
    %1117 = tpu.reciprocal %1116 {approx = true} : vector<8x1xf32> -> vector<8x1xf32>
    %1118 = vector.broadcast %1117 : vector<8x1xf32> to vector<8x8xf32>
    %1119 = arith.mulf %1114, %1118 : vector<8x8xf32>
    %cst_359 = arith.constant dense<0.000000e+00> : vector<8x128xf32>
    %1120 = tpu.matmul %1119, %1038, %cst_359 {dimension_numbers = #tpu.dot_dimension_numbers<[1], [0], [0], [1], [0, 0, 1, 1], [], []>} : vector<8x8xf32>, vector<8x128xf32>, vector<8x128xf32> -> vector<8x128xf32>
    %1121 = vector.broadcast %32 : vector<1x128xf32> to vector<8x128xf32>
    %1122 = arith.mulf %1120, %1121 : vector<8x128xf32>
    %1123 = arith.addf %1102, %1122 : vector<8x128xf32>
    %1124 = vector.broadcast %39 : vector<1x128xf32> to vector<8x128xf32>
    %1125 = arith.mulf %1036, %1124 : vector<8x128xf32>
    %cst_360 = arith.constant dense<0.000000e+00> : vector<8x8xf32>
    %1126 = tpu.matmul %1125, %1037, %cst_360 {dimension_numbers = #tpu.dot_dimension_numbers<[1], [1], [0], [0], [0, 0, 1, 0], [], []>} : vector<8x128xf32>, vector<8x128xf32>, vector<8x8xf32> -> vector<8x8xf32>
    %cst_361 = arith.constant 0.316227764 : f32
    %1127 = vector.broadcast %cst_361 : f32 to vector<8x8xf32>
    %1128 = arith.mulf %1126, %1127 : vector<8x8xf32>
    %1129 = vector.broadcast %104 : vector<1x8xf32> to vector<8x8xf32>
    %1130 = arith.addf %1128, %1129 : vector<8x8xf32>
    %cst_362 = arith.constant dense<0xFF800000> : vector<8xf32>
    %1131 = vector.multi_reduction <maximumf>, %1130, %cst_362 [1] : vector<8x8xf32> to vector<8xf32>
    %1132 = vector.shape_cast %1131 : vector<8xf32> to vector<8x1xf32>
    %1133 = vector.broadcast %1132 : vector<8x1xf32> to vector<8x8xf32>
    %1134 = arith.subf %1130, %1133 : vector<8x8xf32>
    %1135 = math.exp %1134 : vector<8x8xf32>
    %cst_363 = arith.constant dense<0.000000e+00> : vector<8xf32>
    %1136 = vector.multi_reduction <add>, %1135, %cst_363 [1] : vector<8x8xf32> to vector<8xf32>
    %1137 = vector.shape_cast %1136 : vector<8xf32> to vector<8x1xf32>
    %1138 = tpu.reciprocal %1137 {approx = true} : vector<8x1xf32> -> vector<8x1xf32>
    %1139 = vector.broadcast %1138 : vector<8x1xf32> to vector<8x8xf32>
    %1140 = arith.mulf %1135, %1139 : vector<8x8xf32>
    %cst_364 = arith.constant dense<0.000000e+00> : vector<8x128xf32>
    %1141 = tpu.matmul %1140, %1038, %cst_364 {dimension_numbers = #tpu.dot_dimension_numbers<[1], [0], [0], [1], [0, 0, 1, 1], [], []>} : vector<8x8xf32>, vector<8x128xf32>, vector<8x128xf32> -> vector<8x128xf32>
    %1142 = vector.broadcast %39 : vector<1x128xf32> to vector<8x128xf32>
    %1143 = arith.mulf %1141, %1142 : vector<8x128xf32>
    %1144 = arith.addf %1123, %1143 : vector<8x128xf32>
    %1145 = vector.broadcast %46 : vector<1x128xf32> to vector<8x128xf32>
    %1146 = arith.mulf %1036, %1145 : vector<8x128xf32>
    %cst_365 = arith.constant dense<0.000000e+00> : vector<8x8xf32>
    %1147 = tpu.matmul %1146, %1037, %cst_365 {dimension_numbers = #tpu.dot_dimension_numbers<[1], [1], [0], [0], [0, 0, 1, 0], [], []>} : vector<8x128xf32>, vector<8x128xf32>, vector<8x8xf32> -> vector<8x8xf32>
    %cst_366 = arith.constant 0.316227764 : f32
    %1148 = vector.broadcast %cst_366 : f32 to vector<8x8xf32>
    %1149 = arith.mulf %1147, %1148 : vector<8x8xf32>
    %1150 = vector.broadcast %104 : vector<1x8xf32> to vector<8x8xf32>
    %1151 = arith.addf %1149, %1150 : vector<8x8xf32>
    %cst_367 = arith.constant dense<0xFF800000> : vector<8xf32>
    %1152 = vector.multi_reduction <maximumf>, %1151, %cst_367 [1] : vector<8x8xf32> to vector<8xf32>
    %1153 = vector.shape_cast %1152 : vector<8xf32> to vector<8x1xf32>
    %1154 = vector.broadcast %1153 : vector<8x1xf32> to vector<8x8xf32>
    %1155 = arith.subf %1151, %1154 : vector<8x8xf32>
    %1156 = math.exp %1155 : vector<8x8xf32>
    %cst_368 = arith.constant dense<0.000000e+00> : vector<8xf32>
    %1157 = vector.multi_reduction <add>, %1156, %cst_368 [1] : vector<8x8xf32> to vector<8xf32>
    %1158 = vector.shape_cast %1157 : vector<8xf32> to vector<8x1xf32>
    %1159 = tpu.reciprocal %1158 {approx = true} : vector<8x1xf32> -> vector<8x1xf32>
    %1160 = vector.broadcast %1159 : vector<8x1xf32> to vector<8x8xf32>
    %1161 = arith.mulf %1156, %1160 : vector<8x8xf32>
    %cst_369 = arith.constant dense<0.000000e+00> : vector<8x128xf32>
    %1162 = tpu.matmul %1161, %1038, %cst_369 {dimension_numbers = #tpu.dot_dimension_numbers<[1], [0], [0], [1], [0, 0, 1, 1], [], []>} : vector<8x8xf32>, vector<8x128xf32>, vector<8x128xf32> -> vector<8x128xf32>
    %1163 = vector.broadcast %46 : vector<1x128xf32> to vector<8x128xf32>
    %1164 = arith.mulf %1162, %1163 : vector<8x128xf32>
    %1165 = arith.addf %1144, %1164 : vector<8x128xf32>
    %1166 = vector.broadcast %53 : vector<1x128xf32> to vector<8x128xf32>
    %1167 = arith.mulf %1036, %1166 : vector<8x128xf32>
    %cst_370 = arith.constant dense<0.000000e+00> : vector<8x8xf32>
    %1168 = tpu.matmul %1167, %1037, %cst_370 {dimension_numbers = #tpu.dot_dimension_numbers<[1], [1], [0], [0], [0, 0, 1, 0], [], []>} : vector<8x128xf32>, vector<8x128xf32>, vector<8x8xf32> -> vector<8x8xf32>
    %cst_371 = arith.constant 0.316227764 : f32
    %1169 = vector.broadcast %cst_371 : f32 to vector<8x8xf32>
    %1170 = arith.mulf %1168, %1169 : vector<8x8xf32>
    %1171 = vector.broadcast %104 : vector<1x8xf32> to vector<8x8xf32>
    %1172 = arith.addf %1170, %1171 : vector<8x8xf32>
    %cst_372 = arith.constant dense<0xFF800000> : vector<8xf32>
    %1173 = vector.multi_reduction <maximumf>, %1172, %cst_372 [1] : vector<8x8xf32> to vector<8xf32>
    %1174 = vector.shape_cast %1173 : vector<8xf32> to vector<8x1xf32>
    %1175 = vector.broadcast %1174 : vector<8x1xf32> to vector<8x8xf32>
    %1176 = arith.subf %1172, %1175 : vector<8x8xf32>
    %1177 = math.exp %1176 : vector<8x8xf32>
    %cst_373 = arith.constant dense<0.000000e+00> : vector<8xf32>
    %1178 = vector.multi_reduction <add>, %1177, %cst_373 [1] : vector<8x8xf32> to vector<8xf32>
    %1179 = vector.shape_cast %1178 : vector<8xf32> to vector<8x1xf32>
    %1180 = tpu.reciprocal %1179 {approx = true} : vector<8x1xf32> -> vector<8x1xf32>
    %1181 = vector.broadcast %1180 : vector<8x1xf32> to vector<8x8xf32>
    %1182 = arith.mulf %1177, %1181 : vector<8x8xf32>
    %cst_374 = arith.constant dense<0.000000e+00> : vector<8x128xf32>
    %1183 = tpu.matmul %1182, %1038, %cst_374 {dimension_numbers = #tpu.dot_dimension_numbers<[1], [0], [0], [1], [0, 0, 1, 1], [], []>} : vector<8x8xf32>, vector<8x128xf32>, vector<8x128xf32> -> vector<8x128xf32>
    %1184 = vector.broadcast %53 : vector<1x128xf32> to vector<8x128xf32>
    %1185 = arith.mulf %1183, %1184 : vector<8x128xf32>
    %1186 = arith.addf %1165, %1185 : vector<8x128xf32>
    %1187 = vector.broadcast %60 : vector<1x128xf32> to vector<8x128xf32>
    %1188 = arith.mulf %1036, %1187 : vector<8x128xf32>
    %cst_375 = arith.constant dense<0.000000e+00> : vector<8x8xf32>
    %1189 = tpu.matmul %1188, %1037, %cst_375 {dimension_numbers = #tpu.dot_dimension_numbers<[1], [1], [0], [0], [0, 0, 1, 0], [], []>} : vector<8x128xf32>, vector<8x128xf32>, vector<8x8xf32> -> vector<8x8xf32>
    %cst_376 = arith.constant 0.316227764 : f32
    %1190 = vector.broadcast %cst_376 : f32 to vector<8x8xf32>
    %1191 = arith.mulf %1189, %1190 : vector<8x8xf32>
    %1192 = vector.broadcast %104 : vector<1x8xf32> to vector<8x8xf32>
    %1193 = arith.addf %1191, %1192 : vector<8x8xf32>
    %cst_377 = arith.constant dense<0xFF800000> : vector<8xf32>
    %1194 = vector.multi_reduction <maximumf>, %1193, %cst_377 [1] : vector<8x8xf32> to vector<8xf32>
    %1195 = vector.shape_cast %1194 : vector<8xf32> to vector<8x1xf32>
    %1196 = vector.broadcast %1195 : vector<8x1xf32> to vector<8x8xf32>
    %1197 = arith.subf %1193, %1196 : vector<8x8xf32>
    %1198 = math.exp %1197 : vector<8x8xf32>
    %cst_378 = arith.constant dense<0.000000e+00> : vector<8xf32>
    %1199 = vector.multi_reduction <add>, %1198, %cst_378 [1] : vector<8x8xf32> to vector<8xf32>
    %1200 = vector.shape_cast %1199 : vector<8xf32> to vector<8x1xf32>
    %1201 = tpu.reciprocal %1200 {approx = true} : vector<8x1xf32> -> vector<8x1xf32>
    %1202 = vector.broadcast %1201 : vector<8x1xf32> to vector<8x8xf32>
    %1203 = arith.mulf %1198, %1202 : vector<8x8xf32>
    %cst_379 = arith.constant dense<0.000000e+00> : vector<8x128xf32>
    %1204 = tpu.matmul %1203, %1038, %cst_379 {dimension_numbers = #tpu.dot_dimension_numbers<[1], [0], [0], [1], [0, 0, 1, 1], [], []>} : vector<8x8xf32>, vector<8x128xf32>, vector<8x128xf32> -> vector<8x128xf32>
    %1205 = vector.broadcast %60 : vector<1x128xf32> to vector<8x128xf32>
    %1206 = arith.mulf %1204, %1205 : vector<8x128xf32>
    %1207 = arith.addf %1186, %1206 : vector<8x128xf32>
    %1208 = vector.broadcast %67 : vector<1x128xf32> to vector<8x128xf32>
    %1209 = arith.mulf %1036, %1208 : vector<8x128xf32>
    %cst_380 = arith.constant dense<0.000000e+00> : vector<8x8xf32>
    %1210 = tpu.matmul %1209, %1037, %cst_380 {dimension_numbers = #tpu.dot_dimension_numbers<[1], [1], [0], [0], [0, 0, 1, 0], [], []>} : vector<8x128xf32>, vector<8x128xf32>, vector<8x8xf32> -> vector<8x8xf32>
    %cst_381 = arith.constant 0.316227764 : f32
    %1211 = vector.broadcast %cst_381 : f32 to vector<8x8xf32>
    %1212 = arith.mulf %1210, %1211 : vector<8x8xf32>
    %1213 = vector.broadcast %104 : vector<1x8xf32> to vector<8x8xf32>
    %1214 = arith.addf %1212, %1213 : vector<8x8xf32>
    %cst_382 = arith.constant dense<0xFF800000> : vector<8xf32>
    %1215 = vector.multi_reduction <maximumf>, %1214, %cst_382 [1] : vector<8x8xf32> to vector<8xf32>
    %1216 = vector.shape_cast %1215 : vector<8xf32> to vector<8x1xf32>
    %1217 = vector.broadcast %1216 : vector<8x1xf32> to vector<8x8xf32>
    %1218 = arith.subf %1214, %1217 : vector<8x8xf32>
    %1219 = math.exp %1218 : vector<8x8xf32>
    %cst_383 = arith.constant dense<0.000000e+00> : vector<8xf32>
    %1220 = vector.multi_reduction <add>, %1219, %cst_383 [1] : vector<8x8xf32> to vector<8xf32>
    %1221 = vector.shape_cast %1220 : vector<8xf32> to vector<8x1xf32>
    %1222 = tpu.reciprocal %1221 {approx = true} : vector<8x1xf32> -> vector<8x1xf32>
    %1223 = vector.broadcast %1222 : vector<8x1xf32> to vector<8x8xf32>
    %1224 = arith.mulf %1219, %1223 : vector<8x8xf32>
    %cst_384 = arith.constant dense<0.000000e+00> : vector<8x128xf32>
    %1225 = tpu.matmul %1224, %1038, %cst_384 {dimension_numbers = #tpu.dot_dimension_numbers<[1], [0], [0], [1], [0, 0, 1, 1], [], []>} : vector<8x8xf32>, vector<8x128xf32>, vector<8x128xf32> -> vector<8x128xf32>
    %1226 = vector.broadcast %67 : vector<1x128xf32> to vector<8x128xf32>
    %1227 = arith.mulf %1225, %1226 : vector<8x128xf32>
    %1228 = arith.addf %1207, %1227 : vector<8x128xf32>
    %1229 = vector.broadcast %74 : vector<1x128xf32> to vector<8x128xf32>
    %1230 = arith.mulf %1036, %1229 : vector<8x128xf32>
    %cst_385 = arith.constant dense<0.000000e+00> : vector<8x8xf32>
    %1231 = tpu.matmul %1230, %1037, %cst_385 {dimension_numbers = #tpu.dot_dimension_numbers<[1], [1], [0], [0], [0, 0, 1, 0], [], []>} : vector<8x128xf32>, vector<8x128xf32>, vector<8x8xf32> -> vector<8x8xf32>
    %cst_386 = arith.constant 0.316227764 : f32
    %1232 = vector.broadcast %cst_386 : f32 to vector<8x8xf32>
    %1233 = arith.mulf %1231, %1232 : vector<8x8xf32>
    %1234 = vector.broadcast %104 : vector<1x8xf32> to vector<8x8xf32>
    %1235 = arith.addf %1233, %1234 : vector<8x8xf32>
    %cst_387 = arith.constant dense<0xFF800000> : vector<8xf32>
    %1236 = vector.multi_reduction <maximumf>, %1235, %cst_387 [1] : vector<8x8xf32> to vector<8xf32>
    %1237 = vector.shape_cast %1236 : vector<8xf32> to vector<8x1xf32>
    %1238 = vector.broadcast %1237 : vector<8x1xf32> to vector<8x8xf32>
    %1239 = arith.subf %1235, %1238 : vector<8x8xf32>
    %1240 = math.exp %1239 : vector<8x8xf32>
    %cst_388 = arith.constant dense<0.000000e+00> : vector<8xf32>
    %1241 = vector.multi_reduction <add>, %1240, %cst_388 [1] : vector<8x8xf32> to vector<8xf32>
    %1242 = vector.shape_cast %1241 : vector<8xf32> to vector<8x1xf32>
    %1243 = tpu.reciprocal %1242 {approx = true} : vector<8x1xf32> -> vector<8x1xf32>
    %1244 = vector.broadcast %1243 : vector<8x1xf32> to vector<8x8xf32>
    %1245 = arith.mulf %1240, %1244 : vector<8x8xf32>
    %cst_389 = arith.constant dense<0.000000e+00> : vector<8x128xf32>
    %1246 = tpu.matmul %1245, %1038, %cst_389 {dimension_numbers = #tpu.dot_dimension_numbers<[1], [0], [0], [1], [0, 0, 1, 1], [], []>} : vector<8x8xf32>, vector<8x128xf32>, vector<8x128xf32> -> vector<8x128xf32>
    %1247 = vector.broadcast %74 : vector<1x128xf32> to vector<8x128xf32>
    %1248 = arith.mulf %1246, %1247 : vector<8x128xf32>
    %1249 = arith.addf %1228, %1248 : vector<8x128xf32>
    %c3_390 = arith.constant 3 : index
    %c0_391 = arith.constant 0 : index
    %c0_392 = arith.constant 0 : index
    %1250 = vector.load %arg7[%c3_390, %c0_391, %c0_392] : memref<4x128x128xf32, #tpu.memory_space<vmem>>, vector<1x128x128xf32>
    %1251 = vector.shape_cast %1250 : vector<1x128x128xf32> to vector<128x128xf32>
    %cst_393 = arith.constant dense<0.000000e+00> : vector<8x128xf32>
    %1252 = tpu.matmul %1249, %1251, %cst_393 {dimension_numbers = #tpu.dot_dimension_numbers<[1], [0], [0], [1], [0, 0, 1, 1], [], []>} : vector<8x128xf32>, vector<128x128xf32>, vector<8x128xf32> -> vector<8x128xf32>
    %c3_394 = arith.constant 3 : index
    %c0_395 = arith.constant 0 : index
    %c0_396 = arith.constant 0 : index
    %1253 = vector.load %arg8[%c3_394, %c0_395, %c0_396] : memref<4x1x128xf32, #tpu.memory_space<vmem>>, vector<1x1x128xf32>
    %1254 = vector.shape_cast %1253 : vector<1x1x128xf32> to vector<1x128xf32>
    %1255 = vector.broadcast %1254 : vector<1x128xf32> to vector<8x128xf32>
    %1256 = arith.addf %1252, %1255 : vector<8x128xf32>
    %1257 = arith.addf %1256, %1028 : vector<8x128xf32>
    %c3_397 = arith.constant 3 : index
    %c0_398 = arith.constant 0 : index
    %c0_399 = arith.constant 0 : index
    %1258 = vector.load %arg9[%c3_397, %c0_398, %c0_399] : memref<4x1x128xf32, #tpu.memory_space<vmem>>, vector<1x1x128xf32>
    %1259 = vector.shape_cast %1258 : vector<1x1x128xf32> to vector<1x128xf32>
    %c3_400 = arith.constant 3 : index
    %c0_401 = arith.constant 0 : index
    %c0_402 = arith.constant 0 : index
    %1260 = vector.load %arg10[%c3_400, %c0_401, %c0_402] : memref<4x1x128xf32, #tpu.memory_space<vmem>>, vector<1x1x128xf32>
    %1261 = vector.shape_cast %1260 : vector<1x1x128xf32> to vector<1x128xf32>
    %1262 = vector.broadcast %4 : vector<1x128xf32> to vector<8x128xf32>
    %1263 = arith.mulf %1257, %1262 : vector<8x128xf32>
    %cst_403 = arith.constant dense<0.000000e+00> : vector<8xf32>
    %1264 = vector.multi_reduction <add>, %1263, %cst_403 [1] : vector<8x128xf32> to vector<8xf32>
    %1265 = vector.shape_cast %1264 : vector<8xf32> to vector<8x1xf32>
    %cst_404 = arith.constant 0.00999999977 : f32
    %1266 = vector.broadcast %cst_404 : f32 to vector<8x1xf32>
    %1267 = arith.mulf %1265, %1266 : vector<8x1xf32>
    %1268 = vector.broadcast %1267 : vector<8x1xf32> to vector<8x128xf32>
    %1269 = arith.subf %1257, %1268 : vector<8x128xf32>
    %1270 = vector.broadcast %4 : vector<1x128xf32> to vector<8x128xf32>
    %1271 = arith.mulf %1269, %1270 : vector<8x128xf32>
    %1272 = arith.mulf %1271, %1271 : vector<8x128xf32>
    %cst_405 = arith.constant dense<0.000000e+00> : vector<8xf32>
    %1273 = vector.multi_reduction <add>, %1272, %cst_405 [1] : vector<8x128xf32> to vector<8xf32>
    %1274 = vector.shape_cast %1273 : vector<8xf32> to vector<8x1xf32>
    %cst_406 = arith.constant 0.00999999977 : f32
    %1275 = vector.broadcast %cst_406 : f32 to vector<8x1xf32>
    %1276 = arith.mulf %1274, %1275 : vector<8x1xf32>
    %cst_407 = arith.constant 9.99999996E-13 : f32
    %1277 = vector.broadcast %cst_407 : f32 to vector<8x1xf32>
    %1278 = arith.addf %1276, %1277 : vector<8x1xf32>
    %1279 = math.rsqrt %1278 : vector<8x1xf32>
    %1280 = vector.broadcast %1279 : vector<8x1xf32> to vector<8x128xf32>
    %1281 = arith.mulf %1271, %1280 : vector<8x128xf32>
    %1282 = vector.broadcast %1259 : vector<1x128xf32> to vector<8x128xf32>
    %1283 = arith.mulf %1281, %1282 : vector<8x128xf32>
    %1284 = vector.broadcast %1261 : vector<1x128xf32> to vector<8x128xf32>
    %1285 = arith.addf %1283, %1284 : vector<8x128xf32>
    %c3_408 = arith.constant 3 : index
    %c0_409 = arith.constant 0 : index
    %c0_410 = arith.constant 0 : index
    %1286 = vector.load %arg11[%c3_408, %c0_409, %c0_410] : memref<4x128x768xf32, #tpu.memory_space<vmem>>, vector<1x128x768xf32>
    %1287 = vector.shape_cast %1286 : vector<1x128x768xf32> to vector<128x768xf32>
    %cst_411 = arith.constant dense<0.000000e+00> : vector<8x768xf32>
    %1288 = tpu.matmul %1285, %1287, %cst_411 {dimension_numbers = #tpu.dot_dimension_numbers<[1], [0], [0], [1], [0, 0, 1, 1], [], []>} : vector<8x128xf32>, vector<128x768xf32>, vector<8x768xf32> -> vector<8x768xf32>
    %c3_412 = arith.constant 3 : index
    %c0_413 = arith.constant 0 : index
    %c0_414 = arith.constant 0 : index
    %1289 = vector.load %arg12[%c3_412, %c0_413, %c0_414] : memref<4x1x768xf32, #tpu.memory_space<vmem>>, vector<1x1x768xf32>
    %1290 = vector.shape_cast %1289 : vector<1x1x768xf32> to vector<1x768xf32>
    %1291 = vector.broadcast %1290 : vector<1x768xf32> to vector<8x768xf32>
    %1292 = arith.addf %1288, %1291 : vector<8x768xf32>
    %cst_415 = arith.constant 5.000000e-01 : f32
    %1293 = vector.broadcast %cst_415 : f32 to vector<8x768xf32>
    %1294 = arith.mulf %1293, %1292 : vector<8x768xf32>
    %cst_416 = arith.constant 0.707106769 : f32
    %1295 = vector.broadcast %cst_416 : f32 to vector<8x768xf32>
    %1296 = arith.mulf %1292, %1295 : vector<8x768xf32>
    %1297 = math.erf %1296 : vector<8x768xf32>
    %cst_417 = arith.constant 1.000000e+00 : f32
    %1298 = vector.broadcast %cst_417 : f32 to vector<8x768xf32>
    %1299 = arith.addf %1298, %1297 : vector<8x768xf32>
    %1300 = arith.mulf %1294, %1299 : vector<8x768xf32>
    %c3_418 = arith.constant 3 : index
    %c0_419 = arith.constant 0 : index
    %c0_420 = arith.constant 0 : index
    %1301 = vector.load %arg13[%c3_418, %c0_419, %c0_420] : memref<4x768x128xf32, #tpu.memory_space<vmem>>, vector<1x768x128xf32>
    %1302 = vector.shape_cast %1301 : vector<1x768x128xf32> to vector<768x128xf32>
    %cst_421 = arith.constant dense<0.000000e+00> : vector<8x128xf32>
    %1303 = tpu.matmul %1300, %1302, %cst_421 {dimension_numbers = #tpu.dot_dimension_numbers<[1], [0], [0], [1], [0, 0, 1, 1], [], []>} : vector<8x768xf32>, vector<768x128xf32>, vector<8x128xf32> -> vector<8x128xf32>
    %c3_422 = arith.constant 3 : index
    %c0_423 = arith.constant 0 : index
    %c0_424 = arith.constant 0 : index
    %1304 = vector.load %arg14[%c3_422, %c0_423, %c0_424] : memref<4x1x128xf32, #tpu.memory_space<vmem>>, vector<1x1x128xf32>
    %1305 = vector.shape_cast %1304 : vector<1x1x128xf32> to vector<1x128xf32>
    %1306 = vector.broadcast %1305 : vector<1x128xf32> to vector<8x128xf32>
    %1307 = arith.addf %1303, %1306 : vector<8x128xf32>
    %1308 = arith.addf %1307, %1285 : vector<8x128xf32>
    %c3_425 = arith.constant 3 : index
    %c0_426 = arith.constant 0 : index
    %c0_427 = arith.constant 0 : index
    %1309 = vector.load %arg15[%c3_425, %c0_426, %c0_427] : memref<4x1x128xf32, #tpu.memory_space<vmem>>, vector<1x1x128xf32>
    %1310 = vector.shape_cast %1309 : vector<1x1x128xf32> to vector<1x128xf32>
    %c3_428 = arith.constant 3 : index
    %c0_429 = arith.constant 0 : index
    %c0_430 = arith.constant 0 : index
    %1311 = vector.load %arg16[%c3_428, %c0_429, %c0_430] : memref<4x1x128xf32, #tpu.memory_space<vmem>>, vector<1x1x128xf32>
    %1312 = vector.shape_cast %1311 : vector<1x1x128xf32> to vector<1x128xf32>
    %1313 = vector.broadcast %4 : vector<1x128xf32> to vector<8x128xf32>
    %1314 = arith.mulf %1308, %1313 : vector<8x128xf32>
    %cst_431 = arith.constant dense<0.000000e+00> : vector<8xf32>
    %1315 = vector.multi_reduction <add>, %1314, %cst_431 [1] : vector<8x128xf32> to vector<8xf32>
    %1316 = vector.shape_cast %1315 : vector<8xf32> to vector<8x1xf32>
    %cst_432 = arith.constant 0.00999999977 : f32
    %1317 = vector.broadcast %cst_432 : f32 to vector<8x1xf32>
    %1318 = arith.mulf %1316, %1317 : vector<8x1xf32>
    %1319 = vector.broadcast %1318 : vector<8x1xf32> to vector<8x128xf32>
    %1320 = arith.subf %1308, %1319 : vector<8x128xf32>
    %1321 = vector.broadcast %4 : vector<1x128xf32> to vector<8x128xf32>
    %1322 = arith.mulf %1320, %1321 : vector<8x128xf32>
    %1323 = arith.mulf %1322, %1322 : vector<8x128xf32>
    %cst_433 = arith.constant dense<0.000000e+00> : vector<8xf32>
    %1324 = vector.multi_reduction <add>, %1323, %cst_433 [1] : vector<8x128xf32> to vector<8xf32>
    %1325 = vector.shape_cast %1324 : vector<8xf32> to vector<8x1xf32>
    %cst_434 = arith.constant 0.00999999977 : f32
    %1326 = vector.broadcast %cst_434 : f32 to vector<8x1xf32>
    %1327 = arith.mulf %1325, %1326 : vector<8x1xf32>
    %cst_435 = arith.constant 9.99999996E-13 : f32
    %1328 = vector.broadcast %cst_435 : f32 to vector<8x1xf32>
    %1329 = arith.addf %1327, %1328 : vector<8x1xf32>
    %1330 = math.rsqrt %1329 : vector<8x1xf32>
    %1331 = vector.broadcast %1330 : vector<8x1xf32> to vector<8x128xf32>
    %1332 = arith.mulf %1322, %1331 : vector<8x128xf32>
    %1333 = vector.broadcast %1310 : vector<1x128xf32> to vector<8x128xf32>
    %1334 = arith.mulf %1332, %1333 : vector<8x128xf32>
    %1335 = vector.broadcast %1312 : vector<1x128xf32> to vector<8x128xf32>
    %1336 = arith.addf %1334, %1335 : vector<8x128xf32>
    %1337 = vector.extract_strided_slice %1336 {offsets = [0, 0], sizes = [1, 128], strides = [1, 1]} : vector<8x128xf32> to vector<1x128xf32>
    %c0_436 = arith.constant 0 : index
    %c0_437 = arith.constant 0 : index
    %1338 = vector.load %arg17[%c0_436, %c0_437] : memref<128x128xf32, #tpu.memory_space<vmem>>, vector<128x128xf32>
    %cst_438 = arith.constant dense<0.000000e+00> : vector<1x128xf32>
    %1339 = tpu.matmul %1337, %1338, %cst_438 {dimension_numbers = #tpu.dot_dimension_numbers<[1], [0], [0], [1], [0, 0, 1, 1], [], []>} : vector<1x128xf32>, vector<128x128xf32>, vector<1x128xf32> -> vector<1x128xf32>
    %c0_439 = arith.constant 0 : index
    %c0_440 = arith.constant 0 : index
    %1340 = vector.load %arg18[%c0_439, %c0_440] : memref<1x128xf32, #tpu.memory_space<vmem>>, vector<1x128xf32>
    %1341 = arith.addf %1339, %1340 : vector<1x128xf32>
    %1342 = math.tanh %1341 : vector<1x128xf32>
    %c0_441 = arith.constant 0 : index
    %c0_442 = arith.constant 0 : index
    %1343 = vector.load %arg19[%c0_441, %c0_442] : memref<128x128xf32, #tpu.memory_space<vmem>>, vector<128x128xf32>
    %cst_443 = arith.constant dense<0.000000e+00> : vector<1x128xf32>
    %1344 = tpu.matmul %1342, %1343, %cst_443 {dimension_numbers = #tpu.dot_dimension_numbers<[1], [0], [0], [1], [0, 0, 1, 1], [], []>} : vector<1x128xf32>, vector<128x128xf32>, vector<1x128xf32> -> vector<1x128xf32>
    %c0_444 = arith.constant 0 : index
    %c0_445 = arith.constant 0 : index
    %1345 = vector.load %arg20[%c0_444, %c0_445] : memref<1x128xf32, #tpu.memory_space<vmem>>, vector<1x128xf32>
    %1346 = arith.addf %1344, %1345 : vector<1x128xf32>
    %c0_446 = arith.constant 0 : index
    %c0_447 = arith.constant 0 : index
    %c0_448 = arith.constant 0 : index
    %1347 = vector.load %arg21[%c0_446, %c0_447, %c0_448] : memref<1x1x128xf32, #tpu.memory_space<vmem>>, vector<1x1x128xf32>
    %1348 = vector.shape_cast %1347 : vector<1x1x128xf32> to vector<1x128xf32>
    %1349 = vector.shape_cast %1346 : vector<1x128xf32> to vector<1x1x128xf32>
    tpu.vector_store %arg21[%c0_446, %c0_447, %c0_448], %1349 {strides = array<i32>} : memref<1x1x128xf32, #tpu.memory_space<vmem>>, vector<1x1x128xf32>,
    return
  }
  func.func @transform_0(%arg0: i32) -> (i32, i32, i32) {
    %c0_i32 = arith.constant 0 : i32
    %c0_i32_0 = arith.constant 0 : i32
    %c0_i32_1 = arith.constant 0 : i32
    return %arg0, %c0_i32, %c0_i32_0 : i32, i32, i32
  }
  func.func @transform_1(%arg0: i32) -> (i32, i32, i32) {
    %c0_i32 = arith.constant 0 : i32
    %c0_i32_0 = arith.constant 0 : i32
    %c0_i32_1 = arith.constant 0 : i32
    return %arg0, %c0_i32, %c0_i32_0 : i32, i32, i32
  }
  func.func @transform_2(%arg0: i32) -> (i32, i32) {
    %c0_i32 = arith.constant 0 : i32
    %c0_i32_0 = arith.constant 0 : i32
    %c0_i32_1 = arith.constant 0 : i32
    return %c0_i32, %c0_i32_0 : i32, i32
  }
  func.func @transform_3(%arg0: i32) -> (i32, i32) {
    %c0_i32 = arith.constant 0 : i32
    %c0_i32_0 = arith.constant 0 : i32
    %c0_i32_1 = arith.constant 0 : i32
    return %c0_i32, %c0_i32_0 : i32, i32
  }
  func.func @transform_4(%arg0: i32) -> (i32, i32, i32) {
    %c0_i32 = arith.constant 0 : i32
    %c0_i32_0 = arith.constant 0 : i32
    %c0_i32_1 = arith.constant 0 : i32
    %c0_i32_2 = arith.constant 0 : i32
    return %c0_i32, %c0_i32_0, %c0_i32_1 : i32, i32, i32
  }
  func.func @transform_5(%arg0: i32) -> (i32, i32, i32) {
    %c0_i32 = arith.constant 0 : i32
    %c0_i32_0 = arith.constant 0 : i32
    %c0_i32_1 = arith.constant 0 : i32
    %c0_i32_2 = arith.constant 0 : i32
    return %c0_i32, %c0_i32_0, %c0_i32_1 : i32, i32, i32
  }
  func.func @transform_6(%arg0: i32) -> (i32, i32, i32) {
    %c0_i32 = arith.constant 0 : i32
    %c0_i32_0 = arith.constant 0 : i32
    %c0_i32_1 = arith.constant 0 : i32
    %c0_i32_2 = arith.constant 0 : i32
    return %c0_i32, %c0_i32_0, %c0_i32_1 : i32, i32, i32
  }
  func.func @transform_7(%arg0: i32) -> (i32, i32, i32) {
    %c0_i32 = arith.constant 0 : i32
    %c0_i32_0 = arith.constant 0 : i32
    %c0_i32_1 = arith.constant 0 : i32
    %c0_i32_2 = arith.constant 0 : i32
    return %c0_i32, %c0_i32_0, %c0_i32_1 : i32, i32, i32
  }
  func.func @transform_8(%arg0: i32) -> (i32, i32, i32) {
    %c0_i32 = arith.constant 0 : i32
    %c0_i32_0 = arith.constant 0 : i32
    %c0_i32_1 = arith.constant 0 : i32
    %c0_i32_2 = arith.constant 0 : i32
    return %c0_i32, %c0_i32_0, %c0_i32_1 : i32, i32, i32
  }
  func.func @transform_9(%arg0: i32) -> (i32, i32, i32) {
    %c0_i32 = arith.constant 0 : i32
    %c0_i32_0 = arith.constant 0 : i32
    %c0_i32_1 = arith.constant 0 : i32
    %c0_i32_2 = arith.constant 0 : i32
    return %c0_i32, %c0_i32_0, %c0_i32_1 : i32, i32, i32
  }
  func.func @transform_10(%arg0: i32) -> (i32, i32, i32) {
    %c0_i32 = arith.constant 0 : i32
    %c0_i32_0 = arith.constant 0 : i32
    %c0_i32_1 = arith.constant 0 : i32
    %c0_i32_2 = arith.constant 0 : i32
    return %c0_i32, %c0_i32_0, %c0_i32_1 : i32, i32, i32
  }
  func.func @transform_11(%arg0: i32) -> (i32, i32, i32) {
    %c0_i32 = arith.constant 0 : i32
    %c0_i32_0 = arith.constant 0 : i32
    %c0_i32_1 = arith.constant 0 : i32
    %c0_i32_2 = arith.constant 0 : i32
    return %c0_i32, %c0_i32_0, %c0_i32_1 : i32, i32, i32
  }
  func.func @transform_12(%arg0: i32) -> (i32, i32, i32) {
    %c0_i32 = arith.constant 0 : i32
    %c0_i32_0 = arith.constant 0 : i32
    %c0_i32_1 = arith.constant 0 : i32
    %c0_i32_2 = arith.constant 0 : i32
    return %c0_i32, %c0_i32_0, %c0_i32_1 : i32, i32, i32
  }
  func.func @transform_13(%arg0: i32) -> (i32, i32, i32) {
    %c0_i32 = arith.constant 0 : i32
    %c0_i32_0 = arith.constant 0 : i32
    %c0_i32_1 = arith.constant 0 : i32
    %c0_i32_2 = arith.constant 0 : i32
    return %c0_i32, %c0_i32_0, %c0_i32_1 : i32, i32, i32
  }
  func.func @transform_14(%arg0: i32) -> (i32, i32, i32) {
    %c0_i32 = arith.constant 0 : i32
    %c0_i32_0 = arith.constant 0 : i32
    %c0_i32_1 = arith.constant 0 : i32
    %c0_i32_2 = arith.constant 0 : i32
    return %c0_i32, %c0_i32_0, %c0_i32_1 : i32, i32, i32
  }
  func.func @transform_15(%arg0: i32) -> (i32, i32, i32) {
    %c0_i32 = arith.constant 0 : i32
    %c0_i32_0 = arith.constant 0 : i32
    %c0_i32_1 = arith.constant 0 : i32
    %c0_i32_2 = arith.constant 0 : i32
    return %c0_i32, %c0_i32_0, %c0_i32_1 : i32, i32, i32
  }
  func.func @transform_16(%arg0: i32) -> (i32, i32) {
    %c0_i32 = arith.constant 0 : i32
    %c0_i32_0 = arith.constant 0 : i32
    %c0_i32_1 = arith.constant 0 : i32
    return %c0_i32, %c0_i32_0 : i32, i32
  }
  func.func @transform_17(%arg0: i32) -> (i32, i32) {
    %c0_i32 = arith.constant 0 : i32
    %c0_i32_0 = arith.constant 0 : i32
    %c0_i32_1 = arith.constant 0 : i32
    return %c0_i32, %c0_i32_0 : i32, i32
  }
  func.func @transform_18(%arg0: i32) -> (i32, i32) {
    %c0_i32 = arith.constant 0 : i32
    %c0_i32_0 = arith.constant 0 : i32
    %c0_i32_1 = arith.constant 0 : i32
    return %c0_i32, %c0_i32_0 : i32, i32
  }
  func.func @transform_19(%arg0: i32) -> (i32, i32) {
    %c0_i32 = arith.constant 0 : i32
    %c0_i32_0 = arith.constant 0 : i32
    %c0_i32_1 = arith.constant 0 : i32
    return %c0_i32, %c0_i32_0 : i32, i32
  }
  func.func @transform_20(%arg0: i32) -> (i32, i32, i32) {
    %c0_i32 = arith.constant 0 : i32
    %c0_i32_0 = arith.constant 0 : i32
    %c0_i32_1 = arith.constant 0 : i32
    return %arg0, %c0_i32, %c0_i32_0 : i32, i32, i32
  }
}

</mosaic_0001>

<bundles_post_ra>
// kernel: bert_forward.1
= control target key start
LH: loop header
LB: loop body
LE: loop exit
PB: predicated region body
PF: predicated region fallthrough
CT: control target
= control target key end

     0   :  { %s10708_s0 = inlined_call_operand.vmem [shape: f32[2,8,128], index: 0, kind: input, shape index: {}]   ;;  %s10709_s1 = inlined_call_operand.vmem [shape: f32[2,1,8], index: 1, kind: input, shape index: {}]   ;;  %s10710_s2 = inlined_call_operand.hbm [shape: f32[1,128], index: 2, kind: input, shape index: {}]   ;;  %s10711_s3 = inlined_call_operand.hbm [shape: f32[1,128], index: 3, kind: input, shape index: {}]   ;;  %s10712_s4 = inlined_call_operand.hbm [shape: f32[4,128,384], index: 4, kind: input, shape index: {}]   ;;  %s10713_s5 = inlined_call_operand.hbm [shape: f32[4,1,384], index: 5, kind: input, shape index: {}]   ;;  %s10714_s6 = inlined_call_operand.hbm [shape: f32[4,128,128], index: 6, kind: input, shape index: {}]   ;;  %s10715_s7 = inlined_call_operand.hbm [shape: f32[4,1,128], index: 7, kind: input, shape index: {}]   ;;  %s10716_s8 = inlined_call_operand.hbm [shape: f32[4,1,128], index: 8, kind: input, shape index: {}]   ;;  %s10717_s9 = inlined_call_operand.hbm [shape: f32[4,1,128], index: 9, kind: input, shape index: {}]   ;;  %s10718_s10 = inlined_call_operand.hbm [shape: f32[4,128,768], index: 10, kind: input, shape index: {}]   ;;  %s10719_s11 = inlined_call_operand.hbm [shape: f32[4,1,768], index: 11, kind: input, shape index: {}]   ;;  %s10720_s12 = inlined_call_operand.hbm [shape: f32[4,768,128], index: 12, kind: input, shape index: {}]   ;;  %s10721_s13 = inlined_call_operand.hbm [shape: f32[4,1,128], index: 13, kind: input, shape index: {}]   ;;  %s10722_s14 = inlined_call_operand.hbm [shape: f32[4,1,128], index: 14, kind: input, shape index: {}]   ;;  %s10723_s15 = inlined_call_operand.hbm [shape: f32[4,1,128], index: 15, kind: input, shape index: {}]   ;;  %s10724_s16 = inlined_call_operand.hbm [shape: f32[128,128], index: 16, kind: input, shape index: {}]   ;;  %s10725_s17 = inlined_call_operand.hbm [shape: f32[1,128], index: 17, kind: input, shape index: {}]   ;;  %s10726_s18 = inlined_call_operand.hbm [shape: f32[128,128], index: 18, kind: input, shape index: {}]   ;;  %s10727_s19 = inlined_call_operand.hbm [shape: f32[1,128], index: 19, kind: input, shape index: {}]   ;;  %s10728_s20 = inlined_call_operand.hbm [shape: f32[2,1,128], index: 20, kind: output, shape index: {}]  }
   0x1   :  { %10743 = sst [smem:[#allocation51_spill]] %s10708_s0 }
   0x2   :  { %10744 = sst [smem:[#allocation52_spill]] %s10709_s1 }
   0x3   :  { %10745 = sst [smem:[#allocation53_spill]] %s10710_s2 }
   0x4   :  { %10746 = sst [smem:[#allocation54_spill]] %s10711_s3 }
   0x5   :  { %10747 = sst [smem:[#allocation55_spill]] %s10712_s4 }
   0x6   :  { %10748 = sst [smem:[#allocation56_spill]] %s10713_s5 }
   0x7   :  { %10749 = sst [smem:[#allocation57_spill]] %s10715_s7 }
   0x8   :  { %10750 = sst [smem:[#allocation58_spill]] %s10717_s9 }
   0x9   :  { %10751 = sst [smem:[#allocation59_spill]] %s10719_s11 }
   0xa   :  { %10752 = sst [smem:[#allocation60_spill]] %s10728_s20 }
   0xb   :  { %25 = vsyncpa [#allocation3], 0 }
   0xc   :  { %26 = vsyncpa [#allocation6], 0 }
   0xd   :  { %27 = vsyncpa [#allocation9], 0 }
   0xe   :  { %28 = vsyncpa [#allocation12], 0 }
   0xf   :  { %29 = vsyncpa [#allocation15], 0 }
  0x10   :  { %30 = vsyncpa [#allocation18], 0 }
  0x11   :  { %31 = vsyncpa [#allocation21], 0 }
  0x12   :  { %32 = vsyncpa [#allocation24], 0 }
  0x13   :  { %33 = vsyncpa [#allocation27], 0 }
  0x14   :  { %34 = vsyncpa [#allocation30], 0 }
  0x15   :  { %35 = vsyncpa [#allocation4], 0 }
  0x16   :  { %37 = vsyncpa [#allocation4 + $0x1], 0  ;;  %s8874_s1 = smov 0   ;;  %s8876_s22 = smov 0  }
  0x17   :  { %s8878_s23 = smov 0   ;;  %s8880_s24 = smov 0  }
  0x18 LB: > { %10753 = sst [smem:[#allocation43_spill]] %s8725_s1  ;;  %s8895_s2 = sadd.s32 4294967295, %s8737_s24   ;;  %s8737_s24 = sphi %s8880_s24, %s10831_s24   ;;  %s8733_s23 = sphi %s8878_s23, %s10834_s23   ;;  %s8729_s22 = sphi %s8876_s22, %s10833_s22   ;;  %s8725_s1 = sphi %s8874_s1, %s10832_s1  }
  0x19   : > { %10754 = sst [smem:[#allocation44_spill]] %s8729_s22  ;;  %s7487_s25 = sadd.s32 4294967294, %s8737_s24  }
  0x1a   : > { %10755 = sst [smem:[#allocation45_spill]] %s8733_s23  ;;  %s8899_s3 = sadd.s32 1, %s8737_s24  }
  0x1b   : > { %10756 = sst [smem:[#allocation46_spill]] %s8737_s24  ;;  %s480_s26 = sadd.s32 1, %s8733_s23 }
  0x1c   : > { %10757 = sst [smem:[#allocation47_spill]] %s8899_s3  ;;  %s477_s27 = ssub.s32 %s8737_s24, %s8899_s3 }
  0x1d   : > { %p490_p0 = scmp.ne.s32.totalorder %s8733_s23, %s8729_s22  ;;  %p478_p1 = scmp.eq.s32.totalorder %s477_s27, 0 }
  0x1e   : > { %p491_p2 = scmp.eq.s32.totalorder %s8895_s2, 1  ;;  %p496_p3 = scmp.ne.s32.totalorder %s8729_s22, %s8725_s1 }
  0x1f   : > { %p497_p4 = scmp.eq.s32.totalorder %s7487_s25, 1  ;;  %p7488_p7 = scmp.ge.s32.totalorder %s8737_s24, 1 }
  0x20   : > { %s8910_s28 = scalar_select %p478_p1, %s8733_s23, %s480_s26  }
  0x21   : > { %p8912_p5 = por %p491_p2, %p490_p0  ;;  %p8916_p6 = por %p497_p4, %p496_p3 }
  0x22   : > { %10758 = sst [smem:[#allocation48_spill]] %s8910_s28  ;;  %p504_p8 = scmp.lt.s32.totalorder %s8737_s24, 3 }
  0x23   : > { %s10759_s4 = scalar_select %p8912_p5, 1, 0 }
  0x24   : > { %s10761_s29 = scalar_select %p8916_p6, 1, 0 }
  0x25   : > { %10760 = sst [smem:[#allocation49_spill]] %s10759_s4  ;;  %p7738_p9 = scmp.eq.s32.totalorder %s8895_s2, 0 }
  0x26   : > { %10762 = sst [smem:[#allocation50_spill]] %s10761_s29  ;;  %p8923_p10 = pnand %p7488_p7, %p504_p8 }
  0x27   : > { %s10764_s25 = sld [smem:[#allocation54_spill]]  ;;  %s8739_s27 = smov [#allocation5]  }
  0x28   : > { %p7679_p11 = pneg %p8923_p10  ;;  %s530_s28 = sshll.u32 %s8739_s27, 4  ;;  %s531_s28 = int_to_ptr.vmem [resolvable:$true] %s530_s28 }
  0x29   : > { %s10765_s5 = sld [smem:[#allocation56_spill]]  ;;  %s8740_s0 = smov [#allocation8]  }
  0x2a   : > { %p8937_p12 = pnand %p7738_p9, %p7679_p11  ;;  %s555_s21 = sshll.u32 %s8740_s0, 4  ;;  %s556_s21 = int_to_ptr.vmem [resolvable:$true] %s555_s21 }
  0x2b   : > { %s8742_s27 = smov 3   ;;  %s10767_s7 = sld [smem:[#allocation57_spill]] }
  0x2c   : > { %s8743_s24 = smov [#allocation11]   ;;  %s10768_s9 = sld [smem:[#allocation58_spill]] }
  0x2d   : > { %s528_s26 = sshll.u32 %s10764_s25, 4  ;;  %s10739_s25 = smov 48   ;;  %s529_s26 = int_to_ptr.hbm [resolvable:$true] %s528_s26 }
  0x2e   : > { %7685 = dma.hbm_to_vmem [thread:$0]  (!%p8937_p12), %s529_s26, 16, %s531_s28, [#allocation6]  }
  0x2f   : > { %s553_s29 = sshll.u32 %s10765_s5, 4  ;;  %s583_s4 = sshll.u32 %s8743_s24, 4  ;;  %s554_s29 = int_to_ptr.hbm [resolvable:$true] %s553_s29  ;;  %s584_s4 = int_to_ptr.vmem [resolvable:$true] %s583_s4 }
  0x30   : > { %7691 = dma.hbm_to_vmem [thread:$0]  (!%p8937_p12), %s554_s29, 192, %s556_s21, [#allocation9], %s10739_s25, %s10739_s25, %s8742_s27  }
  0x31   : > { %s581_s5 = sshll.u32 %s10767_s7, 4  ;;  %s10742_s26 = smov 16   ;;  %s582_s5 = int_to_ptr.hbm [resolvable:$true] %s581_s5 }
  0x32   : > { %s609_s28 = sshll.u32 %s10768_s9, 4  ;;  %s8745_s22 = smov 1   ;;  %s610_s28 = int_to_ptr.hbm [resolvable:$true] %s609_s28 }
  0x33   : > { %7697 = dma.hbm_to_vmem [thread:$0]  (!%p8937_p12), %s582_s5, 64, %s584_s4, [#allocation12], %s10742_s26, %s10742_s26, %s8745_s22  }
  0x34   : > { %s8746_s29 = smov [#allocation14]   ;;  %s10769_s11 = sld [smem:[#allocation59_spill]] }
  0x35   : > { %s611_s21 = sshll.u32 %s8746_s29, 4  ;;  %s8747_s20 = smov [#allocation17]   ;;  %s612_s21 = int_to_ptr.vmem [resolvable:$true] %s611_s21 }
  0x36   : > { %7703 = dma.hbm_to_vmem [thread:$0]  (!%p8937_p12), %s610_s28, 64, %s612_s21, [#allocation15], %s10742_s26, %s10742_s26, %s8745_s22  }
  0x37   : > { %s639_s3 = sshll.u32 %s8747_s20, 4  ;;  %s665_s4 = sshll.u32 %s10721_s13, 4  ;;  %s640_s3 = int_to_ptr.vmem [resolvable:$true] %s639_s3  ;;  %s666_s4 = int_to_ptr.hbm [resolvable:$true] %s665_s4 }
  0x38   : > { %s8748_s29 = smov 96   ;;  %s8749_s25 = smov 6  }
  0x39   : > { %s8750_s27 = smov [#allocation20]   ;;  %s693_s28 = sshll.u32 %s10723_s15, 4  ;;  %s694_s28 = int_to_ptr.hbm [resolvable:$true] %s693_s28 }
  0x3a   : > { %s637_s24 = sshll.u32 %s10769_s11, 4  ;;  %s667_s23 = sshll.u32 %s8750_s27, 4  ;;  %s638_s24 = int_to_ptr.hbm [resolvable:$true] %s637_s24  ;;  %s668_s23 = int_to_ptr.vmem [resolvable:$true] %s667_s23 }
  0x3b   : > { %7709 = dma.hbm_to_vmem [thread:$0]  (!%p8937_p12), %s638_s24, 384, %s640_s3, [#allocation18], %s8748_s29, %s8748_s29, %s8749_s25  }
  0x3c   : > { %7715 = dma.hbm_to_vmem [thread:$0]  (!%p8937_p12), %s666_s4, 64, %s668_s23, [#allocation21], %s10742_s26, %s10742_s26, %s8745_s22  }
  0x3d   : > { %s722_s0 = sshll.u32 %s10725_s17, 4  ;;  %s8751_s25 = smov [#allocation23]   ;;  %s723_s0 = int_to_ptr.hbm [resolvable:$true] %s722_s0 }
  0x3e   : > { %s695_s24 = sshll.u32 %s8751_s25, 4  ;;  %s8752_s7 = smov [#allocation26]   ;;  %s696_s24 = int_to_ptr.vmem [resolvable:$true] %s695_s24 }
  0x3f   : > { %7721 = dma.hbm_to_vmem [thread:$0]  (!%p8937_p12), %s694_s28, 64, %s696_s24, [#allocation24], %s10742_s26, %s10742_s26, %s8745_s22  }
  0x40   : > { %s724_s9 = sshll.u32 %s8752_s7, 4  ;;  %s10770_s29 = sld [smem:[#allocation53_spill]]  ;;  %s725_s9 = int_to_ptr.vmem [resolvable:$true] %s724_s9 }
  0x41   : > { %7727 = dma.hbm_to_vmem [thread:$0]  (!%p8937_p12), %s723_s0, 16, %s725_s9, [#allocation27]  }
  0x42   : > { %s10771_s21 = sld [smem:[#allocation55_spill]]  ;;  %s8753_s25 = smov [#allocation2]  }
  0x43   : > { %s518_s11 = sshll.u32 %s8753_s25, 4  ;;  %s8754_s28 = smov [#allocation7]   ;;  %s519_s11 = int_to_ptr.vmem [resolvable:$true] %s518_s11 }
  0x44   : > { %s541_s24 = sshll.u32 %s8754_s28, 4  ;;  %s8755_s7 = smov 384   ;;  %s542_s24 = int_to_ptr.vmem [resolvable:$true] %s541_s24 }
  0x45   : > { %s8756_s3 = smov 24   ;;  %s567_s9 = sshll.u32 %s10714_s6, 4  ;;  %s568_s9 = int_to_ptr.hbm [resolvable:$true] %s567_s9 }
  0x46   : > { %s516_s4 = sshll.u32 %s10770_s29, 4  ;;  %s8757_s29 = smov [#allocation10]   ;;  %s517_s4 = int_to_ptr.hbm [resolvable:$true] %s516_s4 }
  0x47   : > { %7682 = dma.hbm_to_vmem [thread:$0]  (!%p8937_p12), %s517_s4, 16, %s519_s11, [#allocation3]  }
  0x48   : > { %s539_s20 = sshll.u32 %s10771_s21, 4  ;;  %s569_s27 = sshll.u32 %s8757_s29, 4  ;;  %s540_s20 = int_to_ptr.hbm [resolvable:$true] %s539_s20  ;;  %s570_s27 = int_to_ptr.vmem [resolvable:$true] %s569_s27 }
  0x49   : > { %7688 = dma.hbm_to_vmem [thread:$0]  (!%p8937_p12), %s540_s20, 24576, %s542_s24, [#allocation6], %s8755_s7, %s8755_s7, %s8756_s3  }
  0x4a   : > { %s595_s11 = sshll.u32 %s10716_s8, 4  ;;  %s10740_s4 = smov 128   ;;  %s596_s11 = int_to_ptr.hbm [resolvable:$true] %s595_s11 }
  0x4b   : > { %s8759_s25 = smov 8   ;;  %s8760_s20 = smov [#allocation13]  }
  0x4c   : > { %7694 = dma.hbm_to_vmem [thread:$0]  (!%p8937_p12), %s568_s9, 8192, %s570_s27, [#allocation9], %s10740_s4, %s10740_s4, %s8759_s25  }
  0x4d   : > { %s597_s28 = sshll.u32 %s8760_s20, 4  ;;  %s623_s3 = sshll.u32 %s10718_s10, 4  ;;  %s598_s28 = int_to_ptr.vmem [resolvable:$true] %s597_s28  ;;  %s624_s3 = int_to_ptr.hbm [resolvable:$true] %s623_s3 }
  0x4e   : > { %7700 = dma.hbm_to_vmem [thread:$0]  (!%p8937_p12), %s596_s11, 64, %s598_s28, [#allocation12], %s10742_s26, %s10742_s26, %s8745_s22  }
  0x4f   : > { %s8761_s5 = smov [#allocation16]   ;;  %s651_s9 = sshll.u32 %s10720_s12, 4  ;;  %s652_s9 = int_to_ptr.hbm [resolvable:$true] %s651_s9 }
  0x50   : > { %s625_s0 = sshll.u32 %s8761_s5, 4  ;;  %s8762_s27 = smov 768   ;;  %s626_s0 = int_to_ptr.vmem [resolvable:$true] %s625_s0 }
  0x51   : > { %s10772_s21 = smov 48   ;;  %s679_s7 = sshll.u32 %s10722_s14, 4  ;;  %s680_s7 = int_to_ptr.hbm [resolvable:$true] %s679_s7 }
  0x52   : > { %7706 = dma.hbm_to_vmem [thread:$0]  (!%p8937_p12), %s624_s3, 49152, %s626_s0, [#allocation15], %s8762_s27, %s8762_s27, %s10772_s21  }
  0x53   : > { %s8763_s4 = smov [#allocation19]   ;;  %s10773_s28 = smov 128  }
  0x54   : > { %s653_s11 = sshll.u32 %s8763_s4, 4  ;;  %s8764_s5 = smov [#allocation22]   ;;  %s654_s11 = int_to_ptr.vmem [resolvable:$true] %s653_s11 }
  0x55   : > { %7712 = dma.hbm_to_vmem [thread:$0]  (!%p8937_p12), %s652_s9, 49152, %s654_s11, [#allocation18], %s10773_s28, %s10773_s28, %s8759_s25  }
  0x56   : > { %s681_s29 = sshll.u32 %s8764_s5, 4  ;;  %s707_s3 = sshll.u32 %s10724_s16, 4  ;;  %s682_s29 = int_to_ptr.vmem [resolvable:$true] %s681_s29  ;;  %s708_s3 = int_to_ptr.hbm [resolvable:$true] %s707_s3 }
  0x57   : > { %s10774_s0 = smov 16   ;;  %s733_s21 = sshll.u32 %s10726_s18, 4  ;;  %s734_s21 = int_to_ptr.hbm [resolvable:$true] %s733_s21 }
  0x58   : > { %7718 = dma.hbm_to_vmem [thread:$0]  (!%p8937_p12), %s680_s7, 64, %s682_s29, [#allocation21], %s10774_s0, %s10774_s0, %s8745_s22  }
  0x59   : > { %s8765_s9 = smov [#allocation25]   ;;  %s8766_s26 = smov [#allocation28]  }
  0x5a   : > { %s709_s20 = sshll.u32 %s8765_s9, 4  ;;  %s735_s24 = sshll.u32 %s8766_s26, 4  ;;  %s710_s20 = int_to_ptr.vmem [resolvable:$true] %s709_s20  ;;  %s736_s24 = int_to_ptr.vmem [resolvable:$true] %s735_s24 }
  0x5b   : > { %7724 = dma.hbm_to_vmem [thread:$0]  (!%p8937_p12), %s708_s3, 2048, %s710_s20, [#allocation24], %s10773_s28, %s10773_s28, %s8759_s25  }
  0x5c   : > { %s748_s22 = sshll.u32 %s10727_s19, 4  ;;  %s8767_s7 = smov [#allocation29]   ;;  %s749_s22 = int_to_ptr.hbm [resolvable:$true] %s748_s22 }
  0x5d   : > { %7730 = dma.hbm_to_vmem [thread:$0]  (!%p8937_p12), %s734_s21, 2048, %s736_s24, [#allocation27], %s10773_s28, %s10773_s28, %s8759_s25  }
  0x5e   : > { %s750_s29 = sshll.u32 %s8767_s7, 4  ;;  %776 = sbr.rel (%p8923_p10) target bundleno = 8712 (0x2208), region = 100  ;;  %s751_s29 = int_to_ptr.vmem [resolvable:$true] %s750_s29 }
  0x5f   : > { %7733 = dma.hbm_to_vmem [thread:$0]  (!%p8937_p12), %s749_s22, 16, %s751_s29, [#allocation30]  }
  0x63   : > { %8680 = dma.done.wait (%p7738_p9), [#allocation3], 16  }
  0x64   : > { %8682 = vsyncadd (%p7738_p9), [#allocation3], 4294967280 }
  0x65   : > { %8684 = dma.done.wait (%p7738_p9), [#allocation6], 24592  }
  0x66   : > { %8686 = vsyncadd (%p7738_p9), [#allocation6], 4294942704 }
  0x67   : > { %8688 = dma.done.wait (%p7738_p9), [#allocation9], 8384  }
  0x68   : > { %8690 = vsyncadd (%p7738_p9), [#allocation9], 4294958912 }
  0x69   : > { %8692 = dma.done.wait (%p7738_p9), [#allocation12], 128  }
  0x6a   : > { %8694 = vsyncadd (%p7738_p9), [#allocation12], 4294967168 }
  0x6b   : > { %8696 = dma.done.wait (%p7738_p9), [#allocation15], 49216  }
  0x6c   : > { %8698 = vsyncadd (%p7738_p9), [#allocation15], 4294918080 }
  0x6d   : > { %8700 = dma.done.wait (%p7738_p9), [#allocation18], 49536  }
  0x6e   : > { %8702 = vsyncadd (%p7738_p9), [#allocation18], 4294917760 }
  0x6f   : > { %8704 = dma.done.wait (%p7738_p9), [#allocation21], 128  }
  0x70   : > { %8706 = vsyncadd (%p7738_p9), [#allocation21], 4294967168 }
  0x71   : > { %8708 = dma.done.wait (%p7738_p9), [#allocation24], 2112  }
  0x72   : > { %8710 = vsyncadd (%p7738_p9), [#allocation24], 4294965184 }
  0x73   : > { %8712 = dma.done.wait (%p7738_p9), [#allocation27], 2064  }
  0x74   : > { %8714 = vsyncadd (%p7738_p9), [#allocation27], 4294965232 }
  0x75   : > { %8716 = dma.done.wait (%p7738_p9), [#allocation30], 16  }
  0x76   : > { %8718 = vsyncadd (%p7738_p9), [#allocation30], 4294967280  ;;  %p921_p13 = scmp.lt.s32.totalorder %s8895_s2, 1  ;;  %v928_v0 = vlaneseq  ;;  %s10775_s23 = sld [smem:[#allocation51_spill]]  ;;  %v8768_v2 = vmov 0.0   ;;  %v1061_v6 = vld [vmem:[#allocation7 + $0x168] sm:$0xff] }
  0x77   : > { %s10776_s27 = sld [smem:[#allocation52_spill]]  ;;  %v1062_v7 = vld [vmem:[#allocation7 + $0x170] sm:$0xff]  ;;  %v1063_v8 = vld [vmem:[#allocation7 + $0x178] sm:$0xff]  ;;  %1072 = vmatpush.msra.mxu0 %v1061_v6  ;;  %v1060_v11 = vld [vmem:[#allocation7 + $0x160] sm:$0xff]  ;;  %vm1158_vm13 = vcmask 64512  }
  0x78   : > { %s922_s1 = scalar_select %p921_p13, %s8895_s2, 1  ;;  %v9102_v1 = vand.u32 127, %v928_v0  ;;  %1092 = vmatpush.msra.mxu1 %v1062_v7  ;;  %v1058_v9 = vld [vmem:[#allocation7 + $0x150] sm:$0xff]  ;;  %v1059_v10 = vld [vmem:[#allocation7 + $0x158] sm:$0xff]  ;;  %1112 = vmatpush.msra.mxu2 %v1063_v8  ;;  %v1056_v18 = vld [vmem:[#allocation7 + $0x140] sm:$0xff] }
  0x79   : > { %1073 = vmatpush.msra.mxu0 %v1058_v9  ;;  %v1055_v17 = vld [vmem:[#allocation7 + $0x138] sm:$0xff]  ;;  %v1057_v19 = vld [vmem:[#allocation7 + $0x148] sm:$0xff]  ;;  %v1052_v20 = vld [vmem:[#allocation7 + $0x120] sm:$0xff]  ;;  %s10825_s9 = sld [smem:[#allocation44_spill]] }
  0x7a   : > { %s7527_s30 = sshll.u32 %s922_s1, 3  ;;  %vm930_vm0 = vcmp.lt.s32.totalorder %v9102_v1, 100  ;;  %1093 = vmatpush.msra.mxu1 %v1059_v10  ;;  %1113 = vmatpush.msra.mxu2 %v1060_v11  ;;  %v1053_v21 = vld [vmem:[#allocation7 + $0x128] sm:$0xff]  ;;  %v1054_v22 = vld [vmem:[#allocation7 + $0x130] sm:$0xff]  ;;  %v1051_v25 = vld [vmem:[#allocation7 + $0x118] sm:$0xff]  ;;  %vm958_vm4 = vcmp.ge.s32.totalorder %v9102_v1, 50 }
  0x7b   : > { %v9111_v3 = vsel %vm930_vm0, 1.0, %v8768_v2  ;;  %1074 = vmatpush.msra.mxu0 %v1055_v17  ;;  %v1049_v23 = vld [vmem:[#allocation7 + $0x108] sm:$0xff]  ;;  %v1050_v24 = vld [vmem:[#allocation7 + $0x110] sm:$0xff]  ;;  %v1047_v27 = vld [vmem:[#allocation7 + $0xf8] sm:$0xff]  ;;  %vm959_vm5 = vcmp.lt.s32.totalorder %v9102_v1, 60  ;;  %vm934_vm6 = vcmp.lt.s32.totalorder %v9102_v1, 10 }
  0x7c   : > { %s924_s3 = scalar_lea.vmem %s10775_s23, %s7527_s30  ;;  %1094 = vmatpush.msra.mxu1 %v1056_v18  ;;  %1114 = vmatpush.msra.mxu2 %v1057_v19  ;;  %v1046_v26 = vld [vmem:[#allocation7 + $0xf0] sm:$0xff]  ;;  %v1048_v28 = vld [vmem:[#allocation7 + $0x100] sm:$0xff]  ;;  %v1043_v29 = vld [vmem:[#allocation7 + $0xd8] sm:$0xff]  ;;  %v9134_v18 = vsel %vm934_vm6, 1.0, %v8768_v2  ;;  %vm968_vm8 = vcmp.ge.s32.totalorder %v9102_v1, 70  ;;  %vm969_vm9 = vcmp.lt.s32.totalorder %v9102_v1, 80 }
  0x7d   : > { %s9116_s21 = scalar_lea.vmem %s10776_s27, %s922_s1  ;;  %v982_v4 = vld [vmem:[%s924_s3] sm:$0xff]  ;;  %1075 = vmatpush.msra.mxu0 %v1052_v20  ;;  %v1045_v31 = vld [vmem:[#allocation7 + $0xe8] sm:$0xff]  ;;  %v1042_v34 = vld [vmem:[#allocation7 + $0xd0] sm:$0xff]  ;;  %vm978_vm11 = vcmp.ge.s32.totalorder %v9102_v1, 90  ;;  %vm938_vm14 = vcmp.ge.s32.totalorder %v9102_v1, 10  ;;  %vm939_vm15 = vcmp.lt.s32.totalorder %v9102_v1, 20 }
  0x7e   : > { %v985_v5 = vmul.f32 %v9111_v3, %v982_v4  ;;  %1095 = vmatpush.msra.mxu1 %v1053_v21  ;;  %1115 = vmatpush.msra.mxu2 %v1054_v22  ;;  %v1044_v30 = vld [vmem:[#allocation7 + $0xe0] sm:$0xff]  ;;  %v1041_v33 = vld [vmem:[#allocation7 + $0xc8] sm:$0xff]  ;;  %v1038_v36 = vld [vmem:[#allocation7 + $0xb0] sm:$0xff]  ;;  %s10826_s11 = sld [smem:[#allocation60_spill]] }
  0x7f   : > { %1076 = vmatpush.msra.mxu0 %v1049_v23  ;;  %v1040_v32 = vld [vmem:[#allocation7 + $0xc0] sm:$0xff]  ;;  %v1037_v35 = vld [vmem:[#allocation7 + $0xa8] sm:$0xff]  ;;  %v1039_v37 = vld [vmem:[#allocation7 + $0xb8] sm:$0xff]  ;;  %s919_s20 = sand.u32 1, %s10825_s9  }
  0x80   : > { %986 = vadd.xlane.f32.xlu0 %v985_v5  ;;  %1096 = vmatpush.msra.mxu1 %v1050_v24  ;;  %v1034_v38 = vld [vmem:[#allocation7 + $0x90] sm:$0xff]  ;;  %v1035_v39 = vld [vmem:[#allocation7 + $0x98] sm:$0xff]  ;;  %v1036_v40 = vld [vmem:[#allocation7 + $0xa0] sm:$0xff]  ;;  %s920_s7 = scalar_lea.vmem [#allocation31], %s919_s20  ;;  %s7237_s30 = scalar_lea.sflag [#allocation4], %s919_s20 }
  0x81   : > { %1116 = vmatpush.msra.mxu2 %v1051_v25  ;;  %1077 = vmatpush.msra.mxu0 %v1046_v26  ;;  %v1031_v41 = vld [vmem:[#allocation7 + $0x78] sm:$0xff]  ;;  %v1032_v42 = vld [vmem:[#allocation7 + $0x80] sm:$0xff]  ;;  %v1033_v43 = vld [vmem:[#allocation7 + $0x88] sm:$0xff]  ;;  %s7247_s29 = sshll.u32 %s920_s7, 4  ;;  %s7248_s29 = int_to_ptr.vmem [resolvable:$true] %s7247_s29 }
  0x82   : > { %1097 = vmatpush.msra.mxu1 %v1047_v27  ;;  %v1028_v44 = vld [vmem:[#allocation7 + $0x60] sm:$0xff]  ;;  %v1029_v45 = vld [vmem:[#allocation7 + $0x68] sm:$0xff]  ;;  %v1030_v46 = vld [vmem:[#allocation7 + $0x70] sm:$0xff] }
  0x83   : > { %1117 = vmatpush.msra.mxu2 %v1048_v28  ;;  %1078 = vmatpush.msra.mxu0 %v1043_v29  ;;  %v1025_v47 = vld [vmem:[#allocation7 + $0x48] sm:$0xff]  ;;  %v1026_v48 = vld [vmem:[#allocation7 + $0x50] sm:$0xff]  ;;  %v1027_v49 = vld [vmem:[#allocation7 + $0x58] sm:$0xff] }
  0x84   : > { %1098 = vmatpush.msra.mxu1 %v1044_v30  ;;  %v1022_v50 = vld [vmem:[#allocation7 + $0x30] sm:$0xff]  ;;  %v1023_v51 = vld [vmem:[#allocation7 + $0x38] sm:$0xff]  ;;  %v1024_v52 = vld [vmem:[#allocation7 + $0x40] sm:$0xff]  ;;  %s7245_s22 = scalar_lea.hbm %s10826_s11, %s8895_s2  ;;  %s8655_s2 = scalar_lea.hbm %s10826_s11, 2 }
  0x85   : > { %1118 = vmatpush.msra.mxu2 %v1045_v31  ;;  %1079 = vmatpush.msra.mxu0 %v1040_v32  ;;  %v1019_v53 = vld [vmem:[#allocation7 + $0x18] sm:$0xff]  ;;  %v1020_v54 = vld [vmem:[#allocation7 + $0x20] sm:$0xff]  ;;  %v1021_v55 = vld [vmem:[#allocation7 + $0x28] sm:$0xff]  ;;  %s7249_s1 = sshll.u32 %s7245_s22, 4  ;;  %s7250_s1 = int_to_ptr.hbm [resolvable:$true] %s7249_s1 }
  0x86   : > { %1099 = vmatpush.msra.mxu1 %v1041_v33  ;;  %v1016_v56 = vld [vmem:[#allocation7] sm:$0xff]  ;;  %v1017_v57 = vld [vmem:[#allocation7 + $0x8] sm:$0xff]  ;;  %v1018_v58 = vld [vmem:[#allocation7 + $0x10] sm:$0xff]  ;;  %s8649_s25 = sshra.s32 %s7250_s1, 4  ;;  %s8650_s25 = int_to_ptr.hbm [resolvable:$true] %s8649_s25 }
  0x87   : > { %1119 = vmatpush.msra.mxu2 %v1042_v34  ;;  %1080 = vmatpush.msra.mxu0 %v1037_v35  ;;  %v7838_v7 = vld [vmem:[#allocation2] ss:$0 sm:$0xff]  ;;  %v7839_v10 = vld [vmem:[#allocation5] ss:$0 sm:$0xff]  ;;  %vm960_vm7 = vmand %vm958_vm4, %vm959_vm5  ;;  %vm953_vm4 = vcmp.ge.s32.totalorder %v9102_v1, 40  ;;  %vm954_vm5 = vcmp.lt.s32.totalorder %v9102_v1, 50  ;;  %p8656_p3 = scmp.lt.s32.totalorder %s8650_s25, %s10826_s11 }
  0x88   : > { %1100 = vmatpush.msra.mxu1 %v1038_v36  ;;  %v9137_v19 = vsel %vm960_vm7, 1.0, %v8768_v2  ;;  %vm970_vm10 = vmand %vm968_vm8, %vm969_vm9  ;;  %v9175_v32 = vld [vmem:[%s9116_s21] ss:$0 sm:$0xff]  ;;  %vm963_vm7 = vcmp.ge.s32.totalorder %v9102_v1, 60  ;;  %vm964_vm8 = vcmp.lt.s32.totalorder %v9102_v1, 70  ;;  %s8651_s28 = scalar_lea.hbm %s8650_s25, 1 }
  0x89   : > { %1120 = vmatpush.msra.mxu2 %v1039_v37  ;;  %1081 = vmatpush.msra.mxu0 %v1034_v38  ;;  %v9156_v27 = vsel %vm970_vm10, 1.0, %v8768_v2  ;;  %vm979_vm12 = vmand %vm978_vm11, %vm930_vm0  ;;  %vm973_vm10 = vcmp.ge.s32.totalorder %v9102_v1, 80  ;;  %vm974_vm11 = vcmp.lt.s32.totalorder %v9102_v1, 90  ;;  %p8652_p0 = scmp.ne.s32.totalorder %s8650_s25, %s8651_s28  ;;  %p8657_p4 = scmp.lt.s32.totalorder %s8655_s2, %s8651_s28 }
  0x8a   : > { %1101 = vmatpush.msra.mxu1 %v1035_v39  ;;  %v9170_v29 = vsel %vm979_vm12, 1.0, %v8768_v2  ;;  %vm940_vm0 = vmand %vm938_vm14, %vm939_vm15  ;;  %vm948_vm14 = vcmp.ge.s32.totalorder %v9102_v1, 30  ;;  %vm949_vm15 = vcmp.lt.s32.totalorder %v9102_v1, 40 }
  0x8b   : > { %1121 = vmatpush.msra.mxu2 %v1036_v40  ;;  %1082 = vmatpush.msra.mxu0 %v1031_v41  ;;  %vm955_vm6 = vmand %vm953_vm4, %vm954_vm5  ;;  %p8653_p1 = pnand %p8652_p0, %p8912_p5  ;;  %p8658_p7 = por %p8657_p4, %p8656_p3 }
  0x8c   : > { %1102 = vmatpush.msra.mxu1 %v1032_v42  ;;  %vm965_vm9 = vmand %vm963_vm7, %vm964_vm8 }
  0x8d   : > { %1122 = vmatpush.msra.mxu2 %v1033_v43  ;;  %1083 = vmatpush.msra.mxu0 %v1028_v44  ;;  %v9185_v44 = vsel %vm940_vm0, 1.0, %v8768_v2  ;;  %vm975_vm12 = vmand %vm973_vm10, %vm974_vm11  ;;  %p8654_p2 = pneg %p8653_p1 }
  0x8e   : > { %1103 = vmatpush.msra.mxu1 %v1029_v45  ;;  %vm950_vm0 = vmand %vm948_vm14, %vm949_vm15 }
  0x8f   : > { %1123 = vmatpush.msra.mxu2 %v1030_v46  ;;  %1084 = vmatpush.msra.mxu0 %v1025_v47  ;;  %p8659_p8 = pnand %p8658_p7, %p8654_p2 }
  0x90   : > { %1104 = vmatpush.msra.mxu1 %v1026_v48 }
  0x91   : > { %1124 = vmatpush.msra.mxu2 %v1027_v49  ;;  %1085 = vmatpush.msra.mxu0 %v1022_v50 }
  0x92   : > { %1105 = vmatpush.msra.mxu1 %v1023_v51 }
  0x93   : > { %1125 = vmatpush.msra.mxu2 %v1024_v52  ;;  %1086 = vmatpush.msra.mxu0 %v1019_v53 }
  0x94   : > { %1106 = vmatpush.msra.mxu1 %v1020_v54 }
  0x95   : > { %1126 = vmatpush.msra.mxu2 %v1021_v55  ;;  %1087 = vmatpush.msra.mxu0 %v1016_v56 }
  0x96   : > { %1107 = vmatpush.msra.mxu1 %v1017_v57 }
  0x97   : > { %1127 = vmatpush.msra.mxu2 %v1018_v58 }
  0xf3   : > { %v987_v12 = vpop.xlane.xlu0 %986 }
  0xf4   : > { %v988_v13 = vmul.f32 0.01, %v987_v12 }
  0xf6   : > { %v989_v14 = vsub.f32 %v982_v4, %v988_v13  ;;  %v1064_v13 = vld [vmem:[#allocation8] sm:$0x7] }
  0xf7   : > { %v1068_v24 = vperm.slane %v1064_v13, 2 }
  0xf8   : > { %v9120_v15 = vmul.f32 %v9111_v3, %v989_v14  ;;  %v1066_v14 = vperm.slane %v1064_v13, 0 }
  0xfa   : > { %v991_v16 = vmul.f32 %v9120_v15, %v9120_v15 }
  0xfc   : > { %992 = vadd.xlane.f32.xlu0 %v991_v16  ;;  %v1067_v16 = vperm.slane %v1064_v13, 1 }
 0x16f   : > { %v993_v59 = vpop.xlane.xlu0 %992 }
 0x170   : > { %v994_v60 = vmul.f32 0.01, %v993_v59 }
 0x172   : > { %v995_v61 = vadd.f32 1e-12, %v994_v60 }
 0x174   : > { %7864 = vrsqrt.f32 %v995_v61  ;;  %vm1002_vm2 = vweird.f32 %v995_v61 }
 0x17a   : > { %v7865_v62 = vpop.eup %7864 }
 0x17b   : > { %v997_v63 = vmul.f32 %v7865_v62, %v995_v61  ;;  %vm1003_vm1 = vweird.f32 %v7865_v62  ;;  %v9208_v61 = vsel %vm955_vm6, 1.0, %v8768_v2 }
 0x17c   : > { %vm1004_vm3 = vmor %vm1002_vm2, %vm1003_vm1  ;;  %vm943_vm1 = vcmp.ge.s32.totalorder %v9102_v1, 20  ;;  %vm944_vm2 = vcmp.lt.s32.totalorder %v9102_v1, 30 }
 0x17d   : > { %v998_v0 = vmul.f32 %v7865_v62, %v997_v63  ;;  %v9216_v63 = vsel %vm965_vm9, 1.0, %v8768_v2 }
 0x17f   : > { %v999_v4 = vmul.f32 0.5, %v998_v0 }
 0x181   : > { %v1000_v5 = vsub.f32 1.5, %v999_v4  ;;  %v9223_v4 = vsel %vm975_vm12, 1.0, %v8768_v2 }
 0x183   : > { %v1001_v6 = vmul.f32 %v7865_v62, %v1000_v5 }
 0x185   : > { %v1005_v8 = vsel %vm1004_vm3, %v7865_v62, %v1001_v6  ;;  %vm945_vm3 = vmand %vm943_vm1, %vm944_vm2 }
 0x186   : > { %v1006_v9 = vmul.f32 %v1005_v8, %v9120_v15  ;;  %v9200_v59 = vsel %vm945_vm3, 1.0, %v8768_v2 }
 0x188   : > { %v1010_v11 = vmul.f32 %v7838_v7, %v1006_v9 }
 0x18a   : > { %v9125_v12 = vadd.f32 %v7839_v10, %v1010_v11 }
 0x18c   : > { %1088 = vmatmul.f32.vlgmr.msra.gmra.mxu0 %v9125_v12  ;;  %1108 = vmatmul.f32.vlgmr.msra.gmra.mxu1 %v9125_v12 }
 0x18d   : > { %1128 = vmatmul.f32.vlgmr.msra.gmra.mxu2 %v9125_v12 }
 0x209   : > { %v1089_v15 = vpop.f32.mrf.mxu0  ;;  %v1109_v17 = vpop.f32.mrf.mxu1 }
 0x20a   : > { %v9139_v20 = vadd.f32 %v1089_v15, %v1066_v14  ;;  %v9141_v21 = vadd.f32 %v1109_v17, %v1067_v16 }
 0x20c   : > { %1148 = vmatpush.xpose.msrb.mxu2 %v9141_v21  ;;  %1447 = vmatpush.xpose.msrb.mxu1 %v9141_v21  ;;  %v1132_v22 = vmul.f32 %v9134_v18, %v9139_v20  ;;  %v1431_v23 = vmul.f32 %v9137_v19, %v9139_v20  ;;  %v1549_v28 = vmul.f32 %v9156_v27, %v9139_v20 }
 0x20d   : > { %v1667_v30 = vmul.f32 %v9170_v29, %v9139_v20  ;;  %v1195_v45 = vmul.f32 %v9185_v44, %v9139_v20  ;;  %v1254_v60 = vmul.f32 %v9200_v59, %v9139_v20  ;;  %v1372_v62 = vmul.f32 %v9208_v61, %v9139_v20 }
 0x20e   : > { %v1490_v0 = vmul.f32 %v9216_v63, %v9139_v20  ;;  %v1608_v5 = vmul.f32 %v9223_v4, %v9139_v20 }
 0x20f   : > { %1149 = vmatmul.f32.vlgmr.msrb.gmra.mxu2 %v1132_v22  ;;  %1448 = vmatmul.f32.vlgmr.msrb.gmra.mxu1 %v1431_v23 }
 0x210   : > { %1565 = vmatpush.xpose.msra.mxu1 %v9141_v21  ;;  %v1129_v25 = vpop.f32.mrf.mxu2 }
 0x211   : > { %v9153_v26 = vadd.f32 %v1129_v25, %v1068_v24 }
 0x213   : > { %1188 = vmatpush.msra.mxu3 %v9153_v26  ;;  %1306 = vmatpush.msra.mxu2 %v9153_v26 }
 0x214   : > { %1683 = vmatpush.xpose.msrb.mxu1 %v9141_v21  ;;  %1424 = vmatpush.msrb.mxu0 %v9153_v26 }
 0x215   : > { %1211 = vmatpush.xpose.msrb.mxu3 %v9141_v21  ;;  %1329 = vmatpush.xpose.msrb.mxu2 %v9141_v21 }
 0x216   : > { %1542 = vmatpush.msra.mxu0 %v9153_v26 }
 0x217   : > { %1566 = vmatmul.f32.vlgmr.msra.gmra.mxu1 %v1549_v28 }
 0x21f   : > { %1684 = vmatmul.f32.vlgmr.msrb.gmra.mxu1 %v1667_v30 }
 0x28c   : > { %v1449_v9 = vpop.f32.mrf.mxu1 }
 0x28d   : > { %v1452_v11 = vmul.f32 0.31622776, %v1449_v9 }
 0x28f   : > { %v1453_v16 = vadd.f32 %v9175_v32, %v1452_v11 }
 0x291   : > { %v1454_v15 = vsel %vm1158_vm13, %v1453_v16, -inf }
 0x292   : > { %v1150_v31 = vpop.f32.mrf.mxu2 }
 0x293   : > { %v1153_v33 = vmul.f32 0.31622776, %v1150_v31 }
 0x294   : > { %v1567_v30 = vpop.f32.mrf.mxu1 }
 0x295   : > { %v1157_v34 = vadd.f32 %v9175_v32, %v1153_v33 }
 0x297   : > { %v1159_v35 = vsel %vm1158_vm13, %v1157_v34, -inf }
 0x298   : > { %1160 = vmax.xlane.f32.xlu1 %v1159_v35 }
 0x30b   : > { %v1161_v36 = vpop.xlane.xlu1 %1160 }
 0x30c   : > { %v1162_v37 = vsub.f32 %v1157_v34, %v1161_v36 }
 0x30e   : > { %v1163_v38 = vmul.f32 1.442695, %v1162_v37  ;;  %v1685_v37 = vpop.f32.mrf.mxu1 }
 0x310   : > { %7866 = vpow2.f32 %v1163_v38 }
 0x316   : > { %v7867_v39 = vpop.eup %7866 }
 0x317   : > { %v1165_v40 = vsel %vm1158_vm13, %v7867_v39, 0.0 }
 0x318   : > { %1166 = vadd.xlane.f32.xlu1 %v1165_v40 }
 0x38b   : > { %v1167_v41 = vpop.xlane.xlu1 %1166 }
 0x38c   : > { %7868 = vrcp.f32 %v1167_v41 }
 0x392   : > { %v7869_v42 = vpop.eup %7868 }
 0x393   : > { %v1169_v43 = vmul.f32 %v7869_v42, %v7867_v39  ;;  %v1688_v39 = vmul.f32 0.31622776, %v1685_v37 }
 0x395   : > { %7539 = vmatmul.msk.f32.vlgmr.msra.gmra.mxu3 %vm1158_vm13, %v1169_v43  ;;  %v1689_v43 = vadd.f32 %v9175_v32, %v1688_v39 }
 0x396   : > { %1247 = vmatpush.msra.mxu3 %v9153_v26 }
 0x39d   : > { %1212 = vmatmul.f32.vlgmr.msrb.gmra.mxu3 %v1195_v45 }
 0x39e   : > { %1270 = vmatpush.xpose.msrb.mxu3 %v9141_v21 }
 0x418   : > { %v9190_v46 = vpop.f32.mrf.mxu3 }
 0x420   : > { %v1213_v47 = vpop.f32.mrf.mxu3 }
 0x421   : > { %v1216_v48 = vmul.f32 0.31622776, %v1213_v47  ;;  %v1690_v47 = vsel %vm1158_vm13, %v1689_v43, -inf }
 0x423   : > { %v1217_v49 = vadd.f32 %v9175_v32, %v1216_v48 }
 0x425   : > { %v1218_v50 = vsel %vm1158_vm13, %v1217_v49, -inf }
 0x426   : > { %1219 = vmax.xlane.f32.xlu2 %v1218_v50 }
 0x499   : > { %v1220_v51 = vpop.xlane.xlu2 %1219 }
 0x49a   : > { %v1221_v52 = vsub.f32 %v1217_v49, %v1220_v51 }
 0x49c   : > { %v1222_v53 = vmul.f32 1.442695, %v1221_v52 }
 0x49e   : > { %7870 = vpow2.f32 %v1222_v53 }
 0x4a4   : > { %v7871_v54 = vpop.eup %7870 }
 0x4a5   : > { %v1224_v55 = vsel %vm1158_vm13, %v7871_v54, 0.0 }
 0x4a6   : > { %1225 = vadd.xlane.f32.xlu2 %v1224_v55 }
 0x519   : > { %v1226_v56 = vpop.xlane.xlu2 %1225 }
 0x51a   : > { %7872 = vrcp.f32 %v1226_v56  ;;  %v9253_v56 = vsel %vm950_vm0, 1.0, %v8768_v2 }
 0x520   : > { %v7873_v57 = vpop.eup %7872 }
 0x521   : > { %v1228_v58 = vmul.f32 %v7873_v57, %v7871_v54  ;;  %v1313_v57 = vmul.f32 %v9253_v56, %v9139_v20 }
 0x523   : > { %7540 = vmatmul.msk.f32.vlgmr.msra.gmra.mxu3 %vm1158_vm13, %v1228_v58 }
 0x524   : > { %1388 = vmatpush.xpose.msra.mxu3 %v9141_v21 }
 0x52b   : > { %1271 = vmatmul.f32.vlgmr.msrb.gmra.mxu3 %v1254_v60 }
 0x52c   : > { %1506 = vmatpush.xpose.msrb.mxu3 %v9141_v21 }
 0x533   : > { %1389 = vmatmul.f32.vlgmr.msra.gmra.mxu3 %v1372_v62 }
 0x534   : > { %1624 = vmatpush.xpose.msra.mxu3 %v9141_v21 }
 0x53b   : > { %1507 = vmatmul.f32.vlgmr.msrb.gmra.mxu3 %v1490_v0  ;;  %v1570_v0 = vmul.f32 0.31622776, %v1567_v30 }
 0x53d   : > { %v1571_v2 = vadd.f32 %v9175_v32, %v1570_v0 }
 0x53f   : > { %v1572_v20 = vsel %vm1158_vm13, %v1571_v2, -inf }
 0x543   : > { %1625 = vmatmul.f32.vlgmr.msra.gmra.mxu3 %v1608_v5 }
 0x5a6   : > { %v9227_v6 = vpop.f32.mrf.mxu3 }
 0x5ae   : > { %v1272_v7 = vpop.f32.mrf.mxu3 }
 0x5af   : > { %v1275_v8 = vmul.f32 0.31622776, %v1272_v7 }
 0x5b1   : > { %v1276_v10 = vadd.f32 %v9175_v32, %v1275_v8 }
 0x5b3   : > { %v1277_v13 = vsel %vm1158_vm13, %v1276_v10, -inf }
 0x5b4   : > { %1278 = vmax.xlane.f32.xlu0 %v1277_v13 }
 0x5b6   : > { %v1390_v14 = vpop.f32.mrf.mxu3 }
 0x5b7   : > { %v1393_v33 = vmul.f32 0.31622776, %v1390_v14 }
 0x5b9   : > { %v1394_v36 = vadd.f32 %v9175_v32, %v1393_v33 }
 0x5bb   : > { %v1395_v40 = vsel %vm1158_vm13, %v1394_v36, -inf }
 0x5bc   : > { %1455 = vmax.xlane.f32.xlu0 %v1454_v15 }
 0x5be   : > { %v1508_v17 = vpop.f32.mrf.mxu3 }
 0x5bf   : > { %v1511_v21 = vmul.f32 0.31622776, %v1508_v17 }
 0x5c1   : > { %v1512_v22 = vadd.f32 %v9175_v32, %v1511_v21 }
 0x5c3   : > { %v1513_v23 = vsel %vm1158_vm13, %v1512_v22, -inf }
 0x5c4   : > { %1514 = vmax.xlane.f32.xlu0 %v1513_v23 }
 0x5c6   : > { %v1626_v8 = vpop.f32.mrf.mxu3 }
 0x627   : > { %v1279_v24 = vpop.xlane.xlu0 %1278 }
 0x628   : > { %v1280_v25 = vsub.f32 %v1276_v10, %v1279_v24  ;;  %v1629_v10 = vmul.f32 0.31622776, %v1626_v8 }
 0x62a   : > { %v1281_v28 = vmul.f32 1.442695, %v1280_v25  ;;  %v1630_v14 = vadd.f32 %v9175_v32, %v1629_v10 }
 0x62c   : > { %7874 = vpow2.f32 %v1281_v28  ;;  %v1631_v15 = vsel %vm1158_vm13, %v1630_v14, -inf }
 0x62f   : > { %v1456_v35 = vpop.xlane.xlu0 %1455 }
 0x630   : > { %v1457_v38 = vsub.f32 %v1453_v16, %v1456_v35 }
 0x632   : > { %v7875_v31 = vpop.eup %7874  ;;  %v1458_v41 = vmul.f32 1.442695, %v1457_v38 }
 0x633   : > { %v1283_v34 = vsel %vm1158_vm13, %v7875_v31, 0.0 }
 0x634   : > { %1284 = vadd.xlane.f32.xlu1 %v1283_v34  ;;  %7876 = vpow2.f32 %v1458_v41 }
 0x637   : > { %v1515_v42 = vpop.xlane.xlu0 %1514 }
 0x638   : > { %v1516_v45 = vsub.f32 %v1512_v22, %v1515_v42 }
 0x63a   : > { %v1517_v48 = vmul.f32 1.442695, %v1516_v45  ;;  %v9240_v49 = vpop.eup %7876 }
 0x63b   : > { %v1460_v50 = vsel %vm1158_vm13, %v9240_v49, 0.0 }
 0x63c   : > { %1396 = vmax.xlane.f32.xlu1 %v1395_v40  ;;  %7878 = vpow2.f32 %v1517_v48 }
 0x642   : > { %v9244_v51 = vpop.eup %7878 }
 0x643   : > { %v1519_v52 = vsel %vm1158_vm13, %v9244_v51, 0.0 }
 0x644   : > { %1691 = vmax.xlane.f32.xlu1 %v1690_v47 }
 0x64c   : > { %1461 = vadd.xlane.f32.xlu1 %v1460_v50 }
 0x654   : > { %1520 = vadd.xlane.f32.xlu1 %v1519_v52 }
 0x6a7   : > { %v1285_v53 = vpop.xlane.xlu1 %1284 }
 0x6a8   : > { %7880 = vrcp.f32 %v1285_v53 }
 0x6ae   : > { %v7881_v54 = vpop.eup %7880 }
 0x6af   : > { %v1287_v55 = vmul.f32 %v7881_v54, %v7875_v31  ;;  %v1397_v7 = vpop.xlane.xlu1 %1396 }
 0x6b0   : > { %v1398_v9 = vsub.f32 %v1394_v36, %v1397_v7 }
 0x6b1   : > { %7541 = vmatmul.msk.f32.vlgmr.msra.gmra.mxu2 %vm1158_vm13, %v1287_v55 }
 0x6b2   : > { %1365 = vmatpush.msra.mxu2 %v9153_v26  ;;  %v1399_v11 = vmul.f32 1.442695, %v1398_v9 }
 0x6b4   : > { %7882 = vpow2.f32 %v1399_v11  ;;  %v1739_v11 = vld [vmem:[#allocation10 + $0x68] sm:$0xff] }
 0x6b7   : > { %v1692_v13 = vpop.xlane.xlu1 %1691 }
 0x6b8   : > { %v1693_v16 = vsub.f32 %v1689_v43, %v1692_v13  ;;  %v1738_v13 = vld [vmem:[#allocation10 + $0x60] sm:$0xff] }
 0x6b9   : > { %1330 = vmatmul.f32.vlgmr.msrb.gmra.mxu2 %v1313_v57 }
 0x6ba   : > { %1483 = vmatpush.msrb.mxu2 %v9153_v26  ;;  %v1694_v17 = vmul.f32 1.442695, %v1693_v16  ;;  %v7883_v21 = vpop.eup %7882  ;;  %v1735_v16 = vld [vmem:[#allocation10 + $0x48] sm:$0xff] }
 0x6bb   : > { %v1401_v22 = vsel %vm1158_vm13, %v7883_v21, 0.0 }
 0x6bc   : > { %7884 = vpow2.f32 %v1694_v17  ;;  %v1733_v17 = vld [vmem:[#allocation10 + $0x38] sm:$0xff] }
 0x6bf   : > { %v1462_v38 = vpop.xlane.xlu1 %1461 }
 0x6c2   : > { %v7885_v23 = vpop.eup %7884 }
 0x6c3   : > { %v1696_v24 = vsel %vm1158_vm13, %v7885_v23, 0.0 }
 0x6c7   : > { %v1521_v45 = vpop.xlane.xlu1 %1520 }
 0x734   : > { %v9258_v58 = vpop.f32.mrf.mxu2 }
 0x73c   : > { %v1331_v60 = vpop.f32.mrf.mxu2 }
 0x73d   : > { %v1334_v62 = vmul.f32 0.31622776, %v1331_v60 }
 0x73f   : > { %v1335_v1 = vadd.f32 %v9175_v32, %v1334_v62  ;;  %v1741_v62 = vld [vmem:[#allocation10 + $0x78] sm:$0xff] }
 0x740   : > { %1746 = vmatpush.msrb.mxu3 %v1741_v62  ;;  %v7840_v62 = vld [vmem:[#allocation11] ss:$0 sm:$0xff] }
 0x741   : > { %v1336_v5 = vsel %vm1158_vm13, %v1335_v1, -inf }
 0x742   : > { %1337 = vmax.xlane.f32.xlu2 %v1336_v5 }
 0x74a   : > { %1573 = vmax.xlane.f32.xlu2 %v1572_v20 }
 0x752   : > { %1632 = vmax.xlane.f32.xlu2 %v1631_v15  ;;  %v1734_v15 = vld [vmem:[#allocation10 + $0x40] sm:$0xff] }
 0x75a   : > { %1402 = vadd.xlane.f32.xlu2 %v1401_v22  ;;  %v1731_v22 = vld [vmem:[#allocation10 + $0x28] sm:$0xff] }
 0x762   : > { %1697 = vadd.xlane.f32.xlu2 %v1696_v24  ;;  %v1729_v24 = vld [vmem:[#allocation10 + $0x18] sm:$0xff] }
 0x7b5   : > { %v1338_v25 = vpop.xlane.xlu2 %1337 }
 0x7b6   : > { %v1339_v28 = vsub.f32 %v1335_v1, %v1338_v25  ;;  %v1728_v25 = vld [vmem:[#allocation10 + $0x10] sm:$0xff] }
 0x7b8   : > { %v1340_v30 = vmul.f32 1.442695, %v1339_v28  ;;  %v1727_v28 = vld [vmem:[#allocation10 + $0x8] sm:$0xff] }
 0x7ba   : > { %7886 = vpow2.f32 %v1340_v30  ;;  %v1726_v30 = vld [vmem:[#allocation10] sm:$0xff] }
 0x7bd   : > { %v1574_v32 = vpop.xlane.xlu2 %1573 }
 0x7be   : > { %v1575_v31 = vsub.f32 %v1571_v2, %v1574_v32 }
 0x7c0   : > { %v7887_v33 = vpop.eup %7886  ;;  %v1576_v34 = vmul.f32 1.442695, %v1575_v31  ;;  %v1252_v31 = vmul.f32 %v9185_v44, %v9227_v6 }
 0x7c1   : > { %v1342_v35 = vsel %vm1158_vm13, %v7887_v33, 0.0 }
 0x7c2   : > { %7888 = vpow2.f32 %v1576_v34  ;;  %1343 = vadd.xlane.f32.xlu0 %v1342_v35  ;;  %v1193_v34 = vmul.f32 %v9134_v18, %v9190_v46  ;;  %v1311_v35 = vmul.f32 %v9200_v59, %v9258_v58 }
 0x7c5   : > { %v1633_v36 = vpop.xlane.xlu2 %1632 }
 0x7c6   : > { %v1634_v37 = vsub.f32 %v1630_v14, %v1633_v36  ;;  %v1736_v14 = vld [vmem:[#allocation10 + $0x50] sm:$0xff]  ;;  %v1253_v36 = vadd.f32 %v1252_v31, %v1193_v34  ;;  %v1830_v34 = vld [vmem:[#allocation16 + $0xf8] sm:$0xff] }
 0x7c7   : > { %v1836_v31 = vld [vmem:[#allocation16 + $0x128] sm:$0xff] }
 0x7c8   : > { %v7889_v39 = vpop.eup %7888  ;;  %v1635_v40 = vmul.f32 1.442695, %v1634_v37 }
 0x7c9   : > { %v1578_v41 = vsel %vm1158_vm13, %v7889_v39, 0.0 }
 0x7ca   : > { %7890 = vpow2.f32 %v1635_v40  ;;  %1579 = vadd.xlane.f32.xlu0 %v1578_v41 }
 0x7cd   : > { %v1403_v42 = vpop.xlane.xlu2 %1402 }
 0x7ce   : > { %7892 = vrcp.f32 %v1403_v42 }
 0x7cf   : > { %7894 = vrcp.f32 %v1521_v45 }
 0x7d0   : > { %v7891_v43 = vpop.eup %7890 }
 0x7d1   : > { %v1637_v47 = vsel %vm1158_vm13, %v7891_v43, 0.0 }
 0x7d2   : > { %1638 = vadd.xlane.f32.xlu0 %v1637_v47 }
 0x7d4   : > { %v7893_v48 = vpop.eup %7892 }
 0x7d5   : > { %v1405_v50 = vmul.f32 %v7893_v48, %v7883_v21  ;;  %v7895_v52 = vpop.eup %7894  ;;  %v1732_v21 = vld [vmem:[#allocation10 + $0x30] sm:$0xff] }
 0x7d6   : > { %v1523_v53 = vmul.f32 %v7895_v52, %v9244_v51  ;;  %v1698_v51 = vpop.xlane.xlu2 %1697 }
 0x7d7   : > { %7543 = vmatmul.msk.f32.vlgmr.msrb.gmra.mxu0 %vm1158_vm13, %v1405_v50 }
 0x7d8   : > { %1660 = vmatpush.msrb.mxu0 %v9153_v26 }
 0x7df   : > { %7545 = vmatmul.msk.f32.vlgmr.msra.gmra.mxu0 %vm1158_vm13, %v1523_v53 }
 0x835   : > { %v1344_v54 = vpop.xlane.xlu0 %1343 }
 0x836   : > { %7896 = vrcp.f32 %v1344_v54 }
 0x837   : > { %7898 = vrcp.f32 %v1462_v38  ;;  %v1312_v38 = vadd.f32 %v1311_v35, %v1253_v36  ;;  %v1823_v35 = vld [vmem:[#allocation16 + $0xc0] sm:$0xff]  ;;  %v1824_v36 = vld [vmem:[#allocation16 + $0xc8] sm:$0xff] }
 0x83c   : > { %v7897_v55 = vpop.eup %7896 }
 0x83d   : > { %v1346_v57 = vmul.f32 %v7897_v55, %v7887_v33  ;;  %v1580_v60 = vpop.xlane.xlu0 %1579  ;;  %v7899_v1 = vpop.eup %7898 }
 0x83e   : > { %7900 = vrcp.f32 %v1580_v60  ;;  %v1464_v0 = vmul.f32 %v7899_v1, %v9240_v49  ;;  %v1740_v49 = vld [vmem:[#allocation10 + $0x70] sm:$0xff] }
 0x83f   : > { %7542 = vmatmul.msk.f32.vlgmr.msra.gmra.mxu2 %vm1158_vm13, %v1346_v57  ;;  %1747 = vmatpush.msrb.mxu3 %v1740_v49  ;;  %v1871_v49 = vld [vmem:[#allocation16 + $0x240] sm:$0xff] }
 0x840   : > { %1601 = vmatpush.msra.mxu2 %v9153_v26 }
 0x841   : > { %1748 = vmatpush.msrb.mxu3 %v1739_v11  ;;  %v1872_v11 = vld [vmem:[#allocation16 + $0x248] sm:$0xff] }
 0x843   : > { %1749 = vmatpush.msrb.mxu3 %v1738_v13  ;;  %v1866_v13 = vld [vmem:[#allocation16 + $0x218] sm:$0xff] }
 0x844   : > { %v7901_v7 = vpop.eup %7900 }
 0x845   : > { %v1639_v5 = vpop.xlane.xlu0 %1638  ;;  %v1582_v8 = vmul.f32 %v7901_v7, %v7889_v39  ;;  %v1889_v7 = vld [vmem:[#allocation16 + $0x2d0] sm:$0xff] }
 0x846   : > { %7902 = vrcp.f32 %v1639_v5  ;;  %1909 = vmatpush.msra.mxu0 %v1889_v7  ;;  %v1855_v7 = vld [vmem:[#allocation16 + $0x1c0] sm:$0xff] }
 0x847   : > { %7544 = vmatmul.msk.f32.vlgmr.msrb.gmra.mxu2 %vm1158_vm13, %v1464_v0  ;;  %7904 = vrcp.f32 %v1698_v51 }
 0x848   : > { %1719 = vmatpush.msrb.mxu2 %v9153_v26  ;;  %v1737_v26 = vld [vmem:[#allocation10 + $0x58] sm:$0xff] }
 0x849   : > { %1750 = vmatpush.msrb.mxu3 %v1737_v26  ;;  %v1859_v26 = vld [vmem:[#allocation16 + $0x1e0] sm:$0xff] }
 0x84b   : > { %1751 = vmatpush.msrb.mxu3 %v1736_v14  ;;  %v1860_v14 = vld [vmem:[#allocation16 + $0x1e8] sm:$0xff] }
 0x84c   : > { %v7903_v2 = vpop.eup %7902 }
 0x84d   : > { %v1641_v9 = vmul.f32 %v7903_v2, %v7891_v43  ;;  %v7905_v10 = vpop.eup %7904  ;;  %1752 = vmatpush.msrb.mxu3 %v1735_v16  ;;  %v1890_v2 = vld [vmem:[#allocation16 + $0x2d8] sm:$0xff]  ;;  %v1891_v16 = vld [vmem:[#allocation16 + $0x2e0] sm:$0xff] }
 0x84e   : > { %v1700_v20 = vmul.f32 %v7905_v10, %v7885_v23  ;;  %v1730_v23 = vld [vmem:[#allocation10 + $0x20] sm:$0xff]  ;;  %1929 = vmatpush.msra.mxu1 %v1890_v2  ;;  %v1856_v2 = vld [vmem:[#allocation16 + $0x1c8] sm:$0xff] }
 0x84f   : > { %7546 = vmatmul.msk.f32.vlgmr.msra.gmra.mxu2 %vm1158_vm13, %v1582_v8  ;;  %7547 = vmatmul.msk.f32.vlgmr.msrb.gmra.mxu0 %vm1158_vm13, %v1641_v9  ;;  %v1883_v8 = vld [vmem:[#allocation16 + $0x2a0] sm:$0xff]  ;;  %v1884_v9 = vld [vmem:[#allocation16 + $0x2a8] sm:$0xff]  ;;  %v1877_v10 = vld [vmem:[#allocation16 + $0x270] sm:$0xff] }
 0x850   : > { %1753 = vmatpush.msrb.mxu3 %v1734_v15  ;;  %1910 = vmatpush.msra.mxu0 %v1883_v8  ;;  %v1892_v15 = vld [vmem:[#allocation16 + $0x2e8] sm:$0xff]  ;;  %v1881_v8 = vld [vmem:[#allocation16 + $0x290] sm:$0xff] }
 0x851   : > { %1930 = vmatpush.msra.mxu1 %v1884_v9  ;;  %1949 = vmatpush.msra.mxu2 %v1891_v16  ;;  %v1882_v9 = vld [vmem:[#allocation16 + $0x298] sm:$0xff]  ;;  %v1837_v16 = vld [vmem:[#allocation16 + $0x130] sm:$0xff] }
 0x852   : > { %1754 = vmatpush.msrb.mxu3 %v1733_v17  ;;  %1911 = vmatpush.msra.mxu0 %v1877_v10  ;;  %v1885_v17 = vld [vmem:[#allocation16 + $0x2b0] sm:$0xff] }
 0x853   : > { %1950 = vmatpush.msra.mxu2 %v1885_v17  ;;  %v1849_v10 = vld [vmem:[#allocation16 + $0x190] sm:$0xff]  ;;  %v1863_v17 = vld [vmem:[#allocation16 + $0x200] sm:$0xff] }
 0x854   : > { %1755 = vmatpush.msrb.mxu3 %v1732_v21  ;;  %v1426_v33 = vpop.f32.mrf.mxu0  ;;  %1912 = vmatpush.msra.mxu0 %v1871_v49  ;;  %v1886_v21 = vld [vmem:[#allocation16 + $0x2b8] sm:$0xff]  ;;  %v1875_v49 = vld [vmem:[#allocation16 + $0x260] sm:$0xff] }
 0x855   : > { %v1429_v41 = vmul.f32 %v9208_v61, %v1426_v33  ;;  %v1829_v33 = vld [vmem:[#allocation16 + $0xf0] sm:$0xff] }
 0x856   : > { %1756 = vmatpush.msrb.mxu3 %v1731_v22  ;;  %v1853_v22 = vld [vmem:[#allocation16 + $0x1b0] sm:$0xff] }
 0x857   : > { %7548 = vmatmul.msk.f32.vlgmr.msrb.gmra.mxu2 %vm1158_vm13, %v1700_v20  ;;  %v1878_v20 = vld [vmem:[#allocation16 + $0x278] sm:$0xff] }
 0x858   : > { %1757 = vmatpush.msrb.mxu3 %v1730_v23  ;;  %1931 = vmatpush.msra.mxu1 %v1878_v20  ;;  %v1854_v23 = vld [vmem:[#allocation16 + $0x1b8] sm:$0xff] }
 0x859   : > { %v1850_v20 = vld [vmem:[#allocation16 + $0x198] sm:$0xff] }
 0x85a   : > { %1758 = vmatpush.msrb.mxu3 %v1729_v24  ;;  %1932 = vmatpush.msra.mxu1 %v1872_v11  ;;  %v1847_v24 = vld [vmem:[#allocation16 + $0x180] sm:$0xff]  ;;  %v1876_v11 = vld [vmem:[#allocation16 + $0x268] sm:$0xff] }
 0x85c   : > { %1759 = vmatpush.msrb.mxu3 %v1728_v25  ;;  %v1544_v43 = vpop.f32.mrf.mxu0  ;;  %1933 = vmatpush.msra.mxu1 %v1866_v13  ;;  %v1848_v25 = vld [vmem:[#allocation16 + $0x188] sm:$0xff] }
 0x85d   : > { %v1547_v48 = vmul.f32 %v9216_v63, %v1544_v43  ;;  %v1844_v13 = vld [vmem:[#allocation16 + $0x168] sm:$0xff] }
 0x85e   : > { %1760 = vmatpush.msrb.mxu3 %v1727_v28  ;;  %1934 = vmatpush.msra.mxu1 %v1860_v14  ;;  %v1841_v28 = vld [vmem:[#allocation16 + $0x150] sm:$0xff]  ;;  %v1870_v14 = vld [vmem:[#allocation16 + $0x238] sm:$0xff] }
 0x860   : > { %1761 = vmatpush.msrb.mxu3 %v1726_v30  ;;  %1935 = vmatpush.msra.mxu1 %v1854_v23  ;;  %v1842_v30 = vld [vmem:[#allocation16 + $0x158] sm:$0xff]  ;;  %v1832_v23 = vld [vmem:[#allocation16 + $0x108] sm:$0xff] }
 0x862   : > { %1969 = vmatpush.msra.mxu3 %v1892_v15  ;;  %1936 = vmatpush.msra.mxu1 %v1848_v25  ;;  %v1838_v15 = vld [vmem:[#allocation16 + $0x138] sm:$0xff] }
 0x863   : > { %v1858_v25 = vld [vmem:[#allocation16 + $0x1d8] sm:$0xff] }
 0x864   : > { %1970 = vmatpush.msra.mxu3 %v1886_v21  ;;  %1937 = vmatpush.msra.mxu1 %v1842_v30  ;;  %v1864_v21 = vld [vmem:[#allocation16 + $0x208] sm:$0xff]  ;;  %v1826_v30 = vld [vmem:[#allocation16 + $0xd8] sm:$0xff] }
 0x866   : > { %1938 = vmatpush.msra.mxu1 %v1836_v31  ;;  %v1852_v31 = vld [vmem:[#allocation16 + $0x1a8] sm:$0xff] }
 0x868   : > { %1939 = vmatpush.msra.mxu1 %v1830_v34  ;;  %v1820_v34 = vld [vmem:[#allocation16 + $0xa8] sm:$0xff] }
 0x86a   : > { %1940 = vmatpush.msra.mxu1 %v1824_v36  ;;  %v1846_v36 = vld [vmem:[#allocation16 + $0x178] sm:$0xff] }
 0x8c2   : > { %v1367_v32 = vpop.f32.mrf.mxu2 }
 0x8c3   : > { %v1370_v37 = vmul.f32 %v9253_v56, %v1367_v32  ;;  %v1835_v32 = vld [vmem:[#allocation16 + $0x120] sm:$0xff] }
 0x8c5   : > { %v1371_v40 = vadd.f32 %v1370_v37, %v1312_v38  ;;  %v1817_v37 = vld [vmem:[#allocation16 + $0x90] sm:$0xff]  ;;  %v1818_v38 = vld [vmem:[#allocation16 + $0x98] sm:$0xff] }
 0x8c6   : > { %1941 = vmatpush.msra.mxu1 %v1818_v38  ;;  %v1814_v38 = vld [vmem:[#allocation16 + $0x78] sm:$0xff] }
 0x8c7   : > { %v1430_v45 = vadd.f32 %v1429_v41, %v1371_v40 }
 0x8ca   : > { %v1485_v39 = vpop.f32.mrf.mxu2 }
 0x8cb   : > { %v1488_v42 = vmul.f32 %v9137_v19, %v1485_v39 }
 0x8cc   : > { %v1662_v58 = vpop.f32.mrf.mxu0 }
 0x8cd   : > { %v1489_v6 = vadd.f32 %v1488_v42, %v1430_v45  ;;  %v1665_v53 = vmul.f32 %v9223_v4, %v1662_v58  ;;  %v1811_v45 = vld [vmem:[#allocation16 + $0x60] sm:$0xff]  ;;  %v1873_v58 = vld [vmem:[#allocation16 + $0x250] sm:$0xff] }
 0x8cf   : > { %v1548_v50 = vadd.f32 %v1547_v48, %v1489_v6  ;;  %v1812_v6 = vld [vmem:[#allocation16 + $0x68] sm:$0xff] }
 0x8d0   : > { %1942 = vmatpush.msra.mxu1 %v1812_v6  ;;  %v1880_v48 = vld [vmem:[#allocation16 + $0x288] sm:$0xff]  ;;  %v1834_v6 = vld [vmem:[#allocation16 + $0x118] sm:$0xff] }
 0x8d1   : > { %1971 = vmatpush.msra.mxu3 %v1880_v48  ;;  %v1802_v48 = vld [vmem:[#allocation16 + $0x18] sm:$0xff] }
 0x8d2   : > { %v1603_v47 = vpop.f32.mrf.mxu2 }
 0x8d3   : > { %v1606_v46 = vmul.f32 %v9156_v27, %v1603_v47  ;;  %v1879_v47 = vld [vmem:[#allocation16 + $0x280] sm:$0xff] }
 0x8d4   : > { %1951 = vmatpush.msra.mxu2 %v1879_v47  ;;  %v1801_v47 = vld [vmem:[#allocation16 + $0x10] sm:$0xff] }
 0x8d5   : > { %v1607_v52 = vadd.f32 %v1606_v46, %v1548_v50  ;;  %v1805_v46 = vld [vmem:[#allocation16 + $0x30] sm:$0xff]  ;;  %v1806_v50 = vld [vmem:[#allocation16 + $0x38] sm:$0xff] }
 0x8d6   : > { %1943 = vmatpush.msra.mxu1 %v1806_v50  ;;  %1952 = vmatpush.msra.mxu2 %v1873_v58  ;;  %v1828_v50 = vld [vmem:[#allocation16 + $0xe8] sm:$0xff]  ;;  %v1821_v58 = vld [vmem:[#allocation16 + $0xb0] sm:$0xff] }
 0x8d7   : > { %v1666_v55 = vadd.f32 %v1665_v53, %v1607_v52  ;;  %v1874_v52 = vld [vmem:[#allocation16 + $0x258] sm:$0xff]  ;;  %v1799_v53 = vld [vmem:[#allocation16] sm:$0xff] }
 0x8d8   : > { %1972 = vmatpush.msra.mxu3 %v1874_v52  ;;  %v1822_v52 = vld [vmem:[#allocation16 + $0xb8] sm:$0xff] }
 0x8da   : > { %v1721_v54 = vpop.f32.mrf.mxu2 }
 0x8db   : > { %v1724_v57 = vmul.f32 %v9170_v29, %v1721_v54  ;;  %v1800_v54 = vld [vmem:[#allocation16 + $0x8] sm:$0xff] }
 0x8dc   : > { %1944 = vmatpush.msra.mxu1 %v1800_v54  ;;  %v1815_v54 = vld [vmem:[#allocation16 + $0x80] sm:$0xff] }
 0x8dd   : > { %v1725_v60 = vadd.f32 %v1724_v57, %v1666_v55  ;;  %v1867_v55 = vld [vmem:[#allocation16 + $0x220] sm:$0xff]  ;;  %v1868_v57 = vld [vmem:[#allocation16 + $0x228] sm:$0xff] }
 0x8de   : > { %1953 = vmatpush.msra.mxu2 %v1867_v55  ;;  %1973 = vmatpush.msra.mxu3 %v1868_v57  ;;  %v1816_v55 = vld [vmem:[#allocation16 + $0x88] sm:$0xff] }
 0x8df   : > { %1762 = vmatmul.f32.vlgmr.msrb.gmra.mxu3 %v1725_v60  ;;  %v1893_v60 = vld [vmem:[#allocation16 + $0x2f0] sm:$0xff] }
 0x962   : > { %v1763_v1 = vpop.f32.mrf.mxu3 }
 0x963   : > { %v1764_v0 = vadd.f32 %v7840_v62, %v1763_v1  ;;  %v1894_v62 = vld [vmem:[#allocation16 + $0x2f8] sm:$0xff]  ;;  %v1861_v1 = vld [vmem:[#allocation16 + $0x1f0] sm:$0xff] }
 0x964   : > { %2009 = vmatpush.msrb.mxu1 %v1894_v62  ;;  %1954 = vmatpush.msra.mxu2 %v1861_v1  ;;  %v1810_v62 = vld [vmem:[#allocation16 + $0x58] sm:$0xff] }
 0x965   : > { %v9297_v5 = vadd.f32 %v1764_v0, %v9125_v12  ;;  %v1865_v12 = vld [vmem:[#allocation16 + $0x210] sm:$0xff]  ;;  %v1862_v0 = vld [vmem:[#allocation16 + $0x1f8] sm:$0xff] }
 0x966   : > { %1913 = vmatpush.msra.mxu0 %v1865_v12  ;;  %1974 = vmatpush.msra.mxu3 %v1862_v0  ;;  %v1843_v12 = vld [vmem:[#allocation16 + $0x160] sm:$0xff] }
 0x967   : > { %v1769_v51 = vmul.f32 %v9111_v3, %v9297_v5  ;;  %1955 = vmatpush.msra.mxu2 %v1855_v7  ;;  %v1803_v0 = vld [vmem:[#allocation16 + $0x20] sm:$0xff] }
 0x968   : > { %1914 = vmatpush.msra.mxu0 %v1859_v26  ;;  %1975 = vmatpush.msra.mxu3 %v1856_v2  ;;  %v1869_v26 = vld [vmem:[#allocation16 + $0x230] sm:$0xff] }
 0x969   : > { %1770 = vadd.xlane.f32.xlu1 %v1769_v51  ;;  %v1888_v51 = vld [vmem:[#allocation16 + $0x2c8] sm:$0xff]  ;;  %1956 = vmatpush.msra.mxu2 %v1849_v10 }
 0x96a   : > { %1915 = vmatpush.msra.mxu0 %v1853_v22  ;;  %2010 = vmatpush.msrb.mxu1 %v1888_v51  ;;  %v1831_v22 = vld [vmem:[#allocation16 + $0x100] sm:$0xff] }
 0x96b   : > { %1976 = vmatpush.msra.mxu3 %v1850_v20  ;;  %1957 = vmatpush.msra.mxu2 %v1843_v12  ;;  %v7841_v20 = vld [vmem:[#allocation13] ss:$0 sm:$0xff] }
 0x96c   : > { %1916 = vmatpush.msra.mxu0 %v1847_v24  ;;  %2011 = vmatpush.msrb.mxu1 %v1882_v9  ;;  %v1857_v24 = vld [vmem:[#allocation16 + $0x1d0] sm:$0xff] }
 0x96d   : > { %1977 = vmatpush.msra.mxu3 %v1844_v13  ;;  %1958 = vmatpush.msra.mxu2 %v1837_v16  ;;  %v2324_v16 = vld [vmem:[#allocation19 + $0xf8] sm:$0xff] }
 0x96e   : > { %1917 = vmatpush.msra.mxu0 %v1841_v28  ;;  %2012 = vmatpush.msrb.mxu1 %v1876_v11  ;;  %v1825_v28 = vld [vmem:[#allocation16 + $0xd0] sm:$0xff]  ;;  %v7842_v11 = vld [vmem:[#allocation14] ss:$0 sm:$0xff] }
 0x96f   : > { %1978 = vmatpush.msra.mxu3 %v1838_v15  ;;  %1959 = vmatpush.msra.mxu2 %v1831_v22  ;;  %v2323_v15 = vld [vmem:[#allocation19 + $0xf0] sm:$0xff]  ;;  %v2305_v22 = vld [vmem:[#allocation19 + $0x60] sm:$0xff] }
 0x970   : > { %1918 = vmatpush.msra.mxu0 %v1835_v32  ;;  %2013 = vmatpush.msrb.mxu1 %v1870_v14  ;;  %v1851_v32 = vld [vmem:[#allocation16 + $0x1a0] sm:$0xff]  ;;  %v2308_v14 = vld [vmem:[#allocation19 + $0x78] sm:$0xff] }
 0x971   : > { %1979 = vmatpush.msra.mxu3 %v1832_v23  ;;  %1960 = vmatpush.msra.mxu2 %v1825_v28  ;;  %v2321_v23 = vld [vmem:[#allocation19 + $0xe0] sm:$0xff] }
 0x972   : > { %1919 = vmatpush.msra.mxu0 %v1829_v33  ;;  %2014 = vmatpush.msrb.mxu1 %v1864_v21  ;;  %v1819_v33 = vld [vmem:[#allocation16 + $0xa0] sm:$0xff] }
 0x973   : > { %1980 = vmatpush.msra.mxu3 %v1826_v30  ;;  %1961 = vmatpush.msra.mxu2 %v1819_v33  ;;  %v2322_v21 = vld [vmem:[#allocation19 + $0xe8] sm:$0xff] }
 0x974   : > { %1920 = vmatpush.msra.mxu0 %v1823_v35  ;;  %2015 = vmatpush.msrb.mxu1 %v1858_v25  ;;  %v1845_v35 = vld [vmem:[#allocation16 + $0x170] sm:$0xff] }
 0x975   : > { %1981 = vmatpush.msra.mxu3 %v1820_v34 }
 0x976   : > { %1921 = vmatpush.msra.mxu0 %v1817_v37  ;;  %2016 = vmatpush.msrb.mxu1 %v1852_v31  ;;  %v1813_v37 = vld [vmem:[#allocation16 + $0x70] sm:$0xff] }
 0x977   : > { %1962 = vmatpush.msra.mxu2 %v1813_v37  ;;  %1982 = vmatpush.msra.mxu3 %v1814_v38 }
 0x978   : > { %1922 = vmatpush.msra.mxu0 %v1811_v45  ;;  %2017 = vmatpush.msrb.mxu1 %v1846_v36  ;;  %v1833_v45 = vld [vmem:[#allocation16 + $0x110] sm:$0xff] }
 0x97a   : > { %1923 = vmatpush.msra.mxu0 %v1805_v46  ;;  %v1827_v46 = vld [vmem:[#allocation16 + $0xe0] sm:$0xff] }
 0x97c   : > { %1924 = vmatpush.msra.mxu0 %v1799_v53 }
 0x97e   : > { %1989 = vmatpush.msrb.mxu0 %v1893_v60  ;;  %v1809_v60 = vld [vmem:[#allocation16 + $0x50] sm:$0xff] }
 0x9dc   : > { %v1771_v39 = vpop.xlane.xlu1 %1770 }
 0x9dd   : > { %v1772_v40 = vmul.f32 0.01, %v1771_v39  ;;  %v1839_v39 = vld [vmem:[#allocation16 + $0x140] sm:$0xff] }
 0x9df   : > { %v1773_v41 = vsub.f32 %v9297_v5, %v1772_v40  ;;  %v1887_v5 = vld [vmem:[#allocation16 + $0x2c0] sm:$0xff]  ;;  %v1840_v40 = vld [vmem:[#allocation16 + $0x148] sm:$0xff] }
 0x9e0   : > { %1990 = vmatpush.msrb.mxu0 %v1887_v5  ;;  %2018 = vmatpush.msrb.mxu1 %v1840_v40  ;;  %v1804_v5 = vld [vmem:[#allocation16 + $0x28] sm:$0xff] }
 0x9e1   : > { %v9303_v42 = vmul.f32 %v9111_v3, %v1773_v41  ;;  %v1807_v41 = vld [vmem:[#allocation16 + $0x40] sm:$0xff] }
 0x9e2   : > { %1991 = vmatpush.msrb.mxu0 %v1881_v8  ;;  %1963 = vmatpush.msra.mxu2 %v1807_v41 }
 0x9e3   : > { %v1775_v43 = vmul.f32 %v9303_v42, %v9303_v42  ;;  %2019 = vmatpush.msrb.mxu1 %v1834_v6 }
 0x9e4   : > { %1992 = vmatpush.msrb.mxu0 %v1875_v49  ;;  %1964 = vmatpush.msra.mxu2 %v1801_v47 }
 0x9e5   : > { %1776 = vadd.xlane.f32.xlu2 %v1775_v43  ;;  %v1808_v43 = vld [vmem:[#allocation16 + $0x48] sm:$0xff]  ;;  %2020 = vmatpush.msrb.mxu1 %v1828_v50 }
 0x9e6   : > { %1993 = vmatpush.msrb.mxu0 %v1869_v26  ;;  %1983 = vmatpush.msra.mxu3 %v1808_v43 }
 0x9e7   : > { %2021 = vmatpush.msrb.mxu1 %v1822_v52  ;;  %2393 = vmatpush.msrb.mxu2 %v2308_v14 }
 0x9e8   : > { %1994 = vmatpush.msrb.mxu0 %v1863_v17  ;;  %1984 = vmatpush.msra.mxu3 %v1802_v48  ;;  %v2306_v17 = vld [vmem:[#allocation19 + $0x68] sm:$0xff] }
 0x9e9   : > { %2022 = vmatpush.msrb.mxu1 %v1816_v55 }
 0x9ea   : > { %1995 = vmatpush.msrb.mxu0 %v1857_v24  ;;  %2413 = vmatpush.msrb.mxu3 %v2324_v16  ;;  %v9316_v24 = vld [vmem:[#allocation17] sm:$0x3f] }
 0x9eb   : > { %2023 = vmatpush.msrb.mxu1 %v1810_v62  ;;  %v1897_v25 = vperm.slane %v9316_v24, 0  ;;  %v1898_v28 = vperm.slane %v9316_v24, 1  ;;  %v1899_v36 = vperm.slane %v9316_v24, 2  ;;  %v1900_v37 = vperm.slane %v9316_v24, 3 }
 0x9ec   : > { %1996 = vmatpush.msrb.mxu0 %v1851_v32  ;;  %2414 = vmatpush.msrb.mxu3 %v2323_v15  ;;  %v1901_v40 = vperm.slane %v9316_v24, 4 }
 0x9ed   : > { %2024 = vmatpush.msrb.mxu1 %v1804_v5 }
 0x9ee   : > { %1997 = vmatpush.msrb.mxu0 %v1845_v35  ;;  %2415 = vmatpush.msrb.mxu3 %v2322_v21 }
 0x9f0   : > { %1998 = vmatpush.msrb.mxu0 %v1839_v39  ;;  %2416 = vmatpush.msrb.mxu3 %v2321_v23 }
 0x9f2   : > { %1999 = vmatpush.msrb.mxu0 %v1833_v45 }
 0x9f4   : > { %2000 = vmatpush.msrb.mxu0 %v1827_v46 }
 0x9f6   : > { %2001 = vmatpush.msrb.mxu0 %v1821_v58 }
 0x9f8   : > { %2002 = vmatpush.msrb.mxu0 %v1815_v54 }
 0x9fa   : > { %2003 = vmatpush.msrb.mxu0 %v1809_v60 }
 0x9fc   : > { %2004 = vmatpush.msrb.mxu0 %v1803_v0 }
 0xa58   : > { %v1777_v53 = vpop.xlane.xlu2 %1776 }
 0xa59   : > { %v1778_v57 = vmul.f32 0.01, %v1777_v53 }
 0xa5b   : > { %v1779_v1 = vadd.f32 1e-12, %v1778_v57 }
 0xa5d   : > { %7906 = vrsqrt.f32 %v1779_v1  ;;  %vm1786_vm2 = vweird.f32 %v1779_v1 }
 0xa63   : > { %v7907_v51 = vpop.eup %7906 }
 0xa64   : > { %v1781_v7 = vmul.f32 %v7907_v51, %v1779_v1  ;;  %vm1787_vm1 = vweird.f32 %v7907_v51 }
 0xa65   : > { %vm1788_vm3 = vmor %vm1786_vm2, %vm1787_vm1 }
 0xa66   : > { %v1782_v2 = vmul.f32 %v7907_v51, %v1781_v7 }
 0xa68   : > { %v1783_v8 = vmul.f32 0.5, %v1782_v2 }
 0xa6a   : > { %v1784_v9 = vsub.f32 1.5, %v1783_v8 }
 0xa6c   : > { %v1785_v10 = vmul.f32 %v7907_v51, %v1784_v9  ;;  %v2320_v9 = vld [vmem:[#allocation19 + $0xd8] sm:$0xff] }
 0xa6d   : > { %2417 = vmatpush.msrb.mxu3 %v2320_v9 }
 0xa6e   : > { %v1789_v49 = vsel %vm1788_vm3, %v7907_v51, %v1785_v10  ;;  %v2304_v51 = vld [vmem:[#allocation19 + $0x58] sm:$0xff] }
 0xa6f   : > { %v1790_v12 = vmul.f32 %v1789_v49, %v9303_v42  ;;  %v2307_v42 = vld [vmem:[#allocation19 + $0x70] sm:$0xff] }
 0xa70   : > { %2394 = vmatpush.msrb.mxu2 %v2307_v42 }
 0xa71   : > { %v1794_v13 = vmul.f32 %v7841_v20, %v1790_v12  ;;  %v2303_v12 = vld [vmem:[#allocation19 + $0x50] sm:$0xff] }
 0xa72   : > { %2395 = vmatpush.msrb.mxu2 %v2306_v17 }
 0xa73   : > { %v9308_v26 = vadd.f32 %v7842_v11, %v1794_v13  ;;  %v2319_v13 = vld [vmem:[#allocation19 + $0xd0] sm:$0xff] }
 0xa74   : > { %2396 = vmatpush.msrb.mxu2 %v2305_v22  ;;  %2418 = vmatpush.msrb.mxu3 %v2319_v13 }
 0xa75   : > { %1925 = vmatmul.f32.vlgmr.msra.gmra.mxu0 %v9308_v26  ;;  %1945 = vmatmul.f32.vlgmr.msra.gmra.mxu1 %v9308_v26 }
 0xa76   : > { %1965 = vmatmul.f32.vlgmr.msra.gmra.mxu2 %v9308_v26  ;;  %1985 = vmatmul.f32.vlgmr.msra.gmra.mxu3 %v9308_v26 }
 0xa77   : > { %2397 = vmatpush.msrb.mxu2 %v2304_v51  ;;  %v2316_v51 = vld [vmem:[#allocation19 + $0xb8] sm:$0xff] }
 0xa79   : > { %2398 = vmatpush.msrb.mxu2 %v2303_v12 }
 0xa7d   : > { %2005 = vmatmul.f32.vlgmr.msrb.gmra.mxu0 %v9308_v26  ;;  %2025 = vmatmul.f32.vlgmr.msrb.gmra.mxu1 %v9308_v26 }
 0xaf2   : > { %v1926_v30 = vpop.f32.mrf.mxu0  ;;  %v1946_v32 = vpop.f32.mrf.mxu1 }
 0xaf3   : > { %v9320_v31 = vadd.f32 %v1926_v30, %v1897_v25  ;;  %v9322_v33 = vadd.f32 %v1946_v32, %v1898_v28  ;;  %v2302_v30 = vld [vmem:[#allocation19 + $0x48] sm:$0xff] }
 0xaf4   : > { %v2318_v32 = vld [vmem:[#allocation19 + $0xc8] sm:$0xff]  ;;  %2399 = vmatpush.msrb.mxu2 %v2302_v30 }
 0xaf5   : > { %v9325_v34 = vmul.f32 0.70710677, %v9320_v31  ;;  %v9328_v35 = vmul.f32 0.70710677, %v9322_v33  ;;  %2419 = vmatpush.msrb.mxu3 %v2318_v32  ;;  %v2314_v30 = vld [vmem:[#allocation19 + $0xa8] sm:$0xff] }
 0xaf7   : > { %v2041_v38 = vmul.f32 %v9325_v34, %v9325_v34  ;;  %v2081_v39 = vmul.f32 %v9328_v35, %v9328_v35 }
 0xaf9   : > { %v9337_v41 = vmin.f32 %v2041_v38, 16.0  ;;  %v9339_v43 = vmin.f32 %v2081_v39, 16.0  ;;  %v1966_v45 = vpop.f32.mrf.mxu2  ;;  %v1986_v6 = vpop.f32.mrf.mxu3  ;;  %v2301_v39 = vld [vmem:[#allocation19 + $0x40] sm:$0xff] }
 0xafa   : > { %v9341_v47 = vadd.f32 %v1966_v45, %v1899_v36  ;;  %v9343_v48 = vadd.f32 %v1986_v6, %v1900_v37  ;;  %v2006_v46 = vpop.f32.mrf.mxu0  ;;  %2400 = vmatpush.msrb.mxu2 %v2301_v39 }
 0xafb   : > { %v2043_v50 = vmul.f32 2.1237322e-06, %v9337_v41  ;;  %v2054_v58 = vmul.f32 3.8918573e-05, %v9337_v41  ;;  %v2083_v52 = vmul.f32 2.1237322e-06, %v9339_v43  ;;  %v9352_v55 = vadd.f32 %v2006_v46, %v1901_v40 }
 0xafc   : > { %v2094_v53 = vmul.f32 3.8918573e-05, %v9339_v43  ;;  %v9350_v54 = vmul.f32 0.70710677, %v9341_v47  ;;  %v9357_v5 = vmul.f32 0.70710677, %v9343_v48 }
 0xafd   : > { %v2044_v57 = vadd.f32 0.00028619796, %v2043_v50  ;;  %v2055_v60 = vadd.f32 0.001143296, %v2054_v58  ;;  %v2084_v62 = vadd.f32 0.00028619796, %v2083_v52 }
 0xafe   : > { %v2095_v1 = vadd.f32 0.001143296, %v2094_v53  ;;  %v2121_v0 = vmul.f32 %v9350_v54, %v9350_v54  ;;  %v2161_v49 = vmul.f32 %v9357_v5, %v9357_v5  ;;  %v9368_v11 = vmul.f32 0.70710677, %v9352_v55  ;;  %v2317_v53 = vld [vmem:[#allocation19 + $0xc0] sm:$0xff] }
 0xaff   : > { %v2045_v7 = vmul.f32 %v2044_v57, %v9337_v41  ;;  %v2056_v2 = vmul.f32 %v2055_v60, %v9337_v41  ;;  %v2085_v8 = vmul.f32 %v2084_v62, %v9339_v43  ;;  %v2300_v57 = vld [vmem:[#allocation19 + $0x38] sm:$0xff]  ;;  %2420 = vmatpush.msrb.mxu3 %v2317_v53 }
 0xb00   : > { %v2096_v10 = vmul.f32 %v2095_v1, %v9339_v43  ;;  %v9363_v20 = vmin.f32 %v2121_v0, 16.0  ;;  %v9375_v28 = vmin.f32 %v2161_v49, 16.0  ;;  %2401 = vmatpush.msrb.mxu2 %v2300_v57 }
 0xb01   : > { %v2046_v14 = vadd.f32 0.0036580483, %v2045_v7  ;;  %v2057_v16 = vadd.f32 0.014752088, %v2056_v2  ;;  %v2086_v42 = vadd.f32 0.0036580483, %v2085_v8  ;;  %2421 = vmatpush.msrb.mxu3 %v2316_v51 }
 0xb02   : > { %v2097_v15 = vadd.f32 0.014752088, %v2096_v10  ;;  %v2123_v17 = vmul.f32 2.1237322e-06, %v9363_v20  ;;  %v2134_v21 = vmul.f32 3.8918573e-05, %v9363_v20 }
 0xb03   : > { %v2047_v22 = vmul.f32 %v2046_v14, %v9337_v41  ;;  %v2058_v23 = vmul.f32 %v2057_v16, %v9337_v41  ;;  %v2087_v25 = vmul.f32 %v2086_v42, %v9339_v43  ;;  %v2163_v52 = vmul.f32 2.1237322e-06, %v9375_v28  ;;  %v2299_v42 = vld [vmem:[#allocation19 + $0x30] sm:$0xff] }
 0xb04   : > { %v2098_v36 = vmul.f32 %v2097_v15, %v9339_v43  ;;  %v2124_v37 = vadd.f32 0.00028619796, %v2123_v17  ;;  %v2135_v38 = vadd.f32 0.001143296, %v2134_v21  ;;  %v2174_v0 = vmul.f32 3.8918573e-05, %v9375_v28  ;;  %2402 = vmatpush.msrb.mxu2 %v2299_v42 }
 0xb05   : > { %v2048_v40 = vadd.f32 0.05243302, %v2047_v22  ;;  %v2059_v45 = vadd.f32 0.112945676, %v2058_v23  ;;  %v2088_v6 = vadd.f32 0.05243302, %v2087_v25 }
 0xb06   : > { %v2099_v46 = vadd.f32 0.112945676, %v2098_v36  ;;  %v2125_v50 = vmul.f32 %v2124_v37, %v9363_v20  ;;  %v2136_v58 = vmul.f32 %v2135_v38, %v9363_v20  ;;  %v2164_v9 = vadd.f32 0.00028619796, %v2163_v52  ;;  %v2315_v15 = vld [vmem:[#allocation19 + $0xb0] sm:$0xff]  ;;  %v2298_v17 = vld [vmem:[#allocation19 + $0x28] sm:$0xff] }
 0xb07   : > { %v2049_v60 = vmul.f32 %v2048_v40, %v9337_v41  ;;  %v2060_v62 = vmul.f32 %v2059_v45, %v9337_v41  ;;  %v2089_v1 = vmul.f32 %v2088_v6, %v9339_v43  ;;  %v2175_v25 = vadd.f32 0.001143296, %v2174_v0  ;;  %2422 = vmatpush.msrb.mxu3 %v2315_v15  ;;  %2403 = vmatpush.msrb.mxu2 %v2298_v17  ;;  %v2312_v52 = vld [vmem:[#allocation19 + $0x98] sm:$0xff]  ;;  %v2293_v17 = vld [vmem:[#allocation19] sm:$0xff] }
 0xb08   : > { %v2100_v7 = vmul.f32 %v2099_v46, %v9339_v43  ;;  %v2126_v2 = vadd.f32 0.0036580483, %v2125_v50  ;;  %v2137_v8 = vadd.f32 0.014752088, %v2136_v58  ;;  %v2165_v23 = vmul.f32 %v2164_v9, %v9375_v28  ;;  %v2313_v50 = vld [vmem:[#allocation19 + $0xa0] sm:$0xff]  ;;  %v2296_v58 = vld [vmem:[#allocation19 + $0x18] sm:$0xff] }
 0xb09   : > { %v2050_v10 = vadd.f32 0.18741608, %v2049_v60  ;;  %v2061_v49 = vadd.f32 0.4994258, %v2060_v62  ;;  %v2090_v12 = vadd.f32 0.18741608, %v2089_v1  ;;  %v2201_v40 = vmul.f32 %v9368_v11, %v9368_v11  ;;  %2423 = vmatpush.msrb.mxu3 %v2314_v30  ;;  %v2026_v60 = vpop.f32.mrf.mxu1 }
 0xb0a   : > { %v2101_v13 = vadd.f32 0.4994258, %v2100_v7  ;;  %v2127_v14 = vmul.f32 %v2126_v2, %v9363_v20  ;;  %v2138_v16 = vmul.f32 %v2137_v8, %v9363_v20  ;;  %v1902_v46 = vperm.slane %v9316_v24, 5  ;;  %v2295_v62 = vld [vmem:[#allocation19 + $0x10] sm:$0xff]  ;;  %v2294_v8 = vld [vmem:[#allocation19 + $0x8] sm:$0xff] }
 0xb0b   : > { %v2051_v21 = vmul.f32 %v2050_v10, %v9337_v41  ;;  %v2062_v22 = vmul.f32 %v2061_v49, %v9337_v41  ;;  %v2091_v38 = vmul.f32 %v2090_v12, %v9339_v43  ;;  %v2297_v41 = vld [vmem:[#allocation19 + $0x20] sm:$0xff]  ;;  %v2176_v57 = vmul.f32 %v2175_v25, %v9375_v28  ;;  %2424 = vmatpush.msrb.mxu3 %v2313_v50  ;;  %v2311_v1 = vld [vmem:[#allocation19 + $0x90] sm:$0xff] }
 0xb0c   : > { %v2102_v32 = vmul.f32 %v2101_v13, %v9339_v43  ;;  %v2139_v36 = vadd.f32 0.112945676, %v2138_v16  ;;  %v2128_v39 = vadd.f32 0.05243302, %v2127_v14  ;;  %v2166_v43 = vadd.f32 0.0036580483, %v2165_v23  ;;  %2404 = vmatpush.msrb.mxu2 %v2297_v41 }
 0xb0d   : > { %v9392_v37 = vadd.f32 1.0, %v2062_v22  ;;  %v2052_v53 = vadd.f32 1.1283791, %v2051_v21  ;;  %v2092_v0 = vadd.f32 1.1283791, %v2091_v38  ;;  %v9405_v24 = vmin.f32 %v2201_v40, 16.0  ;;  %2425 = vmatpush.msrb.mxu3 %v2312_v52 }
 0xb0e   : > { %v9397_v45 = vadd.f32 1.0, %v2102_v32  ;;  %v2140_v6 = vmul.f32 %v2139_v36, %v9363_v20  ;;  %v2129_v51 = vmul.f32 %v2128_v39, %v9363_v20  ;;  %2405 = vmatpush.msrb.mxu2 %v2296_v58  ;;  %v9407_v2 = vadd.f32 %v2026_v60, %v1902_v46  ;;  %v2310_v13 = vld [vmem:[#allocation19 + $0x88] sm:$0xff]  ;;  %v2340_v14 = vld [vmem:[#allocation19 + $0x178] sm:$0xff]  ;;  %v2309_v32 = vld [vmem:[#allocation19 + $0x80] sm:$0xff] }
 0xb0f   : > { %7908 = vrcp.f32 %v9392_v37  ;;  %v9410_v9 = vmul.f32 %v2052_v53, %v9325_v34  ;;  %v2073_v10 = vand.u32 2147483647, %v9392_v37  ;;  %v2167_v49 = vmul.f32 %v2166_v43, %v9375_v28  ;;  %2426 = vmatpush.msrb.mxu3 %v2311_v1  ;;  %2433 = vmatpush.msra.mxu0 %v2340_v14  ;;  %v2356_v34 = vld [vmem:[#allocation19 + $0x1f8] sm:$0xff]  ;;  %v2339_v36 = vld [vmem:[#allocation19 + $0x170] sm:$0xff]  ;;  %v2338_v43 = vld [vmem:[#allocation19 + $0x168] sm:$0xff] }
 0xb10   : > { %7910 = vrcp.f32 %v9397_v45  ;;  %v2141_v7 = vadd.f32 0.4994258, %v2140_v6  ;;  %v2177_v12 = vadd.f32 0.014752088, %v2176_v57  ;;  %2406 = vmatpush.msrb.mxu2 %v2295_v62  ;;  %vm2069_vm4 = vweird.f32 %v9392_v37  ;;  %2453 = vmatpush.msra.mxu1 %v2356_v34  ;;  %v2355_v41 = vld [vmem:[#allocation19 + $0x1f0] sm:$0xff]  ;;  %v2372_v6 = vld [vmem:[#allocation19 + $0x278] sm:$0xff] }
 0xb11   : > { %v2075_v16 = vand.u32 2147483648, %v9392_v37  ;;  %v2113_v42 = vand.u32 2147483647, %v9397_v45  ;;  %v9421_v22 = vmul.f32 %v2092_v0, %v9328_v35  ;;  %v2130_v23 = vadd.f32 0.18741608, %v2129_v51  ;;  %2427 = vmatpush.msrb.mxu3 %v2310_v13  ;;  %2434 = vmatpush.msra.mxu0 %v2339_v36  ;;  %v2388_v46 = vld [vmem:[#allocation19 + $0x2f8] sm:$0xff] }
 0xb12   : > { %v2142_v15 = vmul.f32 %v2141_v7, %v9363_v20  ;;  %v2178_v25 = vmul.f32 %v2177_v12, %v9375_v28  ;;  %v2203_v30 = vmul.f32 2.1237322e-06, %v9405_v24  ;;  %2407 = vmatpush.msrb.mxu2 %v2294_v8  ;;  %vm2109_vm5 = vweird.f32 %v9397_v45  ;;  %v2354_v57 = vld [vmem:[#allocation19 + $0x1e8] sm:$0xff]  ;;  %2454 = vmatpush.msra.mxu1 %v2355_v41  ;;  %v2371_v0 = vld [vmem:[#allocation19 + $0x270] sm:$0xff]  ;;  %v2337_v13 = vld [vmem:[#allocation19 + $0x160] sm:$0xff] }
 0xb13   : > { %v2214_v35 = vmul.f32 3.8918573e-05, %v9405_v24  ;;  %vm9433_vm6 = vcmp.eq.f32.partialorder %v2073_v10, 8.507059e+37  ;;  %v2115_v52 = vand.u32 2147483648, %v9397_v45  ;;  %2428 = vmatpush.msrb.mxu3 %v2309_v32  ;;  %v2076_v62 = vor.u32 1.1754944e-38, %v2075_v16  ;;  %v2387_v51 = vld [vmem:[#allocation19 + $0x2f0] sm:$0xff]  ;;  %2435 = vmatpush.msra.mxu0 %v2338_v43 }
 0xb14   : > { %v9430_v40 = vadd.f32 1.0, %v2142_v15  ;;  %v2179_v53 = vadd.f32 0.112945676, %v2178_v25  ;;  %2408 = vmatpush.msrb.mxu2 %v2293_v17  ;;  %v9442_v1 = vmul.f32 0.70710677, %v9407_v2  ;;  %v2131_v8 = vmul.f32 %v2130_v23, %v9363_v20  ;;  %v2353_v14 = vld [vmem:[#allocation19 + $0x1e0] sm:$0xff]  ;;  %2455 = vmatpush.msra.mxu1 %v2354_v57 }
 0xb15   : > { %v9418_v21 = vpop.eup %7908  ;;  %v2168_v10 = vadd.f32 0.05243302, %v2167_v49  ;;  %2493 = vmatpush.msra.mxu3 %v2388_v46  ;;  %v2204_v15 = vadd.f32 0.00028619796, %v2203_v30  ;;  %v2215_v34 = vadd.f32 0.001143296, %v2214_v35  ;;  %2436 = vmatpush.msra.mxu0 %v2337_v13 }
 0xb16   : > { %v9425_v38 = vpop.eup %7910  ;;  %v2065_v39 = vmul.f32 %v9418_v21, %v9392_v37  ;;  %7912 = vrcp.f32 %v9430_v40  ;;  %2473 = vmatpush.msra.mxu2 %v2372_v6  ;;  %v2180_v12 = vmul.f32 %v2179_v53, %v9375_v28  ;;  %vm2070_vm7 = vweird.f32 %v9418_v21  ;;  %v2370_v17 = vld [vmem:[#allocation19 + $0x268] sm:$0xff]  ;;  %v2336_v23 = vld [vmem:[#allocation19 + $0x158] sm:$0xff]  ;;  %2456 = vmatpush.msra.mxu1 %v2353_v14  ;;  %v2369_v6 = vld [vmem:[#allocation19 + $0x260] sm:$0xff] }
 0xb17   : > { %v2105_v58 = vmul.f32 %v9425_v38, %v9397_v45  ;;  %v2386_v25 = vld [vmem:[#allocation19 + $0x2e8] sm:$0xff]  ;;  %vm2110_vm8 = vweird.f32 %v9425_v38  ;;  %vm9450_vm9 = vcmp.eq.f32.partialorder %v2113_v42, 8.507059e+37  ;;  %2494 = vmatpush.msra.mxu3 %v2387_v51  ;;  %v2205_v30 = vmul.f32 %v2204_v15, %v9405_v24  ;;  %v2352_v41 = vld [vmem:[#allocation19 + $0x1d8] sm:$0xff]  ;;  %v2385_v42 = vld [vmem:[#allocation19 + $0x2e0] sm:$0xff]  ;;  %2437 = vmatpush.msra.mxu0 %v2336_v23 }
 0xb18   : > { %v2066_v60 = vsub.f32 1.0, %v2065_v39  ;;  %2474 = vmatpush.msra.mxu2 %v2371_v0  ;;  %v2181_v49 = vadd.f32 0.4994258, %v2180_v12  ;;  %v2216_v39 = vmul.f32 %v2215_v34, %v9405_v24  ;;  %v2241_v35 = vmul.f32 %v9442_v1, %v9442_v1  ;;  %vm9463_vm10 = vmor %vm2069_vm4, %vm2070_vm7  ;;  %v2351_v0 = vld [vmem:[#allocation19 + $0x1d0] sm:$0xff]  ;;  %2457 = vmatpush.msra.mxu1 %v2352_v41  ;;  %v2368_v13 = vld [vmem:[#allocation19 + $0x258] sm:$0xff] }
 0xb19   : > { %v2106_v7 = vsub.f32 1.0, %v2105_v58  ;;  %v2116_v53 = vor.u32 1.1754944e-38, %v2115_v52  ;;  %v9468_v43 = vadd.f32 1.1283791, %v2131_v8  ;;  %2495 = vmatpush.msra.mxu3 %v2386_v25  ;;  %vm9480_vm11 = vmor %vm2109_vm5, %vm2110_vm8  ;;  %v2384_v14 = vld [vmem:[#allocation19 + $0x2d8] sm:$0xff]  ;;  %v2350_v34 = vld [vmem:[#allocation19 + $0x1c8] sm:$0xff]  ;;  %vm2149_vm14 = vweird.f32 %v9430_v40 }
 0xb1a   : > { %v2067_v16 = vmul.f32 %v9418_v21, %v2066_v60  ;;  %v2182_v57 = vmul.f32 %v2181_v49, %v9375_v28  ;;  %2475 = vmatpush.msra.mxu2 %v2370_v17  ;;  %v2335_v60 = vld [vmem:[#allocation19 + $0x150] sm:$0xff]  ;;  %v2217_v8 = vadd.f32 0.014752088, %v2216_v39  ;;  %v9485_v12 = vmin.f32 %v2241_v35, 16.0  ;;  %2458 = vmatpush.msra.mxu1 %v2351_v0  ;;  %v2349_v20 = vld [vmem:[#allocation19 + $0x1c0] sm:$0xff]  ;;  %v2366_v35 = vld [vmem:[#allocation19 + $0x248] sm:$0xff] }
 0xb1b   : > { %v2107_v32 = vmul.f32 %v9425_v38, %v2106_v7  ;;  %v2169_v7 = vmul.f32 %v2168_v10, %v9375_v28  ;;  %v2206_v15 = vadd.f32 0.0036580483, %v2205_v30  ;;  %2496 = vmatpush.msra.mxu3 %v2385_v42  ;;  %v2334_v10 = vld [vmem:[#allocation19 + $0x148] sm:$0xff]  ;;  %2438 = vmatpush.msra.mxu0 %v2335_v60  ;;  %v2155_v30 = vand.u32 2147483648, %v9430_v40  ;;  %v2332_v46 = vld [vmem:[#allocation19 + $0x138] sm:$0xff]  ;;  %v2365_v52 = vld [vmem:[#allocation19 + $0x240] sm:$0xff] }
 0xb1c   : > { %v2068_v36 = vadd.f32 %v9418_v21, %v2067_v16  ;;  %v9471_v51 = vpop.eup %7912  ;;  %2476 = vmatpush.msra.mxu2 %v2369_v6  ;;  %v9498_v50 = vadd.f32 1.0, %v2182_v57  ;;  %v2218_v23 = vmul.f32 %v2217_v8, %v9405_v24  ;;  %2459 = vmatpush.msra.mxu1 %v2350_v34  ;;  %v2382_v41 = vld [vmem:[#allocation19 + $0x2c8] sm:$0xff]  ;;  %v2153_v6 = vand.u32 2147483647, %v9430_v40  ;;  %v2331_v8 = vld [vmem:[#allocation19 + $0x130] sm:$0xff] }
 0xb1d   : > { %v2108_v58 = vadd.f32 %v9425_v38, %v2107_v32  ;;  %v2145_v16 = vmul.f32 %v9471_v51, %v9430_v40  ;;  %vm2150_vm12 = vweird.f32 %v9471_v51  ;;  %2497 = vmatpush.msra.mxu3 %v2384_v14  ;;  %v2170_v39 = vadd.f32 0.18741608, %v2169_v7  ;;  %2439 = vmatpush.msra.mxu0 %v2334_v10  ;;  %v2381_v7 = vld [vmem:[#allocation19 + $0x2c0] sm:$0xff]  ;;  %v2380_v10 = vld [vmem:[#allocation19 + $0x2b8] sm:$0xff] }
 0xb1e   : > { %v2072_v37 = vsel %vm9463_vm10, %v9418_v21, %v2068_v36  ;;  %v2243_v36 = vmul.f32 2.1237322e-06, %v9485_v12  ;;  %2477 = vmatpush.msra.mxu2 %v2368_v13  ;;  %7914 = vrcp.f32 %v9498_v50  ;;  %v2207_v42 = vmul.f32 %v2206_v15, %v9405_v24  ;;  %vm9511_vm15 = vmor %vm2149_vm14, %vm2150_vm12  ;;  %2460 = vmatpush.msra.mxu1 %v2349_v20  ;;  %v2364_v15 = vld [vmem:[#allocation19 + $0x238] sm:$0xff] }
 0xb1f   : > { %v2077_v21 = vsel %vm9433_vm6, %v2076_v62, %v2072_v37  ;;  %v2112_v45 = vsel %vm9480_vm11, %v9425_v38, %v2108_v58  ;;  %v2367_v38 = vld [vmem:[#allocation19 + $0x250] sm:$0xff]  ;;  %v2146_v49 = vsub.f32 1.0, %v2145_v16  ;;  %v2348_v58 = vld [vmem:[#allocation19 + $0x1b8] sm:$0xff]  ;;  %v2219_v60 = vadd.f32 0.112945676, %v2218_v23 }
 0xb20   : > { %v2078_v17 = vmul.f32 %v2077_v21, %v9410_v9  ;;  %v2117_v25 = vsel %vm9450_vm9, %v2116_v53, %v2112_v45  ;;  %v2383_v62 = vld [vmem:[#allocation19 + $0x2d0] sm:$0xff]  ;;  %v2333_v9 = vld [vmem:[#allocation19 + $0x140] sm:$0xff]  ;;  %2478 = vmatpush.msra.mxu2 %v2367_v38  ;;  %v2244_v40 = vadd.f32 0.00028619796, %v2243_v36  ;;  %v2156_v13 = vor.u32 1.1754944e-38, %v2155_v30  ;;  %2461 = vmatpush.msra.mxu1 %v2348_v58  ;;  %v2346_v38 = vld [vmem:[#allocation19 + $0x1a8] sm:$0xff] }
 0xb21   : > { %v2118_v32 = vmul.f32 %v2117_v25, %v9421_v22  ;;  %v2147_v22 = vmul.f32 %v9471_v51, %v2146_v49  ;;  %2498 = vmatpush.msra.mxu3 %v2383_v62  ;;  %2440 = vmatpush.msra.mxu0 %v2333_v9  ;;  %v2171_v14 = vmul.f32 %v2170_v39, %v9375_v28  ;;  %v2254_v45 = vmul.f32 3.8918573e-05, %v9485_v12  ;;  %v2347_v16 = vld [vmem:[#allocation19 + $0x1b0] sm:$0xff]  ;;  %v2330_v28 = vld [vmem:[#allocation19 + $0x128] sm:$0xff]  ;;  %v2329_v39 = vld [vmem:[#allocation19 + $0x120] sm:$0xff] }
 0xb22   : > { %v7549_v53 = vclamps-f32 %v2078_v17, 1.0  ;;  %2479 = vmatpush.msra.mxu2 %v2366_v35  ;;  %v2220_v21 = vmul.f32 %v2219_v60, %v9405_v24  ;;  %v2133_v34 = vmul.f32 %v9468_v43, %v9350_v54  ;;  %vm2154_vm0 = vcmp.eq.f32.partialorder %v2153_v6, 8.507059e+37  ;;  %2462 = vmatpush.msra.mxu1 %v2347_v16  ;;  %v2363_v9 = vld [vmem:[#allocation19 + $0x230] sm:$0xff]  ;;  %v2345_v35 = vld [vmem:[#allocation19 + $0x1a0] sm:$0xff] }
 0xb23   : > { %v7550_v0 = vclamps-f32 %v2118_v32, 1.0  ;;  %v2148_v37 = vadd.f32 %v9471_v51, %v2147_v22  ;;  %2499 = vmatpush.msra.mxu3 %v2382_v41  ;;  %2441 = vmatpush.msra.mxu0 %v2332_v46  ;;  %v2208_v25 = vadd.f32 0.05243302, %v2207_v42  ;;  %v2255_v36 = vadd.f32 0.001143296, %v2254_v45  ;;  %v2379_v30 = vld [vmem:[#allocation19 + $0x2b0] sm:$0xff] }
 0xb24   : > { %2480 = vmatpush.msra.mxu2 %v2365_v52  ;;  %v9524_v62 = vpop.eup %7914  ;;  %v2281_v32 = vadd.f32 1.0, %v7549_v53  ;;  %v2221_v23 = vadd.f32 0.4994258, %v2220_v21  ;;  %v2029_v54 = vmul.f32 0.5, %v9320_v31  ;;  %v2172_v41 = vadd.f32 1.1283791, %v2171_v14  ;;  %2463 = vmatpush.msra.mxu1 %v2346_v38 }
 0xb25   : > { %v2152_v17 = vsel %vm9511_vm15, %v9471_v51, %v2148_v37  ;;  %2500 = vmatpush.msra.mxu3 %v2381_v7  ;;  %2442 = vmatpush.msra.mxu0 %v2331_v8  ;;  %v2282_v43 = vadd.f32 1.0, %v7550_v0  ;;  %v2185_v51 = vmul.f32 %v9524_v62, %v9498_v50  ;;  %v2245_v6 = vmul.f32 %v2244_v40, %v9485_v12  ;;  %v2362_v31 = vld [vmem:[#allocation19 + $0x228] sm:$0xff]  ;;  %v2328_v0 = vld [vmem:[#allocation19 + $0x118] sm:$0xff]  ;;  %v2377_v45 = vld [vmem:[#allocation19 + $0x2a0] sm:$0xff] }
 0xb26   : > { %v2157_v49 = vsel %vm2154_vm0, %v2156_v13, %v2152_v17  ;;  %2481 = vmatpush.msra.mxu2 %v2364_v15  ;;  %v2222_v22 = vmul.f32 %v2221_v23, %v9405_v24  ;;  %v2256_v42 = vmul.f32 %v2255_v36, %v9485_v12  ;;  %v2378_v46 = vld [vmem:[#allocation19 + $0x2a8] sm:$0xff]  ;;  %v2030_v58 = vmul.f32 0.5, %v9322_v33  ;;  %v2344_v37 = vld [vmem:[#allocation19 + $0x198] sm:$0xff]  ;;  %2464 = vmatpush.msra.mxu1 %v2345_v35  ;;  %v2361_v13 = vld [vmem:[#allocation19 + $0x220] sm:$0xff] }
 0xb27   : > { %v2158_v20 = vmul.f32 %v2157_v49, %v2133_v34  ;;  %2501 = vmatpush.msra.mxu3 %v2380_v10  ;;  %2443 = vmatpush.msra.mxu0 %v2330_v28  ;;  %v2186_v57 = vsub.f32 1.0, %v2185_v51  ;;  %v2195_v60 = vand.u32 2147483648, %v9498_v50  ;;  %v2287_v52 = vmul.f32 %v2281_v32, %v2029_v54  ;;  %v2327_v15 = vld [vmem:[#allocation19 + $0x110] sm:$0xff]  ;;  %v2360_v28 = vld [vmem:[#allocation19 + $0x218] sm:$0xff]  ;;  %v2325_v35 = vld [vmem:[#allocation19 + $0x100] sm:$0xff] }
 0xb28   : > { %2482 = vmatpush.msra.mxu2 %v2363_v9  ;;  %v2209_v7 = vmul.f32 %v2208_v25, %v9405_v24  ;;  %v9535_v40 = vadd.f32 1.0, %v2222_v22  ;;  %v2257_v8 = vadd.f32 0.014752088, %v2256_v42  ;;  %v2288_v14 = vmul.f32 %v2282_v43, %v2030_v58  ;;  %2465 = vmatpush.msra.mxu1 %v2344_v37  ;;  %v2343_v25 = vld [vmem:[#allocation19 + $0x190] sm:$0xff]  ;;  %v2376_v36 = vld [vmem:[#allocation19 + $0x298] sm:$0xff]  ;;  %v2326_v9 = vld [vmem:[#allocation19 + $0x108] sm:$0xff] }
 0xb29   : > { %v7551_v53 = vclamps-f32 %v2158_v20, 1.0  ;;  %2502 = vmatpush.msra.mxu3 %v2379_v30  ;;  %2444 = vmatpush.msra.mxu0 %v2329_v39  ;;  %v2187_v33 = vmul.f32 %v9524_v62, %v2186_v57  ;;  %vm2190_vm1 = vweird.f32 %v9524_v62  ;;  %v2193_v21 = vand.u32 2147483647, %v9498_v50  ;;  %v2342_v43 = vld [vmem:[#allocation19 + $0x188] sm:$0xff]  ;;  %v2359_v20 = vld [vmem:[#allocation19 + $0x210] sm:$0xff]  ;;  %v2357_v57 = vld [vmem:[#allocation19 + $0x200] sm:$0xff] }
 0xb2a   : > { %2483 = vmatpush.msra.mxu2 %v2362_v31  ;;  %7916 = vrcp.f32 %v9535_v40  ;;  %v2246_v16 = vadd.f32 0.0036580483, %v2245_v6  ;;  %vm2189_vm2 = vweird.f32 %v9498_v50  ;;  %v2258_v17 = vmul.f32 %v2257_v8, %v9485_v12  ;;  %2429 = vmatmul.f32.vlgmr.msrb.gmra.mxu3 %v2288_v14  ;;  %v2375_v39 = vld [vmem:[#allocation19 + $0x290] sm:$0xff] }
 0xb2b   : > { %2503 = vmatpush.msra.mxu3 %v2378_v46  ;;  %2445 = vmatpush.msra.mxu0 %v2328_v0  ;;  %v2283_v10 = vadd.f32 1.0, %v7551_v53  ;;  %v2188_v34 = vadd.f32 %v9524_v62, %v2187_v33  ;;  %v2031_v38 = vmul.f32 0.5, %v9341_v47  ;;  %vm9547_vm3 = vmor %vm2189_vm2, %vm2190_vm1  ;;  %v2196_v49 = vor.u32 1.1754944e-38, %v2195_v60  ;;  %v2374_v46 = vld [vmem:[#allocation19 + $0x288] sm:$0xff]  ;;  %v2373_v0 = vld [vmem:[#allocation19 + $0x280] sm:$0xff] }
 0xb2c   : > { %2484 = vmatpush.msra.mxu2 %v2361_v13  ;;  %v2210_v23 = vadd.f32 0.18741608, %v2209_v7  ;;  %v2173_v50 = vmul.f32 %v2172_v41, %v9357_v5  ;;  %vm2194_vm4 = vcmp.eq.f32.partialorder %v2193_v21, 8.507059e+37  ;;  %v2259_v47 = vadd.f32 0.112945676, %v2258_v17  ;;  %2466 = vmatpush.msra.mxu1 %v2343_v25  ;;  %v2358_v41 = vld [vmem:[#allocation19 + $0x208] sm:$0xff] }
 0xb2d   : > { %2504 = vmatpush.msra.mxu3 %v2377_v45  ;;  %2409 = vmatmul.f32.vlgmr.msrb.gmra.mxu2 %v2287_v52  ;;  %v2192_v54 = vsel %vm9547_vm3, %v9524_v62, %v2188_v34  ;;  %v2247_v30 = vmul.f32 %v2246_v16, %v9485_v12  ;;  %v2289_v22 = vmul.f32 %v2283_v10, %v2031_v38  ;;  %v2341_v62 = vld [vmem:[#allocation19 + $0x180] sm:$0xff]  ;;  %v2032_v37 = vmul.f32 0.5, %v9343_v48 }
 0xb2e   : > { %2446 = vmatpush.msra.mxu0 %v2327_v15  ;;  %v2197_v51 = vsel %vm2194_vm4, %v2196_v49, %v2192_v54  ;;  %2485 = vmatpush.msra.mxu2 %v2360_v28  ;;  %v2260_v5 = vmul.f32 %v2259_v47, %v9485_v12  ;;  %v2211_v31 = vmul.f32 %v2210_v23, %v9405_v24  ;;  %v2235_v13 = vand.u32 2147483648, %v9535_v40 }
 0xb2f   : > { %v2198_v6 = vmul.f32 %v2197_v51, %v2173_v50  ;;  %2505 = vmatpush.msra.mxu3 %v2376_v36  ;;  %2467 = vmatpush.msra.mxu1 %v2342_v43  ;;  %v2248_v8 = vadd.f32 0.05243302, %v2247_v30  ;;  %v2233_v45 = vand.u32 2147483647, %v9535_v40  ;;  %vm2229_vm6 = vweird.f32 %v9535_v40 }
 0xb30   : > { %2447 = vmatpush.msra.mxu0 %v2326_v9  ;;  %v7917_v42 = vpop.eup %7916  ;;  %2486 = vmatpush.msra.mxu2 %v2359_v20  ;;  %v2261_v60 = vadd.f32 0.4994258, %v2260_v5  ;;  %v2212_v24 = vadd.f32 1.1283791, %v2211_v31  ;;  %v2236_v10 = vor.u32 1.1754944e-38, %v2235_v13  ;;  %v2033_v23 = vmul.f32 0.5, %v9352_v55 }
 0xb31   : > { %v7552_v58 = vclamps-f32 %v2198_v6, 1.0  ;;  %v2225_v53 = vmul.f32 %v7917_v42, %v9535_v40  ;;  %2506 = vmatpush.msra.mxu3 %v2375_v39  ;;  %2468 = vmatpush.msra.mxu1 %v2341_v62  ;;  %vm2230_vm5 = vweird.f32 %v7917_v42  ;;  %v2249_v48 = vmul.f32 %v2248_v8, %v9485_v12  ;;  %v2593_v13 = vld [vmem:[#allocation7 + $0x2f0] sm:$0xff] }
 0xb32   : > { %2448 = vmatpush.msra.mxu0 %v2325_v35  ;;  %2487 = vmatpush.msra.mxu2 %v2358_v41  ;;  %v2262_v14 = vmul.f32 %v2261_v60, %v9485_v12  ;;  %vm2231_vm7 = vmor %vm2229_vm6, %vm2230_vm5  ;;  %v2213_v34 = vmul.f32 %v2212_v24, %v9368_v11  ;;  %vm2234_vm8 = vcmp.eq.f32.partialorder %v2233_v45, 8.507059e+37  ;;  %v2034_v6 = vmul.f32 0.5, %v9407_v2  ;;  %v7843_v41 = vld [vmem:[#allocation20] ss:$0 sm:$0xff]  ;;  %v2592_v24 = vld [vmem:[#allocation7 + $0x2e8] sm:$0xff] }
 0xb33   : > { %v2284_v52 = vadd.f32 1.0, %v7552_v58  ;;  %v2226_v7 = vsub.f32 1.0, %v2225_v53  ;;  %2507 = vmatpush.msra.mxu3 %v2374_v46  ;;  %2449 = vmatmul.f32.vlgmr.msra.gmra.mxu0 %v2289_v22  ;;  %v2250_v38 = vadd.f32 0.18741608, %v2249_v48  ;;  %v2591_v45 = vld [vmem:[#allocation7 + $0x2e0] sm:$0xff] }
 0xb34   : > { %2488 = vmatpush.msra.mxu2 %v2357_v57  ;;  %v2263_v16 = vadd.f32 1.0, %v2262_v14  ;;  %v2594_v14 = vld [vmem:[#allocation7 + $0x2f8] sm:$0xff]  ;;  %2604 = vmatpush.msrb.mxu0 %v2592_v24 }
 0xb35   : > { %v2290_v33 = vmul.f32 %v2284_v52, %v2032_v37  ;;  %v2227_v21 = vmul.f32 %v7917_v42, %v2226_v7  ;;  %2508 = vmatpush.msra.mxu3 %v2373_v0  ;;  %v2251_v40 = vmul.f32 %v2250_v38, %v9485_v12  ;;  %2624 = vmatpush.msrb.mxu1 %v2593_v13  ;;  %v2584_v38 = vld [vmem:[#allocation7 + $0x2a8] sm:$0xff] }
 0xb36   : > { %7918 = vrcp.f32 %v2263_v16  ;;  %v2275_v47 = vand.u32 2147483648, %v2263_v16  ;;  %v2273_v11 = vand.u32 2147483647, %v2263_v16  ;;  %vm2269_vm10 = vweird.f32 %v2263_v16  ;;  %2644 = vmatpush.msrb.mxu2 %v2594_v14 }
 0xb37   : > { %v2228_v15 = vadd.f32 %v7917_v42, %v2227_v21  ;;  %2469 = vmatmul.f32.vlgmr.msra.gmra.mxu1 %v2290_v33  ;;  %v2252_v43 = vadd.f32 1.1283791, %v2251_v40  ;;  %v2589_v33 = vld [vmem:[#allocation7 + $0x2d0] sm:$0xff]  ;;  %v2590_v21 = vld [vmem:[#allocation7 + $0x2d8] sm:$0xff] }
 0xb38   : > { %v2276_v30 = vor.u32 1.1754944e-38, %v2275_v47  ;;  %vm2274_vm12 = vcmp.eq.f32.partialorder %v2273_v11, 8.507059e+37  ;;  %2605 = vmatpush.msrb.mxu0 %v2589_v33  ;;  %2625 = vmatpush.msrb.mxu1 %v2590_v21  ;;  %v2577_v40 = vld [vmem:[#allocation7 + $0x270] sm:$0xff]  ;;  %v2575_v47 = vld [vmem:[#allocation7 + $0x260] sm:$0xff]  ;;  %v2572_v11 = vld [vmem:[#allocation7 + $0x248] sm:$0xff] }
 0xb39   : > { %v2232_v17 = vsel %vm2231_vm7, %v7917_v42, %v2228_v15  ;;  %v2253_v39 = vmul.f32 %v2252_v43, %v9442_v1  ;;  %2645 = vmatpush.msrb.mxu2 %v2591_v45  ;;  %v2576_v43 = vld [vmem:[#allocation7 + $0x268] sm:$0xff] }
 0xb3a   : > { %v2237_v25 = vsel %vm2234_vm8, %v2236_v10, %v2232_v17  ;;  %v2587_v17 = vld [vmem:[#allocation7 + $0x2c0] sm:$0xff] }
 0xb3b   : > { %v2238_v28 = vmul.f32 %v2237_v25, %v2213_v34  ;;  %v2586_v34 = vld [vmem:[#allocation7 + $0x2b8] sm:$0xff]  ;;  %v2588_v25 = vld [vmem:[#allocation7 + $0x2c8] sm:$0xff]  ;;  %2626 = vmatpush.msrb.mxu1 %v2587_v17 }
 0xb3c   : > { %v7919_v49 = vpop.eup %7918  ;;  %2606 = vmatpush.msrb.mxu0 %v2586_v34  ;;  %2646 = vmatpush.msrb.mxu2 %v2588_v25  ;;  %v7845_v25 = vld [vmem:[#allocation23] ss:$0 sm:$0xff] }
 0xb3d   : > { %v7553_v32 = vclamps-f32 %v2238_v28, 1.0  ;;  %v2265_v9 = vmul.f32 %v7919_v49, %v2263_v16  ;;  %vm2270_vm9 = vweird.f32 %v7919_v49  ;;  %v2583_v28 = vld [vmem:[#allocation7 + $0x2a0] sm:$0xff]  ;;  %2627 = vmatpush.msrb.mxu1 %v2584_v38 }
 0xb3e   : > { %vm2271_vm11 = vmor %vm2269_vm10, %vm2270_vm9  ;;  %2607 = vmatpush.msrb.mxu0 %v2583_v28 }
 0xb3f   : > { %v2285_v36 = vadd.f32 1.0, %v7553_v32  ;;  %v2266_v54 = vsub.f32 1.0, %v2265_v9  ;;  %v2585_v32 = vld [vmem:[#allocation7 + $0x2b0] sm:$0xff]  ;;  %v2578_v9 = vld [vmem:[#allocation7 + $0x278] sm:$0xff] }
 0xb40   : > { %2647 = vmatpush.msrb.mxu2 %v2585_v32  ;;  %v2596_v32 = vld [vmem:[#allocation8 + $0x3] sm:$0x7] }
 0xb41   : > { %v2291_v50 = vmul.f32 %v2285_v36, %v2033_v23  ;;  %v2267_v20 = vmul.f32 %v7919_v49, %v2266_v54  ;;  %v2581_v23 = vld [vmem:[#allocation7 + $0x290] sm:$0xff]  ;;  %v2582_v36 = vld [vmem:[#allocation7 + $0x298] sm:$0xff] }
 0xb42   : > { %2628 = vmatpush.msrb.mxu1 %v2581_v23  ;;  %2648 = vmatpush.msrb.mxu2 %v2582_v36  ;;  %v2574_v54 = vld [vmem:[#allocation7 + $0x258] sm:$0xff]  ;;  %v2599_v23 = vperm.slane %v2596_v32, 1 }
 0xb43   : > { %2489 = vmatmul.f32.vlgmr.msra.gmra.mxu2 %v2291_v50  ;;  %v2268_v51 = vadd.f32 %v7919_v49, %v2267_v20  ;;  %v2579_v50 = vld [vmem:[#allocation7 + $0x280] sm:$0xff] }
 0xb44   : > { %2629 = vmatpush.msrb.mxu1 %v2578_v9  ;;  %2649 = vmatpush.msrb.mxu2 %v2579_v50  ;;  %v2571_v20 = vld [vmem:[#allocation7 + $0x240] sm:$0xff] }
 0xb45   : > { %v2272_v35 = vsel %vm2271_vm11, %v7919_v49, %v2268_v51  ;;  %v2580_v49 = vld [vmem:[#allocation7 + $0x288] sm:$0xff]  ;;  %v2573_v51 = vld [vmem:[#allocation7 + $0x250] sm:$0xff] }
 0xb46   : > { %v2277_v55 = vsel %vm2274_vm12, %v2276_v30, %v2272_v35  ;;  %2608 = vmatpush.msrb.mxu0 %v2580_v49  ;;  %2630 = vmatpush.msrb.mxu1 %v2575_v47  ;;  %v2568_v30 = vld [vmem:[#allocation7 + $0x228] sm:$0xff]  ;;  %v2570_v35 = vld [vmem:[#allocation7 + $0x238] sm:$0xff]  ;;  %v2598_v49 = vperm.slane %v2596_v32, 0  ;;  %v2600_v47 = vperm.slane %v2596_v32, 2 }
 0xb47   : > { %v2278_v22 = vmul.f32 %v2277_v55, %v2253_v39  ;;  %2650 = vmatpush.msrb.mxu2 %v2576_v43  ;;  %v2569_v39 = vld [vmem:[#allocation7 + $0x230] sm:$0xff] }
 0xb48   : > { %2609 = vmatpush.msrb.mxu0 %v2577_v40  ;;  %2631 = vmatpush.msrb.mxu1 %v2572_v11  ;;  %v2565_v55 = vld [vmem:[#allocation7 + $0x210] sm:$0xff] }
 0xb49   : > { %v7554_v12 = vclamps-f32 %v2278_v22, 1.0  ;;  %2651 = vmatpush.msrb.mxu2 %v2573_v51  ;;  %v2566_v22 = vld [vmem:[#allocation7 + $0x218] sm:$0xff] }
 0xb4a   : > { %2610 = vmatpush.msrb.mxu0 %v2574_v54  ;;  %2632 = vmatpush.msrb.mxu1 %v2569_v39 }
 0xb4b   : > { %v2286_v5 = vadd.f32 1.0, %v7554_v12  ;;  %2652 = vmatpush.msrb.mxu2 %v2570_v35  ;;  %v2567_v12 = vld [vmem:[#allocation7 + $0x220] sm:$0xff] }
 0xb4c   : > { %2611 = vmatpush.msrb.mxu0 %v2571_v20  ;;  %2633 = vmatpush.msrb.mxu1 %v2566_v22 }
 0xb4d   : > { %v2292_v62 = vmul.f32 %v2286_v5, %v2034_v6  ;;  %2653 = vmatpush.msrb.mxu2 %v2567_v12  ;;  %v2562_v6 = vld [vmem:[#allocation7 + $0x1f8] sm:$0xff]  ;;  %v2563_v5 = vld [vmem:[#allocation7 + $0x200] sm:$0xff] }
 0xb4e   : > { %2612 = vmatpush.msrb.mxu0 %v2568_v30  ;;  %2634 = vmatpush.msrb.mxu1 %v2563_v5 }
 0xb4f   : > { %2509 = vmatmul.f32.vlgmr.msra.gmra.mxu3 %v2292_v62  ;;  %v2564_v62 = vld [vmem:[#allocation7 + $0x208] sm:$0xff] }
 0xb50   : > { %2613 = vmatpush.msrb.mxu0 %v2565_v55  ;;  %2654 = vmatpush.msrb.mxu2 %v2564_v62  ;;  %v8092_v62 = vld [vmem:[%s9116_s21] ss:$0 sm:$0xff] }
 0xb52   : > { %2614 = vmatpush.msrb.mxu0 %v2562_v6 }
 0xbad   : > { %v2430_v46 = vpop.f32.mrf.mxu3 }
 0xbb0   : > { %v2410_v42 = vpop.f32.mrf.mxu2  ;;  %v2450_v53 = vpop.f32.mrf.mxu0 }
 0xbb1   : > { %v2411_v31 = vadd.f32 %v7843_v41, %v2410_v42  ;;  %v2559_v41 = vld [vmem:[#allocation7 + $0x1e0] sm:$0xff]  ;;  %v2560_v42 = vld [vmem:[#allocation7 + $0x1e8] sm:$0xff] }
 0xbb2   : > { %2615 = vmatpush.msrb.mxu0 %v2559_v41  ;;  %2635 = vmatpush.msrb.mxu1 %v2560_v42 }
 0xbb3   : > { %v2431_v58 = vadd.f32 %v2430_v46, %v2411_v31  ;;  %v2561_v31 = vld [vmem:[#allocation7 + $0x1f0] sm:$0xff]  ;;  %v2556_v46 = vld [vmem:[#allocation7 + $0x1c8] sm:$0xff] }
 0xbb4   : > { %v2470_v60 = vpop.f32.mrf.mxu1  ;;  %2655 = vmatpush.msrb.mxu2 %v2561_v31  ;;  %2616 = vmatpush.msrb.mxu0 %v2556_v46 }
 0xbb5   : > { %v2451_v57 = vadd.f32 %v2450_v53, %v2431_v58  ;;  %v2557_v58 = vld [vmem:[#allocation7 + $0x1d0] sm:$0xff]  ;;  %v2558_v53 = vld [vmem:[#allocation7 + $0x1d8] sm:$0xff] }
 0xbb6   : > { %2636 = vmatpush.msrb.mxu1 %v2557_v58  ;;  %2656 = vmatpush.msrb.mxu2 %v2558_v53 }
 0xbb7   : > { %v2471_v0 = vadd.f32 %v2470_v60, %v2451_v57  ;;  %v2553_v57 = vld [vmem:[#allocation7 + $0x1b0] sm:$0xff]  ;;  %v2554_v60 = vld [vmem:[#allocation7 + $0x1b8] sm:$0xff] }
 0xbb8   : > { %2617 = vmatpush.msrb.mxu0 %v2553_v57  ;;  %2637 = vmatpush.msrb.mxu1 %v2554_v60 }
 0xbc6   : > { %v2490_v1 = vpop.f32.mrf.mxu2 }
 0xbc7   : > { %v2491_v37 = vadd.f32 %v2490_v1, %v2471_v0  ;;  %v2555_v0 = vld [vmem:[#allocation7 + $0x1c0] sm:$0xff]  ;;  %v2550_v1 = vld [vmem:[#allocation7 + $0x198] sm:$0xff] }
 0xbc8   : > { %2657 = vmatpush.msrb.mxu2 %v2555_v0  ;;  %2618 = vmatpush.msrb.mxu0 %v2550_v1 }
 0xbd2   : > { %v2510_v52 = vpop.f32.mrf.mxu3 }
 0xbd3   : > { %v2511_v7 = vadd.f32 %v2510_v52, %v2491_v37  ;;  %v2551_v37 = vld [vmem:[#allocation7 + $0x1a0] sm:$0xff]  ;;  %v2552_v52 = vld [vmem:[#allocation7 + $0x1a8] sm:$0xff] }
 0xbd4   : > { %2638 = vmatpush.msrb.mxu1 %v2551_v37  ;;  %2658 = vmatpush.msrb.mxu2 %v2552_v52 }
 0xbd5   : > { %v2513_v8 = vadd.f32 %v2511_v7, %v9308_v26  ;;  %v2547_v7 = vld [vmem:[#allocation7 + $0x180] sm:$0xff] }
 0xbd6   : > { %2619 = vmatpush.msrb.mxu0 %v2547_v7 }
 0xbd7   : > { %v2516_v2 = vmul.f32 %v9111_v3, %v2513_v8 }
 0xbd9   : > { %2517 = vadd.xlane.f32.xlu0 %v2516_v2  ;;  %v2549_v2 = vld [vmem:[#allocation7 + $0x190] sm:$0xff] }
 0xbda   : > { %2659 = vmatpush.msrb.mxu2 %v2549_v2 }
 0xc4c   : > { %v2518_v16 = vpop.xlane.xlu0 %2517 }
 0xc4d   : > { %v2519_v15 = vmul.f32 0.01, %v2518_v16 }
 0xc4f   : > { %v2520_v48 = vsub.f32 %v2513_v8, %v2519_v15  ;;  %v2548_v8 = vld [vmem:[#allocation7 + $0x188] sm:$0xff] }
 0xc50   : > { %2639 = vmatpush.msrb.mxu1 %v2548_v8 }
 0xc51   : > { %v9573_v26 = vmul.f32 %v9111_v3, %v2520_v48 }
 0xc53   : > { %v2522_v10 = vmul.f32 %v9573_v26, %v9573_v26 }
 0xc55   : > { %2523 = vadd.xlane.f32.xlu1 %v2522_v10  ;;  %v7844_v10 = vld [vmem:[#allocation22] ss:$0 sm:$0xff] }
 0xcc8   : > { %v2524_v24 = vpop.xlane.xlu1 %2523 }
 0xcc9   : > { %v2525_v13 = vmul.f32 0.01, %v2524_v24 }
 0xccb   : > { %v2526_v14 = vadd.f32 1e-12, %v2525_v13 }
 0xccd   : > { %7920 = vrsqrt.f32 %v2526_v14  ;;  %vm2533_vm15 = vweird.f32 %v2526_v14 }
 0xcd3   : > { %v7921_v33 = vpop.eup %7920 }
 0xcd4   : > { %v2528_v21 = vmul.f32 %v7921_v33, %v2526_v14  ;;  %vm2534_vm14 = vweird.f32 %v7921_v33 }
 0xcd5   : > { %vm2535_vm0 = vmor %vm2533_vm15, %vm2534_vm14 }
 0xcd6   : > { %v2529_v45 = vmul.f32 %v7921_v33, %v2528_v21 }
 0xcd8   : > { %v2530_v16 = vmul.f32 0.5, %v2529_v45 }
 0xcda   : > { %v2531_v15 = vsub.f32 1.5, %v2530_v16 }
 0xcdc   : > { %v2532_v48 = vmul.f32 %v7921_v33, %v2531_v15 }
 0xcde   : > { %v2536_v34 = vsel %vm2535_vm0, %v7921_v33, %v2532_v48 }
 0xcdf   : > { %v2537_v17 = vmul.f32 %v2536_v34, %v9573_v26 }
 0xce1   : > { %v2541_v28 = vmul.f32 %v7844_v10, %v2537_v17 }
 0xce3   : > { %v9578_v38 = vadd.f32 %v7845_v25, %v2541_v28 }
 0xce5   : > { %2620 = vmatmul.f32.vlgmr.msrb.gmra.mxu0 %v9578_v38  ;;  %2640 = vmatmul.f32.vlgmr.msrb.gmra.mxu1 %v9578_v38 }
 0xce6   : > { %2660 = vmatmul.f32.vlgmr.msrb.gmra.mxu2 %v9578_v38 }
 0xd62   : > { %v2621_v36 = vpop.f32.mrf.mxu0  ;;  %v2641_v40 = vpop.f32.mrf.mxu1 }
 0xd63   : > { %v2622_v9 = vadd.f32 %v2621_v36, %v2598_v49  ;;  %v2642_v50 = vadd.f32 %v2641_v40, %v2599_v23 }
 0xd65   : > { %2680 = vmatpush.xpose.msrb.mxu3 %v2642_v50  ;;  %2739 = vmatpush.xpose.msra.mxu1 %v2642_v50  ;;  %v2664_v26 = vmul.f32 %v9134_v18, %v2622_v9  ;;  %v2723_v54 = vmul.f32 %v9185_v44, %v2622_v9  ;;  %v2782_v11 = vmul.f32 %v9200_v59, %v2622_v9 }
 0xd66   : > { %v2841_v51 = vmul.f32 %v9253_v56, %v2622_v9  ;;  %v2900_v30 = vmul.f32 %v9208_v61, %v2622_v9  ;;  %v2959_v39 = vmul.f32 %v9137_v19, %v2622_v9  ;;  %v3018_v35 = vmul.f32 %v9216_v63, %v2622_v9 }
 0xd67   : > { %v3077_v55 = vmul.f32 %v9156_v27, %v2622_v9  ;;  %v3136_v22 = vmul.f32 %v9223_v4, %v2622_v9  ;;  %v3195_v12 = vmul.f32 %v9170_v29, %v2622_v9 }
 0xd68   : > { %2681 = vmatmul.f32.vlgmr.msrb.gmra.mxu3 %v2664_v26  ;;  %2740 = vmatmul.f32.vlgmr.msra.gmra.mxu1 %v2723_v54 }
 0xd69   : > { %2798 = vmatpush.xpose.msra.mxu3 %v2642_v50  ;;  %2857 = vmatpush.xpose.msrb.mxu1 %v2642_v50  ;;  %v2661_v43 = vpop.f32.mrf.mxu2 }
 0xd6a   : > { %v9585_v20 = vadd.f32 %v2661_v43, %v2600_v47 }
 0xd6c   : > { %2716 = vmatpush.msra.mxu0 %v9585_v20  ;;  %2775 = vmatpush.msra.mxu2 %v9585_v20 }
 0xd6d   : > { %2916 = vmatpush.xpose.msrb.mxu3 %v2642_v50  ;;  %2975 = vmatpush.xpose.msra.mxu1 %v2642_v50 }
 0xd6e   : > { %2834 = vmatpush.msrb.mxu0 %v9585_v20  ;;  %2893 = vmatpush.msrb.mxu2 %v9585_v20 }
 0xd70   : > { %2799 = vmatmul.f32.vlgmr.msra.gmra.mxu3 %v2782_v11  ;;  %2858 = vmatmul.f32.vlgmr.msrb.gmra.mxu1 %v2841_v51 }
 0xd71   : > { %3034 = vmatpush.xpose.msra.mxu3 %v2642_v50  ;;  %3093 = vmatpush.xpose.msrb.mxu1 %v2642_v50 }
 0xd78   : > { %2917 = vmatmul.f32.vlgmr.msrb.gmra.mxu3 %v2900_v30  ;;  %2976 = vmatmul.f32.vlgmr.msra.gmra.mxu1 %v2959_v39 }
 0xd79   : > { %3152 = vmatpush.xpose.msrb.mxu3 %v2642_v50  ;;  %3211 = vmatpush.xpose.msra.mxu1 %v2642_v50 }
 0xd80   : > { %3035 = vmatmul.f32.vlgmr.msra.gmra.mxu3 %v3018_v35  ;;  %3094 = vmatmul.f32.vlgmr.msrb.gmra.mxu1 %v3077_v55 }
 0xd88   : > { %3153 = vmatmul.f32.vlgmr.msrb.gmra.mxu3 %v3136_v22  ;;  %3212 = vmatmul.f32.vlgmr.msra.gmra.mxu1 %v3195_v12 }
 0xde5   : > { %v2741_v6 = vpop.f32.mrf.mxu1 }
 0xde6   : > { %v2744_v5 = vmul.f32 0.31622776, %v2741_v6 }
 0xde8   : > { %v2745_v41 = vadd.f32 %v8092_v62, %v2744_v5 }
 0xdea   : > { %v2746_v42 = vsel %vm1158_vm13, %v2745_v41, -inf }
 0xdeb   : > { %2747 = vmax.xlane.f32.xlu2 %v2746_v42  ;;  %v2682_v31 = vpop.f32.mrf.mxu3 }
 0xdec   : > { %v2685_v46 = vmul.f32 0.31622776, %v2682_v31 }
 0xded   : > { %v2859_v58 = vpop.f32.mrf.mxu1 }
 0xdee   : > { %v2862_v53 = vmul.f32 0.31622776, %v2859_v58  ;;  %v2686_v57 = vadd.f32 %v8092_v62, %v2685_v46 }
 0xdf0   : > { %v2687_v60 = vsel %vm1158_vm13, %v2686_v57, -inf  ;;  %v2863_v0 = vadd.f32 %v8092_v62, %v2862_v53 }
 0xdf1   : > { %2688 = vmax.xlane.f32.xlu0 %v2687_v60 }
 0xdf2   : > { %v2864_v1 = vsel %vm1158_vm13, %v2863_v0, -inf }
 0xdf3   : > { %2865 = vmax.xlane.f32.xlu1 %v2864_v1  ;;  %v2800_v37 = vpop.f32.mrf.mxu3 }
 0xdf4   : > { %v2803_v52 = vmul.f32 0.31622776, %v2800_v37 }
 0xdf5   : > { %v2977_v7 = vpop.f32.mrf.mxu1 }
 0xdf6   : > { %v2980_v8 = vmul.f32 0.31622776, %v2977_v7  ;;  %v2804_v2 = vadd.f32 %v8092_v62, %v2803_v52 }
 0xdf8   : > { %v2805_v24 = vsel %vm1158_vm13, %v2804_v2, -inf  ;;  %v2981_v13 = vadd.f32 %v8092_v62, %v2980_v8 }
 0xdf9   : > { %2806 = vmax.xlane.f32.xlu2 %v2805_v24 }
 0xdfa   : > { %v2982_v14 = vsel %vm1158_vm13, %v2981_v13, -inf }
 0xdfb   : > { %v2918_v33 = vpop.f32.mrf.mxu3  ;;  %2983 = vmax.xlane.f32.xlu0 %v2982_v14 }
 0xdfc   : > { %v2921_v21 = vmul.f32 0.31622776, %v2918_v33 }
 0xdfd   : > { %v3095_v45 = vpop.f32.mrf.mxu1 }
 0xdfe   : > { %v3098_v16 = vmul.f32 0.31622776, %v3095_v45  ;;  %v2922_v15 = vadd.f32 %v8092_v62, %v2921_v21 }
 0xe00   : > { %v2923_v48 = vsel %vm1158_vm13, %v2922_v15, -inf  ;;  %v3099_v10 = vadd.f32 %v8092_v62, %v3098_v16 }
 0xe01   : > { %2924 = vmax.xlane.f32.xlu1 %v2923_v48 }
 0xe02   : > { %v3100_v34 = vsel %vm1158_vm13, %v3099_v10, -inf }
 0xe03   : > { %v3036_v17 = vpop.f32.mrf.mxu3  ;;  %3101 = vmax.xlane.f32.xlu2 %v3100_v34 }
 0xe04   : > { %v3039_v25 = vmul.f32 0.31622776, %v3036_v17 }
 0xe05   : > { %v3213_v28 = vpop.f32.mrf.mxu1 }
 0xe06   : > { %v3216_v32 = vmul.f32 0.31622776, %v3213_v28  ;;  %v3040_v49 = vadd.f32 %v8092_v62, %v3039_v25 }
 0xe08   : > { %v3041_v23 = vsel %vm1158_vm13, %v3040_v49, -inf  ;;  %v3217_v36 = vadd.f32 %v8092_v62, %v3216_v32 }
 0xe09   : > { %3042 = vmax.xlane.f32.xlu0 %v3041_v23 }
 0xe0a   : > { %v3218_v40 = vsel %vm1158_vm13, %v3217_v36, -inf }
 0xe0b   : > { %v3154_v9 = vpop.f32.mrf.mxu3  ;;  %3219 = vmax.xlane.f32.xlu1 %v3218_v40 }
 0xe0c   : > { %v3157_v50 = vmul.f32 0.31622776, %v3154_v9 }
 0xe0e   : > { %v9609_v26 = vadd.f32 %v8092_v62, %v3157_v50 }
 0xe10   : > { %v3159_v54 = vsel %vm1158_vm13, %v9609_v26, -inf }
 0xe11   : > { %3160 = vmax.xlane.f32.xlu2 %v3159_v54 }
 0xe5e   : > { %v2748_v47 = vpop.xlane.xlu2 %2747 }
 0xe5f   : > { %v2749_v43 = vsub.f32 %v2745_v41, %v2748_v47 }
 0xe61   : > { %v2750_v11 = vmul.f32 1.442695, %v2749_v43 }
 0xe63   : > { %7922 = vpow2.f32 %v2750_v11 }
 0xe64   : > { %v2689_v51 = vpop.xlane.xlu0 %2688 }
 0xe65   : > { %v2690_v30 = vsub.f32 %v2686_v57, %v2689_v51 }
 0xe66   : > { %v2866_v39 = vpop.xlane.xlu1 %2865 }
 0xe67   : > { %v2691_v35 = vmul.f32 1.442695, %v2690_v30  ;;  %v2867_v55 = vsub.f32 %v2863_v0, %v2866_v39 }
 0xe69   : > { %v9613_v22 = vpop.eup %7922  ;;  %7924 = vpow2.f32 %v2691_v35  ;;  %v2868_v12 = vmul.f32 1.442695, %v2867_v55 }
 0xe6a   : > { %v2752_v6 = vsel %vm1158_vm13, %v9613_v22, 0.0 }
 0xe6b   : > { %7926 = vpow2.f32 %v2868_v12  ;;  %2753 = vadd.xlane.f32.xlu0 %v2752_v6 }
 0xe6c   : > { %v2807_v5 = vpop.xlane.xlu2 %2806 }
 0xe6d   : > { %v2808_v62 = vsub.f32 %v2804_v2, %v2807_v5 }
 0xe6e   : > { %v2984_v42 = vpop.xlane.xlu0 %2983 }
 0xe6f   : > { %v9617_v41 = vpop.eup %7924  ;;  %v2809_v31 = vmul.f32 1.442695, %v2808_v62  ;;  %v2985_v46 = vsub.f32 %v2981_v13, %v2984_v42 }
 0xe70   : > { %v2693_v58 = vsel %vm1158_vm13, %v9617_v41, 0.0 }
 0xe71   : > { %v9621_v53 = vpop.eup %7926  ;;  %7928 = vpow2.f32 %v2809_v31  ;;  %v2986_v57 = vmul.f32 1.442695, %v2985_v46  ;;  %2694 = vadd.xlane.f32.xlu1 %v2693_v58 }
 0xe72   : > { %v2870_v60 = vsel %vm1158_vm13, %v9621_v53, 0.0 }
 0xe73   : > { %7930 = vpow2.f32 %v2986_v57  ;;  %2871 = vadd.xlane.f32.xlu2 %v2870_v60 }
 0xe74   : > { %v2925_v0 = vpop.xlane.xlu1 %2924 }
 0xe75   : > { %v2926_v1 = vsub.f32 %v2922_v15, %v2925_v0 }
 0xe76   : > { %v3102_v37 = vpop.xlane.xlu2 %3101 }
 0xe77   : > { %v7929_v52 = vpop.eup %7928  ;;  %v2927_v7 = vmul.f32 1.442695, %v2926_v1  ;;  %v3103_v8 = vsub.f32 %v3099_v10, %v3102_v37 }
 0xe78   : > { %v2811_v2 = vsel %vm1158_vm13, %v7929_v52, 0.0 }
 0xe79   : > { %v7931_v24 = vpop.eup %7930  ;;  %7932 = vpow2.f32 %v2927_v7  ;;  %v3104_v13 = vmul.f32 1.442695, %v3103_v8  ;;  %2812 = vadd.xlane.f32.xlu0 %v2811_v2 }
 0xe7a   : > { %v2988_v14 = vsel %vm1158_vm13, %v7931_v24, 0.0 }
 0xe7b   : > { %7934 = vpow2.f32 %v3104_v13  ;;  %2989 = vadd.xlane.f32.xlu1 %v2988_v14  ;;  %v3270_v13 = vld [vmem:[#allocation10 + $0xf8] sm:$0xff]  ;;  %v3269_v14 = vld [vmem:[#allocation10 + $0xf0] sm:$0xff] }
 0xe7c   : > { %v3043_v33 = vpop.xlane.xlu0 %3042  ;;  %3276 = vmatpush.msra.mxu3 %v3270_v13  ;;  %v3416_v13 = vld [vmem:[#allocation16 + $0x5a0] sm:$0xff] }
 0xe7d   : > { %v3044_v21 = vsub.f32 %v3040_v49, %v3043_v33  ;;  %v3267_v33 = vld [vmem:[#allocation10 + $0xe0] sm:$0xff] }
 0xe7e   : > { %v3220_v45 = vpop.xlane.xlu1 %3219  ;;  %3277 = vmatpush.msra.mxu3 %v3269_v14  ;;  %v3417_v14 = vld [vmem:[#allocation16 + $0x5a8] sm:$0xff] }
 0xe7f   : > { %v7933_v16 = vpop.eup %7932  ;;  %v3045_v48 = vmul.f32 1.442695, %v3044_v21  ;;  %v3221_v15 = vsub.f32 %v3217_v36, %v3220_v45  ;;  %v3266_v21 = vld [vmem:[#allocation10 + $0xd8] sm:$0xff]  ;;  %v3265_v45 = vld [vmem:[#allocation10 + $0xd0] sm:$0xff] }
 0xe80   : > { %v2929_v34 = vsel %vm1158_vm13, %v7933_v16, 0.0 }
 0xe81   : > { %v7935_v17 = vpop.eup %7934  ;;  %7936 = vpow2.f32 %v3045_v48  ;;  %v3222_v10 = vmul.f32 1.442695, %v3221_v15  ;;  %2930 = vadd.xlane.f32.xlu2 %v2929_v34  ;;  %v3263_v48 = vld [vmem:[#allocation10 + $0xc0] sm:$0xff]  ;;  %v3262_v15 = vld [vmem:[#allocation10 + $0xb8] sm:$0xff]  ;;  %v3261_v34 = vld [vmem:[#allocation10 + $0xb0] sm:$0xff] }
 0xe82   : > { %v3106_v25 = vsel %vm1158_vm13, %v7935_v17, 0.0 }
 0xe83   : > { %7938 = vpow2.f32 %v3222_v10  ;;  %3107 = vadd.xlane.f32.xlu0 %v3106_v25  ;;  %v3259_v10 = vld [vmem:[#allocation10 + $0xa0] sm:$0xff] }
 0xe84   : > { %v3161_v28 = vpop.xlane.xlu2 %3160 }
 0xe85   : > { %v3162_v32 = vsub.f32 %v9609_v26, %v3161_v28 }
 0xe87   : > { %v7937_v23 = vpop.eup %7936  ;;  %v3163_v40 = vmul.f32 1.442695, %v3162_v32  ;;  %v3258_v32 = vld [vmem:[#allocation10 + $0x98] sm:$0xff] }
 0xe88   : > { %v3047_v49 = vsel %vm1158_vm13, %v7937_v23, 0.0 }
 0xe89   : > { %v7939_v9 = vpop.eup %7938  ;;  %7940 = vpow2.f32 %v3163_v40  ;;  %3048 = vadd.xlane.f32.xlu1 %v3047_v49  ;;  %v3256_v40 = vld [vmem:[#allocation10 + $0x88] sm:$0xff]  ;;  %v3255_v49 = vld [vmem:[#allocation10 + $0x80] sm:$0xff] }
 0xe8a   : > { %v3224_v36 = vsel %vm1158_vm13, %v7939_v9, 0.0 }
 0xe8b   : > { %3225 = vadd.xlane.f32.xlu2 %v3224_v36 }
 0xe8f   : > { %v7941_v50 = vpop.eup %7940 }
 0xe90   : > { %v3165_v54 = vsel %vm1158_vm13, %v7941_v50, 0.0 }
 0xe91   : > { %3166 = vadd.xlane.f32.xlu0 %v3165_v54 }
 0xede   : > { %v2754_v47 = vpop.xlane.xlu0 %2753 }
 0xedf   : > { %7942 = vrcp.f32 %v2754_v47 }
 0xee4   : > { %v2695_v43 = vpop.xlane.xlu1 %2694 }
 0xee5   : > { %v7943_v11 = vpop.eup %7942  ;;  %7944 = vrcp.f32 %v2695_v43 }
 0xee6   : > { %v2756_v26 = vmul.f32 %v7943_v11, %v9613_v22  ;;  %v2872_v51 = vpop.xlane.xlu2 %2871 }
 0xee7   : > { %7946 = vrcp.f32 %v2872_v51 }
 0xee8   : > { %7556 = vmatmul.msk.f32.vlgmr.msra.gmra.mxu2 %vm1158_vm13, %v2756_v26 }
 0xee9   : > { %3011 = vmatpush.msra.mxu2 %v9585_v20 }
 0xeeb   : > { %v7945_v30 = vpop.eup %7944 }
 0xeec   : > { %v2697_v39 = vmul.f32 %v7945_v30, %v9617_v41  ;;  %v2813_v35 = vpop.xlane.xlu0 %2812 }
 0xeed   : > { %v7947_v55 = vpop.eup %7946  ;;  %7948 = vrcp.f32 %v2813_v35 }
 0xeee   : > { %v2874_v12 = vmul.f32 %v7947_v55, %v9621_v53  ;;  %7555 = vmatmul.msk.f32.vlgmr.msra.gmra.mxu0 %vm1158_vm13, %v2697_v39  ;;  %v2990_v6 = vpop.xlane.xlu1 %2989 }
 0xeef   : > { %2952 = vmatpush.msra.mxu0 %v9585_v20  ;;  %7950 = vrcp.f32 %v2990_v6 }
 0xef0   : > { %7558 = vmatmul.msk.f32.vlgmr.msrb.gmra.mxu2 %vm1158_vm13, %v2874_v12 }
 0xef1   : > { %3129 = vmatpush.msrb.mxu2 %v9585_v20 }
 0xef3   : > { %v7949_v22 = vpop.eup %7948 }
 0xef4   : > { %v2815_v5 = vmul.f32 %v7949_v22, %v7929_v52  ;;  %v2931_v62 = vpop.xlane.xlu2 %2930 }
 0xef5   : > { %v7951_v42 = vpop.eup %7950  ;;  %7952 = vrcp.f32 %v2931_v62 }
 0xef6   : > { %v2992_v41 = vmul.f32 %v7951_v42, %v7931_v24  ;;  %7557 = vmatmul.msk.f32.vlgmr.msrb.gmra.mxu0 %vm1158_vm13, %v2815_v5  ;;  %v3108_v31 = vpop.xlane.xlu0 %3107 }
 0xef7   : > { %3070 = vmatpush.msrb.mxu0 %v9585_v20  ;;  %7954 = vrcp.f32 %v3108_v31 }
 0xef8   : > { %7560 = vmatmul.msk.f32.vlgmr.msra.gmra.mxu2 %vm1158_vm13, %v2992_v41 }
 0xef9   : > { %3247 = vmatpush.msra.mxu2 %v9585_v20 }
 0xefb   : > { %v7953_v46 = vpop.eup %7952 }
 0xefc   : > { %v2933_v58 = vmul.f32 %v7953_v46, %v7933_v16  ;;  %v3049_v53 = vpop.xlane.xlu1 %3048  ;;  %v3264_v16 = vld [vmem:[#allocation10 + $0xc8] sm:$0xff] }
 0xefd   : > { %v7955_v57 = vpop.eup %7954  ;;  %7956 = vrcp.f32 %v3049_v53 }
 0xefe   : > { %v3110_v60 = vmul.f32 %v7955_v57, %v7935_v17  ;;  %v3226_v0 = vpop.xlane.xlu2 %3225  ;;  %7559 = vmatmul.msk.f32.vlgmr.msra.gmra.mxu0 %vm1158_vm13, %v2933_v58  ;;  %v3260_v17 = vld [vmem:[#allocation10 + $0xa8] sm:$0xff] }
 0xeff   : > { %7958 = vrcp.f32 %v3226_v0  ;;  %3188 = vmatpush.msra.mxu0 %v9585_v20  ;;  %v3268_v20 = vld [vmem:[#allocation10 + $0xe8] sm:$0xff] }
 0xf00   : > { %7562 = vmatmul.msk.f32.vlgmr.msrb.gmra.mxu2 %vm1158_vm13, %v3110_v60  ;;  %3278 = vmatpush.msra.mxu3 %v3268_v20  ;;  %v3410_v20 = vld [vmem:[#allocation16 + $0x570] sm:$0xff] }
 0xf02   : > { %3279 = vmatpush.msra.mxu3 %v3267_v33  ;;  %v3411_v33 = vld [vmem:[#allocation16 + $0x578] sm:$0xff] }
 0xf03   : > { %v7957_v1 = vpop.eup %7956 }
 0xf04   : > { %v3051_v37 = vmul.f32 %v7957_v1, %v7937_v23  ;;  %v3167_v52 = vpop.xlane.xlu0 %3166  ;;  %3280 = vmatpush.msra.mxu3 %v3266_v21  ;;  %v3257_v23 = vld [vmem:[#allocation10 + $0x90] sm:$0xff]  ;;  %v7846_v1 = vld [vmem:[#allocation11 + $0x1] ss:$0 sm:$0xff] }
 0xf05   : > { %v7959_v7 = vpop.eup %7958  ;;  %7960 = vrcp.f32 %v3167_v52  ;;  %v3404_v21 = vld [vmem:[#allocation16 + $0x540] sm:$0xff] }
 0xf06   : > { %v3228_v8 = vmul.f32 %v7959_v7, %v7939_v9  ;;  %7561 = vmatmul.msk.f32.vlgmr.msrb.gmra.mxu0 %vm1158_vm13, %v3051_v37  ;;  %3281 = vmatpush.msra.mxu3 %v3265_v45  ;;  %v3405_v45 = vld [vmem:[#allocation16 + $0x548] sm:$0xff] }
 0xf08   : > { %7564 = vmatmul.msk.f32.vlgmr.msra.gmra.mxu2 %vm1158_vm13, %v3228_v8  ;;  %3282 = vmatpush.msra.mxu3 %v3264_v16  ;;  %v3399_v16 = vld [vmem:[#allocation16 + $0x518] sm:$0xff] }
 0xf0a   : > { %3283 = vmatpush.msra.mxu3 %v3263_v48  ;;  %v3392_v48 = vld [vmem:[#allocation16 + $0x4e0] sm:$0xff] }
 0xf0b   : > { %v7961_v2 = vpop.eup %7960 }
 0xf0c   : > { %v3169_v24 = vmul.f32 %v7961_v2, %v7941_v50  ;;  %3284 = vmatpush.msra.mxu3 %v3262_v15  ;;  %v3422_v2 = vld [vmem:[#allocation16 + $0x5d0] sm:$0xff]  ;;  %v3393_v15 = vld [vmem:[#allocation16 + $0x4e8] sm:$0xff] }
 0xf0d   : > { %3443 = vmatpush.msrb.mxu0 %v3422_v2  ;;  %v3388_v2 = vld [vmem:[#allocation16 + $0x4c0] sm:$0xff] }
 0xf0e   : > { %7563 = vmatmul.msk.f32.vlgmr.msra.gmra.mxu0 %vm1158_vm13, %v3169_v24  ;;  %3285 = vmatpush.msra.mxu3 %v3261_v34  ;;  %v3423_v24 = vld [vmem:[#allocation16 + $0x5d8] sm:$0xff]  ;;  %v3424_v34 = vld [vmem:[#allocation16 + $0x5e0] sm:$0xff] }
 0xf0f   : > { %3463 = vmatpush.msrb.mxu1 %v3423_v24  ;;  %3444 = vmatpush.msrb.mxu0 %v3416_v13  ;;  %v3389_v24 = vld [vmem:[#allocation16 + $0x4c8] sm:$0xff]  ;;  %v3414_v13 = vld [vmem:[#allocation16 + $0x590] sm:$0xff] }
 0xf10   : > { %3286 = vmatpush.msra.mxu3 %v3260_v17  ;;  %v3425_v17 = vld [vmem:[#allocation16 + $0x5e8] sm:$0xff]  ;;  %3483 = vmatpush.msrb.mxu2 %v3424_v34  ;;  %v3370_v34 = vld [vmem:[#allocation16 + $0x430] sm:$0xff] }
 0xf11   : > { %3464 = vmatpush.msrb.mxu1 %v3417_v14  ;;  %3445 = vmatpush.msrb.mxu0 %v3410_v20  ;;  %v3415_v14 = vld [vmem:[#allocation16 + $0x598] sm:$0xff]  ;;  %v3382_v20 = vld [vmem:[#allocation16 + $0x490] sm:$0xff] }
 0xf12   : > { %3287 = vmatpush.msra.mxu3 %v3259_v10  ;;  %v3418_v10 = vld [vmem:[#allocation16 + $0x5b0] sm:$0xff] }
 0xf13   : > { %3465 = vmatpush.msrb.mxu1 %v3411_v33  ;;  %3446 = vmatpush.msrb.mxu0 %v3404_v21  ;;  %v3383_v33 = vld [vmem:[#allocation16 + $0x498] sm:$0xff]  ;;  %v3408_v21 = vld [vmem:[#allocation16 + $0x560] sm:$0xff] }
 0xf14   : > { %3288 = vmatpush.msra.mxu3 %v3258_v32  ;;  %v3387_v32 = vld [vmem:[#allocation16 + $0x4b8] sm:$0xff]  ;;  %3484 = vmatpush.msrb.mxu2 %v3418_v10  ;;  %v3396_v10 = vld [vmem:[#allocation16 + $0x500] sm:$0xff] }
 0xf15   : > { %3466 = vmatpush.msrb.mxu1 %v3405_v45  ;;  %v3409_v45 = vld [vmem:[#allocation16 + $0x568] sm:$0xff] }
 0xf16   : > { %3289 = vmatpush.msra.mxu3 %v3257_v23  ;;  %v3380_v23 = vld [vmem:[#allocation16 + $0x480] sm:$0xff] }
 0xf17   : > { %3467 = vmatpush.msrb.mxu1 %v3399_v16  ;;  %v3377_v16 = vld [vmem:[#allocation16 + $0x468] sm:$0xff] }
 0xf18   : > { %3290 = vmatpush.msra.mxu3 %v3256_v40  ;;  %v3381_v40 = vld [vmem:[#allocation16 + $0x488] sm:$0xff] }
 0xf19   : > { %3468 = vmatpush.msrb.mxu1 %v3393_v15  ;;  %v3403_v15 = vld [vmem:[#allocation16 + $0x538] sm:$0xff] }
 0xf1a   : > { %3291 = vmatpush.msra.mxu3 %v3255_v49  ;;  %v3374_v49 = vld [vmem:[#allocation16 + $0x450] sm:$0xff] }
 0xf1b   : > { %3469 = vmatpush.msrb.mxu1 %v3387_v32  ;;  %v3365_v32 = vld [vmem:[#allocation16 + $0x408] sm:$0xff] }
 0xf1c   : > { %3503 = vmatpush.msrb.mxu3 %v3425_v17  ;;  %v3371_v17 = vld [vmem:[#allocation16 + $0x438] sm:$0xff] }
 0xf1d   : > { %3470 = vmatpush.msrb.mxu1 %v3381_v40  ;;  %v3391_v40 = vld [vmem:[#allocation16 + $0x4d8] sm:$0xff] }
 0xf6b   : > { %v2718_v25 = vpop.f32.mrf.mxu0  ;;  %v2777_v28 = vpop.f32.mrf.mxu2 }
 0xf6c   : > { %v2721_v50 = vmul.f32 %v9134_v18, %v2718_v25  ;;  %v2780_v54 = vmul.f32 %v9185_v44, %v2777_v28  ;;  %v3419_v25 = vld [vmem:[#allocation16 + $0x5b8] sm:$0xff]  ;;  %v3386_v28 = vld [vmem:[#allocation16 + $0x4b0] sm:$0xff] }
 0xf6d   : > { %3504 = vmatpush.msrb.mxu3 %v3419_v25  ;;  %v3397_v25 = vld [vmem:[#allocation16 + $0x508] sm:$0xff] }
 0xf6e   : > { %v2781_v43 = vadd.f32 %v2780_v54, %v2721_v50  ;;  %v3369_v50 = vld [vmem:[#allocation16 + $0x428] sm:$0xff]  ;;  %v3362_v54 = vld [vmem:[#allocation16 + $0x3f0] sm:$0xff] }
 0xf73   : > { %v2836_v9 = vpop.f32.mrf.mxu0  ;;  %v2895_v36 = vpop.f32.mrf.mxu2 }
 0xf74   : > { %v2839_v47 = vmul.f32 %v9200_v59, %v2836_v9  ;;  %v2898_v30 = vmul.f32 %v9253_v56, %v2895_v36  ;;  %v3375_v9 = vld [vmem:[#allocation16 + $0x458] sm:$0xff]  ;;  %v3368_v36 = vld [vmem:[#allocation16 + $0x420] sm:$0xff] }
 0xf75   : > { %3471 = vmatpush.msrb.mxu1 %v3375_v9  ;;  %v3359_v9 = vld [vmem:[#allocation16 + $0x3d8] sm:$0xff] }
 0xf76   : > { %v2840_v51 = vadd.f32 %v2839_v47, %v2781_v43  ;;  %v3363_v47 = vld [vmem:[#allocation16 + $0x3f8] sm:$0xff]  ;;  %v3356_v43 = vld [vmem:[#allocation16 + $0x3c0] sm:$0xff] }
 0xf77   : > { %3472 = vmatpush.msrb.mxu1 %v3369_v50  ;;  %v3385_v50 = vld [vmem:[#allocation16 + $0x4a8] sm:$0xff] }
 0xf78   : > { %v2899_v35 = vadd.f32 %v2898_v30, %v2840_v51  ;;  %v3351_v51 = vld [vmem:[#allocation16 + $0x398] sm:$0xff] }
 0xf79   : > { %3473 = vmatpush.msrb.mxu1 %v3363_v47  ;;  %v3353_v47 = vld [vmem:[#allocation16 + $0x3a8] sm:$0xff] }
 0xf7b   : > { %v2954_v11 = vpop.f32.mrf.mxu0  ;;  %v3013_v26 = vpop.f32.mrf.mxu2 }
 0xf7c   : > { %v2957_v39 = vmul.f32 %v9208_v61, %v2954_v11  ;;  %v3016_v22 = vmul.f32 %v9137_v19, %v3013_v26  ;;  %v3357_v11 = vld [vmem:[#allocation16 + $0x3c8] sm:$0xff]  ;;  %v3350_v26 = vld [vmem:[#allocation16 + $0x390] sm:$0xff] }
 0xf7d   : > { %3474 = vmatpush.msrb.mxu1 %v3357_v11  ;;  %v3379_v11 = vld [vmem:[#allocation16 + $0x478] sm:$0xff] }
 0xf7e   : > { %v2958_v55 = vadd.f32 %v2957_v39, %v2899_v35 }
 0xf7f   : > { %3475 = vmatpush.msrb.mxu1 %v3351_v51  ;;  %v3347_v51 = vld [vmem:[#allocation16 + $0x378] sm:$0xff] }
 0xf80   : > { %v3017_v62 = vadd.f32 %v3016_v22, %v2958_v55  ;;  %v3345_v22 = vld [vmem:[#allocation16 + $0x368] sm:$0xff] }
 0xf81   : > { %3476 = vmatpush.msrb.mxu1 %v3345_v22  ;;  %v3367_v22 = vld [vmem:[#allocation16 + $0x418] sm:$0xff] }
 0xf83   : > { %v3072_v12 = vpop.f32.mrf.mxu0  ;;  %v3131_v6 = vpop.f32.mrf.mxu2 }
 0xf84   : > { %v3075_v5 = vmul.f32 %v9216_v63, %v3072_v12  ;;  %v3134_v41 = vmul.f32 %v9156_v27, %v3131_v6  ;;  %v3344_v6 = vld [vmem:[#allocation16 + $0x360] sm:$0xff] }
 0xf86   : > { %v3076_v42 = vadd.f32 %v3075_v5, %v3017_v62  ;;  %v3412_v5 = vld [vmem:[#allocation16 + $0x580] sm:$0xff]  ;;  %v3413_v62 = vld [vmem:[#allocation16 + $0x588] sm:$0xff] }
 0xf87   : > { %3485 = vmatpush.msrb.mxu2 %v3412_v5  ;;  %3505 = vmatpush.msrb.mxu3 %v3413_v62  ;;  %v3334_v5 = vld [vmem:[#allocation16 + $0x310] sm:$0xff]  ;;  %v3335_v62 = vld [vmem:[#allocation16 + $0x318] sm:$0xff] }
 0xf88   : > { %v3135_v58 = vadd.f32 %v3134_v41, %v3076_v42  ;;  %v3338_v42 = vld [vmem:[#allocation16 + $0x330] sm:$0xff]  ;;  %v3339_v41 = vld [vmem:[#allocation16 + $0x338] sm:$0xff] }
 0xf89   : > { %3477 = vmatpush.msrb.mxu1 %v3339_v41  ;;  %v3361_v41 = vld [vmem:[#allocation16 + $0x3e8] sm:$0xff] }
 0xf8b   : > { %v3190_v31 = vpop.f32.mrf.mxu0  ;;  %v3249_v46 = vpop.f32.mrf.mxu2 }
 0xf8c   : > { %v3193_v53 = vmul.f32 %v9223_v4, %v3190_v31  ;;  %v3252_v60 = vmul.f32 %v9170_v29, %v3249_v46  ;;  %v3406_v31 = vld [vmem:[#allocation16 + $0x550] sm:$0xff]  ;;  %v3407_v46 = vld [vmem:[#allocation16 + $0x558] sm:$0xff] }
 0xf8d   : > { %3486 = vmatpush.msrb.mxu2 %v3406_v31  ;;  %3506 = vmatpush.msrb.mxu3 %v3407_v46  ;;  %v3354_v31 = vld [vmem:[#allocation16 + $0x3b0] sm:$0xff]  ;;  %v3355_v46 = vld [vmem:[#allocation16 + $0x3b8] sm:$0xff] }
 0xf8e   : > { %v3194_v57 = vadd.f32 %v3193_v53, %v3135_v58  ;;  %v3332_v58 = vld [vmem:[#allocation16 + $0x300] sm:$0xff]  ;;  %v3333_v53 = vld [vmem:[#allocation16 + $0x308] sm:$0xff] }
 0xf8f   : > { %3478 = vmatpush.msrb.mxu1 %v3333_v53  ;;  %v3348_v53 = vld [vmem:[#allocation16 + $0x380] sm:$0xff] }
 0xf90   : > { %v3253_v0 = vadd.f32 %v3252_v60, %v3194_v57  ;;  %v3400_v57 = vld [vmem:[#allocation16 + $0x520] sm:$0xff]  ;;  %v3401_v60 = vld [vmem:[#allocation16 + $0x528] sm:$0xff] }
 0xf91   : > { %3487 = vmatpush.msrb.mxu2 %v3400_v57  ;;  %3507 = vmatpush.msrb.mxu3 %v3401_v60  ;;  %v3349_v57 = vld [vmem:[#allocation16 + $0x388] sm:$0xff] }
 0xf92   : > { %3292 = vmatmul.f32.vlgmr.msra.gmra.mxu3 %v3253_v0  ;;  %v3426_v0 = vld [vmem:[#allocation16 + $0x5f0] sm:$0xff] }
0x1015   : > { %v3293_v37 = vpop.f32.mrf.mxu3 }
0x1016   : > { %v3294_v52 = vadd.f32 %v7846_v1, %v3293_v37  ;;  %v3427_v1 = vld [vmem:[#allocation16 + $0x5f8] sm:$0xff]  ;;  %v3394_v37 = vld [vmem:[#allocation16 + $0x4f0] sm:$0xff] }
0x1017   : > { %3543 = vmatpush.msra.mxu1 %v3427_v1  ;;  %3488 = vmatpush.msrb.mxu2 %v3394_v37  ;;  %v3343_v1 = vld [vmem:[#allocation16 + $0x358] sm:$0xff] }
0x1018   : > { %v9663_v7 = vadd.f32 %v3294_v52, %v9578_v38  ;;  %v3398_v38 = vld [vmem:[#allocation16 + $0x510] sm:$0xff]  ;;  %v3395_v52 = vld [vmem:[#allocation16 + $0x4f8] sm:$0xff] }
0x1019   : > { %3447 = vmatpush.msrb.mxu0 %v3398_v38  ;;  %3508 = vmatpush.msrb.mxu3 %v3395_v52  ;;  %v3376_v38 = vld [vmem:[#allocation16 + $0x460] sm:$0xff] }
0x101a   : > { %v3301_v8 = vmul.f32 %v9111_v3, %v9663_v7  ;;  %3489 = vmatpush.msrb.mxu2 %v3388_v2  ;;  %v3336_v52 = vld [vmem:[#allocation16 + $0x320] sm:$0xff] }
0x101b   : > { %3448 = vmatpush.msrb.mxu0 %v3392_v48  ;;  %3509 = vmatpush.msrb.mxu3 %v3389_v24  ;;  %v3402_v48 = vld [vmem:[#allocation16 + $0x530] sm:$0xff] }
0x101c   : > { %3302 = vadd.xlane.f32.xlu1 %v3301_v8  ;;  %v3421_v8 = vld [vmem:[#allocation16 + $0x5c8] sm:$0xff]  ;;  %3490 = vmatpush.msrb.mxu2 %v3382_v20 }
0x101d   : > { %3449 = vmatpush.msrb.mxu0 %v3386_v28  ;;  %3544 = vmatpush.msra.mxu1 %v3421_v8  ;;  %v3364_v28 = vld [vmem:[#allocation16 + $0x400] sm:$0xff] }
0x101e   : > { %3510 = vmatpush.msrb.mxu3 %v3383_v33  ;;  %3491 = vmatpush.msrb.mxu2 %v3376_v38  ;;  %v7847_v33 = vld [vmem:[#allocation13 + $0x1] ss:$0 sm:$0xff] }
0x101f   : > { %3450 = vmatpush.msrb.mxu0 %v3380_v23  ;;  %3545 = vmatpush.msra.mxu1 %v3415_v14  ;;  %v3390_v23 = vld [vmem:[#allocation16 + $0x4d0] sm:$0xff] }
0x1020   : > { %3511 = vmatpush.msrb.mxu3 %v3377_v16  ;;  %3492 = vmatpush.msrb.mxu2 %v3370_v34  ;;  %v3859_v34 = vld [vmem:[#allocation19 + $0x3f8] sm:$0xff] }
0x1021   : > { %3451 = vmatpush.msrb.mxu0 %v3374_v49  ;;  %3546 = vmatpush.msra.mxu1 %v3409_v45  ;;  %v3358_v49 = vld [vmem:[#allocation16 + $0x3d0] sm:$0xff]  ;;  %v7848_v45 = vld [vmem:[#allocation14 + $0x1] ss:$0 sm:$0xff] }
0x1022   : > { %3512 = vmatpush.msrb.mxu3 %v3371_v17  ;;  %3493 = vmatpush.msrb.mxu2 %v3364_v28  ;;  %v3858_v17 = vld [vmem:[#allocation19 + $0x3f0] sm:$0xff]  ;;  %v3840_v28 = vld [vmem:[#allocation19 + $0x360] sm:$0xff] }
0x1023   : > { %3452 = vmatpush.msrb.mxu0 %v3368_v36  ;;  %3547 = vmatpush.msra.mxu1 %v3403_v15  ;;  %v3384_v36 = vld [vmem:[#allocation16 + $0x4a0] sm:$0xff]  ;;  %v3843_v15 = vld [vmem:[#allocation19 + $0x378] sm:$0xff] }
0x1024   : > { %3513 = vmatpush.msrb.mxu3 %v3365_v32  ;;  %3494 = vmatpush.msrb.mxu2 %v3358_v49  ;;  %v3856_v32 = vld [vmem:[#allocation19 + $0x3e0] sm:$0xff] }
0x1025   : > { %3453 = vmatpush.msrb.mxu0 %v3362_v54  ;;  %3548 = vmatpush.msra.mxu1 %v3397_v25  ;;  %v3352_v54 = vld [vmem:[#allocation16 + $0x3a0] sm:$0xff] }
0x1026   : > { %3514 = vmatpush.msrb.mxu3 %v3359_v9  ;;  %3495 = vmatpush.msrb.mxu2 %v3352_v54  ;;  %v3857_v25 = vld [vmem:[#allocation19 + $0x3e8] sm:$0xff] }
0x1027   : > { %3454 = vmatpush.msrb.mxu0 %v3356_v43  ;;  %3549 = vmatpush.msra.mxu1 %v3391_v40  ;;  %v3378_v43 = vld [vmem:[#allocation16 + $0x470] sm:$0xff] }
0x1028   : > { %3515 = vmatpush.msrb.mxu3 %v3353_v47 }
0x1029   : > { %3455 = vmatpush.msrb.mxu0 %v3350_v26  ;;  %3550 = vmatpush.msra.mxu1 %v3385_v50  ;;  %v3346_v26 = vld [vmem:[#allocation16 + $0x370] sm:$0xff] }
0x102a   : > { %3496 = vmatpush.msrb.mxu2 %v3346_v26  ;;  %3516 = vmatpush.msrb.mxu3 %v3347_v51 }
0x102b   : > { %3456 = vmatpush.msrb.mxu0 %v3344_v6  ;;  %3551 = vmatpush.msra.mxu1 %v3379_v11  ;;  %v3366_v6 = vld [vmem:[#allocation16 + $0x410] sm:$0xff] }
0x102d   : > { %3457 = vmatpush.msrb.mxu0 %v3338_v42  ;;  %v3360_v42 = vld [vmem:[#allocation16 + $0x3e0] sm:$0xff] }
0x102f   : > { %3458 = vmatpush.msrb.mxu0 %v3332_v58 }
0x1031   : > { %3523 = vmatpush.msra.mxu0 %v3426_v0  ;;  %v3342_v0 = vld [vmem:[#allocation16 + $0x350] sm:$0xff] }
0x108f   : > { %v3303_v30 = vpop.xlane.xlu1 %3302 }
0x1090   : > { %v3304_v39 = vmul.f32 0.01, %v3303_v30  ;;  %v3372_v30 = vld [vmem:[#allocation16 + $0x440] sm:$0xff] }
0x1092   : > { %v3305_v35 = vsub.f32 %v9663_v7, %v3304_v39  ;;  %v3420_v7 = vld [vmem:[#allocation16 + $0x5c0] sm:$0xff]  ;;  %v3373_v39 = vld [vmem:[#allocation16 + $0x448] sm:$0xff] }
0x1093   : > { %3524 = vmatpush.msra.mxu0 %v3420_v7  ;;  %3552 = vmatpush.msra.mxu1 %v3373_v39  ;;  %v3337_v7 = vld [vmem:[#allocation16 + $0x328] sm:$0xff] }
0x1094   : > { %v9669_v55 = vmul.f32 %v9111_v3, %v3305_v35  ;;  %v3340_v35 = vld [vmem:[#allocation16 + $0x340] sm:$0xff] }
0x1095   : > { %3525 = vmatpush.msra.mxu0 %v3414_v13  ;;  %3497 = vmatpush.msrb.mxu2 %v3340_v35 }
0x1096   : > { %v3307_v12 = vmul.f32 %v9669_v55, %v9669_v55  ;;  %3553 = vmatpush.msra.mxu1 %v3367_v22 }
0x1097   : > { %3526 = vmatpush.msra.mxu0 %v3408_v21  ;;  %3498 = vmatpush.msrb.mxu2 %v3334_v5 }
0x1098   : > { %3308 = vadd.xlane.f32.xlu2 %v3307_v12  ;;  %v3341_v12 = vld [vmem:[#allocation16 + $0x348] sm:$0xff]  ;;  %3554 = vmatpush.msra.mxu1 %v3361_v41 }
0x1099   : > { %3527 = vmatpush.msra.mxu0 %v3402_v48  ;;  %3517 = vmatpush.msrb.mxu3 %v3341_v12 }
0x109a   : > { %3555 = vmatpush.msra.mxu1 %v3355_v46  ;;  %3929 = vmatpush.msra.mxu2 %v3843_v15 }
0x109b   : > { %3528 = vmatpush.msra.mxu0 %v3396_v10  ;;  %3518 = vmatpush.msrb.mxu3 %v3335_v62  ;;  %v3841_v10 = vld [vmem:[#allocation19 + $0x368] sm:$0xff] }
0x109c   : > { %3556 = vmatpush.msra.mxu1 %v3349_v57 }
0x109d   : > { %3529 = vmatpush.msra.mxu0 %v3390_v23  ;;  %3949 = vmatpush.msra.mxu3 %v3859_v34  ;;  %v9682_v23 = vld [vmem:[#allocation17 + $0x6] sm:$0x3f] }
0x109e   : > { %3557 = vmatpush.msra.mxu1 %v3343_v1  ;;  %v3431_v40 = vperm.slane %v9682_v23, 0  ;;  %v3432_v49 = vperm.slane %v9682_v23, 1  ;;  %v3433_v11 = vperm.slane %v9682_v23, 2  ;;  %v3434_v26 = vperm.slane %v9682_v23, 3 }
0x109f   : > { %3530 = vmatpush.msra.mxu0 %v3384_v36  ;;  %3950 = vmatpush.msra.mxu3 %v3858_v17  ;;  %v3435_v39 = vperm.slane %v9682_v23, 4 }
0x10a0   : > { %3558 = vmatpush.msra.mxu1 %v3337_v7 }
0x10a1   : > { %3531 = vmatpush.msra.mxu0 %v3378_v43  ;;  %3951 = vmatpush.msra.mxu3 %v3857_v25 }
0x10a3   : > { %3532 = vmatpush.msra.mxu0 %v3372_v30  ;;  %3952 = vmatpush.msra.mxu3 %v3856_v32 }
0x10a5   : > { %3533 = vmatpush.msra.mxu0 %v3366_v6 }
0x10a7   : > { %3534 = vmatpush.msra.mxu0 %v3360_v42 }
0x10a9   : > { %3535 = vmatpush.msra.mxu0 %v3354_v31 }
0x10ab   : > { %3536 = vmatpush.msra.mxu0 %v3348_v53 }
0x10ad   : > { %3537 = vmatpush.msra.mxu0 %v3342_v0 }
0x10af   : > { %3538 = vmatpush.msra.mxu0 %v3336_v52 }
0x110b   : > { %v3309_v58 = vpop.xlane.xlu2 %3308 }
0x110c   : > { %v3310_v60 = vmul.f32 0.01, %v3309_v58 }
0x110e   : > { %v3311_v37 = vadd.f32 1e-12, %v3310_v60 }
0x1110   : > { %7962 = vrsqrt.f32 %v3311_v37  ;;  %vm3318_vm2 = vweird.f32 %v3311_v37 }
0x1116   : > { %v7963_v8 = vpop.eup %7962 }
0x1117   : > { %v3313_v2 = vmul.f32 %v7963_v8, %v3311_v37  ;;  %vm3319_vm1 = vweird.f32 %v7963_v8 }
0x1118   : > { %vm3320_vm3 = vmor %vm3318_vm2, %vm3319_vm1 }
0x1119   : > { %v3314_v24 = vmul.f32 %v7963_v8, %v3313_v2 }
0x111b   : > { %v3315_v13 = vmul.f32 0.5, %v3314_v24 }
0x111d   : > { %v3316_v14 = vsub.f32 1.5, %v3315_v13 }
0x111f   : > { %v3317_v20 = vmul.f32 %v7963_v8, %v3316_v14  ;;  %v3855_v14 = vld [vmem:[#allocation19 + $0x3d8] sm:$0xff] }
0x1120   : > { %3953 = vmatpush.msra.mxu3 %v3855_v14 }
0x1121   : > { %v3321_v21 = vsel %vm3320_vm3, %v7963_v8, %v3317_v20  ;;  %v3839_v8 = vld [vmem:[#allocation19 + $0x358] sm:$0xff] }
0x1122   : > { %v3322_v38 = vmul.f32 %v3321_v21, %v9669_v55  ;;  %v3842_v55 = vld [vmem:[#allocation19 + $0x370] sm:$0xff] }
0x1123   : > { %3930 = vmatpush.msra.mxu2 %v3842_v55 }
0x1124   : > { %v3326_v16 = vmul.f32 %v7847_v33, %v3322_v38  ;;  %v3838_v38 = vld [vmem:[#allocation19 + $0x350] sm:$0xff] }
0x1125   : > { %3931 = vmatpush.msra.mxu2 %v3841_v10 }
0x1126   : > { %v9674_v48 = vadd.f32 %v7848_v45, %v3326_v16  ;;  %v3854_v16 = vld [vmem:[#allocation19 + $0x3d0] sm:$0xff] }
0x1127   : > { %3932 = vmatpush.msra.mxu2 %v3840_v28  ;;  %3954 = vmatpush.msra.mxu3 %v3854_v16 }
0x1128   : > { %3459 = vmatmul.f32.vlgmr.msrb.gmra.mxu0 %v9674_v48  ;;  %3479 = vmatmul.f32.vlgmr.msrb.gmra.mxu1 %v9674_v48 }
0x1129   : > { %3499 = vmatmul.f32.vlgmr.msrb.gmra.mxu2 %v9674_v48  ;;  %3519 = vmatmul.f32.vlgmr.msrb.gmra.mxu3 %v9674_v48 }
0x112a   : > { %3933 = vmatpush.msra.mxu2 %v3839_v8  ;;  %v3851_v8 = vld [vmem:[#allocation19 + $0x3b8] sm:$0xff] }
0x112c   : > { %3934 = vmatpush.msra.mxu2 %v3838_v38 }
0x1130   : > { %3539 = vmatmul.f32.vlgmr.msra.gmra.mxu0 %v9674_v48  ;;  %3559 = vmatmul.f32.vlgmr.msra.gmra.mxu1 %v9674_v48 }
0x11a5   : > { %v3460_v9 = vpop.f32.mrf.mxu0  ;;  %v3480_v36 = vpop.f32.mrf.mxu1 }
0x11a6   : > { %v9686_v50 = vadd.f32 %v3460_v9, %v3431_v40  ;;  %v9688_v54 = vadd.f32 %v3480_v36, %v3432_v49  ;;  %v3837_v9 = vld [vmem:[#allocation19 + $0x348] sm:$0xff] }
0x11a7   : > { %v3853_v36 = vld [vmem:[#allocation19 + $0x3c8] sm:$0xff]  ;;  %3935 = vmatpush.msra.mxu2 %v3837_v9 }
0x11a8   : > { %v9691_v47 = vmul.f32 0.70710677, %v9686_v50  ;;  %v9694_v43 = vmul.f32 0.70710677, %v9688_v54  ;;  %3955 = vmatpush.msra.mxu3 %v3853_v36  ;;  %v3849_v9 = vld [vmem:[#allocation19 + $0x3a8] sm:$0xff] }
0x11aa   : > { %v3575_v51 = vmul.f32 %v9691_v47, %v9691_v47  ;;  %v3615_v30 = vmul.f32 %v9694_v43, %v9694_v43 }
0x11ac   : > { %v9703_v35 = vmin.f32 %v3575_v51, 16.0  ;;  %v9705_v12 = vmin.f32 %v3615_v30, 16.0  ;;  %v3500_v6 = vpop.f32.mrf.mxu2  ;;  %v3520_v22 = vpop.f32.mrf.mxu3  ;;  %v3836_v30 = vld [vmem:[#allocation19 + $0x340] sm:$0xff] }
0x11ad   : > { %v9707_v5 = vadd.f32 %v3500_v6, %v3433_v11  ;;  %v9709_v62 = vadd.f32 %v3520_v22, %v3434_v26  ;;  %v3540_v42 = vpop.f32.mrf.mxu0  ;;  %3936 = vmatpush.msra.mxu2 %v3836_v30 }
0x11ae   : > { %v3577_v41 = vmul.f32 2.1237322e-06, %v9703_v35  ;;  %v3588_v31 = vmul.f32 3.8918573e-05, %v9703_v35  ;;  %v3617_v46 = vmul.f32 2.1237322e-06, %v9705_v12  ;;  %v9718_v57 = vadd.f32 %v3540_v42, %v3435_v39 }
0x11af   : > { %v3628_v58 = vmul.f32 3.8918573e-05, %v9705_v12  ;;  %v9716_v53 = vmul.f32 0.70710677, %v9707_v5  ;;  %v9723_v7 = vmul.f32 0.70710677, %v9709_v62 }
0x11b0   : > { %v3578_v60 = vadd.f32 0.00028619796, %v3577_v41  ;;  %v3589_v0 = vadd.f32 0.001143296, %v3588_v31  ;;  %v3618_v1 = vadd.f32 0.00028619796, %v3617_v46 }
0x11b1   : > { %v3629_v37 = vadd.f32 0.001143296, %v3628_v58  ;;  %v3655_v52 = vmul.f32 %v9716_v53, %v9716_v53  ;;  %v3695_v21 = vmul.f32 %v9723_v7, %v9723_v7  ;;  %v9734_v45 = vmul.f32 0.70710677, %v9718_v57  ;;  %v3852_v58 = vld [vmem:[#allocation19 + $0x3c0] sm:$0xff] }
0x11b2   : > { %v3579_v2 = vmul.f32 %v3578_v60, %v9703_v35  ;;  %v3590_v24 = vmul.f32 %v3589_v0, %v9703_v35  ;;  %v3619_v13 = vmul.f32 %v3618_v1, %v9705_v12  ;;  %v3835_v60 = vld [vmem:[#allocation19 + $0x338] sm:$0xff]  ;;  %3956 = vmatpush.msra.mxu3 %v3852_v58 }
0x11b3   : > { %v3630_v20 = vmul.f32 %v3629_v37, %v9705_v12  ;;  %v9729_v33 = vmin.f32 %v3655_v52, 16.0  ;;  %v9741_v49 = vmin.f32 %v3695_v21, 16.0  ;;  %3937 = vmatpush.msra.mxu2 %v3835_v60 }
0x11b4   : > { %v3580_v15 = vadd.f32 0.0036580483, %v3579_v2  ;;  %v3591_v34 = vadd.f32 0.014752088, %v3590_v24  ;;  %v3620_v55 = vadd.f32 0.0036580483, %v3619_v13  ;;  %3957 = vmatpush.msra.mxu3 %v3851_v8 }
0x11b5   : > { %v3631_v17 = vadd.f32 0.014752088, %v3630_v20  ;;  %v3657_v10 = vmul.f32 2.1237322e-06, %v9729_v33  ;;  %v3668_v25 = vmul.f32 3.8918573e-05, %v9729_v33 }
0x11b6   : > { %v3581_v28 = vmul.f32 %v3580_v15, %v9703_v35  ;;  %v3592_v32 = vmul.f32 %v3591_v34, %v9703_v35  ;;  %v3621_v40 = vmul.f32 %v3620_v55, %v9705_v12  ;;  %v3697_v46 = vmul.f32 2.1237322e-06, %v9741_v49  ;;  %v3834_v55 = vld [vmem:[#allocation19 + $0x330] sm:$0xff] }
0x11b7   : > { %v3632_v11 = vmul.f32 %v3631_v17, %v9705_v12  ;;  %v3658_v26 = vadd.f32 0.00028619796, %v3657_v10  ;;  %v3669_v51 = vadd.f32 0.001143296, %v3668_v25  ;;  %v3708_v52 = vmul.f32 3.8918573e-05, %v9741_v49  ;;  %3938 = vmatpush.msra.mxu2 %v3834_v55 }
0x11b8   : > { %v3582_v39 = vadd.f32 0.05243302, %v3581_v28  ;;  %v3593_v6 = vadd.f32 0.112945676, %v3592_v32  ;;  %v3622_v22 = vadd.f32 0.05243302, %v3621_v40 }
0x11b9   : > { %v3633_v42 = vadd.f32 0.112945676, %v3632_v11  ;;  %v3659_v41 = vmul.f32 %v3658_v26, %v9729_v33  ;;  %v3670_v31 = vmul.f32 %v3669_v51, %v9729_v33  ;;  %v3698_v14 = vadd.f32 0.00028619796, %v3697_v46  ;;  %v3850_v17 = vld [vmem:[#allocation19 + $0x3b0] sm:$0xff]  ;;  %v3833_v10 = vld [vmem:[#allocation19 + $0x328] sm:$0xff] }
0x11ba   : > { %v3583_v0 = vmul.f32 %v3582_v39, %v9703_v35  ;;  %v3594_v1 = vmul.f32 %v3593_v6, %v9703_v35  ;;  %v3623_v37 = vmul.f32 %v3622_v22, %v9705_v12  ;;  %v3709_v40 = vadd.f32 0.001143296, %v3708_v52  ;;  %3958 = vmatpush.msra.mxu3 %v3850_v17  ;;  %3939 = vmatpush.msra.mxu2 %v3833_v10  ;;  %v3847_v46 = vld [vmem:[#allocation19 + $0x398] sm:$0xff]  ;;  %v3828_v10 = vld [vmem:[#allocation19 + $0x300] sm:$0xff] }
0x11bb   : > { %v3634_v2 = vmul.f32 %v3633_v42, %v9705_v12  ;;  %v3660_v24 = vadd.f32 0.0036580483, %v3659_v41  ;;  %v3671_v13 = vadd.f32 0.014752088, %v3670_v31  ;;  %v3699_v32 = vmul.f32 %v3698_v14, %v9741_v49  ;;  %v3848_v41 = vld [vmem:[#allocation19 + $0x3a0] sm:$0xff]  ;;  %v3831_v31 = vld [vmem:[#allocation19 + $0x318] sm:$0xff] }
0x11bc   : > { %v3584_v20 = vadd.f32 0.18741608, %v3583_v0  ;;  %v3595_v21 = vadd.f32 0.4994258, %v3594_v1  ;;  %v3624_v38 = vadd.f32 0.18741608, %v3623_v37  ;;  %v3735_v39 = vmul.f32 %v9734_v45, %v9734_v45  ;;  %3959 = vmatpush.msra.mxu3 %v3849_v9  ;;  %v3560_v0 = vpop.f32.mrf.mxu1 }
0x11bd   : > { %v3635_v16 = vadd.f32 0.4994258, %v3634_v2  ;;  %v3661_v15 = vmul.f32 %v3660_v24, %v9729_v33  ;;  %v3672_v34 = vmul.f32 %v3671_v13, %v9729_v33  ;;  %v3436_v42 = vperm.slane %v9682_v23, 5  ;;  %v3830_v1 = vld [vmem:[#allocation19 + $0x310] sm:$0xff]  ;;  %v3829_v13 = vld [vmem:[#allocation19 + $0x308] sm:$0xff] }
0x11be   : > { %v3585_v25 = vmul.f32 %v3584_v20, %v9703_v35  ;;  %v3596_v28 = vmul.f32 %v3595_v21, %v9703_v35  ;;  %v3625_v51 = vmul.f32 %v3624_v38, %v9705_v12  ;;  %v3832_v35 = vld [vmem:[#allocation19 + $0x320] sm:$0xff]  ;;  %v3710_v60 = vmul.f32 %v3709_v40, %v9741_v49  ;;  %3960 = vmatpush.msra.mxu3 %v3848_v41  ;;  %v3846_v37 = vld [vmem:[#allocation19 + $0x390] sm:$0xff] }
0x11bf   : > { %v3636_v36 = vmul.f32 %v3635_v16, %v9705_v12  ;;  %v3673_v11 = vadd.f32 0.112945676, %v3672_v34  ;;  %v3662_v30 = vadd.f32 0.05243302, %v3661_v15  ;;  %v3700_v12 = vadd.f32 0.0036580483, %v3699_v32  ;;  %3940 = vmatpush.msra.mxu2 %v3832_v35 }
0x11c0   : > { %v9758_v26 = vadd.f32 1.0, %v3596_v28  ;;  %v3586_v58 = vadd.f32 1.1283791, %v3585_v25  ;;  %v3626_v52 = vadd.f32 1.1283791, %v3625_v51  ;;  %v9771_v23 = vmin.f32 %v3735_v39, 16.0  ;;  %3961 = vmatpush.msra.mxu3 %v3847_v46 }
0x11c1   : > { %v9763_v6 = vadd.f32 1.0, %v3636_v36  ;;  %v3674_v22 = vmul.f32 %v3673_v11, %v9729_v33  ;;  %v3663_v8 = vmul.f32 %v3662_v30, %v9729_v33  ;;  %3941 = vmatpush.msra.mxu2 %v3831_v31  ;;  %v9773_v24 = vadd.f32 %v3560_v0, %v3436_v42  ;;  %v3845_v16 = vld [vmem:[#allocation19 + $0x388] sm:$0xff]  ;;  %v3875_v15 = vld [vmem:[#allocation19 + $0x478] sm:$0xff]  ;;  %v3844_v36 = vld [vmem:[#allocation19 + $0x380] sm:$0xff] }
0x11c2   : > { %7964 = vrcp.f32 %v9758_v26  ;;  %v9776_v14 = vmul.f32 %v3586_v58, %v9691_v47  ;;  %v3607_v20 = vand.u32 2147483647, %v9758_v26  ;;  %v3701_v21 = vmul.f32 %v3700_v12, %v9741_v49  ;;  %3962 = vmatpush.msra.mxu3 %v3846_v37  ;;  %3969 = vmatpush.msrb.mxu0 %v3875_v15  ;;  %v3891_v47 = vld [vmem:[#allocation19 + $0x4f8] sm:$0xff]  ;;  %v3874_v11 = vld [vmem:[#allocation19 + $0x470] sm:$0xff]  ;;  %v3873_v12 = vld [vmem:[#allocation19 + $0x468] sm:$0xff] }
0x11c3   : > { %7966 = vrcp.f32 %v9763_v6  ;;  %v3675_v2 = vadd.f32 0.4994258, %v3674_v22  ;;  %v3711_v38 = vadd.f32 0.014752088, %v3710_v60  ;;  %3942 = vmatpush.msra.mxu2 %v3830_v1  ;;  %vm3603_vm4 = vweird.f32 %v9758_v26  ;;  %3989 = vmatpush.msrb.mxu1 %v3891_v47  ;;  %v3890_v35 = vld [vmem:[#allocation19 + $0x4f0] sm:$0xff]  ;;  %v3907_v22 = vld [vmem:[#allocation19 + $0x578] sm:$0xff] }
0x11c4   : > { %v3609_v34 = vand.u32 2147483648, %v9758_v26  ;;  %v3647_v55 = vand.u32 2147483647, %v9763_v6  ;;  %v9787_v28 = vmul.f32 %v3626_v52, %v9694_v43  ;;  %v3664_v32 = vadd.f32 0.18741608, %v3663_v8  ;;  %3963 = vmatpush.msra.mxu3 %v3845_v16  ;;  %3970 = vmatpush.msrb.mxu0 %v3874_v11  ;;  %v3923_v42 = vld [vmem:[#allocation19 + $0x5f8] sm:$0xff] }
0x11c5   : > { %v3676_v17 = vmul.f32 %v3675_v2, %v9729_v33  ;;  %v3712_v40 = vmul.f32 %v3711_v38, %v9741_v49  ;;  %v3737_v9 = vmul.f32 2.1237322e-06, %v9771_v23  ;;  %3943 = vmatpush.msra.mxu2 %v3829_v13  ;;  %vm3643_vm5 = vweird.f32 %v9763_v6  ;;  %v3889_v60 = vld [vmem:[#allocation19 + $0x4e8] sm:$0xff]  ;;  %3990 = vmatpush.msrb.mxu1 %v3890_v35  ;;  %v3906_v52 = vld [vmem:[#allocation19 + $0x570] sm:$0xff]  ;;  %v3872_v16 = vld [vmem:[#allocation19 + $0x460] sm:$0xff] }
0x11c6   : > { %v3748_v43 = vmul.f32 3.8918573e-05, %v9771_v23  ;;  %vm9799_vm6 = vcmp.eq.f32.partialorder %v3607_v20, 8.507059e+37  ;;  %v3649_v46 = vand.u32 2147483648, %v9763_v6  ;;  %3964 = vmatpush.msra.mxu3 %v3844_v36  ;;  %v3610_v1 = vor.u32 1.1754944e-38, %v3609_v34  ;;  %v3922_v8 = vld [vmem:[#allocation19 + $0x5f0] sm:$0xff]  ;;  %3971 = vmatpush.msrb.mxu0 %v3873_v12 }
0x11c7   : > { %v9796_v39 = vadd.f32 1.0, %v3676_v17  ;;  %v3713_v58 = vadd.f32 0.112945676, %v3712_v40  ;;  %3944 = vmatpush.msra.mxu2 %v3828_v10  ;;  %v9808_v37 = vmul.f32 0.70710677, %v9773_v24  ;;  %v3665_v13 = vmul.f32 %v3664_v32, %v9729_v33  ;;  %v3888_v15 = vld [vmem:[#allocation19 + $0x4e0] sm:$0xff]  ;;  %3991 = vmatpush.msrb.mxu1 %v3889_v60 }
0x11c8   : > { %v9784_v25 = vpop.eup %7964  ;;  %v3702_v20 = vadd.f32 0.05243302, %v3701_v21  ;;  %4029 = vmatpush.msrb.mxu3 %v3923_v42  ;;  %v3738_v17 = vadd.f32 0.00028619796, %v3737_v9  ;;  %v3749_v47 = vadd.f32 0.001143296, %v3748_v43  ;;  %3972 = vmatpush.msrb.mxu0 %v3872_v16 }
0x11c9   : > { %v9791_v51 = vpop.eup %7966  ;;  %v3599_v30 = vmul.f32 %v9784_v25, %v9758_v26  ;;  %7968 = vrcp.f32 %v9796_v39  ;;  %4009 = vmatpush.msrb.mxu2 %v3907_v22  ;;  %v3714_v38 = vmul.f32 %v3713_v58, %v9741_v49  ;;  %vm3604_vm7 = vweird.f32 %v9784_v25  ;;  %v3905_v10 = vld [vmem:[#allocation19 + $0x568] sm:$0xff]  ;;  %v3871_v32 = vld [vmem:[#allocation19 + $0x458] sm:$0xff]  ;;  %3992 = vmatpush.msrb.mxu1 %v3888_v15  ;;  %v3904_v22 = vld [vmem:[#allocation19 + $0x560] sm:$0xff] }
0x11ca   : > { %v3639_v31 = vmul.f32 %v9791_v51, %v9763_v6  ;;  %v3921_v40 = vld [vmem:[#allocation19 + $0x5e8] sm:$0xff]  ;;  %vm3644_vm8 = vweird.f32 %v9791_v51  ;;  %vm9816_vm9 = vcmp.eq.f32.partialorder %v3647_v55, 8.507059e+37  ;;  %4030 = vmatpush.msrb.mxu3 %v3922_v8  ;;  %v3739_v9 = vmul.f32 %v3738_v17, %v9771_v23  ;;  %v3887_v35 = vld [vmem:[#allocation19 + $0x4d8] sm:$0xff]  ;;  %v3920_v55 = vld [vmem:[#allocation19 + $0x5e0] sm:$0xff]  ;;  %3973 = vmatpush.msrb.mxu0 %v3871_v32 }
0x11cb   : > { %v3600_v0 = vsub.f32 1.0, %v3599_v30  ;;  %4010 = vmatpush.msrb.mxu2 %v3906_v52  ;;  %v3715_v21 = vadd.f32 0.4994258, %v3714_v38  ;;  %v3750_v30 = vmul.f32 %v3749_v47, %v9771_v23  ;;  %v3775_v43 = vmul.f32 %v9808_v37, %v9808_v37  ;;  %vm9829_vm10 = vmor %vm3603_vm4, %vm3604_vm7  ;;  %v3886_v52 = vld [vmem:[#allocation19 + $0x4d0] sm:$0xff]  ;;  %3993 = vmatpush.msrb.mxu1 %v3887_v35  ;;  %v3903_v16 = vld [vmem:[#allocation19 + $0x558] sm:$0xff] }
0x11cc   : > { %v3640_v2 = vsub.f32 1.0, %v3639_v31  ;;  %v3650_v58 = vor.u32 1.1754944e-38, %v3649_v46  ;;  %v9834_v12 = vadd.f32 1.1283791, %v3665_v13  ;;  %4031 = vmatpush.msrb.mxu3 %v3921_v40  ;;  %vm9846_vm11 = vmor %vm3643_vm5, %vm3644_vm8  ;;  %v3919_v15 = vld [vmem:[#allocation19 + $0x5d8] sm:$0xff]  ;;  %v3885_v47 = vld [vmem:[#allocation19 + $0x4c8] sm:$0xff]  ;;  %vm3683_vm14 = vweird.f32 %v9796_v39 }
0x11cd   : > { %v3601_v34 = vmul.f32 %v9784_v25, %v3600_v0  ;;  %v3716_v60 = vmul.f32 %v3715_v21, %v9741_v49  ;;  %4011 = vmatpush.msrb.mxu2 %v3905_v10  ;;  %v3870_v0 = vld [vmem:[#allocation19 + $0x450] sm:$0xff]  ;;  %v3751_v13 = vadd.f32 0.014752088, %v3750_v30  ;;  %v9851_v38 = vmin.f32 %v3775_v43, 16.0  ;;  %3994 = vmatpush.msrb.mxu1 %v3886_v52  ;;  %v3884_v33 = vld [vmem:[#allocation19 + $0x4c0] sm:$0xff]  ;;  %v3901_v43 = vld [vmem:[#allocation19 + $0x548] sm:$0xff] }
0x11ce   : > { %v3641_v36 = vmul.f32 %v9791_v51, %v3640_v2  ;;  %v3703_v2 = vmul.f32 %v3702_v20, %v9741_v49  ;;  %v3740_v17 = vadd.f32 0.0036580483, %v3739_v9  ;;  %4032 = vmatpush.msrb.mxu3 %v3920_v55  ;;  %v3869_v20 = vld [vmem:[#allocation19 + $0x448] sm:$0xff]  ;;  %3974 = vmatpush.msrb.mxu0 %v3870_v0  ;;  %v3689_v9 = vand.u32 2147483648, %v9796_v39  ;;  %v3867_v42 = vld [vmem:[#allocation19 + $0x438] sm:$0xff]  ;;  %v3900_v46 = vld [vmem:[#allocation19 + $0x540] sm:$0xff] }
0x11cf   : > { %v3602_v11 = vadd.f32 %v9784_v25, %v3601_v34  ;;  %v9837_v8 = vpop.eup %7968  ;;  %4012 = vmatpush.msrb.mxu2 %v3904_v22  ;;  %v9864_v41 = vadd.f32 1.0, %v3716_v60  ;;  %v3752_v32 = vmul.f32 %v3751_v13, %v9771_v23  ;;  %3995 = vmatpush.msrb.mxu1 %v3885_v47  ;;  %v3917_v35 = vld [vmem:[#allocation19 + $0x5c8] sm:$0xff]  ;;  %v3687_v22 = vand.u32 2147483647, %v9796_v39  ;;  %v3866_v13 = vld [vmem:[#allocation19 + $0x430] sm:$0xff] }
0x11d0   : > { %v3642_v31 = vadd.f32 %v9791_v51, %v3641_v36  ;;  %v3679_v34 = vmul.f32 %v9837_v8, %v9796_v39  ;;  %vm3684_vm12 = vweird.f32 %v9837_v8  ;;  %4033 = vmatpush.msrb.mxu3 %v3919_v15  ;;  %v3704_v30 = vadd.f32 0.18741608, %v3703_v2  ;;  %3975 = vmatpush.msrb.mxu0 %v3869_v20  ;;  %v3916_v2 = vld [vmem:[#allocation19 + $0x5c0] sm:$0xff]  ;;  %v3915_v20 = vld [vmem:[#allocation19 + $0x5b8] sm:$0xff] }
0x11d1   : > { %v3606_v26 = vsel %vm9829_vm10, %v9784_v25, %v3602_v11  ;;  %v3777_v11 = vmul.f32 2.1237322e-06, %v9851_v38  ;;  %4013 = vmatpush.msrb.mxu2 %v3903_v16  ;;  %7970 = vrcp.f32 %v9864_v41  ;;  %v3741_v55 = vmul.f32 %v3740_v17, %v9771_v23  ;;  %vm9877_vm15 = vmor %vm3683_vm14, %vm3684_vm12  ;;  %3996 = vmatpush.msrb.mxu1 %v3884_v33  ;;  %v3899_v17 = vld [vmem:[#allocation19 + $0x538] sm:$0xff] }
0x11d2   : > { %v3611_v25 = vsel %vm9799_vm6, %v3610_v1, %v3606_v26  ;;  %v3646_v6 = vsel %vm9846_vm11, %v9791_v51, %v3642_v31  ;;  %v3902_v51 = vld [vmem:[#allocation19 + $0x550] sm:$0xff]  ;;  %v3680_v21 = vsub.f32 1.0, %v3679_v34  ;;  %v3883_v31 = vld [vmem:[#allocation19 + $0x4b8] sm:$0xff]  ;;  %v3753_v0 = vadd.f32 0.112945676, %v3752_v32 }
0x11d3   : > { %v3612_v10 = vmul.f32 %v3611_v25, %v9776_v14  ;;  %v3651_v40 = vsel %vm9816_vm9, %v3650_v58, %v3646_v6  ;;  %v3918_v1 = vld [vmem:[#allocation19 + $0x5d0] sm:$0xff]  ;;  %v3868_v14 = vld [vmem:[#allocation19 + $0x440] sm:$0xff]  ;;  %4014 = vmatpush.msrb.mxu2 %v3902_v51  ;;  %v3778_v39 = vadd.f32 0.00028619796, %v3777_v11  ;;  %v3690_v16 = vor.u32 1.1754944e-38, %v3689_v9  ;;  %3997 = vmatpush.msrb.mxu1 %v3883_v31  ;;  %v3881_v51 = vld [vmem:[#allocation19 + $0x4a8] sm:$0xff] }
0x11d4   : > { %v3652_v36 = vmul.f32 %v3651_v40, %v9787_v28  ;;  %v3681_v28 = vmul.f32 %v9837_v8, %v3680_v21  ;;  %4034 = vmatpush.msrb.mxu3 %v3918_v1  ;;  %3976 = vmatpush.msrb.mxu0 %v3868_v14  ;;  %v3705_v15 = vmul.f32 %v3704_v30, %v9741_v49  ;;  %v3788_v6 = vmul.f32 3.8918573e-05, %v9851_v38  ;;  %v3882_v34 = vld [vmem:[#allocation19 + $0x4b0] sm:$0xff]  ;;  %v3865_v49 = vld [vmem:[#allocation19 + $0x428] sm:$0xff]  ;;  %v3864_v30 = vld [vmem:[#allocation19 + $0x420] sm:$0xff] }
0x11d5   : > { %v7565_v58 = vclamps-f32 %v3612_v10, 1.0  ;;  %4015 = vmatpush.msrb.mxu2 %v3901_v43  ;;  %v3754_v25 = vmul.f32 %v3753_v0, %v9771_v23  ;;  %v3667_v47 = vmul.f32 %v9834_v12, %v9716_v53  ;;  %vm3688_vm0 = vcmp.eq.f32.partialorder %v3687_v22, 8.507059e+37  ;;  %3998 = vmatpush.msrb.mxu1 %v3882_v34  ;;  %v3898_v14 = vld [vmem:[#allocation19 + $0x530] sm:$0xff]  ;;  %v3880_v43 = vld [vmem:[#allocation19 + $0x4a0] sm:$0xff] }
0x11d6   : > { %v7566_v52 = vclamps-f32 %v3652_v36, 1.0  ;;  %v3682_v26 = vadd.f32 %v9837_v8, %v3681_v28  ;;  %4035 = vmatpush.msrb.mxu3 %v3917_v35  ;;  %3977 = vmatpush.msrb.mxu0 %v3867_v42  ;;  %v3742_v40 = vadd.f32 0.05243302, %v3741_v55  ;;  %v3789_v11 = vadd.f32 0.001143296, %v3788_v6  ;;  %v3914_v9 = vld [vmem:[#allocation19 + $0x5b0] sm:$0xff] }
0x11d7   : > { %4016 = vmatpush.msrb.mxu2 %v3900_v46  ;;  %v9890_v1 = vpop.eup %7970  ;;  %v3815_v36 = vadd.f32 1.0, %v7565_v58  ;;  %v3755_v32 = vadd.f32 0.4994258, %v3754_v25  ;;  %v3563_v53 = vmul.f32 0.5, %v9686_v50  ;;  %v3706_v35 = vadd.f32 1.1283791, %v3705_v15  ;;  %3999 = vmatpush.msrb.mxu1 %v3881_v51 }
0x11d8   : > { %v3686_v10 = vsel %vm9877_vm15, %v9837_v8, %v3682_v26  ;;  %4036 = vmatpush.msrb.mxu3 %v3916_v2  ;;  %3978 = vmatpush.msrb.mxu0 %v3866_v13  ;;  %v3816_v12 = vadd.f32 1.0, %v7566_v52  ;;  %v3719_v8 = vmul.f32 %v9890_v1, %v9864_v41  ;;  %v3779_v22 = vmul.f32 %v3778_v39, %v9851_v38  ;;  %v3897_v50 = vld [vmem:[#allocation19 + $0x528] sm:$0xff]  ;;  %v3863_v52 = vld [vmem:[#allocation19 + $0x418] sm:$0xff]  ;;  %v3912_v6 = vld [vmem:[#allocation19 + $0x5a0] sm:$0xff] }
0x11d9   : > { %v3691_v21 = vsel %vm3688_vm0, %v3690_v16, %v3686_v10  ;;  %4017 = vmatpush.msrb.mxu2 %v3899_v17  ;;  %v3756_v28 = vmul.f32 %v3755_v32, %v9771_v23  ;;  %v3790_v55 = vmul.f32 %v3789_v11, %v9851_v38  ;;  %v3913_v42 = vld [vmem:[#allocation19 + $0x5a8] sm:$0xff]  ;;  %v3564_v31 = vmul.f32 0.5, %v9688_v54  ;;  %v3879_v26 = vld [vmem:[#allocation19 + $0x498] sm:$0xff]  ;;  %4000 = vmatpush.msrb.mxu1 %v3880_v43  ;;  %v3896_v16 = vld [vmem:[#allocation19 + $0x520] sm:$0xff] }
0x11da   : > { %v3692_v33 = vmul.f32 %v3691_v21, %v3667_v47  ;;  %4037 = vmatpush.msrb.mxu3 %v3915_v20  ;;  %3979 = vmatpush.msrb.mxu0 %v3865_v49  ;;  %v3720_v60 = vsub.f32 1.0, %v3719_v8  ;;  %v3729_v0 = vand.u32 2147483648, %v9864_v41  ;;  %v3821_v46 = vmul.f32 %v3815_v36, %v3563_v53  ;;  %v3862_v17 = vld [vmem:[#allocation19 + $0x410] sm:$0xff]  ;;  %v3895_v49 = vld [vmem:[#allocation19 + $0x518] sm:$0xff]  ;;  %v3860_v43 = vld [vmem:[#allocation19 + $0x400] sm:$0xff] }
0x11db   : > { %4018 = vmatpush.msrb.mxu2 %v3898_v14  ;;  %v3743_v2 = vmul.f32 %v3742_v40, %v9771_v23  ;;  %v9901_v39 = vadd.f32 1.0, %v3756_v28  ;;  %v3791_v13 = vadd.f32 0.014752088, %v3790_v55  ;;  %v3822_v15 = vmul.f32 %v3816_v12, %v3564_v31  ;;  %4001 = vmatpush.msrb.mxu1 %v3879_v26  ;;  %v3878_v40 = vld [vmem:[#allocation19 + $0x490] sm:$0xff]  ;;  %v3911_v11 = vld [vmem:[#allocation19 + $0x598] sm:$0xff]  ;;  %v3861_v14 = vld [vmem:[#allocation19 + $0x408] sm:$0xff] }
0x11dc   : > { %v7567_v58 = vclamps-f32 %v3692_v33, 1.0  ;;  %4038 = vmatpush.msrb.mxu3 %v3914_v9  ;;  %3980 = vmatpush.msrb.mxu0 %v3864_v30  ;;  %v3721_v54 = vmul.f32 %v9890_v1, %v3720_v60  ;;  %vm3724_vm1 = vweird.f32 %v9890_v1  ;;  %v3727_v25 = vand.u32 2147483647, %v9864_v41  ;;  %v3877_v12 = vld [vmem:[#allocation19 + $0x488] sm:$0xff]  ;;  %v3894_v33 = vld [vmem:[#allocation19 + $0x510] sm:$0xff]  ;;  %v3892_v60 = vld [vmem:[#allocation19 + $0x500] sm:$0xff] }
0x11dd   : > { %4019 = vmatpush.msrb.mxu2 %v3897_v50  ;;  %7972 = vrcp.f32 %v9901_v39  ;;  %v3780_v34 = vadd.f32 0.0036580483, %v3779_v22  ;;  %vm3723_vm2 = vweird.f32 %v9864_v41  ;;  %v3792_v10 = vmul.f32 %v3791_v13, %v9851_v38  ;;  %3965 = vmatmul.f32.vlgmr.msra.gmra.mxu3 %v3822_v15  ;;  %v3910_v30 = vld [vmem:[#allocation19 + $0x590] sm:$0xff] }
0x11de   : > { %4039 = vmatpush.msrb.mxu3 %v3913_v42  ;;  %3981 = vmatpush.msrb.mxu0 %v3863_v52  ;;  %v3817_v20 = vadd.f32 1.0, %v7567_v58  ;;  %v3722_v47 = vadd.f32 %v9890_v1, %v3721_v54  ;;  %v3565_v51 = vmul.f32 0.5, %v9707_v5  ;;  %vm9913_vm3 = vmor %vm3723_vm2, %vm3724_vm1  ;;  %v3730_v21 = vor.u32 1.1754944e-38, %v3729_v0  ;;  %v3909_v42 = vld [vmem:[#allocation19 + $0x588] sm:$0xff]  ;;  %v3908_v52 = vld [vmem:[#allocation19 + $0x580] sm:$0xff] }
0x11df   : > { %4020 = vmatpush.msrb.mxu2 %v3896_v16  ;;  %v3744_v32 = vadd.f32 0.18741608, %v3743_v2  ;;  %v3707_v41 = vmul.f32 %v3706_v35, %v9723_v7  ;;  %vm3728_vm4 = vcmp.eq.f32.partialorder %v3727_v25, 8.507059e+37  ;;  %v3793_v5 = vadd.f32 0.112945676, %v3792_v10  ;;  %4002 = vmatpush.msrb.mxu1 %v3878_v40  ;;  %v3893_v35 = vld [vmem:[#allocation19 + $0x508] sm:$0xff] }
0x11e0   : > { %4040 = vmatpush.msrb.mxu3 %v3912_v6  ;;  %3945 = vmatmul.f32.vlgmr.msra.gmra.mxu2 %v3821_v46  ;;  %v3726_v53 = vsel %vm9913_vm3, %v9890_v1, %v3722_v47  ;;  %v3781_v9 = vmul.f32 %v3780_v34, %v9851_v38  ;;  %v3823_v28 = vmul.f32 %v3817_v20, %v3565_v51  ;;  %v3876_v1 = vld [vmem:[#allocation19 + $0x480] sm:$0xff]  ;;  %v3566_v26 = vmul.f32 0.5, %v9709_v62 }
0x11e1   : > { %3982 = vmatpush.msrb.mxu0 %v3862_v17  ;;  %v3731_v8 = vsel %vm3728_vm4, %v3730_v21, %v3726_v53  ;;  %4021 = vmatpush.msrb.mxu2 %v3895_v49  ;;  %v3794_v7 = vmul.f32 %v3793_v5, %v9851_v38  ;;  %v3745_v50 = vmul.f32 %v3744_v32, %v9771_v23  ;;  %v3769_v16 = vand.u32 2147483648, %v9901_v39 }
0x11e2   : > { %v3732_v22 = vmul.f32 %v3731_v8, %v3707_v41  ;;  %4041 = vmatpush.msrb.mxu3 %v3911_v11  ;;  %4003 = vmatpush.msrb.mxu1 %v3877_v12  ;;  %v3782_v13 = vadd.f32 0.05243302, %v3781_v9  ;;  %v3767_v6 = vand.u32 2147483647, %v9901_v39  ;;  %vm3763_vm6 = vweird.f32 %v9901_v39 }
0x11e3   : > { %3983 = vmatpush.msrb.mxu0 %v3861_v14  ;;  %v7973_v55 = vpop.eup %7972  ;;  %4022 = vmatpush.msrb.mxu2 %v3894_v33  ;;  %v3795_v0 = vadd.f32 0.4994258, %v3794_v7  ;;  %v3746_v23 = vadd.f32 1.1283791, %v3745_v50  ;;  %v3770_v20 = vor.u32 1.1754944e-38, %v3769_v16  ;;  %v3567_v32 = vmul.f32 0.5, %v9718_v57 }
0x11e4   : > { %v7568_v31 = vclamps-f32 %v3732_v22, 1.0  ;;  %v3759_v58 = vmul.f32 %v7973_v55, %v9901_v39  ;;  %4042 = vmatpush.msrb.mxu3 %v3910_v30  ;;  %4004 = vmatpush.msrb.mxu1 %v3876_v1  ;;  %vm3764_vm5 = vweird.f32 %v7973_v55  ;;  %v3783_v62 = vmul.f32 %v3782_v13, %v9851_v38  ;;  %v4131_v16 = vld [vmem:[#allocation7 + $0x470] sm:$0xff] }
0x11e5   : > { %3984 = vmatpush.msrb.mxu0 %v3860_v43  ;;  %4023 = vmatpush.msrb.mxu2 %v3893_v35  ;;  %v3796_v15 = vmul.f32 %v3795_v0, %v9851_v38  ;;  %vm3765_vm7 = vmor %vm3763_vm6, %vm3764_vm5  ;;  %v3747_v47 = vmul.f32 %v3746_v23, %v9734_v45  ;;  %vm3768_vm8 = vcmp.eq.f32.partialorder %v3767_v6, 8.507059e+37  ;;  %v3568_v22 = vmul.f32 0.5, %v9773_v24  ;;  %v7849_v35 = vld [vmem:[#allocation20 + $0x1] ss:$0 sm:$0xff]  ;;  %v4130_v23 = vld [vmem:[#allocation7 + $0x468] sm:$0xff] }
0x11e6   : > { %v3818_v46 = vadd.f32 1.0, %v7568_v31  ;;  %v3760_v2 = vsub.f32 1.0, %v3759_v58  ;;  %4043 = vmatpush.msrb.mxu3 %v3909_v42  ;;  %3985 = vmatmul.f32.vlgmr.msrb.gmra.mxu0 %v3823_v28  ;;  %v3784_v51 = vadd.f32 0.18741608, %v3783_v62  ;;  %v4129_v6 = vld [vmem:[#allocation7 + $0x460] sm:$0xff] }
0x11e7   : > { %4024 = vmatpush.msrb.mxu2 %v3892_v60  ;;  %v3797_v34 = vadd.f32 1.0, %v3796_v15  ;;  %v4132_v15 = vld [vmem:[#allocation7 + $0x478] sm:$0xff]  ;;  %4142 = vmatpush.msra.mxu0 %v4130_v23 }
0x11e8   : > { %v3824_v54 = vmul.f32 %v3818_v46, %v3566_v26  ;;  %v3761_v25 = vmul.f32 %v7973_v55, %v3760_v2  ;;  %4044 = vmatpush.msrb.mxu3 %v3908_v52  ;;  %v3785_v39 = vmul.f32 %v3784_v51, %v9851_v38  ;;  %4162 = vmatpush.msra.mxu1 %v4131_v16  ;;  %v4122_v51 = vld [vmem:[#allocation7 + $0x428] sm:$0xff] }
0x11e9   : > { %7974 = vrcp.f32 %v3797_v34  ;;  %v3809_v5 = vand.u32 2147483648, %v3797_v34  ;;  %v3807_v45 = vand.u32 2147483647, %v3797_v34  ;;  %vm3803_vm10 = vweird.f32 %v3797_v34  ;;  %4182 = vmatpush.msra.mxu2 %v4132_v15 }
0x11ea   : > { %v3762_v17 = vadd.f32 %v7973_v55, %v3761_v25  ;;  %4005 = vmatmul.f32.vlgmr.msrb.gmra.mxu1 %v3824_v54  ;;  %v3786_v12 = vadd.f32 1.1283791, %v3785_v39  ;;  %v4127_v54 = vld [vmem:[#allocation7 + $0x450] sm:$0xff]  ;;  %v4128_v25 = vld [vmem:[#allocation7 + $0x458] sm:$0xff] }
0x11eb   : > { %v3810_v9 = vor.u32 1.1754944e-38, %v3809_v5  ;;  %vm3808_vm12 = vcmp.eq.f32.partialorder %v3807_v45, 8.507059e+37  ;;  %4143 = vmatpush.msra.mxu0 %v4127_v54  ;;  %4163 = vmatpush.msra.mxu1 %v4128_v25  ;;  %v4115_v39 = vld [vmem:[#allocation7 + $0x3f0] sm:$0xff]  ;;  %v4113_v5 = vld [vmem:[#allocation7 + $0x3e0] sm:$0xff]  ;;  %v4110_v45 = vld [vmem:[#allocation7 + $0x3c8] sm:$0xff] }
0x11ec   : > { %v3766_v10 = vsel %vm3765_vm7, %v7973_v55, %v3762_v17  ;;  %v3787_v30 = vmul.f32 %v3786_v12, %v9808_v37  ;;  %4183 = vmatpush.msra.mxu2 %v4129_v6  ;;  %v4114_v12 = vld [vmem:[#allocation7 + $0x3e8] sm:$0xff] }
0x11ed   : > { %v3771_v40 = vsel %vm3768_vm8, %v3770_v20, %v3766_v10  ;;  %v4125_v10 = vld [vmem:[#allocation7 + $0x440] sm:$0xff] }
0x11ee   : > { %v3772_v49 = vmul.f32 %v3771_v40, %v3747_v47  ;;  %v4124_v47 = vld [vmem:[#allocation7 + $0x438] sm:$0xff]  ;;  %v4126_v40 = vld [vmem:[#allocation7 + $0x448] sm:$0xff]  ;;  %4164 = vmatpush.msra.mxu1 %v4125_v10 }
0x11ef   : > { %v7975_v21 = vpop.eup %7974  ;;  %4144 = vmatpush.msra.mxu0 %v4124_v47  ;;  %4184 = vmatpush.msra.mxu2 %v4126_v40  ;;  %v7851_v40 = vld [vmem:[#allocation23 + $0x1] ss:$0 sm:$0xff] }
0x11f0   : > { %v7569_v36 = vclamps-f32 %v3772_v49, 1.0  ;;  %v3799_v14 = vmul.f32 %v7975_v21, %v3797_v34  ;;  %vm3804_vm9 = vweird.f32 %v7975_v21  ;;  %v4121_v49 = vld [vmem:[#allocation7 + $0x420] sm:$0xff]  ;;  %4165 = vmatpush.msra.mxu1 %v4122_v51 }
0x11f1   : > { %vm3805_vm11 = vmor %vm3803_vm10, %vm3804_vm9  ;;  %4145 = vmatpush.msra.mxu0 %v4121_v49 }
0x11f2   : > { %v3819_v11 = vadd.f32 1.0, %v7569_v36  ;;  %v3800_v53 = vsub.f32 1.0, %v3799_v14  ;;  %v4123_v36 = vld [vmem:[#allocation7 + $0x430] sm:$0xff]  ;;  %v4116_v14 = vld [vmem:[#allocation7 + $0x3f8] sm:$0xff] }
0x11f3   : > { %4185 = vmatpush.msra.mxu2 %v4123_v36  ;;  %v4134_v36 = vld [vmem:[#allocation8 + $0x6] sm:$0x7] }
0x11f4   : > { %v3825_v41 = vmul.f32 %v3819_v11, %v3567_v32  ;;  %v3801_v33 = vmul.f32 %v7975_v21, %v3800_v53  ;;  %v4119_v32 = vld [vmem:[#allocation7 + $0x410] sm:$0xff]  ;;  %v4120_v11 = vld [vmem:[#allocation7 + $0x418] sm:$0xff] }
0x11f5   : > { %4166 = vmatpush.msra.mxu1 %v4119_v32  ;;  %4186 = vmatpush.msra.mxu2 %v4120_v11  ;;  %v4112_v53 = vld [vmem:[#allocation7 + $0x3d8] sm:$0xff]  ;;  %v4137_v32 = vperm.slane %v4134_v36, 1 }
0x11f6   : > { %4025 = vmatmul.f32.vlgmr.msrb.gmra.mxu2 %v3825_v41  ;;  %v3802_v8 = vadd.f32 %v7975_v21, %v3801_v33  ;;  %v4117_v41 = vld [vmem:[#allocation7 + $0x400] sm:$0xff] }
0x11f7   : > { %4167 = vmatpush.msra.mxu1 %v4116_v14  ;;  %4187 = vmatpush.msra.mxu2 %v4117_v41  ;;  %v4109_v33 = vld [vmem:[#allocation7 + $0x3c0] sm:$0xff] }
0x11f8   : > { %v3806_v43 = vsel %vm3805_vm11, %v7975_v21, %v3802_v8  ;;  %v4118_v21 = vld [vmem:[#allocation7 + $0x408] sm:$0xff]  ;;  %v4111_v8 = vld [vmem:[#allocation7 + $0x3d0] sm:$0xff] }
0x11f9   : > { %v3811_v57 = vsel %vm3808_vm12, %v3810_v9, %v3806_v43  ;;  %4146 = vmatpush.msra.mxu0 %v4118_v21  ;;  %4168 = vmatpush.msra.mxu1 %v4113_v5  ;;  %v4106_v9 = vld [vmem:[#allocation7 + $0x3a8] sm:$0xff]  ;;  %v4108_v43 = vld [vmem:[#allocation7 + $0x3b8] sm:$0xff]  ;;  %v4136_v21 = vperm.slane %v4134_v36, 0  ;;  %v4138_v5 = vperm.slane %v4134_v36, 2 }
0x11fa   : > { %v3812_v28 = vmul.f32 %v3811_v57, %v3787_v30  ;;  %4188 = vmatpush.msra.mxu2 %v4114_v12  ;;  %v4107_v30 = vld [vmem:[#allocation7 + $0x3b0] sm:$0xff] }
0x11fb   : > { %4147 = vmatpush.msra.mxu0 %v4115_v39  ;;  %4169 = vmatpush.msra.mxu1 %v4110_v45  ;;  %v4103_v57 = vld [vmem:[#allocation7 + $0x390] sm:$0xff] }
0x11fc   : > { %v7570_v38 = vclamps-f32 %v3812_v28, 1.0  ;;  %4189 = vmatpush.msra.mxu2 %v4111_v8  ;;  %v4104_v28 = vld [vmem:[#allocation7 + $0x398] sm:$0xff] }
0x11fd   : > { %4148 = vmatpush.msra.mxu0 %v4112_v53  ;;  %4170 = vmatpush.msra.mxu1 %v4107_v30 }
0x11fe   : > { %v3820_v7 = vadd.f32 1.0, %v7570_v38  ;;  %4190 = vmatpush.msra.mxu2 %v4108_v43  ;;  %v4105_v38 = vld [vmem:[#allocation7 + $0x3a0] sm:$0xff] }
0x11ff   : > { %4149 = vmatpush.msra.mxu0 %v4109_v33  ;;  %4171 = vmatpush.msra.mxu1 %v4104_v28 }
0x1200   : > { %v3826_v1 = vmul.f32 %v3820_v7, %v3568_v22  ;;  %4191 = vmatpush.msra.mxu2 %v4105_v38  ;;  %v4100_v22 = vld [vmem:[#allocation7 + $0x378] sm:$0xff]  ;;  %v4101_v7 = vld [vmem:[#allocation7 + $0x380] sm:$0xff] }
0x1201   : > { %4150 = vmatpush.msra.mxu0 %v4106_v9  ;;  %4172 = vmatpush.msra.mxu1 %v4101_v7 }
0x1202   : > { %4045 = vmatmul.f32.vlgmr.msrb.gmra.mxu3 %v3826_v1  ;;  %v4102_v1 = vld [vmem:[#allocation7 + $0x388] sm:$0xff] }
0x1203   : > { %4151 = vmatpush.msra.mxu0 %v4103_v57  ;;  %4192 = vmatpush.msra.mxu2 %v4102_v1  ;;  %v8093_v1 = vld [vmem:[%s9116_s21] ss:$0 sm:$0xff] }
0x1205   : > { %4152 = vmatpush.msra.mxu0 %v4100_v22 }
0x1260   : > { %v3966_v42 = vpop.f32.mrf.mxu3 }
0x1263   : > { %v3946_v55 = vpop.f32.mrf.mxu2  ;;  %v3986_v58 = vpop.f32.mrf.mxu0 }
0x1264   : > { %v3947_v50 = vadd.f32 %v7849_v35, %v3946_v55  ;;  %v4097_v35 = vld [vmem:[#allocation7 + $0x360] sm:$0xff]  ;;  %v4098_v55 = vld [vmem:[#allocation7 + $0x368] sm:$0xff] }
0x1265   : > { %4153 = vmatpush.msra.mxu0 %v4097_v35  ;;  %4173 = vmatpush.msra.mxu1 %v4098_v55 }
0x1266   : > { %v3967_v31 = vadd.f32 %v3966_v42, %v3947_v50  ;;  %v4099_v50 = vld [vmem:[#allocation7 + $0x370] sm:$0xff]  ;;  %v4094_v42 = vld [vmem:[#allocation7 + $0x348] sm:$0xff] }
0x1267   : > { %v4006_v0 = vpop.f32.mrf.mxu1  ;;  %4193 = vmatpush.msra.mxu2 %v4099_v50  ;;  %4154 = vmatpush.msra.mxu0 %v4094_v42 }
0x1268   : > { %v3987_v60 = vadd.f32 %v3986_v58, %v3967_v31  ;;  %v4095_v31 = vld [vmem:[#allocation7 + $0x350] sm:$0xff]  ;;  %v4096_v58 = vld [vmem:[#allocation7 + $0x358] sm:$0xff] }
0x1269   : > { %4174 = vmatpush.msra.mxu1 %v4095_v31  ;;  %4194 = vmatpush.msra.mxu2 %v4096_v58 }
0x126a   : > { %v4007_v52 = vadd.f32 %v4006_v0, %v3987_v60  ;;  %v4091_v60 = vld [vmem:[#allocation7 + $0x330] sm:$0xff]  ;;  %v4092_v0 = vld [vmem:[#allocation7 + $0x338] sm:$0xff] }
0x126b   : > { %4155 = vmatpush.msra.mxu0 %v4091_v60  ;;  %4175 = vmatpush.msra.mxu1 %v4092_v0 }
0x1279   : > { %v4026_v37 = vpop.f32.mrf.mxu2 }
0x127a   : > { %v4027_v26 = vadd.f32 %v4026_v37, %v4007_v52  ;;  %v4093_v52 = vld [vmem:[#allocation7 + $0x340] sm:$0xff]  ;;  %v4088_v37 = vld [vmem:[#allocation7 + $0x318] sm:$0xff] }
0x127b   : > { %4195 = vmatpush.msra.mxu2 %v4093_v52  ;;  %4156 = vmatpush.msra.mxu0 %v4088_v37 }
0x1285   : > { %v4046_v46 = vpop.f32.mrf.mxu3 }
0x1286   : > { %v4047_v2 = vadd.f32 %v4046_v46, %v4027_v26  ;;  %v4089_v26 = vld [vmem:[#allocation7 + $0x320] sm:$0xff]  ;;  %v4090_v46 = vld [vmem:[#allocation7 + $0x328] sm:$0xff] }
0x1287   : > { %4176 = vmatpush.msra.mxu1 %v4089_v26  ;;  %4196 = vmatpush.msra.mxu2 %v4090_v46 }
0x1288   : > { %v4049_v13 = vadd.f32 %v4047_v2, %v9674_v48  ;;  %v4085_v2 = vld [vmem:[#allocation7 + $0x300] sm:$0xff] }
0x1289   : > { %4157 = vmatpush.msra.mxu0 %v4085_v2 }
0x128a   : > { %v4054_v24 = vmul.f32 %v9111_v3, %v4049_v13 }
0x128c   : > { %4055 = vadd.xlane.f32.xlu0 %v4054_v24  ;;  %v4087_v24 = vld [vmem:[#allocation7 + $0x310] sm:$0xff] }
0x128d   : > { %4197 = vmatpush.msra.mxu2 %v4087_v24 }
0x12ff   : > { %v4056_v34 = vpop.xlane.xlu0 %4055 }
0x1300   : > { %v4057_v17 = vmul.f32 0.01, %v4056_v34 }
0x1302   : > { %v4058_v62 = vsub.f32 %v4049_v13, %v4057_v17  ;;  %v4086_v13 = vld [vmem:[#allocation7 + $0x308] sm:$0xff] }
0x1303   : > { %4177 = vmatpush.msra.mxu1 %v4086_v13 }
0x1304   : > { %v9939_v48 = vmul.f32 %v9111_v3, %v4058_v62 }
0x1306   : > { %v4060_v20 = vmul.f32 %v9939_v48, %v9939_v48 }
0x1308   : > { %4061 = vadd.xlane.f32.xlu1 %v4060_v20  ;;  %v7850_v20 = vld [vmem:[#allocation22 + $0x1] ss:$0 sm:$0xff] }
0x137b   : > { %v4062_v23 = vpop.xlane.xlu1 %4061 }
0x137c   : > { %v4063_v16 = vmul.f32 0.01, %v4062_v23 }
0x137e   : > { %v4064_v15 = vadd.f32 1e-12, %v4063_v16 }
0x1380   : > { %7976 = vrsqrt.f32 %v4064_v15  ;;  %vm4071_vm15 = vweird.f32 %v4064_v15 }
0x1386   : > { %v7977_v54 = vpop.eup %7976 }
0x1387   : > { %v4066_v25 = vmul.f32 %v7977_v54, %v4064_v15  ;;  %vm4072_vm14 = vweird.f32 %v7977_v54 }
0x1388   : > { %vm4073_vm0 = vmor %vm4071_vm15, %vm4072_vm14 }
0x1389   : > { %v4067_v6 = vmul.f32 %v7977_v54, %v4066_v25 }
0x138b   : > { %v4068_v34 = vmul.f32 0.5, %v4067_v6 }
0x138d   : > { %v4069_v17 = vsub.f32 1.5, %v4068_v34 }
0x138f   : > { %v4070_v62 = vmul.f32 %v7977_v54, %v4069_v17 }
0x1391   : > { %v4074_v47 = vsel %vm4073_vm0, %v7977_v54, %v4070_v62 }
0x1392   : > { %v4075_v10 = vmul.f32 %v4074_v47, %v9939_v48 }
0x1394   : > { %v4079_v49 = vmul.f32 %v7850_v20, %v4075_v10 }
0x1396   : > { %v9944_v51 = vadd.f32 %v7851_v40, %v4079_v49 }
0x1398   : > { %4158 = vmatmul.f32.vlgmr.msra.gmra.mxu0 %v9944_v51  ;;  %4178 = vmatmul.f32.vlgmr.msra.gmra.mxu1 %v9944_v51 }
0x1399   : > { %4198 = vmatmul.f32.vlgmr.msra.gmra.mxu2 %v9944_v51 }
0x1415   : > { %v4159_v11 = vpop.f32.mrf.mxu0  ;;  %v4179_v39 = vpop.f32.mrf.mxu1 }
0x1416   : > { %v4160_v14 = vadd.f32 %v4159_v11, %v4136_v21  ;;  %v4180_v41 = vadd.f32 %v4179_v39, %v4137_v32 }
0x1418   : > { %4218 = vmatpush.xpose.msra.mxu3 %v4180_v41  ;;  %4277 = vmatpush.xpose.msrb.mxu1 %v4180_v41  ;;  %v4202_v48 = vmul.f32 %v9134_v18, %v4160_v14  ;;  %v4261_v53 = vmul.f32 %v9185_v44, %v4160_v14  ;;  %v4320_v45 = vmul.f32 %v9200_v59, %v4160_v14 }
0x1419   : > { %v4379_v8 = vmul.f32 %v9253_v56, %v4160_v14  ;;  %v4438_v9 = vmul.f32 %v9208_v61, %v4160_v14  ;;  %v4497_v30 = vmul.f32 %v9137_v19, %v4160_v14  ;;  %v4556_v43 = vmul.f32 %v9216_v63, %v4160_v14 }
0x141a   : > { %v4615_v57 = vmul.f32 %v9156_v27, %v4160_v14  ;;  %v4674_v28 = vmul.f32 %v9223_v4, %v4160_v14  ;;  %v4733_v38 = vmul.f32 %v9170_v29, %v4160_v14 }
0x141b   : > { %4219 = vmatmul.f32.vlgmr.msra.gmra.mxu3 %v4202_v48  ;;  %4278 = vmatmul.f32.vlgmr.msrb.gmra.mxu1 %v4261_v53 }
0x141c   : > { %4336 = vmatpush.xpose.msrb.mxu3 %v4180_v41  ;;  %4395 = vmatpush.xpose.msra.mxu1 %v4180_v41  ;;  %v4199_v12 = vpop.f32.mrf.mxu2 }
0x141d   : > { %v9951_v33 = vadd.f32 %v4199_v12, %v4138_v5 }
0x141f   : > { %4254 = vmatpush.msrb.mxu0 %v9951_v33  ;;  %4313 = vmatpush.msrb.mxu2 %v9951_v33 }
0x1420   : > { %4454 = vmatpush.xpose.msra.mxu3 %v4180_v41  ;;  %4513 = vmatpush.xpose.msrb.mxu1 %v4180_v41 }
0x1421   : > { %4372 = vmatpush.msra.mxu0 %v9951_v33  ;;  %4431 = vmatpush.msra.mxu2 %v9951_v33 }
0x1423   : > { %4337 = vmatmul.f32.vlgmr.msrb.gmra.mxu3 %v4320_v45  ;;  %4396 = vmatmul.f32.vlgmr.msra.gmra.mxu1 %v4379_v8 }
0x1424   : > { %4572 = vmatpush.xpose.msrb.mxu3 %v4180_v41  ;;  %4631 = vmatpush.xpose.msra.mxu1 %v4180_v41 }
0x142b   : > { %4455 = vmatmul.f32.vlgmr.msra.gmra.mxu3 %v4438_v9  ;;  %4514 = vmatmul.f32.vlgmr.msrb.gmra.mxu1 %v4497_v30 }
0x142c   : > { %4690 = vmatpush.xpose.msra.mxu3 %v4180_v41  ;;  %4749 = vmatpush.xpose.msrb.mxu1 %v4180_v41 }
0x1433   : > { %4573 = vmatmul.f32.vlgmr.msrb.gmra.mxu3 %v4556_v43  ;;  %4632 = vmatmul.f32.vlgmr.msra.gmra.mxu1 %v4615_v57 }
0x143b   : > { %4691 = vmatmul.f32.vlgmr.msra.gmra.mxu3 %v4674_v28  ;;  %4750 = vmatmul.f32.vlgmr.msrb.gmra.mxu1 %v4733_v38 }
0x1498   : > { %v4279_v22 = vpop.f32.mrf.mxu1 }
0x1499   : > { %v4282_v7 = vmul.f32 0.31622776, %v4279_v22 }
0x149b   : > { %v4283_v35 = vadd.f32 %v8093_v1, %v4282_v7 }
0x149d   : > { %v4284_v55 = vsel %vm1158_vm13, %v4283_v35, -inf }
0x149e   : > { %4285 = vmax.xlane.f32.xlu2 %v4284_v55  ;;  %v4220_v50 = vpop.f32.mrf.mxu3 }
0x149f   : > { %v4223_v42 = vmul.f32 0.31622776, %v4220_v50 }
0x14a0   : > { %v4397_v31 = vpop.f32.mrf.mxu1 }
0x14a1   : > { %v4400_v58 = vmul.f32 0.31622776, %v4397_v31  ;;  %v4224_v60 = vadd.f32 %v8093_v1, %v4223_v42 }
0x14a3   : > { %v4225_v0 = vsel %vm1158_vm13, %v4224_v60, -inf  ;;  %v4401_v52 = vadd.f32 %v8093_v1, %v4400_v58 }
0x14a4   : > { %4226 = vmax.xlane.f32.xlu0 %v4225_v0 }
0x14a5   : > { %v4402_v37 = vsel %vm1158_vm13, %v4401_v52, -inf }
0x14a6   : > { %4403 = vmax.xlane.f32.xlu1 %v4402_v37  ;;  %v4338_v26 = vpop.f32.mrf.mxu3 }
0x14a7   : > { %v4341_v46 = vmul.f32 0.31622776, %v4338_v26 }
0x14a8   : > { %v4515_v2 = vpop.f32.mrf.mxu1 }
0x14a9   : > { %v4518_v13 = vmul.f32 0.31622776, %v4515_v2  ;;  %v4342_v24 = vadd.f32 %v8093_v1, %v4341_v46 }
0x14ab   : > { %v4343_v23 = vsel %vm1158_vm13, %v4342_v24, -inf  ;;  %v4519_v16 = vadd.f32 %v8093_v1, %v4518_v13 }
0x14ac   : > { %4344 = vmax.xlane.f32.xlu2 %v4343_v23 }
0x14ad   : > { %v4520_v15 = vsel %vm1158_vm13, %v4519_v16, -inf }
0x14ae   : > { %v4456_v54 = vpop.f32.mrf.mxu3  ;;  %4521 = vmax.xlane.f32.xlu0 %v4520_v15 }
0x14af   : > { %v4459_v25 = vmul.f32 0.31622776, %v4456_v54 }
0x14b0   : > { %v4633_v6 = vpop.f32.mrf.mxu1 }
0x14b1   : > { %v4636_v34 = vmul.f32 0.31622776, %v4633_v6  ;;  %v4460_v17 = vadd.f32 %v8093_v1, %v4459_v25 }
0x14b3   : > { %v4461_v62 = vsel %vm1158_vm13, %v4460_v17, -inf  ;;  %v4637_v20 = vadd.f32 %v8093_v1, %v4636_v34 }
0x14b4   : > { %4462 = vmax.xlane.f32.xlu1 %v4461_v62 }
0x14b5   : > { %v4638_v47 = vsel %vm1158_vm13, %v4637_v20, -inf }
0x14b6   : > { %v4574_v10 = vpop.f32.mrf.mxu3  ;;  %4639 = vmax.xlane.f32.xlu2 %v4638_v47 }
0x14b7   : > { %v4577_v40 = vmul.f32 0.31622776, %v4574_v10 }
0x14b8   : > { %v4751_v49 = vpop.f32.mrf.mxu1 }
0x14b9   : > { %v4754_v36 = vmul.f32 0.31622776, %v4751_v49  ;;  %v4578_v21 = vadd.f32 %v8093_v1, %v4577_v40 }
0x14bb   : > { %v4579_v32 = vsel %vm1158_vm13, %v4578_v21, -inf  ;;  %v4755_v11 = vadd.f32 %v8093_v1, %v4754_v36 }
0x14bc   : > { %4580 = vmax.xlane.f32.xlu0 %v4579_v32 }
0x14bd   : > { %v4756_v39 = vsel %vm1158_vm13, %v4755_v11, -inf }
0x14be   : > { %v4692_v14 = vpop.f32.mrf.mxu3  ;;  %4757 = vmax.xlane.f32.xlu1 %v4756_v39 }
0x14bf   : > { %v4695_v41 = vmul.f32 0.31622776, %v4692_v14 }
0x14c1   : > { %v9975_v48 = vadd.f32 %v8093_v1, %v4695_v41 }
0x14c3   : > { %v4697_v53 = vsel %vm1158_vm13, %v9975_v48, -inf }
0x14c4   : > { %4698 = vmax.xlane.f32.xlu2 %v4697_v53 }
0x1511   : > { %v4286_v5 = vpop.xlane.xlu2 %4285 }
0x1512   : > { %v4287_v12 = vsub.f32 %v4283_v35, %v4286_v5 }
0x1514   : > { %v4288_v45 = vmul.f32 1.442695, %v4287_v12 }
0x1516   : > { %7978 = vpow2.f32 %v4288_v45 }
0x1517   : > { %v4227_v8 = vpop.xlane.xlu0 %4226 }
0x1518   : > { %v4228_v9 = vsub.f32 %v4224_v60, %v4227_v8 }
0x1519   : > { %v4404_v30 = vpop.xlane.xlu1 %4403 }
0x151a   : > { %v4229_v43 = vmul.f32 1.442695, %v4228_v9  ;;  %v4405_v57 = vsub.f32 %v4401_v52, %v4404_v30 }
0x151c   : > { %v9979_v28 = vpop.eup %7978  ;;  %7980 = vpow2.f32 %v4229_v43  ;;  %v4406_v38 = vmul.f32 1.442695, %v4405_v57 }
0x151d   : > { %v4290_v22 = vsel %vm1158_vm13, %v9979_v28, 0.0 }
0x151e   : > { %7982 = vpow2.f32 %v4406_v38  ;;  %4291 = vadd.xlane.f32.xlu0 %v4290_v22 }
0x151f   : > { %v4345_v7 = vpop.xlane.xlu2 %4344 }
0x1520   : > { %v4346_v1 = vsub.f32 %v4342_v24, %v4345_v7 }
0x1521   : > { %v4522_v55 = vpop.xlane.xlu0 %4521 }
0x1522   : > { %v9983_v35 = vpop.eup %7980  ;;  %v4347_v50 = vmul.f32 1.442695, %v4346_v1  ;;  %v4523_v42 = vsub.f32 %v4519_v16, %v4522_v55 }
0x1523   : > { %v4231_v31 = vsel %vm1158_vm13, %v9983_v35, 0.0 }
0x1524   : > { %v9987_v58 = vpop.eup %7982  ;;  %7984 = vpow2.f32 %v4347_v50  ;;  %v4524_v60 = vmul.f32 1.442695, %v4523_v42  ;;  %4232 = vadd.xlane.f32.xlu1 %v4231_v31 }
0x1525   : > { %v4408_v0 = vsel %vm1158_vm13, %v9987_v58, 0.0 }
0x1526   : > { %7986 = vpow2.f32 %v4524_v60  ;;  %4409 = vadd.xlane.f32.xlu2 %v4408_v0 }
0x1527   : > { %v4463_v52 = vpop.xlane.xlu1 %4462 }
0x1528   : > { %v4464_v37 = vsub.f32 %v4460_v17, %v4463_v52 }
0x1529   : > { %v4640_v26 = vpop.xlane.xlu2 %4639 }
0x152a   : > { %v7985_v46 = vpop.eup %7984  ;;  %v4465_v2 = vmul.f32 1.442695, %v4464_v37  ;;  %v4641_v13 = vsub.f32 %v4637_v20, %v4640_v26 }
0x152b   : > { %v4349_v24 = vsel %vm1158_vm13, %v7985_v46, 0.0 }
0x152c   : > { %v7987_v23 = vpop.eup %7986  ;;  %7988 = vpow2.f32 %v4465_v2  ;;  %v4642_v16 = vmul.f32 1.442695, %v4641_v13  ;;  %4350 = vadd.xlane.f32.xlu0 %v4349_v24 }
0x152d   : > { %v4526_v15 = vsel %vm1158_vm13, %v7987_v23, 0.0 }
0x152e   : > { %7990 = vpow2.f32 %v4642_v16  ;;  %4527 = vadd.xlane.f32.xlu1 %v4526_v15  ;;  %v4808_v16 = vld [vmem:[#allocation10 + $0x178] sm:$0xff]  ;;  %v4807_v15 = vld [vmem:[#allocation10 + $0x170] sm:$0xff] }
0x152f   : > { %v4581_v54 = vpop.xlane.xlu0 %4580  ;;  %4814 = vmatpush.msrb.mxu3 %v4808_v16  ;;  %v4954_v16 = vld [vmem:[#allocation16 + $0x8a0] sm:$0xff] }
0x1530   : > { %v4582_v25 = vsub.f32 %v4578_v21, %v4581_v54  ;;  %v4805_v54 = vld [vmem:[#allocation10 + $0x160] sm:$0xff] }
0x1531   : > { %v4758_v6 = vpop.xlane.xlu1 %4757  ;;  %4815 = vmatpush.msrb.mxu3 %v4807_v15  ;;  %v4955_v15 = vld [vmem:[#allocation16 + $0x8a8] sm:$0xff] }
0x1532   : > { %v7989_v34 = vpop.eup %7988  ;;  %v4583_v62 = vmul.f32 1.442695, %v4582_v25  ;;  %v4759_v17 = vsub.f32 %v4755_v11, %v4758_v6  ;;  %v4804_v25 = vld [vmem:[#allocation10 + $0x158] sm:$0xff]  ;;  %v4803_v6 = vld [vmem:[#allocation10 + $0x150] sm:$0xff] }
0x1533   : > { %v4467_v47 = vsel %vm1158_vm13, %v7989_v34, 0.0 }
0x1534   : > { %v7991_v10 = vpop.eup %7990  ;;  %7992 = vpow2.f32 %v4583_v62  ;;  %v4760_v20 = vmul.f32 1.442695, %v4759_v17  ;;  %4468 = vadd.xlane.f32.xlu2 %v4467_v47  ;;  %v4801_v62 = vld [vmem:[#allocation10 + $0x140] sm:$0xff]  ;;  %v4800_v17 = vld [vmem:[#allocation10 + $0x138] sm:$0xff]  ;;  %v4799_v47 = vld [vmem:[#allocation10 + $0x130] sm:$0xff] }
0x1535   : > { %v4644_v40 = vsel %vm1158_vm13, %v7991_v10, 0.0 }
0x1536   : > { %7994 = vpow2.f32 %v4760_v20  ;;  %4645 = vadd.xlane.f32.xlu0 %v4644_v40  ;;  %v4797_v20 = vld [vmem:[#allocation10 + $0x120] sm:$0xff] }
0x1537   : > { %v4699_v49 = vpop.xlane.xlu2 %4698 }
0x1538   : > { %v4700_v36 = vsub.f32 %v9975_v48, %v4699_v49 }
0x153a   : > { %v7993_v32 = vpop.eup %7992  ;;  %v4701_v39 = vmul.f32 1.442695, %v4700_v36  ;;  %v4796_v36 = vld [vmem:[#allocation10 + $0x118] sm:$0xff] }
0x153b   : > { %v4585_v21 = vsel %vm1158_vm13, %v7993_v32, 0.0 }
0x153c   : > { %v7995_v14 = vpop.eup %7994  ;;  %7996 = vpow2.f32 %v4701_v39  ;;  %4586 = vadd.xlane.f32.xlu1 %v4585_v21  ;;  %v4794_v39 = vld [vmem:[#allocation10 + $0x108] sm:$0xff]  ;;  %v4793_v21 = vld [vmem:[#allocation10 + $0x100] sm:$0xff] }
0x153d   : > { %v4762_v11 = vsel %vm1158_vm13, %v7995_v14, 0.0 }
0x153e   : > { %4763 = vadd.xlane.f32.xlu2 %v4762_v11 }
0x1542   : > { %v7997_v41 = vpop.eup %7996 }
0x1543   : > { %v4703_v53 = vsel %vm1158_vm13, %v7997_v41, 0.0 }
0x1544   : > { %4704 = vadd.xlane.f32.xlu0 %v4703_v53 }
0x1591   : > { %v4292_v5 = vpop.xlane.xlu0 %4291 }
0x1592   : > { %7998 = vrcp.f32 %v4292_v5 }
0x1597   : > { %v4233_v12 = vpop.xlane.xlu1 %4232 }
0x1598   : > { %v7999_v45 = vpop.eup %7998  ;;  %8000 = vrcp.f32 %v4233_v12 }
0x1599   : > { %v4294_v48 = vmul.f32 %v7999_v45, %v9979_v28  ;;  %v4410_v8 = vpop.xlane.xlu2 %4409 }
0x159a   : > { %8002 = vrcp.f32 %v4410_v8 }
0x159b   : > { %7572 = vmatmul.msk.f32.vlgmr.msrb.gmra.mxu2 %vm1158_vm13, %v4294_v48 }
0x159c   : > { %4549 = vmatpush.msrb.mxu2 %v9951_v33 }
0x159e   : > { %v8001_v9 = vpop.eup %8000 }
0x159f   : > { %v4235_v30 = vmul.f32 %v8001_v9, %v9983_v35  ;;  %v4351_v43 = vpop.xlane.xlu0 %4350 }
0x15a0   : > { %v8003_v57 = vpop.eup %8002  ;;  %8004 = vrcp.f32 %v4351_v43 }
0x15a1   : > { %v4412_v38 = vmul.f32 %v8003_v57, %v9987_v58  ;;  %7571 = vmatmul.msk.f32.vlgmr.msrb.gmra.mxu0 %vm1158_vm13, %v4235_v30  ;;  %v4528_v22 = vpop.xlane.xlu1 %4527 }
0x15a2   : > { %4490 = vmatpush.msrb.mxu0 %v9951_v33  ;;  %8006 = vrcp.f32 %v4528_v22 }
0x15a3   : > { %7574 = vmatmul.msk.f32.vlgmr.msra.gmra.mxu2 %vm1158_vm13, %v4412_v38 }
0x15a4   : > { %4667 = vmatpush.msra.mxu2 %v9951_v33 }
0x15a6   : > { %v8005_v28 = vpop.eup %8004 }
0x15a7   : > { %v4353_v7 = vmul.f32 %v8005_v28, %v7985_v46  ;;  %v4469_v1 = vpop.xlane.xlu2 %4468 }
0x15a8   : > { %v8007_v55 = vpop.eup %8006  ;;  %8008 = vrcp.f32 %v4469_v1 }
0x15a9   : > { %v4530_v35 = vmul.f32 %v8007_v55, %v7987_v23  ;;  %7573 = vmatmul.msk.f32.vlgmr.msra.gmra.mxu0 %vm1158_vm13, %v4353_v7  ;;  %v4646_v50 = vpop.xlane.xlu0 %4645 }
0x15aa   : > { %4608 = vmatpush.msra.mxu0 %v9951_v33  ;;  %8010 = vrcp.f32 %v4646_v50 }
0x15ab   : > { %7576 = vmatmul.msk.f32.vlgmr.msrb.gmra.mxu2 %vm1158_vm13, %v4530_v35 }
0x15ac   : > { %4785 = vmatpush.msrb.mxu2 %v9951_v33 }
0x15ae   : > { %v8009_v42 = vpop.eup %8008 }
0x15af   : > { %v4471_v31 = vmul.f32 %v8009_v42, %v7989_v34  ;;  %v4587_v58 = vpop.xlane.xlu1 %4586  ;;  %v4802_v34 = vld [vmem:[#allocation10 + $0x148] sm:$0xff] }
0x15b0   : > { %v8011_v60 = vpop.eup %8010  ;;  %8012 = vrcp.f32 %v4587_v58 }
0x15b1   : > { %v4648_v0 = vmul.f32 %v8011_v60, %v7991_v10  ;;  %v4764_v52 = vpop.xlane.xlu2 %4763  ;;  %7575 = vmatmul.msk.f32.vlgmr.msrb.gmra.mxu0 %vm1158_vm13, %v4471_v31  ;;  %v4798_v10 = vld [vmem:[#allocation10 + $0x128] sm:$0xff] }
0x15b2   : > { %8014 = vrcp.f32 %v4764_v52  ;;  %4726 = vmatpush.msrb.mxu0 %v9951_v33  ;;  %v4806_v33 = vld [vmem:[#allocation10 + $0x168] sm:$0xff] }
0x15b3   : > { %7578 = vmatmul.msk.f32.vlgmr.msra.gmra.mxu2 %vm1158_vm13, %v4648_v0  ;;  %4816 = vmatpush.msrb.mxu3 %v4806_v33  ;;  %v4948_v33 = vld [vmem:[#allocation16 + $0x870] sm:$0xff] }
0x15b5   : > { %4817 = vmatpush.msrb.mxu3 %v4805_v54  ;;  %v4949_v54 = vld [vmem:[#allocation16 + $0x878] sm:$0xff] }
0x15b6   : > { %v8013_v37 = vpop.eup %8012 }
0x15b7   : > { %v4589_v26 = vmul.f32 %v8013_v37, %v7993_v32  ;;  %v4705_v46 = vpop.xlane.xlu0 %4704  ;;  %4818 = vmatpush.msrb.mxu3 %v4804_v25  ;;  %v4795_v32 = vld [vmem:[#allocation10 + $0x110] sm:$0xff]  ;;  %v7852_v37 = vld [vmem:[#allocation11 + $0x2] ss:$0 sm:$0xff] }
0x15b8   : > { %v8015_v2 = vpop.eup %8014  ;;  %8016 = vrcp.f32 %v4705_v46  ;;  %v4942_v25 = vld [vmem:[#allocation16 + $0x840] sm:$0xff] }
0x15b9   : > { %v4766_v13 = vmul.f32 %v8015_v2, %v7995_v14  ;;  %7577 = vmatmul.msk.f32.vlgmr.msra.gmra.mxu0 %vm1158_vm13, %v4589_v26  ;;  %4819 = vmatpush.msrb.mxu3 %v4803_v6  ;;  %v4943_v6 = vld [vmem:[#allocation16 + $0x848] sm:$0xff] }
0x15bb   : > { %7580 = vmatmul.msk.f32.vlgmr.msrb.gmra.mxu2 %vm1158_vm13, %v4766_v13  ;;  %4820 = vmatpush.msrb.mxu3 %v4802_v34  ;;  %v4937_v34 = vld [vmem:[#allocation16 + $0x818] sm:$0xff] }
0x15bd   : > { %4821 = vmatpush.msrb.mxu3 %v4801_v62  ;;  %v4930_v62 = vld [vmem:[#allocation16 + $0x7e0] sm:$0xff] }
0x15be   : > { %v8017_v24 = vpop.eup %8016 }
0x15bf   : > { %v4707_v23 = vmul.f32 %v8017_v24, %v7997_v41  ;;  %4822 = vmatpush.msrb.mxu3 %v4800_v17  ;;  %v4960_v24 = vld [vmem:[#allocation16 + $0x8d0] sm:$0xff]  ;;  %v4931_v17 = vld [vmem:[#allocation16 + $0x7e8] sm:$0xff] }
0x15c0   : > { %4981 = vmatpush.msra.mxu0 %v4960_v24  ;;  %v4926_v24 = vld [vmem:[#allocation16 + $0x7c0] sm:$0xff] }
0x15c1   : > { %7579 = vmatmul.msk.f32.vlgmr.msrb.gmra.mxu0 %vm1158_vm13, %v4707_v23  ;;  %4823 = vmatpush.msrb.mxu3 %v4799_v47  ;;  %v4961_v23 = vld [vmem:[#allocation16 + $0x8d8] sm:$0xff]  ;;  %v4962_v47 = vld [vmem:[#allocation16 + $0x8e0] sm:$0xff] }
0x15c2   : > { %5001 = vmatpush.msra.mxu1 %v4961_v23  ;;  %4982 = vmatpush.msra.mxu0 %v4954_v16  ;;  %v4927_v23 = vld [vmem:[#allocation16 + $0x7c8] sm:$0xff]  ;;  %v4952_v16 = vld [vmem:[#allocation16 + $0x890] sm:$0xff] }
0x15c3   : > { %4824 = vmatpush.msrb.mxu3 %v4798_v10  ;;  %v4963_v10 = vld [vmem:[#allocation16 + $0x8e8] sm:$0xff]  ;;  %5021 = vmatpush.msra.mxu2 %v4962_v47  ;;  %v4908_v47 = vld [vmem:[#allocation16 + $0x730] sm:$0xff] }
0x15c4   : > { %5002 = vmatpush.msra.mxu1 %v4955_v15  ;;  %4983 = vmatpush.msra.mxu0 %v4948_v33  ;;  %v4953_v15 = vld [vmem:[#allocation16 + $0x898] sm:$0xff]  ;;  %v4920_v33 = vld [vmem:[#allocation16 + $0x790] sm:$0xff] }
0x15c5   : > { %4825 = vmatpush.msrb.mxu3 %v4797_v20  ;;  %v4956_v20 = vld [vmem:[#allocation16 + $0x8b0] sm:$0xff] }
0x15c6   : > { %5003 = vmatpush.msra.mxu1 %v4949_v54  ;;  %4984 = vmatpush.msra.mxu0 %v4942_v25  ;;  %v4921_v54 = vld [vmem:[#allocation16 + $0x798] sm:$0xff]  ;;  %v4946_v25 = vld [vmem:[#allocation16 + $0x860] sm:$0xff] }
0x15c7   : > { %4826 = vmatpush.msrb.mxu3 %v4796_v36  ;;  %v4925_v36 = vld [vmem:[#allocation16 + $0x7b8] sm:$0xff]  ;;  %5022 = vmatpush.msra.mxu2 %v4956_v20  ;;  %v4934_v20 = vld [vmem:[#allocation16 + $0x800] sm:$0xff] }
0x15c8   : > { %5004 = vmatpush.msra.mxu1 %v4943_v6  ;;  %v4947_v6 = vld [vmem:[#allocation16 + $0x868] sm:$0xff] }
0x15c9   : > { %4827 = vmatpush.msrb.mxu3 %v4795_v32  ;;  %v4918_v32 = vld [vmem:[#allocation16 + $0x780] sm:$0xff] }
0x15ca   : > { %5005 = vmatpush.msra.mxu1 %v4937_v34  ;;  %v4915_v34 = vld [vmem:[#allocation16 + $0x768] sm:$0xff] }
0x15cb   : > { %4828 = vmatpush.msrb.mxu3 %v4794_v39  ;;  %v4919_v39 = vld [vmem:[#allocation16 + $0x788] sm:$0xff] }
0x15cc   : > { %5006 = vmatpush.msra.mxu1 %v4931_v17  ;;  %v4941_v17 = vld [vmem:[#allocation16 + $0x838] sm:$0xff] }
0x15cd   : > { %4829 = vmatpush.msrb.mxu3 %v4793_v21  ;;  %v4912_v21 = vld [vmem:[#allocation16 + $0x750] sm:$0xff] }
0x15ce   : > { %5007 = vmatpush.msra.mxu1 %v4925_v36  ;;  %v4903_v36 = vld [vmem:[#allocation16 + $0x708] sm:$0xff] }
0x15cf   : > { %5041 = vmatpush.msra.mxu3 %v4963_v10  ;;  %v4909_v10 = vld [vmem:[#allocation16 + $0x738] sm:$0xff] }
0x15d0   : > { %5008 = vmatpush.msra.mxu1 %v4919_v39  ;;  %v4929_v39 = vld [vmem:[#allocation16 + $0x7d8] sm:$0xff] }
0x161e   : > { %v4256_v40 = vpop.f32.mrf.mxu0  ;;  %v4315_v49 = vpop.f32.mrf.mxu2 }
0x161f   : > { %v4259_v41 = vmul.f32 %v9134_v18, %v4256_v40  ;;  %v4318_v53 = vmul.f32 %v9185_v44, %v4315_v49  ;;  %v4957_v40 = vld [vmem:[#allocation16 + $0x8b8] sm:$0xff]  ;;  %v4924_v49 = vld [vmem:[#allocation16 + $0x7b0] sm:$0xff] }
0x1620   : > { %5042 = vmatpush.msra.mxu3 %v4957_v40  ;;  %v4935_v40 = vld [vmem:[#allocation16 + $0x808] sm:$0xff] }
0x1621   : > { %v4319_v12 = vadd.f32 %v4318_v53, %v4259_v41  ;;  %v4907_v41 = vld [vmem:[#allocation16 + $0x728] sm:$0xff]  ;;  %v4900_v53 = vld [vmem:[#allocation16 + $0x6f0] sm:$0xff] }
0x1626   : > { %v4374_v14 = vpop.f32.mrf.mxu0  ;;  %v4433_v11 = vpop.f32.mrf.mxu2 }
0x1627   : > { %v4377_v5 = vmul.f32 %v9200_v59, %v4374_v14  ;;  %v4436_v9 = vmul.f32 %v9253_v56, %v4433_v11  ;;  %v4913_v14 = vld [vmem:[#allocation16 + $0x758] sm:$0xff]  ;;  %v4906_v11 = vld [vmem:[#allocation16 + $0x720] sm:$0xff] }
0x1628   : > { %5009 = vmatpush.msra.mxu1 %v4913_v14  ;;  %v4897_v14 = vld [vmem:[#allocation16 + $0x6d8] sm:$0xff] }
0x1629   : > { %v4378_v8 = vadd.f32 %v4377_v5, %v4319_v12  ;;  %v4901_v5 = vld [vmem:[#allocation16 + $0x6f8] sm:$0xff]  ;;  %v4894_v12 = vld [vmem:[#allocation16 + $0x6c0] sm:$0xff] }
0x162a   : > { %5010 = vmatpush.msra.mxu1 %v4907_v41  ;;  %v4923_v41 = vld [vmem:[#allocation16 + $0x7a8] sm:$0xff] }
0x162b   : > { %v4437_v43 = vadd.f32 %v4436_v9, %v4378_v8  ;;  %v4889_v8 = vld [vmem:[#allocation16 + $0x698] sm:$0xff] }
0x162c   : > { %5011 = vmatpush.msra.mxu1 %v4901_v5  ;;  %v4891_v5 = vld [vmem:[#allocation16 + $0x6a8] sm:$0xff] }
0x162e   : > { %v4492_v45 = vpop.f32.mrf.mxu0  ;;  %v4551_v48 = vpop.f32.mrf.mxu2 }
0x162f   : > { %v4495_v30 = vmul.f32 %v9208_v61, %v4492_v45  ;;  %v4554_v28 = vmul.f32 %v9137_v19, %v4551_v48  ;;  %v4895_v45 = vld [vmem:[#allocation16 + $0x6c8] sm:$0xff]  ;;  %v4888_v48 = vld [vmem:[#allocation16 + $0x690] sm:$0xff] }
0x1630   : > { %5012 = vmatpush.msra.mxu1 %v4895_v45  ;;  %v4917_v45 = vld [vmem:[#allocation16 + $0x778] sm:$0xff] }
0x1631   : > { %v4496_v57 = vadd.f32 %v4495_v30, %v4437_v43 }
0x1632   : > { %5013 = vmatpush.msra.mxu1 %v4889_v8  ;;  %v4885_v8 = vld [vmem:[#allocation16 + $0x678] sm:$0xff] }
0x1633   : > { %v4555_v1 = vadd.f32 %v4554_v28, %v4496_v57  ;;  %v4883_v28 = vld [vmem:[#allocation16 + $0x668] sm:$0xff] }
0x1634   : > { %5014 = vmatpush.msra.mxu1 %v4883_v28  ;;  %v4905_v28 = vld [vmem:[#allocation16 + $0x718] sm:$0xff] }
0x1636   : > { %v4610_v38 = vpop.f32.mrf.mxu0  ;;  %v4669_v22 = vpop.f32.mrf.mxu2 }
0x1637   : > { %v4613_v7 = vmul.f32 %v9216_v63, %v4610_v38  ;;  %v4672_v35 = vmul.f32 %v9156_v27, %v4669_v22  ;;  %v4882_v22 = vld [vmem:[#allocation16 + $0x660] sm:$0xff] }
0x1639   : > { %v4614_v55 = vadd.f32 %v4613_v7, %v4555_v1  ;;  %v4950_v7 = vld [vmem:[#allocation16 + $0x880] sm:$0xff]  ;;  %v4951_v1 = vld [vmem:[#allocation16 + $0x888] sm:$0xff] }
0x163a   : > { %5023 = vmatpush.msra.mxu2 %v4950_v7  ;;  %5043 = vmatpush.msra.mxu3 %v4951_v1  ;;  %v4872_v7 = vld [vmem:[#allocation16 + $0x610] sm:$0xff]  ;;  %v4873_v1 = vld [vmem:[#allocation16 + $0x618] sm:$0xff] }
0x163b   : > { %v4673_v31 = vadd.f32 %v4672_v35, %v4614_v55  ;;  %v4876_v55 = vld [vmem:[#allocation16 + $0x630] sm:$0xff]  ;;  %v4877_v35 = vld [vmem:[#allocation16 + $0x638] sm:$0xff] }
0x163c   : > { %5015 = vmatpush.msra.mxu1 %v4877_v35  ;;  %v4899_v35 = vld [vmem:[#allocation16 + $0x6e8] sm:$0xff] }
0x163e   : > { %v4728_v50 = vpop.f32.mrf.mxu0  ;;  %v4787_v42 = vpop.f32.mrf.mxu2 }
0x163f   : > { %v4731_v58 = vmul.f32 %v9223_v4, %v4728_v50  ;;  %v4790_v0 = vmul.f32 %v9170_v29, %v4787_v42  ;;  %v4944_v50 = vld [vmem:[#allocation16 + $0x850] sm:$0xff]  ;;  %v4945_v42 = vld [vmem:[#allocation16 + $0x858] sm:$0xff] }
0x1640   : > { %5024 = vmatpush.msra.mxu2 %v4944_v50  ;;  %5044 = vmatpush.msra.mxu3 %v4945_v42  ;;  %v4892_v50 = vld [vmem:[#allocation16 + $0x6b0] sm:$0xff]  ;;  %v4893_v42 = vld [vmem:[#allocation16 + $0x6b8] sm:$0xff] }
0x1641   : > { %v4732_v60 = vadd.f32 %v4731_v58, %v4673_v31  ;;  %v4870_v31 = vld [vmem:[#allocation16 + $0x600] sm:$0xff]  ;;  %v4871_v58 = vld [vmem:[#allocation16 + $0x608] sm:$0xff] }
0x1642   : > { %5016 = vmatpush.msra.mxu1 %v4871_v58  ;;  %v4886_v58 = vld [vmem:[#allocation16 + $0x680] sm:$0xff] }
0x1643   : > { %v4791_v52 = vadd.f32 %v4790_v0, %v4732_v60  ;;  %v4938_v60 = vld [vmem:[#allocation16 + $0x820] sm:$0xff]  ;;  %v4939_v0 = vld [vmem:[#allocation16 + $0x828] sm:$0xff] }
0x1644   : > { %5025 = vmatpush.msra.mxu2 %v4938_v60  ;;  %5045 = vmatpush.msra.mxu3 %v4939_v0  ;;  %v4887_v60 = vld [vmem:[#allocation16 + $0x688] sm:$0xff] }
0x1645   : > { %4830 = vmatmul.f32.vlgmr.msrb.gmra.mxu3 %v4791_v52  ;;  %v4964_v52 = vld [vmem:[#allocation16 + $0x8f0] sm:$0xff] }
0x16c8   : > { %v4831_v26 = vpop.f32.mrf.mxu3 }
0x16c9   : > { %v4832_v46 = vadd.f32 %v7852_v37, %v4831_v26  ;;  %v4965_v37 = vld [vmem:[#allocation16 + $0x8f8] sm:$0xff]  ;;  %v4932_v26 = vld [vmem:[#allocation16 + $0x7f0] sm:$0xff] }
0x16ca   : > { %5081 = vmatpush.msrb.mxu1 %v4965_v37  ;;  %5026 = vmatpush.msra.mxu2 %v4932_v26  ;;  %v4881_v37 = vld [vmem:[#allocation16 + $0x658] sm:$0xff] }
0x16cb   : > { %v10029_v2 = vadd.f32 %v4832_v46, %v9944_v51  ;;  %v4936_v51 = vld [vmem:[#allocation16 + $0x810] sm:$0xff]  ;;  %v4933_v46 = vld [vmem:[#allocation16 + $0x7f8] sm:$0xff] }
0x16cc   : > { %4985 = vmatpush.msra.mxu0 %v4936_v51  ;;  %5046 = vmatpush.msra.mxu3 %v4933_v46  ;;  %v4914_v51 = vld [vmem:[#allocation16 + $0x760] sm:$0xff] }
0x16cd   : > { %v4839_v13 = vmul.f32 %v9111_v3, %v10029_v2  ;;  %5027 = vmatpush.msra.mxu2 %v4926_v24  ;;  %v4874_v46 = vld [vmem:[#allocation16 + $0x620] sm:$0xff] }
0x16ce   : > { %4986 = vmatpush.msra.mxu0 %v4930_v62  ;;  %5047 = vmatpush.msra.mxu3 %v4927_v23  ;;  %v4940_v62 = vld [vmem:[#allocation16 + $0x830] sm:$0xff] }
0x16cf   : > { %4840 = vadd.xlane.f32.xlu1 %v4839_v13  ;;  %v4959_v13 = vld [vmem:[#allocation16 + $0x8c8] sm:$0xff]  ;;  %5028 = vmatpush.msra.mxu2 %v4920_v33 }
0x16d0   : > { %4987 = vmatpush.msra.mxu0 %v4924_v49  ;;  %5082 = vmatpush.msrb.mxu1 %v4959_v13  ;;  %v4902_v49 = vld [vmem:[#allocation16 + $0x700] sm:$0xff] }
0x16d1   : > { %5048 = vmatpush.msra.mxu3 %v4921_v54  ;;  %5029 = vmatpush.msra.mxu2 %v4914_v51  ;;  %v7853_v54 = vld [vmem:[#allocation13 + $0x2] ss:$0 sm:$0xff] }
0x16d2   : > { %4988 = vmatpush.msra.mxu0 %v4918_v32  ;;  %5083 = vmatpush.msrb.mxu1 %v4953_v15  ;;  %v4928_v32 = vld [vmem:[#allocation16 + $0x7d0] sm:$0xff] }
0x16d3   : > { %5049 = vmatpush.msra.mxu3 %v4915_v34  ;;  %5030 = vmatpush.msra.mxu2 %v4908_v47  ;;  %v5397_v47 = vld [vmem:[#allocation19 + $0x6f8] sm:$0xff] }
0x16d4   : > { %4989 = vmatpush.msra.mxu0 %v4912_v21  ;;  %5084 = vmatpush.msrb.mxu1 %v4947_v6  ;;  %v4896_v21 = vld [vmem:[#allocation16 + $0x6d0] sm:$0xff]  ;;  %v7854_v6 = vld [vmem:[#allocation14 + $0x2] ss:$0 sm:$0xff] }
0x16d5   : > { %5050 = vmatpush.msra.mxu3 %v4909_v10  ;;  %5031 = vmatpush.msra.mxu2 %v4902_v49  ;;  %v5396_v10 = vld [vmem:[#allocation19 + $0x6f0] sm:$0xff]  ;;  %v5378_v49 = vld [vmem:[#allocation19 + $0x660] sm:$0xff] }
0x16d6   : > { %4990 = vmatpush.msra.mxu0 %v4906_v11  ;;  %5085 = vmatpush.msrb.mxu1 %v4941_v17  ;;  %v4922_v11 = vld [vmem:[#allocation16 + $0x7a0] sm:$0xff]  ;;  %v5381_v17 = vld [vmem:[#allocation19 + $0x678] sm:$0xff] }
0x16d7   : > { %5051 = vmatpush.msra.mxu3 %v4903_v36  ;;  %5032 = vmatpush.msra.mxu2 %v4896_v21  ;;  %v5394_v36 = vld [vmem:[#allocation19 + $0x6e0] sm:$0xff] }
0x16d8   : > { %4991 = vmatpush.msra.mxu0 %v4900_v53  ;;  %5086 = vmatpush.msrb.mxu1 %v4935_v40  ;;  %v4890_v53 = vld [vmem:[#allocation16 + $0x6a0] sm:$0xff] }
0x16d9   : > { %5052 = vmatpush.msra.mxu3 %v4897_v14  ;;  %5033 = vmatpush.msra.mxu2 %v4890_v53  ;;  %v5395_v40 = vld [vmem:[#allocation19 + $0x6e8] sm:$0xff] }
0x16da   : > { %4992 = vmatpush.msra.mxu0 %v4894_v12  ;;  %5087 = vmatpush.msrb.mxu1 %v4929_v39  ;;  %v4916_v12 = vld [vmem:[#allocation16 + $0x770] sm:$0xff] }
0x16db   : > { %5053 = vmatpush.msra.mxu3 %v4891_v5 }
0x16dc   : > { %4993 = vmatpush.msra.mxu0 %v4888_v48  ;;  %5088 = vmatpush.msrb.mxu1 %v4923_v41  ;;  %v4884_v48 = vld [vmem:[#allocation16 + $0x670] sm:$0xff] }
0x16dd   : > { %5034 = vmatpush.msra.mxu2 %v4884_v48  ;;  %5054 = vmatpush.msra.mxu3 %v4885_v8 }
0x16de   : > { %4994 = vmatpush.msra.mxu0 %v4882_v22  ;;  %5089 = vmatpush.msrb.mxu1 %v4917_v45  ;;  %v4904_v22 = vld [vmem:[#allocation16 + $0x710] sm:$0xff] }
0x16e0   : > { %4995 = vmatpush.msra.mxu0 %v4876_v55  ;;  %v4898_v55 = vld [vmem:[#allocation16 + $0x6e0] sm:$0xff] }
0x16e2   : > { %4996 = vmatpush.msra.mxu0 %v4870_v31 }
0x16e4   : > { %5061 = vmatpush.msrb.mxu0 %v4964_v52  ;;  %v4880_v52 = vld [vmem:[#allocation16 + $0x650] sm:$0xff] }
0x1742   : > { %v4841_v9 = vpop.xlane.xlu1 %4840 }
0x1743   : > { %v4842_v30 = vmul.f32 0.01, %v4841_v9  ;;  %v4910_v9 = vld [vmem:[#allocation16 + $0x740] sm:$0xff] }
0x1745   : > { %v4843_v43 = vsub.f32 %v10029_v2, %v4842_v30  ;;  %v4958_v2 = vld [vmem:[#allocation16 + $0x8c0] sm:$0xff]  ;;  %v4911_v30 = vld [vmem:[#allocation16 + $0x748] sm:$0xff] }
0x1746   : > { %5062 = vmatpush.msrb.mxu0 %v4958_v2  ;;  %5090 = vmatpush.msrb.mxu1 %v4911_v30  ;;  %v4875_v2 = vld [vmem:[#allocation16 + $0x628] sm:$0xff] }
0x1747   : > { %v10035_v57 = vmul.f32 %v9111_v3, %v4843_v43  ;;  %v4878_v43 = vld [vmem:[#allocation16 + $0x640] sm:$0xff] }
0x1748   : > { %5063 = vmatpush.msrb.mxu0 %v4952_v16  ;;  %5035 = vmatpush.msra.mxu2 %v4878_v43 }
0x1749   : > { %v4845_v38 = vmul.f32 %v10035_v57, %v10035_v57  ;;  %5091 = vmatpush.msrb.mxu1 %v4905_v28 }
0x174a   : > { %5064 = vmatpush.msrb.mxu0 %v4946_v25  ;;  %5036 = vmatpush.msra.mxu2 %v4872_v7 }
0x174b   : > { %4846 = vadd.xlane.f32.xlu2 %v4845_v38  ;;  %v4879_v38 = vld [vmem:[#allocation16 + $0x648] sm:$0xff]  ;;  %5092 = vmatpush.msrb.mxu1 %v4899_v35 }
0x174c   : > { %5065 = vmatpush.msrb.mxu0 %v4940_v62  ;;  %5055 = vmatpush.msra.mxu3 %v4879_v38 }
0x174d   : > { %5093 = vmatpush.msrb.mxu1 %v4893_v42  ;;  %5467 = vmatpush.msrb.mxu2 %v5381_v17 }
0x174e   : > { %5066 = vmatpush.msrb.mxu0 %v4934_v20  ;;  %5056 = vmatpush.msra.mxu3 %v4873_v1  ;;  %v5379_v20 = vld [vmem:[#allocation19 + $0x668] sm:$0xff] }
0x174f   : > { %5094 = vmatpush.msrb.mxu1 %v4887_v60 }
0x1750   : > { %5067 = vmatpush.msrb.mxu0 %v4928_v32  ;;  %5487 = vmatpush.msrb.mxu3 %v5397_v47  ;;  %v10048_v32 = vld [vmem:[#allocation17 + $0xc] sm:$0x3f] }
0x1751   : > { %5095 = vmatpush.msrb.mxu1 %v4881_v37  ;;  %v4969_v39 = vperm.slane %v10048_v32, 0  ;;  %v4970_v21 = vperm.slane %v10048_v32, 1  ;;  %v4971_v45 = vperm.slane %v10048_v32, 2  ;;  %v4972_v48 = vperm.slane %v10048_v32, 3 }
0x1752   : > { %5068 = vmatpush.msrb.mxu0 %v4922_v11  ;;  %5488 = vmatpush.msrb.mxu3 %v5396_v10  ;;  %v4973_v30 = vperm.slane %v10048_v32, 4 }
0x1753   : > { %5096 = vmatpush.msrb.mxu1 %v4875_v2 }
0x1754   : > { %5069 = vmatpush.msrb.mxu0 %v4916_v12  ;;  %5489 = vmatpush.msrb.mxu3 %v5395_v40 }
0x1756   : > { %5070 = vmatpush.msrb.mxu0 %v4910_v9  ;;  %5490 = vmatpush.msrb.mxu3 %v5394_v36 }
0x1758   : > { %5071 = vmatpush.msrb.mxu0 %v4904_v22 }
0x175a   : > { %5072 = vmatpush.msrb.mxu0 %v4898_v55 }
0x175c   : > { %5073 = vmatpush.msrb.mxu0 %v4892_v50 }
0x175e   : > { %5074 = vmatpush.msrb.mxu0 %v4886_v58 }
0x1760   : > { %5075 = vmatpush.msrb.mxu0 %v4880_v52 }
0x1762   : > { %5076 = vmatpush.msrb.mxu0 %v4874_v46 }
0x17be   : > { %v4847_v31 = vpop.xlane.xlu2 %4846 }
0x17bf   : > { %v4848_v0 = vmul.f32 0.01, %v4847_v31 }
0x17c1   : > { %v4849_v26 = vadd.f32 1e-12, %v4848_v0 }
0x17c3   : > { %8018 = vrsqrt.f32 %v4849_v26  ;;  %vm4856_vm2 = vweird.f32 %v4849_v26 }
0x17c9   : > { %v8019_v13 = vpop.eup %8018 }
0x17ca   : > { %v4851_v24 = vmul.f32 %v8019_v13, %v4849_v26  ;;  %vm4857_vm1 = vweird.f32 %v8019_v13 }
0x17cb   : > { %vm4858_vm3 = vmor %vm4856_vm2, %vm4857_vm1 }
0x17cc   : > { %v4852_v23 = vmul.f32 %v8019_v13, %v4851_v24 }
0x17ce   : > { %v4853_v16 = vmul.f32 0.5, %v4852_v23 }
0x17d0   : > { %v4854_v15 = vsub.f32 1.5, %v4853_v16 }
0x17d2   : > { %v4855_v33 = vmul.f32 %v8019_v13, %v4854_v15  ;;  %v5393_v15 = vld [vmem:[#allocation19 + $0x6d8] sm:$0xff] }
0x17d3   : > { %5491 = vmatpush.msrb.mxu3 %v5393_v15 }
0x17d4   : > { %v4859_v25 = vsel %vm4858_vm3, %v8019_v13, %v4855_v33  ;;  %v5377_v13 = vld [vmem:[#allocation19 + $0x658] sm:$0xff] }
0x17d5   : > { %v4860_v51 = vmul.f32 %v4859_v25, %v10035_v57  ;;  %v5380_v57 = vld [vmem:[#allocation19 + $0x670] sm:$0xff] }
0x17d6   : > { %5468 = vmatpush.msrb.mxu2 %v5380_v57 }
0x17d7   : > { %v4864_v34 = vmul.f32 %v7853_v54, %v4860_v51  ;;  %v5376_v51 = vld [vmem:[#allocation19 + $0x650] sm:$0xff] }
0x17d8   : > { %5469 = vmatpush.msrb.mxu2 %v5379_v20 }
0x17d9   : > { %v10040_v62 = vadd.f32 %v7854_v6, %v4864_v34  ;;  %v5392_v34 = vld [vmem:[#allocation19 + $0x6d0] sm:$0xff] }
0x17da   : > { %5470 = vmatpush.msrb.mxu2 %v5378_v49  ;;  %5492 = vmatpush.msrb.mxu3 %v5392_v34 }
0x17db   : > { %4997 = vmatmul.f32.vlgmr.msra.gmra.mxu0 %v10040_v62  ;;  %5017 = vmatmul.f32.vlgmr.msra.gmra.mxu1 %v10040_v62 }
0x17dc   : > { %5037 = vmatmul.f32.vlgmr.msra.gmra.mxu2 %v10040_v62  ;;  %5057 = vmatmul.f32.vlgmr.msra.gmra.mxu3 %v10040_v62 }
0x17dd   : > { %5471 = vmatpush.msrb.mxu2 %v5377_v13  ;;  %v5389_v13 = vld [vmem:[#allocation19 + $0x6b8] sm:$0xff] }
0x17df   : > { %5472 = vmatpush.msrb.mxu2 %v5376_v51 }
0x17e3   : > { %5077 = vmatmul.f32.vlgmr.msrb.gmra.mxu0 %v10040_v62  ;;  %5097 = vmatmul.f32.vlgmr.msrb.gmra.mxu1 %v10040_v62 }
0x1858   : > { %v4998_v14 = vpop.f32.mrf.mxu0  ;;  %v5018_v11 = vpop.f32.mrf.mxu1 }
0x1859   : > { %v10052_v41 = vadd.f32 %v4998_v14, %v4969_v39  ;;  %v10054_v53 = vadd.f32 %v5018_v11, %v4970_v21  ;;  %v5375_v14 = vld [vmem:[#allocation19 + $0x648] sm:$0xff] }
0x185a   : > { %v5391_v11 = vld [vmem:[#allocation19 + $0x6c8] sm:$0xff]  ;;  %5473 = vmatpush.msrb.mxu2 %v5375_v14 }
0x185b   : > { %v10057_v5 = vmul.f32 0.70710677, %v10052_v41  ;;  %v10060_v12 = vmul.f32 0.70710677, %v10054_v53  ;;  %5493 = vmatpush.msrb.mxu3 %v5391_v11  ;;  %v5387_v14 = vld [vmem:[#allocation19 + $0x6a8] sm:$0xff] }
0x185d   : > { %v5113_v8 = vmul.f32 %v10057_v5, %v10057_v5  ;;  %v5153_v9 = vmul.f32 %v10060_v12, %v10060_v12 }
0x185f   : > { %v10069_v43 = vmin.f32 %v5113_v8, 16.0  ;;  %v10071_v38 = vmin.f32 %v5153_v9, 16.0  ;;  %v5038_v22 = vpop.f32.mrf.mxu2  ;;  %v5058_v28 = vpop.f32.mrf.mxu3  ;;  %v5374_v9 = vld [vmem:[#allocation19 + $0x640] sm:$0xff] }
0x1860   : > { %v10073_v7 = vadd.f32 %v5038_v22, %v4971_v45  ;;  %v10075_v1 = vadd.f32 %v5058_v28, %v4972_v48  ;;  %v5078_v55 = vpop.f32.mrf.mxu0  ;;  %5474 = vmatpush.msrb.mxu2 %v5374_v9 }
0x1861   : > { %v5115_v35 = vmul.f32 2.1237322e-06, %v10069_v43  ;;  %v5126_v50 = vmul.f32 3.8918573e-05, %v10069_v43  ;;  %v5155_v42 = vmul.f32 2.1237322e-06, %v10071_v38  ;;  %v10084_v60 = vadd.f32 %v5078_v55, %v4973_v30 }
0x1862   : > { %v5166_v31 = vmul.f32 3.8918573e-05, %v10071_v38  ;;  %v10082_v58 = vmul.f32 0.70710677, %v10073_v7  ;;  %v10089_v2 = vmul.f32 0.70710677, %v10075_v1 }
0x1863   : > { %v5116_v0 = vadd.f32 0.00028619796, %v5115_v35  ;;  %v5127_v52 = vadd.f32 0.001143296, %v5126_v50  ;;  %v5156_v37 = vadd.f32 0.00028619796, %v5155_v42 }
0x1864   : > { %v5167_v26 = vadd.f32 0.001143296, %v5166_v31  ;;  %v5193_v46 = vmul.f32 %v10082_v58, %v10082_v58  ;;  %v5233_v25 = vmul.f32 %v10089_v2, %v10089_v2  ;;  %v10100_v6 = vmul.f32 0.70710677, %v10084_v60  ;;  %v5390_v31 = vld [vmem:[#allocation19 + $0x6c0] sm:$0xff] }
0x1865   : > { %v5117_v24 = vmul.f32 %v5116_v0, %v10069_v43  ;;  %v5128_v23 = vmul.f32 %v5127_v52, %v10069_v43  ;;  %v5157_v16 = vmul.f32 %v5156_v37, %v10071_v38  ;;  %v5373_v0 = vld [vmem:[#allocation19 + $0x638] sm:$0xff]  ;;  %5494 = vmatpush.msrb.mxu3 %v5390_v31 }
0x1866   : > { %v5168_v33 = vmul.f32 %v5167_v26, %v10071_v38  ;;  %v10095_v54 = vmin.f32 %v5193_v46, 16.0  ;;  %v10107_v21 = vmin.f32 %v5233_v25, 16.0  ;;  %5475 = vmatpush.msrb.mxu2 %v5373_v0 }
0x1867   : > { %v5118_v17 = vadd.f32 0.0036580483, %v5117_v24  ;;  %v5129_v47 = vadd.f32 0.014752088, %v5128_v23  ;;  %v5158_v57 = vadd.f32 0.0036580483, %v5157_v16  ;;  %5495 = vmatpush.msrb.mxu3 %v5389_v13 }
0x1868   : > { %v5169_v10 = vadd.f32 0.014752088, %v5168_v33  ;;  %v5195_v20 = vmul.f32 2.1237322e-06, %v10095_v54  ;;  %v5206_v40 = vmul.f32 3.8918573e-05, %v10095_v54 }
0x1869   : > { %v5119_v49 = vmul.f32 %v5118_v17, %v10069_v43  ;;  %v5130_v36 = vmul.f32 %v5129_v47, %v10069_v43  ;;  %v5159_v39 = vmul.f32 %v5158_v57, %v10071_v38  ;;  %v5235_v42 = vmul.f32 2.1237322e-06, %v10107_v21  ;;  %v5372_v57 = vld [vmem:[#allocation19 + $0x630] sm:$0xff] }
0x186a   : > { %v5170_v45 = vmul.f32 %v5169_v10, %v10071_v38  ;;  %v5196_v48 = vadd.f32 0.00028619796, %v5195_v20  ;;  %v5207_v8 = vadd.f32 0.001143296, %v5206_v40  ;;  %v5246_v46 = vmul.f32 3.8918573e-05, %v10107_v21  ;;  %5476 = vmatpush.msrb.mxu2 %v5372_v57 }
0x186b   : > { %v5120_v30 = vadd.f32 0.05243302, %v5119_v49  ;;  %v5131_v22 = vadd.f32 0.112945676, %v5130_v36  ;;  %v5160_v28 = vadd.f32 0.05243302, %v5159_v39 }
0x186c   : > { %v5171_v55 = vadd.f32 0.112945676, %v5170_v45  ;;  %v5197_v35 = vmul.f32 %v5196_v48, %v10095_v54  ;;  %v5208_v50 = vmul.f32 %v5207_v8, %v10095_v54  ;;  %v5236_v15 = vadd.f32 0.00028619796, %v5235_v42  ;;  %v5388_v10 = vld [vmem:[#allocation19 + $0x6b0] sm:$0xff]  ;;  %v5371_v20 = vld [vmem:[#allocation19 + $0x628] sm:$0xff] }
0x186d   : > { %v5121_v52 = vmul.f32 %v5120_v30, %v10069_v43  ;;  %v5132_v37 = vmul.f32 %v5131_v22, %v10069_v43  ;;  %v5161_v26 = vmul.f32 %v5160_v28, %v10071_v38  ;;  %v5247_v39 = vadd.f32 0.001143296, %v5246_v46  ;;  %5496 = vmatpush.msrb.mxu3 %v5388_v10  ;;  %5477 = vmatpush.msrb.mxu2 %v5371_v20  ;;  %v5385_v42 = vld [vmem:[#allocation19 + $0x698] sm:$0xff]  ;;  %v5366_v20 = vld [vmem:[#allocation19 + $0x600] sm:$0xff] }
0x186e   : > { %v5172_v24 = vmul.f32 %v5171_v55, %v10071_v38  ;;  %v5198_v23 = vadd.f32 0.0036580483, %v5197_v35  ;;  %v5209_v16 = vadd.f32 0.014752088, %v5208_v50  ;;  %v5237_v36 = vmul.f32 %v5236_v15, %v10107_v21  ;;  %v5386_v35 = vld [vmem:[#allocation19 + $0x6a0] sm:$0xff]  ;;  %v5369_v50 = vld [vmem:[#allocation19 + $0x618] sm:$0xff] }
0x186f   : > { %v5122_v33 = vadd.f32 0.18741608, %v5121_v52  ;;  %v5133_v25 = vadd.f32 0.4994258, %v5132_v37  ;;  %v5162_v51 = vadd.f32 0.18741608, %v5161_v26  ;;  %v5273_v30 = vmul.f32 %v10100_v6, %v10100_v6  ;;  %5497 = vmatpush.msrb.mxu3 %v5387_v14  ;;  %v5098_v52 = vpop.f32.mrf.mxu1 }
0x1870   : > { %v5173_v34 = vadd.f32 0.4994258, %v5172_v24  ;;  %v5199_v17 = vmul.f32 %v5198_v23, %v10095_v54  ;;  %v5210_v47 = vmul.f32 %v5209_v16, %v10095_v54  ;;  %v4974_v55 = vperm.slane %v10048_v32, 5  ;;  %v5368_v37 = vld [vmem:[#allocation19 + $0x610] sm:$0xff]  ;;  %v5367_v16 = vld [vmem:[#allocation19 + $0x608] sm:$0xff] }
0x1871   : > { %v5123_v40 = vmul.f32 %v5122_v33, %v10069_v43  ;;  %v5134_v49 = vmul.f32 %v5133_v25, %v10069_v43  ;;  %v5163_v8 = vmul.f32 %v5162_v51, %v10071_v38  ;;  %v5370_v43 = vld [vmem:[#allocation19 + $0x620] sm:$0xff]  ;;  %v5248_v0 = vmul.f32 %v5247_v39, %v10107_v21  ;;  %5498 = vmatpush.msrb.mxu3 %v5386_v35  ;;  %v5384_v26 = vld [vmem:[#allocation19 + $0x690] sm:$0xff] }
0x1872   : > { %v5174_v11 = vmul.f32 %v5173_v34, %v10071_v38  ;;  %v5211_v45 = vadd.f32 0.112945676, %v5210_v47  ;;  %v5200_v9 = vadd.f32 0.05243302, %v5199_v17  ;;  %v5238_v38 = vadd.f32 0.0036580483, %v5237_v36  ;;  %5478 = vmatpush.msrb.mxu2 %v5370_v43 }
0x1873   : > { %v10124_v48 = vadd.f32 1.0, %v5134_v49  ;;  %v5124_v31 = vadd.f32 1.1283791, %v5123_v40  ;;  %v5164_v46 = vadd.f32 1.1283791, %v5163_v8  ;;  %v10137_v32 = vmin.f32 %v5273_v30, 16.0  ;;  %5499 = vmatpush.msrb.mxu3 %v5385_v42 }
0x1874   : > { %v10129_v22 = vadd.f32 1.0, %v5174_v11  ;;  %v5212_v28 = vmul.f32 %v5211_v45, %v10095_v54  ;;  %v5201_v13 = vmul.f32 %v5200_v9, %v10095_v54  ;;  %5479 = vmatpush.msrb.mxu2 %v5369_v50  ;;  %v10139_v23 = vadd.f32 %v5098_v52, %v4974_v55  ;;  %v5383_v34 = vld [vmem:[#allocation19 + $0x688] sm:$0xff]  ;;  %v5413_v17 = vld [vmem:[#allocation19 + $0x778] sm:$0xff]  ;;  %v5382_v11 = vld [vmem:[#allocation19 + $0x680] sm:$0xff] }
0x1875   : > { %8020 = vrcp.f32 %v10124_v48  ;;  %v10142_v15 = vmul.f32 %v5124_v31, %v10057_v5  ;;  %v5145_v33 = vand.u32 2147483647, %v10124_v48  ;;  %v5239_v25 = vmul.f32 %v5238_v38, %v10107_v21  ;;  %5500 = vmatpush.msrb.mxu3 %v5384_v26  ;;  %5507 = vmatpush.msra.mxu0 %v5413_v17  ;;  %v5429_v5 = vld [vmem:[#allocation19 + $0x7f8] sm:$0xff]  ;;  %v5412_v45 = vld [vmem:[#allocation19 + $0x770] sm:$0xff]  ;;  %v5411_v38 = vld [vmem:[#allocation19 + $0x768] sm:$0xff] }
0x1876   : > { %8022 = vrcp.f32 %v10129_v22  ;;  %v5213_v24 = vadd.f32 0.4994258, %v5212_v28  ;;  %v5249_v51 = vadd.f32 0.014752088, %v5248_v0  ;;  %5480 = vmatpush.msrb.mxu2 %v5368_v37  ;;  %vm5141_vm4 = vweird.f32 %v10124_v48  ;;  %5527 = vmatpush.msra.mxu1 %v5429_v5  ;;  %v5428_v43 = vld [vmem:[#allocation19 + $0x7f0] sm:$0xff]  ;;  %v5445_v28 = vld [vmem:[#allocation19 + $0x878] sm:$0xff] }
0x1877   : > { %v5147_v47 = vand.u32 2147483648, %v10124_v48  ;;  %v5185_v57 = vand.u32 2147483647, %v10129_v22  ;;  %v10153_v49 = vmul.f32 %v5164_v46, %v10060_v12  ;;  %v5202_v36 = vadd.f32 0.18741608, %v5201_v13  ;;  %5501 = vmatpush.msrb.mxu3 %v5383_v34  ;;  %5508 = vmatpush.msra.mxu0 %v5412_v45  ;;  %v5461_v55 = vld [vmem:[#allocation19 + $0x8f8] sm:$0xff] }
0x1878   : > { %v5214_v10 = vmul.f32 %v5213_v24, %v10095_v54  ;;  %v5250_v39 = vmul.f32 %v5249_v51, %v10107_v21  ;;  %v5275_v14 = vmul.f32 2.1237322e-06, %v10137_v32  ;;  %5481 = vmatpush.msrb.mxu2 %v5367_v16  ;;  %vm5181_vm5 = vweird.f32 %v10129_v22  ;;  %v5427_v0 = vld [vmem:[#allocation19 + $0x7e8] sm:$0xff]  ;;  %5528 = vmatpush.msra.mxu1 %v5428_v43  ;;  %v5444_v46 = vld [vmem:[#allocation19 + $0x870] sm:$0xff]  ;;  %v5410_v34 = vld [vmem:[#allocation19 + $0x760] sm:$0xff] }
0x1879   : > { %v5286_v12 = vmul.f32 3.8918573e-05, %v10137_v32  ;;  %vm10165_vm6 = vcmp.eq.f32.partialorder %v5145_v33, 8.507059e+37  ;;  %v5187_v42 = vand.u32 2147483648, %v10129_v22  ;;  %5502 = vmatpush.msrb.mxu3 %v5382_v11  ;;  %v5148_v37 = vor.u32 1.1754944e-38, %v5147_v47  ;;  %v5460_v13 = vld [vmem:[#allocation19 + $0x8f0] sm:$0xff]  ;;  %5509 = vmatpush.msra.mxu0 %v5411_v38 }
0x187a   : > { %v10162_v30 = vadd.f32 1.0, %v5214_v10  ;;  %v5251_v31 = vadd.f32 0.112945676, %v5250_v39  ;;  %5482 = vmatpush.msrb.mxu2 %v5366_v20  ;;  %v10174_v26 = vmul.f32 0.70710677, %v10139_v23  ;;  %v5203_v16 = vmul.f32 %v5202_v36, %v10095_v54  ;;  %v5426_v17 = vld [vmem:[#allocation19 + $0x7e0] sm:$0xff]  ;;  %5529 = vmatpush.msra.mxu1 %v5427_v0 }
0x187b   : > { %v10150_v40 = vpop.eup %8020  ;;  %v5240_v33 = vadd.f32 0.05243302, %v5239_v25  ;;  %5567 = vmatpush.msra.mxu3 %v5461_v55  ;;  %v5276_v10 = vadd.f32 0.00028619796, %v5275_v14  ;;  %v5287_v5 = vadd.f32 0.001143296, %v5286_v12  ;;  %5510 = vmatpush.msra.mxu0 %v5410_v34 }
0x187c   : > { %v10157_v8 = vpop.eup %8022  ;;  %v5137_v9 = vmul.f32 %v10150_v40, %v10124_v48  ;;  %8024 = vrcp.f32 %v10162_v30  ;;  %5547 = vmatpush.msra.mxu2 %v5445_v28  ;;  %v5252_v51 = vmul.f32 %v5251_v31, %v10107_v21  ;;  %vm5142_vm7 = vweird.f32 %v10150_v40  ;;  %v5443_v20 = vld [vmem:[#allocation19 + $0x868] sm:$0xff]  ;;  %v5409_v36 = vld [vmem:[#allocation19 + $0x758] sm:$0xff]  ;;  %5530 = vmatpush.msra.mxu1 %v5426_v17  ;;  %v5442_v28 = vld [vmem:[#allocation19 + $0x860] sm:$0xff] }
0x187d   : > { %v5177_v50 = vmul.f32 %v10157_v8, %v10129_v22  ;;  %v5459_v39 = vld [vmem:[#allocation19 + $0x8e8] sm:$0xff]  ;;  %vm5182_vm8 = vweird.f32 %v10157_v8  ;;  %vm10182_vm9 = vcmp.eq.f32.partialorder %v5185_v57, 8.507059e+37  ;;  %5568 = vmatpush.msra.mxu3 %v5460_v13  ;;  %v5277_v14 = vmul.f32 %v5276_v10, %v10137_v32  ;;  %v5425_v43 = vld [vmem:[#allocation19 + $0x7d8] sm:$0xff]  ;;  %v5458_v57 = vld [vmem:[#allocation19 + $0x8e0] sm:$0xff]  ;;  %5511 = vmatpush.msra.mxu0 %v5409_v36 }
0x187e   : > { %v5138_v52 = vsub.f32 1.0, %v5137_v9  ;;  %5548 = vmatpush.msra.mxu2 %v5444_v46  ;;  %v5253_v25 = vadd.f32 0.4994258, %v5252_v51  ;;  %v5288_v9 = vmul.f32 %v5287_v5, %v10137_v32  ;;  %v5313_v12 = vmul.f32 %v10174_v26, %v10174_v26  ;;  %vm10195_vm10 = vmor %vm5141_vm4, %vm5142_vm7  ;;  %v5424_v46 = vld [vmem:[#allocation19 + $0x7d0] sm:$0xff]  ;;  %5531 = vmatpush.msra.mxu1 %v5425_v43  ;;  %v5441_v34 = vld [vmem:[#allocation19 + $0x858] sm:$0xff] }
0x187f   : > { %v5178_v24 = vsub.f32 1.0, %v5177_v50  ;;  %v5188_v31 = vor.u32 1.1754944e-38, %v5187_v42  ;;  %v10200_v38 = vadd.f32 1.1283791, %v5203_v16  ;;  %5569 = vmatpush.msra.mxu3 %v5459_v39  ;;  %vm10212_vm11 = vmor %vm5181_vm5, %vm5182_vm8  ;;  %v5457_v17 = vld [vmem:[#allocation19 + $0x8d8] sm:$0xff]  ;;  %v5423_v5 = vld [vmem:[#allocation19 + $0x7c8] sm:$0xff]  ;;  %vm5221_vm14 = vweird.f32 %v10162_v30 }
0x1880   : > { %v5139_v47 = vmul.f32 %v10150_v40, %v5138_v52  ;;  %v5254_v0 = vmul.f32 %v5253_v25, %v10107_v21  ;;  %5549 = vmatpush.msra.mxu2 %v5443_v20  ;;  %v5408_v52 = vld [vmem:[#allocation19 + $0x750] sm:$0xff]  ;;  %v5289_v16 = vadd.f32 0.014752088, %v5288_v9  ;;  %v10217_v51 = vmin.f32 %v5313_v12, 16.0  ;;  %5532 = vmatpush.msra.mxu1 %v5424_v46  ;;  %v5422_v54 = vld [vmem:[#allocation19 + $0x7c0] sm:$0xff]  ;;  %v5439_v12 = vld [vmem:[#allocation19 + $0x848] sm:$0xff] }
0x1881   : > { %v5179_v11 = vmul.f32 %v10157_v8, %v5178_v24  ;;  %v5241_v24 = vmul.f32 %v5240_v33, %v10107_v21  ;;  %v5278_v10 = vadd.f32 0.0036580483, %v5277_v14  ;;  %5570 = vmatpush.msra.mxu3 %v5458_v57  ;;  %v5407_v33 = vld [vmem:[#allocation19 + $0x748] sm:$0xff]  ;;  %5512 = vmatpush.msra.mxu0 %v5408_v52  ;;  %v5227_v14 = vand.u32 2147483648, %v10162_v30  ;;  %v5405_v55 = vld [vmem:[#allocation19 + $0x738] sm:$0xff]  ;;  %v5438_v42 = vld [vmem:[#allocation19 + $0x840] sm:$0xff] }
0x1882   : > { %v5140_v45 = vadd.f32 %v10150_v40, %v5139_v47  ;;  %v10203_v13 = vpop.eup %8024  ;;  %5550 = vmatpush.msra.mxu2 %v5442_v28  ;;  %v10230_v35 = vadd.f32 1.0, %v5254_v0  ;;  %v5290_v36 = vmul.f32 %v5289_v16, %v10137_v32  ;;  %5533 = vmatpush.msra.mxu1 %v5423_v5  ;;  %v5455_v43 = vld [vmem:[#allocation19 + $0x8c8] sm:$0xff]  ;;  %v5225_v28 = vand.u32 2147483647, %v10162_v30  ;;  %v5404_v16 = vld [vmem:[#allocation19 + $0x730] sm:$0xff] }
0x1883   : > { %v5180_v50 = vadd.f32 %v10157_v8, %v5179_v11  ;;  %v5217_v47 = vmul.f32 %v10203_v13, %v10162_v30  ;;  %vm5222_vm12 = vweird.f32 %v10203_v13  ;;  %5571 = vmatpush.msra.mxu3 %v5457_v17  ;;  %v5242_v9 = vadd.f32 0.18741608, %v5241_v24  ;;  %5513 = vmatpush.msra.mxu0 %v5407_v33  ;;  %v5454_v24 = vld [vmem:[#allocation19 + $0x8c0] sm:$0xff]  ;;  %v5453_v33 = vld [vmem:[#allocation19 + $0x8b8] sm:$0xff] }
0x1884   : > { %v5144_v48 = vsel %vm10195_vm10, %v10150_v40, %v5140_v45  ;;  %v5315_v45 = vmul.f32 2.1237322e-06, %v10217_v51  ;;  %5551 = vmatpush.msra.mxu2 %v5441_v34  ;;  %8026 = vrcp.f32 %v10230_v35  ;;  %v5279_v57 = vmul.f32 %v5278_v10, %v10137_v32  ;;  %vm10243_vm15 = vmor %vm5221_vm14, %vm5222_vm12  ;;  %5534 = vmatpush.msra.mxu1 %v5422_v54  ;;  %v5437_v10 = vld [vmem:[#allocation19 + $0x838] sm:$0xff] }
0x1885   : > { %v5149_v40 = vsel %vm10165_vm6, %v5148_v37, %v5144_v48  ;;  %v5184_v22 = vsel %vm10212_vm11, %v10157_v8, %v5180_v50  ;;  %v5440_v8 = vld [vmem:[#allocation19 + $0x850] sm:$0xff]  ;;  %v5218_v25 = vsub.f32 1.0, %v5217_v47  ;;  %v5421_v50 = vld [vmem:[#allocation19 + $0x7b8] sm:$0xff]  ;;  %v5291_v52 = vadd.f32 0.112945676, %v5290_v36 }
0x1886   : > { %v5150_v20 = vmul.f32 %v5149_v40, %v10142_v15  ;;  %v5189_v39 = vsel %vm10182_vm9, %v5188_v31, %v5184_v22  ;;  %v5456_v37 = vld [vmem:[#allocation19 + $0x8d0] sm:$0xff]  ;;  %v5406_v15 = vld [vmem:[#allocation19 + $0x740] sm:$0xff]  ;;  %5552 = vmatpush.msra.mxu2 %v5440_v8  ;;  %v5316_v30 = vadd.f32 0.00028619796, %v5315_v45  ;;  %v5228_v34 = vor.u32 1.1754944e-38, %v5227_v14  ;;  %5535 = vmatpush.msra.mxu1 %v5421_v50  ;;  %v5419_v8 = vld [vmem:[#allocation19 + $0x7a8] sm:$0xff] }
0x1887   : > { %v5190_v11 = vmul.f32 %v5189_v39, %v10153_v49  ;;  %v5219_v49 = vmul.f32 %v10203_v13, %v5218_v25  ;;  %5572 = vmatpush.msra.mxu3 %v5456_v37  ;;  %5514 = vmatpush.msra.mxu0 %v5406_v15  ;;  %v5243_v17 = vmul.f32 %v5242_v9, %v10107_v21  ;;  %v5326_v22 = vmul.f32 3.8918573e-05, %v10217_v51  ;;  %v5420_v47 = vld [vmem:[#allocation19 + $0x7b0] sm:$0xff]  ;;  %v5403_v21 = vld [vmem:[#allocation19 + $0x728] sm:$0xff]  ;;  %v5402_v9 = vld [vmem:[#allocation19 + $0x720] sm:$0xff] }
0x1888   : > { %v7581_v31 = vclamps-f32 %v5150_v20, 1.0  ;;  %5553 = vmatpush.msra.mxu2 %v5439_v12  ;;  %v5292_v40 = vmul.f32 %v5291_v52, %v10137_v32  ;;  %v5205_v5 = vmul.f32 %v10200_v38, %v10082_v58  ;;  %vm5226_vm0 = vcmp.eq.f32.partialorder %v5225_v28, 8.507059e+37  ;;  %5536 = vmatpush.msra.mxu1 %v5420_v47  ;;  %v5436_v15 = vld [vmem:[#allocation19 + $0x830] sm:$0xff]  ;;  %v5418_v12 = vld [vmem:[#allocation19 + $0x7a0] sm:$0xff] }
0x1889   : > { %v7582_v46 = vclamps-f32 %v5190_v11, 1.0  ;;  %v5220_v48 = vadd.f32 %v10203_v13, %v5219_v49  ;;  %5573 = vmatpush.msra.mxu3 %v5455_v43  ;;  %5515 = vmatpush.msra.mxu0 %v5405_v55  ;;  %v5280_v39 = vadd.f32 0.05243302, %v5279_v57  ;;  %v5327_v45 = vadd.f32 0.001143296, %v5326_v22  ;;  %v5452_v14 = vld [vmem:[#allocation19 + $0x8b0] sm:$0xff] }
0x188a   : > { %5554 = vmatpush.msra.mxu2 %v5438_v42  ;;  %v10256_v37 = vpop.eup %8026  ;;  %v5353_v11 = vadd.f32 1.0, %v7581_v31  ;;  %v5293_v36 = vadd.f32 0.4994258, %v5292_v40  ;;  %v5101_v58 = vmul.f32 0.5, %v10052_v41  ;;  %v5244_v43 = vadd.f32 1.1283791, %v5243_v17  ;;  %5537 = vmatpush.msra.mxu1 %v5419_v8 }
0x188b   : > { %v5224_v20 = vsel %vm10243_vm15, %v10203_v13, %v5220_v48  ;;  %5574 = vmatpush.msra.mxu3 %v5454_v24  ;;  %5516 = vmatpush.msra.mxu0 %v5404_v16  ;;  %v5354_v38 = vadd.f32 1.0, %v7582_v46  ;;  %v5257_v13 = vmul.f32 %v10256_v37, %v10230_v35  ;;  %v5317_v28 = vmul.f32 %v5316_v30, %v10217_v51  ;;  %v5435_v41 = vld [vmem:[#allocation19 + $0x828] sm:$0xff]  ;;  %v5401_v46 = vld [vmem:[#allocation19 + $0x718] sm:$0xff]  ;;  %v5450_v22 = vld [vmem:[#allocation19 + $0x8a0] sm:$0xff] }
0x188c   : > { %v5229_v25 = vsel %vm5226_vm0, %v5228_v34, %v5224_v20  ;;  %5555 = vmatpush.msra.mxu2 %v5437_v10  ;;  %v5294_v49 = vmul.f32 %v5293_v36, %v10137_v32  ;;  %v5328_v57 = vmul.f32 %v5327_v45, %v10217_v51  ;;  %v5451_v55 = vld [vmem:[#allocation19 + $0x8a8] sm:$0xff]  ;;  %v5102_v50 = vmul.f32 0.5, %v10054_v53  ;;  %v5417_v48 = vld [vmem:[#allocation19 + $0x798] sm:$0xff]  ;;  %5538 = vmatpush.msra.mxu1 %v5418_v12  ;;  %v5434_v34 = vld [vmem:[#allocation19 + $0x820] sm:$0xff] }
0x188d   : > { %v5230_v54 = vmul.f32 %v5229_v25, %v5205_v5  ;;  %5575 = vmatpush.msra.mxu3 %v5453_v33  ;;  %5517 = vmatpush.msra.mxu0 %v5403_v21  ;;  %v5258_v0 = vsub.f32 1.0, %v5257_v13  ;;  %v5267_v52 = vand.u32 2147483648, %v10230_v35  ;;  %v5359_v42 = vmul.f32 %v5353_v11, %v5101_v58  ;;  %v5400_v10 = vld [vmem:[#allocation19 + $0x710] sm:$0xff]  ;;  %v5433_v21 = vld [vmem:[#allocation19 + $0x818] sm:$0xff]  ;;  %v5398_v12 = vld [vmem:[#allocation19 + $0x700] sm:$0xff] }
0x188e   : > { %5556 = vmatpush.msra.mxu2 %v5436_v15  ;;  %v5281_v24 = vmul.f32 %v5280_v39, %v10137_v32  ;;  %v10267_v30 = vadd.f32 1.0, %v5294_v49  ;;  %v5329_v16 = vadd.f32 0.014752088, %v5328_v57  ;;  %v5360_v17 = vmul.f32 %v5354_v38, %v5102_v50  ;;  %5539 = vmatpush.msra.mxu1 %v5417_v48  ;;  %v5416_v39 = vld [vmem:[#allocation19 + $0x790] sm:$0xff]  ;;  %v5449_v45 = vld [vmem:[#allocation19 + $0x898] sm:$0xff]  ;;  %v5399_v15 = vld [vmem:[#allocation19 + $0x708] sm:$0xff] }
0x188f   : > { %v7583_v31 = vclamps-f32 %v5230_v54, 1.0  ;;  %5576 = vmatpush.msra.mxu3 %v5452_v14  ;;  %5518 = vmatpush.msra.mxu0 %v5402_v9  ;;  %v5259_v53 = vmul.f32 %v10256_v37, %v5258_v0  ;;  %vm5262_vm1 = vweird.f32 %v10256_v37  ;;  %v5265_v40 = vand.u32 2147483647, %v10230_v35  ;;  %v5415_v38 = vld [vmem:[#allocation19 + $0x788] sm:$0xff]  ;;  %v5432_v54 = vld [vmem:[#allocation19 + $0x810] sm:$0xff]  ;;  %v5430_v0 = vld [vmem:[#allocation19 + $0x800] sm:$0xff] }
0x1890   : > { %5557 = vmatpush.msra.mxu2 %v5435_v41  ;;  %8028 = vrcp.f32 %v10267_v30  ;;  %v5318_v47 = vadd.f32 0.0036580483, %v5317_v28  ;;  %vm5261_vm2 = vweird.f32 %v10230_v35  ;;  %v5330_v20 = vmul.f32 %v5329_v16, %v10217_v51  ;;  %5503 = vmatmul.f32.vlgmr.msrb.gmra.mxu3 %v5360_v17  ;;  %v5448_v9 = vld [vmem:[#allocation19 + $0x890] sm:$0xff] }
0x1891   : > { %5577 = vmatpush.msra.mxu3 %v5451_v55  ;;  %5519 = vmatpush.msra.mxu0 %v5401_v46  ;;  %v5355_v33 = vadd.f32 1.0, %v7583_v31  ;;  %v5260_v5 = vadd.f32 %v10256_v37, %v5259_v53  ;;  %v5103_v8 = vmul.f32 0.5, %v10073_v7  ;;  %vm10279_vm3 = vmor %vm5261_vm2, %vm5262_vm1  ;;  %v5268_v25 = vor.u32 1.1754944e-38, %v5267_v52  ;;  %v5447_v55 = vld [vmem:[#allocation19 + $0x888] sm:$0xff]  ;;  %v5446_v46 = vld [vmem:[#allocation19 + $0x880] sm:$0xff] }
0x1892   : > { %5558 = vmatpush.msra.mxu2 %v5434_v34  ;;  %v5282_v36 = vadd.f32 0.18741608, %v5281_v24  ;;  %v5245_v35 = vmul.f32 %v5244_v43, %v10089_v2  ;;  %vm5266_vm4 = vcmp.eq.f32.partialorder %v5265_v40, 8.507059e+37  ;;  %v5331_v7 = vadd.f32 0.112945676, %v5330_v20  ;;  %5540 = vmatpush.msra.mxu1 %v5416_v39  ;;  %v5431_v43 = vld [vmem:[#allocation19 + $0x808] sm:$0xff] }
0x1893   : > { %5578 = vmatpush.msra.mxu3 %v5450_v22  ;;  %5483 = vmatmul.f32.vlgmr.msrb.gmra.mxu2 %v5359_v42  ;;  %v5264_v58 = vsel %vm10279_vm3, %v10256_v37, %v5260_v5  ;;  %v5319_v14 = vmul.f32 %v5318_v47, %v10217_v51  ;;  %v5361_v49 = vmul.f32 %v5355_v33, %v5103_v8  ;;  %v5414_v37 = vld [vmem:[#allocation19 + $0x780] sm:$0xff]  ;;  %v5104_v48 = vmul.f32 0.5, %v10075_v1 }
0x1894   : > { %5520 = vmatpush.msra.mxu0 %v5400_v10  ;;  %v5269_v13 = vsel %vm5266_vm4, %v5268_v25, %v5264_v58  ;;  %5559 = vmatpush.msra.mxu2 %v5433_v21  ;;  %v5332_v2 = vmul.f32 %v5331_v7, %v10217_v51  ;;  %v5283_v41 = vmul.f32 %v5282_v36, %v10137_v32  ;;  %v5307_v34 = vand.u32 2147483648, %v10267_v30 }
0x1895   : > { %v5270_v28 = vmul.f32 %v5269_v13, %v5245_v35  ;;  %5579 = vmatpush.msra.mxu3 %v5449_v45  ;;  %5541 = vmatpush.msra.mxu1 %v5415_v38  ;;  %v5320_v16 = vadd.f32 0.05243302, %v5319_v14  ;;  %v5305_v22 = vand.u32 2147483647, %v10267_v30  ;;  %vm5301_vm6 = vweird.f32 %v10267_v30 }
0x1896   : > { %5521 = vmatpush.msra.mxu0 %v5399_v15  ;;  %v8029_v57 = vpop.eup %8028  ;;  %5560 = vmatpush.msra.mxu2 %v5432_v54  ;;  %v5333_v52 = vadd.f32 0.4994258, %v5332_v2  ;;  %v5284_v32 = vadd.f32 1.1283791, %v5283_v41  ;;  %v5308_v33 = vor.u32 1.1754944e-38, %v5307_v34  ;;  %v5105_v36 = vmul.f32 0.5, %v10084_v60 }
0x1897   : > { %v7584_v50 = vclamps-f32 %v5270_v28, 1.0  ;;  %v5297_v31 = vmul.f32 %v8029_v57, %v10267_v30  ;;  %5580 = vmatpush.msra.mxu3 %v5448_v9  ;;  %5542 = vmatpush.msra.mxu1 %v5414_v37  ;;  %vm5302_vm5 = vweird.f32 %v8029_v57  ;;  %v5321_v1 = vmul.f32 %v5320_v16, %v10217_v51  ;;  %v5669_v34 = vld [vmem:[#allocation7 + $0x5f0] sm:$0xff] }
0x1898   : > { %5522 = vmatpush.msra.mxu0 %v5398_v12  ;;  %5561 = vmatpush.msra.mxu2 %v5431_v43  ;;  %v5334_v17 = vmul.f32 %v5333_v52, %v10217_v51  ;;  %vm5303_vm7 = vmor %vm5301_vm6, %vm5302_vm5  ;;  %v5285_v5 = vmul.f32 %v5284_v32, %v10100_v6  ;;  %vm5306_vm8 = vcmp.eq.f32.partialorder %v5305_v22, 8.507059e+37  ;;  %v5106_v28 = vmul.f32 0.5, %v10139_v23  ;;  %v7855_v43 = vld [vmem:[#allocation20 + $0x2] ss:$0 sm:$0xff]  ;;  %v5668_v32 = vld [vmem:[#allocation7 + $0x5e8] sm:$0xff] }
0x1899   : > { %v5356_v42 = vadd.f32 1.0, %v7584_v50  ;;  %v5298_v24 = vsub.f32 1.0, %v5297_v31  ;;  %5581 = vmatpush.msra.mxu3 %v5447_v55  ;;  %5523 = vmatmul.f32.vlgmr.msra.gmra.mxu0 %v5361_v49  ;;  %v5322_v8 = vadd.f32 0.18741608, %v5321_v1  ;;  %v5667_v22 = vld [vmem:[#allocation7 + $0x5e0] sm:$0xff] }
0x189a   : > { %5562 = vmatpush.msra.mxu2 %v5430_v0  ;;  %v5335_v47 = vadd.f32 1.0, %v5334_v17  ;;  %v5670_v17 = vld [vmem:[#allocation7 + $0x5f8] sm:$0xff]  ;;  %5680 = vmatpush.msrb.mxu0 %v5668_v32 }
0x189b   : > { %v5362_v53 = vmul.f32 %v5356_v42, %v5104_v48  ;;  %v5299_v40 = vmul.f32 %v8029_v57, %v5298_v24  ;;  %5582 = vmatpush.msra.mxu3 %v5446_v46  ;;  %v5323_v30 = vmul.f32 %v5322_v8, %v10217_v51  ;;  %5700 = vmatpush.msrb.mxu1 %v5669_v34  ;;  %v5660_v8 = vld [vmem:[#allocation7 + $0x5a8] sm:$0xff] }
0x189c   : > { %8030 = vrcp.f32 %v5335_v47  ;;  %v5347_v7 = vand.u32 2147483648, %v5335_v47  ;;  %v5345_v6 = vand.u32 2147483647, %v5335_v47  ;;  %vm5341_vm10 = vweird.f32 %v5335_v47  ;;  %5720 = vmatpush.msrb.mxu2 %v5670_v17 }
0x189d   : > { %v5300_v10 = vadd.f32 %v8029_v57, %v5299_v40  ;;  %5543 = vmatmul.f32.vlgmr.msra.gmra.mxu1 %v5362_v53  ;;  %v5324_v38 = vadd.f32 1.1283791, %v5323_v30  ;;  %v5665_v53 = vld [vmem:[#allocation7 + $0x5d0] sm:$0xff]  ;;  %v5666_v40 = vld [vmem:[#allocation7 + $0x5d8] sm:$0xff] }
0x189e   : > { %v5348_v14 = vor.u32 1.1754944e-38, %v5347_v7  ;;  %vm5346_vm12 = vcmp.eq.f32.partialorder %v5345_v6, 8.507059e+37  ;;  %5681 = vmatpush.msrb.mxu0 %v5665_v53  ;;  %5701 = vmatpush.msrb.mxu1 %v5666_v40  ;;  %v5653_v30 = vld [vmem:[#allocation7 + $0x570] sm:$0xff]  ;;  %v5651_v7 = vld [vmem:[#allocation7 + $0x560] sm:$0xff]  ;;  %v5648_v6 = vld [vmem:[#allocation7 + $0x548] sm:$0xff] }
0x189f   : > { %v5304_v20 = vsel %vm5303_vm7, %v8029_v57, %v5300_v10  ;;  %v5325_v9 = vmul.f32 %v5324_v38, %v10174_v26  ;;  %5721 = vmatpush.msrb.mxu2 %v5667_v22  ;;  %v5652_v38 = vld [vmem:[#allocation7 + $0x568] sm:$0xff] }
0x18a0   : > { %v5309_v39 = vsel %vm5306_vm8, %v5308_v33, %v5304_v20  ;;  %v5663_v20 = vld [vmem:[#allocation7 + $0x5c0] sm:$0xff] }
0x18a1   : > { %v5310_v21 = vmul.f32 %v5309_v39, %v5285_v5  ;;  %v5662_v5 = vld [vmem:[#allocation7 + $0x5b8] sm:$0xff]  ;;  %v5664_v39 = vld [vmem:[#allocation7 + $0x5c8] sm:$0xff]  ;;  %5702 = vmatpush.msrb.mxu1 %v5663_v20 }
0x18a2   : > { %v8031_v25 = vpop.eup %8030  ;;  %5682 = vmatpush.msrb.mxu0 %v5662_v5  ;;  %5722 = vmatpush.msrb.mxu2 %v5664_v39  ;;  %v7857_v39 = vld [vmem:[#allocation23 + $0x2] ss:$0 sm:$0xff] }
0x18a3   : > { %v7585_v11 = vclamps-f32 %v5310_v21, 1.0  ;;  %v5337_v15 = vmul.f32 %v8031_v25, %v5335_v47  ;;  %vm5342_vm9 = vweird.f32 %v8031_v25  ;;  %v5659_v21 = vld [vmem:[#allocation7 + $0x5a0] sm:$0xff]  ;;  %5703 = vmatpush.msrb.mxu1 %v5660_v8 }
0x18a4   : > { %vm5343_vm11 = vmor %vm5341_vm10, %vm5342_vm9  ;;  %5683 = vmatpush.msrb.mxu0 %v5659_v21 }
0x18a5   : > { %v5357_v45 = vadd.f32 1.0, %v7585_v11  ;;  %v5338_v58 = vsub.f32 1.0, %v5337_v15  ;;  %v5661_v11 = vld [vmem:[#allocation7 + $0x5b0] sm:$0xff]  ;;  %v5654_v15 = vld [vmem:[#allocation7 + $0x578] sm:$0xff] }
0x18a6   : > { %5723 = vmatpush.msrb.mxu2 %v5661_v11  ;;  %v5672_v11 = vld [vmem:[#allocation8 + $0x9] sm:$0x7] }
0x18a7   : > { %v5363_v35 = vmul.f32 %v5357_v45, %v5105_v36  ;;  %v5339_v54 = vmul.f32 %v8031_v25, %v5338_v58  ;;  %v5657_v36 = vld [vmem:[#allocation7 + $0x590] sm:$0xff]  ;;  %v5658_v45 = vld [vmem:[#allocation7 + $0x598] sm:$0xff] }
0x18a8   : > { %5704 = vmatpush.msrb.mxu1 %v5657_v36  ;;  %5724 = vmatpush.msrb.mxu2 %v5658_v45  ;;  %v5650_v58 = vld [vmem:[#allocation7 + $0x558] sm:$0xff]  ;;  %v5675_v36 = vperm.slane %v5672_v11, 1 }
0x18a9   : > { %5563 = vmatmul.f32.vlgmr.msra.gmra.mxu2 %v5363_v35  ;;  %v5340_v13 = vadd.f32 %v8031_v25, %v5339_v54  ;;  %v5655_v35 = vld [vmem:[#allocation7 + $0x580] sm:$0xff] }
0x18aa   : > { %5705 = vmatpush.msrb.mxu1 %v5654_v15  ;;  %5725 = vmatpush.msrb.mxu2 %v5655_v35  ;;  %v5647_v54 = vld [vmem:[#allocation7 + $0x540] sm:$0xff] }
0x18ab   : > { %v5344_v12 = vsel %vm5343_vm11, %v8031_v25, %v5340_v13  ;;  %v5656_v25 = vld [vmem:[#allocation7 + $0x588] sm:$0xff]  ;;  %v5649_v13 = vld [vmem:[#allocation7 + $0x550] sm:$0xff] }
0x18ac   : > { %v5349_v60 = vsel %vm5346_vm12, %v5348_v14, %v5344_v12  ;;  %5684 = vmatpush.msrb.mxu0 %v5656_v25  ;;  %5706 = vmatpush.msrb.mxu1 %v5651_v7  ;;  %v5644_v14 = vld [vmem:[#allocation7 + $0x528] sm:$0xff]  ;;  %v5646_v12 = vld [vmem:[#allocation7 + $0x538] sm:$0xff]  ;;  %v5674_v25 = vperm.slane %v5672_v11, 0  ;;  %v5676_v7 = vperm.slane %v5672_v11, 2 }
0x18ad   : > { %v5350_v49 = vmul.f32 %v5349_v60, %v5325_v9  ;;  %5726 = vmatpush.msrb.mxu2 %v5652_v38  ;;  %v5645_v9 = vld [vmem:[#allocation7 + $0x530] sm:$0xff] }
0x18ae   : > { %5685 = vmatpush.msrb.mxu0 %v5653_v30  ;;  %5707 = vmatpush.msrb.mxu1 %v5648_v6  ;;  %v5641_v60 = vld [vmem:[#allocation7 + $0x510] sm:$0xff] }
0x18af   : > { %v7586_v51 = vclamps-f32 %v5350_v49, 1.0  ;;  %5727 = vmatpush.msrb.mxu2 %v5649_v13  ;;  %v5642_v49 = vld [vmem:[#allocation7 + $0x518] sm:$0xff] }
0x18b0   : > { %5686 = vmatpush.msrb.mxu0 %v5650_v58  ;;  %5708 = vmatpush.msrb.mxu1 %v5645_v9 }
0x18b1   : > { %v5358_v2 = vadd.f32 1.0, %v7586_v51  ;;  %5728 = vmatpush.msrb.mxu2 %v5646_v12  ;;  %v5643_v51 = vld [vmem:[#allocation7 + $0x520] sm:$0xff] }
0x18b2   : > { %5687 = vmatpush.msrb.mxu0 %v5647_v54  ;;  %5709 = vmatpush.msrb.mxu1 %v5642_v49 }
0x18b3   : > { %v5364_v37 = vmul.f32 %v5358_v2, %v5106_v28  ;;  %5729 = vmatpush.msrb.mxu2 %v5643_v51  ;;  %v5638_v28 = vld [vmem:[#allocation7 + $0x4f8] sm:$0xff]  ;;  %v5639_v2 = vld [vmem:[#allocation7 + $0x500] sm:$0xff] }
0x18b4   : > { %5688 = vmatpush.msrb.mxu0 %v5644_v14  ;;  %5710 = vmatpush.msrb.mxu1 %v5639_v2 }
0x18b5   : > { %5583 = vmatmul.f32.vlgmr.msra.gmra.mxu3 %v5364_v37  ;;  %v5640_v37 = vld [vmem:[#allocation7 + $0x508] sm:$0xff] }
0x18b6   : > { %5689 = vmatpush.msrb.mxu0 %v5641_v60  ;;  %5730 = vmatpush.msrb.mxu2 %v5640_v37  ;;  %v8094_v37 = vld [vmem:[%s9116_s21] ss:$0 sm:$0xff] }
0x18b8   : > { %5690 = vmatpush.msrb.mxu0 %v5638_v28 }
0x1913   : > { %v5504_v55 = vpop.f32.mrf.mxu3 }
0x1916   : > { %v5484_v57 = vpop.f32.mrf.mxu2  ;;  %v5524_v31 = vpop.f32.mrf.mxu0 }
0x1917   : > { %v5485_v41 = vadd.f32 %v7855_v43, %v5484_v57  ;;  %v5635_v43 = vld [vmem:[#allocation7 + $0x4e0] sm:$0xff]  ;;  %v5636_v57 = vld [vmem:[#allocation7 + $0x4e8] sm:$0xff] }
0x1918   : > { %5691 = vmatpush.msrb.mxu0 %v5635_v43  ;;  %5711 = vmatpush.msrb.mxu1 %v5636_v57 }
0x1919   : > { %v5505_v50 = vadd.f32 %v5504_v55, %v5485_v41  ;;  %v5637_v41 = vld [vmem:[#allocation7 + $0x4f0] sm:$0xff]  ;;  %v5632_v55 = vld [vmem:[#allocation7 + $0x4c8] sm:$0xff] }
0x191a   : > { %v5544_v52 = vpop.f32.mrf.mxu1  ;;  %5731 = vmatpush.msrb.mxu2 %v5637_v41  ;;  %5692 = vmatpush.msrb.mxu0 %v5632_v55 }
0x191b   : > { %v5525_v0 = vadd.f32 %v5524_v31, %v5505_v50  ;;  %v5633_v50 = vld [vmem:[#allocation7 + $0x4d0] sm:$0xff]  ;;  %v5634_v31 = vld [vmem:[#allocation7 + $0x4d8] sm:$0xff] }
0x191c   : > { %5712 = vmatpush.msrb.mxu1 %v5633_v50  ;;  %5732 = vmatpush.msrb.mxu2 %v5634_v31 }
0x191d   : > { %v5545_v46 = vadd.f32 %v5544_v52, %v5525_v0  ;;  %v5629_v0 = vld [vmem:[#allocation7 + $0x4b0] sm:$0xff]  ;;  %v5630_v52 = vld [vmem:[#allocation7 + $0x4b8] sm:$0xff] }
0x191e   : > { %5693 = vmatpush.msrb.mxu0 %v5629_v0  ;;  %5713 = vmatpush.msrb.mxu1 %v5630_v52 }
0x192c   : > { %v5564_v26 = vpop.f32.mrf.mxu2 }
0x192d   : > { %v5565_v48 = vadd.f32 %v5564_v26, %v5545_v46  ;;  %v5631_v46 = vld [vmem:[#allocation7 + $0x4c0] sm:$0xff]  ;;  %v5626_v26 = vld [vmem:[#allocation7 + $0x498] sm:$0xff] }
0x192e   : > { %5733 = vmatpush.msrb.mxu2 %v5631_v46  ;;  %5694 = vmatpush.msrb.mxu0 %v5626_v26 }
0x1938   : > { %v5584_v42 = vpop.f32.mrf.mxu3 }
0x1939   : > { %v5585_v24 = vadd.f32 %v5584_v42, %v5565_v48  ;;  %v5627_v48 = vld [vmem:[#allocation7 + $0x4a0] sm:$0xff]  ;;  %v5628_v42 = vld [vmem:[#allocation7 + $0x4a8] sm:$0xff] }
0x193a   : > { %5714 = vmatpush.msrb.mxu1 %v5627_v48  ;;  %5734 = vmatpush.msrb.mxu2 %v5628_v42 }
0x193b   : > { %v5587_v16 = vadd.f32 %v5585_v24, %v10040_v62  ;;  %v5623_v24 = vld [vmem:[#allocation7 + $0x480] sm:$0xff] }
0x193c   : > { %5695 = vmatpush.msrb.mxu0 %v5623_v24 }
0x193d   : > { %v5592_v23 = vmul.f32 %v9111_v3, %v5587_v16 }
0x193f   : > { %5593 = vadd.xlane.f32.xlu0 %v5592_v23  ;;  %v5625_v23 = vld [vmem:[#allocation7 + $0x490] sm:$0xff] }
0x1940   : > { %5735 = vmatpush.msrb.mxu2 %v5625_v23 }
0x19b2   : > { %v5594_v47 = vpop.xlane.xlu0 %5593 }
0x19b3   : > { %v5595_v10 = vmul.f32 0.01, %v5594_v47 }
0x19b5   : > { %v5596_v1 = vsub.f32 %v5587_v16, %v5595_v10  ;;  %v5624_v16 = vld [vmem:[#allocation7 + $0x488] sm:$0xff] }
0x19b6   : > { %5715 = vmatpush.msrb.mxu1 %v5624_v16 }
0x19b7   : > { %v10305_v62 = vmul.f32 %v9111_v3, %v5596_v1 }
0x19b9   : > { %v5598_v33 = vmul.f32 %v10305_v62, %v10305_v62 }
0x19bb   : > { %5599 = vadd.xlane.f32.xlu1 %v5598_v33  ;;  %v7856_v33 = vld [vmem:[#allocation22 + $0x2] ss:$0 sm:$0xff] }
0x1a2e   : > { %v5600_v32 = vpop.xlane.xlu1 %5599 }
0x1a2f   : > { %v5601_v34 = vmul.f32 0.01, %v5600_v32 }
0x1a31   : > { %v5602_v17 = vadd.f32 1e-12, %v5601_v34 }
0x1a33   : > { %8032 = vrsqrt.f32 %v5602_v17  ;;  %vm5609_vm15 = vweird.f32 %v5602_v17 }
0x1a39   : > { %v8033_v53 = vpop.eup %8032 }
0x1a3a   : > { %v5604_v40 = vmul.f32 %v8033_v53, %v5602_v17  ;;  %vm5610_vm14 = vweird.f32 %v8033_v53 }
0x1a3b   : > { %vm5611_vm0 = vmor %vm5609_vm15, %vm5610_vm14 }
0x1a3c   : > { %v5605_v22 = vmul.f32 %v8033_v53, %v5604_v40 }
0x1a3e   : > { %v5606_v47 = vmul.f32 0.5, %v5605_v22 }
0x1a40   : > { %v5607_v10 = vsub.f32 1.5, %v5606_v47 }
0x1a42   : > { %v5608_v1 = vmul.f32 %v8033_v53, %v5607_v10 }
0x1a44   : > { %v5612_v5 = vsel %vm5611_vm0, %v8033_v53, %v5608_v1 }
0x1a45   : > { %v5613_v20 = vmul.f32 %v5612_v5, %v10305_v62 }
0x1a47   : > { %v5617_v21 = vmul.f32 %v7856_v33, %v5613_v20 }
0x1a49   : > { %v10310_v8 = vadd.f32 %v7857_v39, %v5617_v21 }
0x1a4b   : > { %5696 = vmatmul.f32.vlgmr.msrb.gmra.mxu0 %v10310_v8  ;;  %5716 = vmatmul.f32.vlgmr.msrb.gmra.mxu1 %v10310_v8 }
0x1a4c   : > { %5736 = vmatmul.f32.vlgmr.msrb.gmra.mxu2 %v10310_v8 }
0x1ac8   : > { %v5697_v45 = vpop.f32.mrf.mxu0  ;;  %v5717_v30 = vpop.f32.mrf.mxu1 }
0x1ac9   : > { %v5698_v15 = vadd.f32 %v5697_v45, %v5674_v25  ;;  %v5718_v35 = vadd.f32 %v5717_v30, %v5675_v36 }
0x1acb   : > { %5756 = vmatpush.xpose.msrb.mxu3 %v5718_v35  ;;  %5815 = vmatpush.xpose.msra.mxu1 %v5718_v35  ;;  %v5740_v62 = vmul.f32 %v9134_v18, %v5698_v15  ;;  %v5799_v58 = vmul.f32 %v9185_v44, %v5698_v15  ;;  %v5858_v6 = vmul.f32 %v9200_v59, %v5698_v15 }
0x1acc   : > { %v5917_v13 = vmul.f32 %v9253_v56, %v5698_v15  ;;  %v5976_v14 = vmul.f32 %v9208_v61, %v5698_v15  ;;  %v6035_v9 = vmul.f32 %v9137_v19, %v5698_v15  ;;  %v6094_v12 = vmul.f32 %v9216_v63, %v5698_v15 }
0x1acd   : > { %v6153_v60 = vmul.f32 %v9156_v27, %v5698_v15  ;;  %v6212_v49 = vmul.f32 %v9223_v4, %v5698_v15  ;;  %v6271_v51 = vmul.f32 %v9170_v29, %v5698_v15 }
0x1ace   : > { %5757 = vmatmul.f32.vlgmr.msrb.gmra.mxu3 %v5740_v62  ;;  %5816 = vmatmul.f32.vlgmr.msra.gmra.mxu1 %v5799_v58 }
0x1acf   : > { %5874 = vmatpush.xpose.msra.mxu3 %v5718_v35  ;;  %5933 = vmatpush.xpose.msrb.mxu1 %v5718_v35  ;;  %v5737_v38 = vpop.f32.mrf.mxu2 }
0x1ad0   : > { %v10317_v54 = vadd.f32 %v5737_v38, %v5676_v7 }
0x1ad2   : > { %5792 = vmatpush.msra.mxu0 %v10317_v54  ;;  %5851 = vmatpush.msra.mxu2 %v10317_v54 }
0x1ad3   : > { %5992 = vmatpush.xpose.msrb.mxu3 %v5718_v35  ;;  %6051 = vmatpush.xpose.msra.mxu1 %v5718_v35 }
0x1ad4   : > { %5910 = vmatpush.msrb.mxu0 %v10317_v54  ;;  %5969 = vmatpush.msrb.mxu2 %v10317_v54 }
0x1ad6   : > { %5875 = vmatmul.f32.vlgmr.msra.gmra.mxu3 %v5858_v6  ;;  %5934 = vmatmul.f32.vlgmr.msrb.gmra.mxu1 %v5917_v13 }
0x1ad7   : > { %6110 = vmatpush.xpose.msra.mxu3 %v5718_v35  ;;  %6169 = vmatpush.xpose.msrb.mxu1 %v5718_v35 }
0x1ade   : > { %5993 = vmatmul.f32.vlgmr.msrb.gmra.mxu3 %v5976_v14  ;;  %6052 = vmatmul.f32.vlgmr.msra.gmra.mxu1 %v6035_v9 }
0x1adf   : > { %6228 = vmatpush.xpose.msrb.mxu3 %v5718_v35  ;;  %6287 = vmatpush.xpose.msra.mxu1 %v5718_v35 }
0x1ae6   : > { %6111 = vmatmul.f32.vlgmr.msra.gmra.mxu3 %v6094_v12  ;;  %6170 = vmatmul.f32.vlgmr.msrb.gmra.mxu1 %v6153_v60 }
0x1aee   : > { %6229 = vmatmul.f32.vlgmr.msrb.gmra.mxu3 %v6212_v49  ;;  %6288 = vmatmul.f32.vlgmr.msra.gmra.mxu1 %v6271_v51 }
0x1b4b   : > { %v5817_v28 = vpop.f32.mrf.mxu1 }
0x1b4c   : > { %v5820_v2 = vmul.f32 0.31622776, %v5817_v28 }
0x1b4e   : > { %v5821_v43 = vadd.f32 %v8094_v37, %v5820_v2 }
0x1b50   : > { %v5822_v57 = vsel %vm1158_vm13, %v5821_v43, -inf }
0x1b51   : > { %5823 = vmax.xlane.f32.xlu2 %v5822_v57  ;;  %v5758_v41 = vpop.f32.mrf.mxu3 }
0x1b52   : > { %v5761_v55 = vmul.f32 0.31622776, %v5758_v41 }
0x1b53   : > { %v5935_v50 = vpop.f32.mrf.mxu1 }
0x1b54   : > { %v5938_v31 = vmul.f32 0.31622776, %v5935_v50  ;;  %v5762_v0 = vadd.f32 %v8094_v37, %v5761_v55 }
0x1b56   : > { %v5763_v52 = vsel %vm1158_vm13, %v5762_v0, -inf  ;;  %v5939_v46 = vadd.f32 %v8094_v37, %v5938_v31 }
0x1b57   : > { %5764 = vmax.xlane.f32.xlu0 %v5763_v52 }
0x1b58   : > { %v5940_v26 = vsel %vm1158_vm13, %v5939_v46, -inf }
0x1b59   : > { %5941 = vmax.xlane.f32.xlu1 %v5940_v26  ;;  %v5876_v48 = vpop.f32.mrf.mxu3 }
0x1b5a   : > { %v5879_v42 = vmul.f32 0.31622776, %v5876_v48 }
0x1b5b   : > { %v6053_v24 = vpop.f32.mrf.mxu1 }
0x1b5c   : > { %v6056_v16 = vmul.f32 0.31622776, %v6053_v24  ;;  %v5880_v23 = vadd.f32 %v8094_v37, %v5879_v42 }
0x1b5e   : > { %v5881_v32 = vsel %vm1158_vm13, %v5880_v23, -inf  ;;  %v6057_v34 = vadd.f32 %v8094_v37, %v6056_v16 }
0x1b5f   : > { %5882 = vmax.xlane.f32.xlu2 %v5881_v32 }
0x1b60   : > { %v6058_v17 = vsel %vm1158_vm13, %v6057_v34, -inf }
0x1b61   : > { %v5994_v53 = vpop.f32.mrf.mxu3  ;;  %6059 = vmax.xlane.f32.xlu0 %v6058_v17 }
0x1b62   : > { %v5997_v40 = vmul.f32 0.31622776, %v5994_v53 }
0x1b63   : > { %v6171_v22 = vpop.f32.mrf.mxu1 }
0x1b64   : > { %v6174_v47 = vmul.f32 0.31622776, %v6171_v22  ;;  %v5998_v10 = vadd.f32 %v8094_v37, %v5997_v40 }
0x1b66   : > { %v5999_v1 = vsel %vm1158_vm13, %v5998_v10, -inf  ;;  %v6175_v33 = vadd.f32 %v8094_v37, %v6174_v47 }
0x1b67   : > { %6000 = vmax.xlane.f32.xlu1 %v5999_v1 }
0x1b68   : > { %v6176_v5 = vsel %vm1158_vm13, %v6175_v33, -inf }
0x1b69   : > { %v6112_v20 = vpop.f32.mrf.mxu3  ;;  %6177 = vmax.xlane.f32.xlu2 %v6176_v5 }
0x1b6a   : > { %v6115_v39 = vmul.f32 0.31622776, %v6112_v20 }
0x1b6b   : > { %v6289_v21 = vpop.f32.mrf.mxu1 }
0x1b6c   : > { %v6292_v11 = vmul.f32 0.31622776, %v6289_v21  ;;  %v6116_v25 = vadd.f32 %v8094_v37, %v6115_v39 }
0x1b6e   : > { %v6117_v36 = vsel %vm1158_vm13, %v6116_v25, -inf  ;;  %v6293_v45 = vadd.f32 %v8094_v37, %v6292_v11 }
0x1b6f   : > { %6118 = vmax.xlane.f32.xlu0 %v6117_v36 }
0x1b70   : > { %v6294_v30 = vsel %vm1158_vm13, %v6293_v45, -inf }
0x1b71   : > { %v6230_v15 = vpop.f32.mrf.mxu3  ;;  %6295 = vmax.xlane.f32.xlu1 %v6294_v30 }
0x1b72   : > { %v6233_v35 = vmul.f32 0.31622776, %v6230_v15 }
0x1b74   : > { %v10341_v62 = vadd.f32 %v8094_v37, %v6233_v35 }
0x1b76   : > { %v6235_v58 = vsel %vm1158_vm13, %v10341_v62, -inf }
0x1b77   : > { %6236 = vmax.xlane.f32.xlu2 %v6235_v58 }
0x1bc4   : > { %v5824_v7 = vpop.xlane.xlu2 %5823 }
0x1bc5   : > { %v5825_v38 = vsub.f32 %v5821_v43, %v5824_v7 }
0x1bc7   : > { %v5826_v6 = vmul.f32 1.442695, %v5825_v38 }
0x1bc9   : > { %8034 = vpow2.f32 %v5826_v6 }
0x1bca   : > { %v5765_v13 = vpop.xlane.xlu0 %5764 }
0x1bcb   : > { %v5766_v14 = vsub.f32 %v5762_v0, %v5765_v13 }
0x1bcc   : > { %v5942_v9 = vpop.xlane.xlu1 %5941 }
0x1bcd   : > { %v5767_v12 = vmul.f32 1.442695, %v5766_v14  ;;  %v5943_v60 = vsub.f32 %v5939_v46, %v5942_v9 }
0x1bcf   : > { %v10345_v49 = vpop.eup %8034  ;;  %8036 = vpow2.f32 %v5767_v12  ;;  %v5944_v51 = vmul.f32 1.442695, %v5943_v60 }
0x1bd0   : > { %v5828_v28 = vsel %vm1158_vm13, %v10345_v49, 0.0 }
0x1bd1   : > { %8038 = vpow2.f32 %v5944_v51  ;;  %5829 = vadd.xlane.f32.xlu0 %v5828_v28 }
0x1bd2   : > { %v5883_v2 = vpop.xlane.xlu2 %5882 }
0x1bd3   : > { %v5884_v37 = vsub.f32 %v5880_v23, %v5883_v2 }
0x1bd4   : > { %v6060_v57 = vpop.xlane.xlu0 %6059 }
0x1bd5   : > { %v10349_v43 = vpop.eup %8036  ;;  %v5885_v41 = vmul.f32 1.442695, %v5884_v37  ;;  %v6061_v55 = vsub.f32 %v6057_v34, %v6060_v57 }
0x1bd6   : > { %v5769_v50 = vsel %vm1158_vm13, %v10349_v43, 0.0 }
0x1bd7   : > { %v10353_v31 = vpop.eup %8038  ;;  %8040 = vpow2.f32 %v5885_v41  ;;  %v6062_v0 = vmul.f32 1.442695, %v6061_v55  ;;  %5770 = vadd.xlane.f32.xlu1 %v5769_v50 }
0x1bd8   : > { %v5946_v52 = vsel %vm1158_vm13, %v10353_v31, 0.0 }
0x1bd9   : > { %8042 = vpow2.f32 %v6062_v0  ;;  %5947 = vadd.xlane.f32.xlu2 %v5946_v52 }
0x1bda   : > { %v6001_v46 = vpop.xlane.xlu1 %6000 }
0x1bdb   : > { %v6002_v26 = vsub.f32 %v5998_v10, %v6001_v46 }
0x1bdc   : > { %v6178_v48 = vpop.xlane.xlu2 %6177 }
0x1bdd   : > { %v8041_v42 = vpop.eup %8040  ;;  %v6003_v24 = vmul.f32 1.442695, %v6002_v26  ;;  %v6179_v16 = vsub.f32 %v6175_v33, %v6178_v48 }
0x1bde   : > { %v5887_v23 = vsel %vm1158_vm13, %v8041_v42, 0.0 }
0x1bdf   : > { %v8043_v32 = vpop.eup %8042  ;;  %8044 = vpow2.f32 %v6003_v24  ;;  %v6180_v34 = vmul.f32 1.442695, %v6179_v16  ;;  %5888 = vadd.xlane.f32.xlu0 %v5887_v23 }
0x1be0   : > { %v6064_v17 = vsel %vm1158_vm13, %v8043_v32, 0.0 }
0x1be1   : > { %8046 = vpow2.f32 %v6180_v34  ;;  %6065 = vadd.xlane.f32.xlu1 %v6064_v17  ;;  %v6346_v34 = vld [vmem:[#allocation10 + $0x1f8] sm:$0xff]  ;;  %v6345_v17 = vld [vmem:[#allocation10 + $0x1f0] sm:$0xff] }
0x1be2   : > { %v6119_v53 = vpop.xlane.xlu0 %6118  ;;  %6352 = vmatpush.msra.mxu3 %v6346_v34  ;;  %v6501_v34 = vld [vmem:[#allocation16 + $0xbe8] sm:$0xff] }
0x1be3   : > { %v6120_v40 = vsub.f32 %v6116_v25, %v6119_v53  ;;  %v6343_v53 = vld [vmem:[#allocation10 + $0x1e0] sm:$0xff] }
0x1be4   : > { %v6296_v22 = vpop.xlane.xlu1 %6295  ;;  %6353 = vmatpush.msra.mxu3 %v6345_v17  ;;  %v6494_v17 = vld [vmem:[#allocation16 + $0xbb0] sm:$0xff] }
0x1be5   : > { %v8045_v47 = vpop.eup %8044  ;;  %v6121_v1 = vmul.f32 1.442695, %v6120_v40  ;;  %v6297_v10 = vsub.f32 %v6293_v45, %v6296_v22  ;;  %v6342_v40 = vld [vmem:[#allocation10 + $0x1d8] sm:$0xff]  ;;  %v6341_v22 = vld [vmem:[#allocation10 + $0x1d0] sm:$0xff] }
0x1be6   : > { %v6005_v5 = vsel %vm1158_vm13, %v8045_v47, 0.0 }
0x1be7   : > { %v8047_v20 = vpop.eup %8046  ;;  %8048 = vpow2.f32 %v6121_v1  ;;  %v6298_v33 = vmul.f32 1.442695, %v6297_v10  ;;  %6006 = vadd.xlane.f32.xlu2 %v6005_v5  ;;  %v6339_v1 = vld [vmem:[#allocation10 + $0x1c0] sm:$0xff]  ;;  %v6338_v10 = vld [vmem:[#allocation10 + $0x1b8] sm:$0xff]  ;;  %v6337_v5 = vld [vmem:[#allocation10 + $0x1b0] sm:$0xff] }
0x1be8   : > { %v6182_v39 = vsel %vm1158_vm13, %v8047_v20, 0.0 }
0x1be9   : > { %8050 = vpow2.f32 %v6298_v33  ;;  %6183 = vadd.xlane.f32.xlu0 %v6182_v39  ;;  %v6335_v33 = vld [vmem:[#allocation10 + $0x1a0] sm:$0xff] }
0x1bea   : > { %v6237_v21 = vpop.xlane.xlu2 %6236 }
0x1beb   : > { %v6238_v11 = vsub.f32 %v10341_v62, %v6237_v21 }
0x1bed   : > { %v8049_v36 = vpop.eup %8048  ;;  %v6239_v30 = vmul.f32 1.442695, %v6238_v11  ;;  %v6334_v11 = vld [vmem:[#allocation10 + $0x198] sm:$0xff] }
0x1bee   : > { %v6123_v25 = vsel %vm1158_vm13, %v8049_v36, 0.0 }
0x1bef   : > { %v8051_v15 = vpop.eup %8050  ;;  %8052 = vpow2.f32 %v6239_v30  ;;  %6124 = vadd.xlane.f32.xlu1 %v6123_v25  ;;  %v6332_v30 = vld [vmem:[#allocation10 + $0x188] sm:$0xff]  ;;  %v6331_v25 = vld [vmem:[#allocation10 + $0x180] sm:$0xff] }
0x1bf0   : > { %v6300_v45 = vsel %vm1158_vm13, %v8051_v15, 0.0 }
0x1bf1   : > { %6301 = vadd.xlane.f32.xlu2 %v6300_v45 }
0x1bf5   : > { %v8053_v35 = vpop.eup %8052 }
0x1bf6   : > { %v6241_v58 = vsel %vm1158_vm13, %v8053_v35, 0.0 }
0x1bf7   : > { %6242 = vadd.xlane.f32.xlu0 %v6241_v58 }
0x1c44   : > { %v5830_v7 = vpop.xlane.xlu0 %5829 }
0x1c45   : > { %8054 = vrcp.f32 %v5830_v7 }
0x1c4a   : > { %v5771_v38 = vpop.xlane.xlu1 %5770 }
0x1c4b   : > { %v8055_v6 = vpop.eup %8054  ;;  %8056 = vrcp.f32 %v5771_v38 }
0x1c4c   : > { %v5832_v62 = vmul.f32 %v8055_v6, %v10345_v49  ;;  %v5948_v13 = vpop.xlane.xlu2 %5947 }
0x1c4d   : > { %8058 = vrcp.f32 %v5948_v13 }
0x1c4e   : > { %7588 = vmatmul.msk.f32.vlgmr.msra.gmra.mxu2 %vm1158_vm13, %v5832_v62 }
0x1c4f   : > { %6087 = vmatpush.msra.mxu2 %v10317_v54 }
0x1c51   : > { %v8057_v14 = vpop.eup %8056 }
0x1c52   : > { %v5773_v9 = vmul.f32 %v8057_v14, %v10349_v43  ;;  %v5889_v12 = vpop.xlane.xlu0 %5888 }
0x1c53   : > { %v8059_v60 = vpop.eup %8058  ;;  %8060 = vrcp.f32 %v5889_v12 }
0x1c54   : > { %v5950_v51 = vmul.f32 %v8059_v60, %v10353_v31  ;;  %7587 = vmatmul.msk.f32.vlgmr.msra.gmra.mxu0 %vm1158_vm13, %v5773_v9  ;;  %v6066_v28 = vpop.xlane.xlu1 %6065 }
0x1c55   : > { %6028 = vmatpush.msra.mxu0 %v10317_v54  ;;  %8062 = vrcp.f32 %v6066_v28 }
0x1c56   : > { %7590 = vmatmul.msk.f32.vlgmr.msrb.gmra.mxu2 %vm1158_vm13, %v5950_v51 }
0x1c57   : > { %6205 = vmatpush.msrb.mxu2 %v10317_v54 }
0x1c59   : > { %v8061_v49 = vpop.eup %8060 }
0x1c5a   : > { %v5891_v2 = vmul.f32 %v8061_v49, %v8041_v42  ;;  %v6007_v37 = vpop.xlane.xlu2 %6006 }
0x1c5b   : > { %v8063_v57 = vpop.eup %8062  ;;  %8064 = vrcp.f32 %v6007_v37 }
0x1c5c   : > { %v6068_v43 = vmul.f32 %v8063_v57, %v8043_v32  ;;  %7589 = vmatmul.msk.f32.vlgmr.msrb.gmra.mxu0 %vm1158_vm13, %v5891_v2  ;;  %v6184_v41 = vpop.xlane.xlu0 %6183 }
0x1c5d   : > { %6146 = vmatpush.msrb.mxu0 %v10317_v54  ;;  %8066 = vrcp.f32 %v6184_v41 }
0x1c5e   : > { %7592 = vmatmul.msk.f32.vlgmr.msra.gmra.mxu2 %vm1158_vm13, %v6068_v43 }
0x1c5f   : > { %6323 = vmatpush.msra.mxu2 %v10317_v54 }
0x1c61   : > { %v8065_v55 = vpop.eup %8064 }
0x1c62   : > { %v6009_v50 = vmul.f32 %v8065_v55, %v8045_v47  ;;  %v6125_v31 = vpop.xlane.xlu1 %6124  ;;  %v6340_v47 = vld [vmem:[#allocation10 + $0x1c8] sm:$0xff] }
0x1c63   : > { %v8067_v0 = vpop.eup %8066  ;;  %8068 = vrcp.f32 %v6125_v31 }
0x1c64   : > { %v6186_v52 = vmul.f32 %v8067_v0, %v8047_v20  ;;  %v6302_v46 = vpop.xlane.xlu2 %6301  ;;  %7591 = vmatmul.msk.f32.vlgmr.msra.gmra.mxu0 %vm1158_vm13, %v6009_v50  ;;  %v6336_v20 = vld [vmem:[#allocation10 + $0x1a8] sm:$0xff]  ;;  %v7858_v50 = vld [vmem:[#allocation11 + $0x3] ss:$0 sm:$0xff] }
0x1c65   : > { %8070 = vrcp.f32 %v6302_v46  ;;  %6264 = vmatpush.msra.mxu0 %v10317_v54  ;;  %v6344_v54 = vld [vmem:[#allocation10 + $0x1e8] sm:$0xff] }
0x1c66   : > { %7594 = vmatmul.msk.f32.vlgmr.msrb.gmra.mxu2 %vm1158_vm13, %v6186_v52  ;;  %6354 = vmatpush.msra.mxu3 %v6344_v54  ;;  %v6499_v52 = vld [vmem:[#allocation16 + $0xbd8] sm:$0xff]  ;;  %v6492_v46 = vld [vmem:[#allocation16 + $0xba0] sm:$0xff] }
0x1c67   : > { %6539 = vmatpush.msrb.mxu1 %v6499_v52  ;;  %v6495_v54 = vld [vmem:[#allocation16 + $0xbb8] sm:$0xff] }
0x1c68   : > { %6355 = vmatpush.msra.mxu3 %v6343_v53  ;;  %v6462_v53 = vld [vmem:[#allocation16 + $0xab0] sm:$0xff]  ;;  %v6479_v52 = vld [vmem:[#allocation16 + $0xb38] sm:$0xff] }
0x1c69   : > { %v8069_v26 = vpop.eup %8068 }
0x1c6a   : > { %v6127_v48 = vmul.f32 %v8069_v26, %v8049_v36  ;;  %v6243_v42 = vpop.xlane.xlu0 %6242  ;;  %6356 = vmatpush.msra.mxu3 %v6342_v40  ;;  %v6333_v36 = vld [vmem:[#allocation10 + $0x190] sm:$0xff]  ;;  %v6486_v26 = vld [vmem:[#allocation16 + $0xb70] sm:$0xff]  ;;  %v6463_v40 = vld [vmem:[#allocation16 + $0xab8] sm:$0xff] }
0x1c6b   : > { %v8071_v24 = vpop.eup %8070  ;;  %8072 = vrcp.f32 %v6243_v42  ;;  %v6481_v42 = vld [vmem:[#allocation16 + $0xb48] sm:$0xff] }
0x1c6c   : > { %v6304_v16 = vmul.f32 %v8071_v24, %v8051_v15  ;;  %7593 = vmatmul.msk.f32.vlgmr.msrb.gmra.mxu0 %vm1158_vm13, %v6127_v48  ;;  %6357 = vmatpush.msra.mxu3 %v6341_v22  ;;  %v6480_v48 = vld [vmem:[#allocation16 + $0xb40] sm:$0xff]  ;;  %v6475_v24 = vld [vmem:[#allocation16 + $0xb18] sm:$0xff] }
0x1c6d   : > { %v6456_v22 = vld [vmem:[#allocation16 + $0xa80] sm:$0xff] }
0x1c6e   : > { %7596 = vmatmul.msk.f32.vlgmr.msra.gmra.mxu2 %vm1158_vm13, %v6304_v16  ;;  %6358 = vmatpush.msra.mxu3 %v6340_v47  ;;  %v6468_v16 = vld [vmem:[#allocation16 + $0xae0] sm:$0xff]  ;;  %v6457_v47 = vld [vmem:[#allocation16 + $0xa88] sm:$0xff] }
0x1c70   : > { %6359 = vmatpush.msra.mxu3 %v6339_v1  ;;  %v6450_v1 = vld [vmem:[#allocation16 + $0xa50] sm:$0xff] }
0x1c71   : > { %v8073_v23 = vpop.eup %8072 }
0x1c72   : > { %v6245_v32 = vmul.f32 %v8073_v23, %v8053_v35  ;;  %6360 = vmatpush.msra.mxu3 %v6338_v10  ;;  %v6469_v23 = vld [vmem:[#allocation16 + $0xae8] sm:$0xff]  ;;  %v6451_v10 = vld [vmem:[#allocation16 + $0xa58] sm:$0xff] }
0x1c74   : > { %7595 = vmatmul.msk.f32.vlgmr.msra.gmra.mxu0 %vm1158_vm13, %v6245_v32  ;;  %6361 = vmatpush.msra.mxu3 %v6337_v5  ;;  %v6500_v32 = vld [vmem:[#allocation16 + $0xbe0] sm:$0xff] }
0x1c75   : > { %6559 = vmatpush.msrb.mxu2 %v6500_v32  ;;  %v6444_v5 = vld [vmem:[#allocation16 + $0xa20] sm:$0xff] }
0x1c76   : > { %6362 = vmatpush.msra.mxu3 %v6336_v20  ;;  %v6445_v20 = vld [vmem:[#allocation16 + $0xa28] sm:$0xff]  ;;  %v6460_v32 = vld [vmem:[#allocation16 + $0xaa0] sm:$0xff] }
0x1c77   : > { %6560 = vmatpush.msrb.mxu2 %v6494_v17  ;;  %v6428_v17 = vld [vmem:[#allocation16 + $0x9a0] sm:$0xff] }
0x1c78   : > { %6363 = vmatpush.msra.mxu3 %v6335_v33  ;;  %v6438_v33 = vld [vmem:[#allocation16 + $0x9f0] sm:$0xff] }
0x1c7a   : > { %6364 = vmatpush.msra.mxu3 %v6334_v11  ;;  %v6433_v11 = vld [vmem:[#allocation16 + $0x9c8] sm:$0xff] }
0x1c7c   : > { %6365 = vmatpush.msra.mxu3 %v6333_v36  ;;  %v6426_v36 = vld [vmem:[#allocation16 + $0x990] sm:$0xff] }
0x1c7e   : > { %6366 = vmatpush.msra.mxu3 %v6332_v30  ;;  %v6427_v30 = vld [vmem:[#allocation16 + $0x998] sm:$0xff] }
0x1c80   : > { %6367 = vmatpush.msra.mxu3 %v6331_v25 }
0x1c82   : > { %6579 = vmatpush.msrb.mxu3 %v6501_v34  ;;  %v6461_v34 = vld [vmem:[#allocation16 + $0xaa8] sm:$0xff] }
0x1c84   : > { %6580 = vmatpush.msrb.mxu3 %v6495_v54  ;;  %v6429_v54 = vld [vmem:[#allocation16 + $0x9a8] sm:$0xff] }
0x1cd1   : > { %v5794_v39 = vpop.f32.mrf.mxu0  ;;  %v5853_v21 = vpop.f32.mrf.mxu2 }
0x1cd2   : > { %v5797_v35 = vmul.f32 %v9134_v18, %v5794_v39  ;;  %v5856_v58 = vmul.f32 %v9185_v44, %v5853_v21  ;;  %v6439_v39 = vld [vmem:[#allocation16 + $0x9f8] sm:$0xff]  ;;  %v6432_v21 = vld [vmem:[#allocation16 + $0x9c0] sm:$0xff] }
0x1cd4   : > { %v5857_v38 = vadd.f32 %v5856_v58, %v5797_v35 }
0x1cd9   : > { %v5912_v15 = vpop.f32.mrf.mxu0  ;;  %v5971_v45 = vpop.f32.mrf.mxu2 }
0x1cda   : > { %v5915_v7 = vmul.f32 %v9200_v59, %v5912_v15  ;;  %v5974_v14 = vmul.f32 %v9253_v56, %v5971_v45 }
0x1cdc   : > { %v5916_v13 = vadd.f32 %v5915_v7, %v5857_v38  ;;  %v6420_v7 = vld [vmem:[#allocation16 + $0x960] sm:$0xff]  ;;  %v6421_v38 = vld [vmem:[#allocation16 + $0x968] sm:$0xff] }
0x1cde   : > { %v5975_v12 = vadd.f32 %v5974_v14, %v5916_v13  ;;  %v6414_v13 = vld [vmem:[#allocation16 + $0x930] sm:$0xff]  ;;  %v6415_v14 = vld [vmem:[#allocation16 + $0x938] sm:$0xff] }
0x1ce1   : > { %v6030_v6 = vpop.f32.mrf.mxu0  ;;  %v6089_v62 = vpop.f32.mrf.mxu2 }
0x1ce2   : > { %v6033_v9 = vmul.f32 %v9208_v61, %v6030_v6  ;;  %v6092_v49 = vmul.f32 %v9137_v19, %v6089_v62  ;;  %v6488_v6 = vld [vmem:[#allocation16 + $0xb80] sm:$0xff]  ;;  %v6489_v62 = vld [vmem:[#allocation16 + $0xb88] sm:$0xff] }
0x1ce3   : > { %6561 = vmatpush.msrb.mxu2 %v6488_v6  ;;  %6581 = vmatpush.msrb.mxu3 %v6489_v62  ;;  %v6418_v6 = vld [vmem:[#allocation16 + $0x950] sm:$0xff]  ;;  %v6419_v62 = vld [vmem:[#allocation16 + $0x958] sm:$0xff] }
0x1ce4   : > { %v6034_v60 = vadd.f32 %v6033_v9, %v5975_v12  ;;  %v6482_v9 = vld [vmem:[#allocation16 + $0xb50] sm:$0xff]  ;;  %v6483_v12 = vld [vmem:[#allocation16 + $0xb58] sm:$0xff] }
0x1ce5   : > { %6562 = vmatpush.msrb.mxu2 %v6482_v9  ;;  %6582 = vmatpush.msrb.mxu3 %v6483_v12  ;;  %v6413_v9 = vld [vmem:[#allocation16 + $0x928] sm:$0xff] }
0x1ce6   : > { %v6093_v2 = vadd.f32 %v6092_v49, %v6034_v60  ;;  %v6408_v60 = vld [vmem:[#allocation16 + $0x900] sm:$0xff]  ;;  %v6477_v49 = vld [vmem:[#allocation16 + $0xb28] sm:$0xff] }
0x1ce7   : > { %6583 = vmatpush.msrb.mxu3 %v6477_v49 }
0x1ce9   : > { %v6148_v51 = vpop.f32.mrf.mxu0  ;;  %v6207_v28 = vpop.f32.mrf.mxu2 }
0x1cea   : > { %v6151_v18 = vmul.f32 %v9216_v63, %v6148_v51  ;;  %v6210_v59 = vmul.f32 %v9156_v27, %v6207_v28  ;;  %v6498_v27 = vld [vmem:[#allocation16 + $0xbd0] sm:$0xff]  ;;  %v6409_v51 = vld [vmem:[#allocation16 + $0x908] sm:$0xff]  ;;  %v6476_v28 = vld [vmem:[#allocation16 + $0xb20] sm:$0xff] }
0x1ceb   : > { %6519 = vmatpush.msrb.mxu0 %v6498_v27  ;;  %6563 = vmatpush.msrb.mxu2 %v6476_v28  ;;  %v6478_v27 = vld [vmem:[#allocation16 + $0xb30] sm:$0xff] }
0x1cec   : > { %v6152_v44 = vadd.f32 %v6151_v18, %v6093_v2  ;;  %v6502_v18 = vld [vmem:[#allocation16 + $0xbf0] sm:$0xff]  ;;  %v6503_v2 = vld [vmem:[#allocation16 + $0xbf8] sm:$0xff] }
0x1ced   : > { %6520 = vmatpush.msrb.mxu0 %v6492_v46  ;;  %v6446_v46 = vld [vmem:[#allocation16 + $0xa30] sm:$0xff] }
0x1cee   : > { %v6211_v43 = vadd.f32 %v6210_v59, %v6152_v44  ;;  %v6470_v44 = vld [vmem:[#allocation16 + $0xaf0] sm:$0xff]  ;;  %v6471_v59 = vld [vmem:[#allocation16 + $0xaf8] sm:$0xff] }
0x1cef   : > { %6521 = vmatpush.msrb.mxu0 %v6486_v26  ;;  %6564 = vmatpush.msrb.mxu2 %v6470_v44  ;;  %v6472_v26 = vld [vmem:[#allocation16 + $0xb00] sm:$0xff] }
0x1cf0   : > { %6584 = vmatpush.msrb.mxu3 %v6471_v59  ;;  %v7860_v59 = vld [vmem:[#allocation14 + $0x3] ss:$0 sm:$0xff] }
0x1cf1   : > { %v6266_v37 = vpop.f32.mrf.mxu0  ;;  %v6325_v57 = vpop.f32.mrf.mxu2  ;;  %6522 = vmatpush.msrb.mxu0 %v6480_v48  ;;  %v6440_v48 = vld [vmem:[#allocation16 + $0xa00] sm:$0xff] }
0x1cf2   : > { %v6269_v41 = vmul.f32 %v9223_v4, %v6266_v37  ;;  %v6328_v61 = vmul.f32 %v9170_v29, %v6325_v57  ;;  %v6493_v4 = vld [vmem:[#allocation16 + $0xba8] sm:$0xff]  ;;  %v6487_v29 = vld [vmem:[#allocation16 + $0xb78] sm:$0xff]  ;;  %v6496_v37 = vld [vmem:[#allocation16 + $0xbc0] sm:$0xff] }
0x1cf3   : > { %6540 = vmatpush.msrb.mxu1 %v6493_v4  ;;  %v6497_v57 = vld [vmem:[#allocation16 + $0xbc8] sm:$0xff]  ;;  %v6447_v4 = vld [vmem:[#allocation16 + $0xa38] sm:$0xff] }
0x1cf4   : > { %v6270_v56 = vadd.f32 %v6269_v41, %v6211_v43  ;;  %v6464_v43 = vld [vmem:[#allocation16 + $0xac0] sm:$0xff]  ;;  %v6465_v41 = vld [vmem:[#allocation16 + $0xac8] sm:$0xff] }
0x1cf5   : > { %6541 = vmatpush.msrb.mxu1 %v6487_v29  ;;  %6565 = vmatpush.msrb.mxu2 %v6464_v43  ;;  %v6473_v29 = vld [vmem:[#allocation16 + $0xb08] sm:$0xff] }
0x1cf6   : > { %v6329_v55 = vadd.f32 %v6328_v61, %v6270_v56  ;;  %v6490_v56 = vld [vmem:[#allocation16 + $0xb90] sm:$0xff]  ;;  %6585 = vmatpush.msrb.mxu3 %v6465_v41  ;;  %v6491_v61 = vld [vmem:[#allocation16 + $0xb98] sm:$0xff] }
0x1cf7   : > { %6542 = vmatpush.msrb.mxu1 %v6481_v42  ;;  %v6441_v42 = vld [vmem:[#allocation16 + $0xa08] sm:$0xff]  ;;  %v6919_v41 = vld [vmem:[#allocation19 + $0x978] sm:$0xff] }
0x1cf8   : > { %6368 = vmatmul.f32.vlgmr.msra.gmra.mxu3 %v6329_v55  ;;  %v6458_v55 = vld [vmem:[#allocation16 + $0xa90] sm:$0xff] }
0x1cf9   : > { %6543 = vmatpush.msrb.mxu1 %v6475_v24  ;;  %6566 = vmatpush.msrb.mxu2 %v6458_v55  ;;  %v6467_v24 = vld [vmem:[#allocation16 + $0xad8] sm:$0xff]  ;;  %v6917_v55 = vld [vmem:[#allocation19 + $0x968] sm:$0xff] }
0x1cfb   : > { %6544 = vmatpush.msrb.mxu1 %v6469_v23  ;;  %v6435_v23 = vld [vmem:[#allocation16 + $0x9d8] sm:$0xff] }
0x1cfd   : > { %6545 = vmatpush.msrb.mxu1 %v6463_v40  ;;  %v6455_v40 = vld [vmem:[#allocation16 + $0xa78] sm:$0xff] }
0x1cff   : > { %6546 = vmatpush.msrb.mxu1 %v6457_v47  ;;  %v6423_v47 = vld [vmem:[#allocation16 + $0x978] sm:$0xff] }
0x1d01   : > { %6547 = vmatpush.msrb.mxu1 %v6451_v10  ;;  %v6449_v10 = vld [vmem:[#allocation16 + $0xa48] sm:$0xff] }
0x1d03   : > { %6548 = vmatpush.msrb.mxu1 %v6445_v20  ;;  %v6417_v20 = vld [vmem:[#allocation16 + $0x948] sm:$0xff] }
0x1d05   : > { %6549 = vmatpush.msrb.mxu1 %v6439_v39  ;;  %v6443_v39 = vld [vmem:[#allocation16 + $0xa18] sm:$0xff] }
0x1d07   : > { %6550 = vmatpush.msrb.mxu1 %v6433_v11  ;;  %v6411_v11 = vld [vmem:[#allocation16 + $0x918] sm:$0xff] }
0x1d09   : > { %6551 = vmatpush.msrb.mxu1 %v6427_v30  ;;  %v6437_v30 = vld [vmem:[#allocation16 + $0x9e8] sm:$0xff] }
0x1d0b   : > { %6552 = vmatpush.msrb.mxu1 %v6421_v38 }
0x1d0d   : > { %6553 = vmatpush.msrb.mxu1 %v6415_v14  ;;  %v6412_v14 = vld [vmem:[#allocation16 + $0x920] sm:$0xff] }
0x1d0f   : > { %6554 = vmatpush.msrb.mxu1 %v6409_v51 }
0x1d11   : > { %6619 = vmatpush.msra.mxu1 %v6503_v2  ;;  %v7859_v2 = vld [vmem:[#allocation13 + $0x3] ss:$0 sm:$0xff] }
0x1d13   : > { %6620 = vmatpush.msra.mxu1 %v6497_v57 }
0x1d15   : > { %6621 = vmatpush.msra.mxu1 %v6491_v61  ;;  %v6934_v61 = vld [vmem:[#allocation19 + $0x9f0] sm:$0xff] }
0x1d7b   : > { %v6369_v31 = vpop.f32.mrf.mxu3 }
0x1d7c   : > { %v6370_v0 = vadd.f32 %v7858_v50, %v6369_v31  ;;  %v6459_v50 = vld [vmem:[#allocation16 + $0xa98] sm:$0xff]  ;;  %v6484_v31 = vld [vmem:[#allocation16 + $0xb60] sm:$0xff] }
0x1d7d   : > { %6586 = vmatpush.msrb.mxu3 %v6459_v50  ;;  %v6933_v50 = vld [vmem:[#allocation19 + $0x9e8] sm:$0xff] }
0x1d7e   : > { %v10395_v19 = vadd.f32 %v6370_v0, %v10310_v8  ;;  %v6474_v8 = vld [vmem:[#allocation16 + $0xb10] sm:$0xff]  ;;  %v6485_v0 = vld [vmem:[#allocation16 + $0xb68] sm:$0xff] }
0x1d7f   : > { %6523 = vmatpush.msrb.mxu0 %v6474_v8  ;;  %6622 = vmatpush.msra.mxu1 %v6485_v0  ;;  %v6466_v8 = vld [vmem:[#allocation16 + $0xad0] sm:$0xff]  ;;  %v6932_v0 = vld [vmem:[#allocation19 + $0x9e0] sm:$0xff] }
0x1d80   : > { %v6377_v63 = vmul.f32 %v9111_v3, %v10395_v19 }
0x1d81   : > { %6524 = vmatpush.msrb.mxu0 %v6468_v16  ;;  %6623 = vmatpush.msra.mxu1 %v6479_v52  ;;  %v6434_v16 = vld [vmem:[#allocation16 + $0x9d0] sm:$0xff] }
0x1d82   : > { %6378 = vadd.xlane.f32.xlu1 %v6377_v63  ;;  %v6453_v63 = vld [vmem:[#allocation16 + $0xa68] sm:$0xff] }
0x1d83   : > { %6525 = vmatpush.msrb.mxu0 %v6462_v53  ;;  %6587 = vmatpush.msrb.mxu3 %v6453_v63  ;;  %v6454_v53 = vld [vmem:[#allocation16 + $0xa70] sm:$0xff] }
0x1d84   : > { %6624 = vmatpush.msra.mxu1 %v6473_v29 }
0x1d85   : > { %6526 = vmatpush.msrb.mxu0 %v6456_v22  ;;  %6588 = vmatpush.msrb.mxu3 %v6447_v4  ;;  %v6422_v22 = vld [vmem:[#allocation16 + $0x970] sm:$0xff] }
0x1d86   : > { %6625 = vmatpush.msra.mxu1 %v6467_v24 }
0x1d87   : > { %6527 = vmatpush.msrb.mxu0 %v6450_v1  ;;  %6589 = vmatpush.msrb.mxu3 %v6441_v42  ;;  %v6448_v1 = vld [vmem:[#allocation16 + $0xa40] sm:$0xff] }
0x1d88   : > { %6626 = vmatpush.msra.mxu1 %v6461_v34 }
0x1d89   : > { %6528 = vmatpush.msrb.mxu0 %v6444_v5  ;;  %6590 = vmatpush.msrb.mxu3 %v6435_v23  ;;  %v6416_v5 = vld [vmem:[#allocation16 + $0x940] sm:$0xff] }
0x1d8a   : > { %6627 = vmatpush.msra.mxu1 %v6455_v40 }
0x1d8b   : > { %6529 = vmatpush.msrb.mxu0 %v6438_v33  ;;  %6591 = vmatpush.msrb.mxu3 %v6429_v54  ;;  %v6442_v33 = vld [vmem:[#allocation16 + $0xa10] sm:$0xff] }
0x1d8c   : > { %6628 = vmatpush.msra.mxu1 %v6449_v10 }
0x1d8d   : > { %6530 = vmatpush.msrb.mxu0 %v6432_v21  ;;  %6592 = vmatpush.msrb.mxu3 %v6423_v47  ;;  %v6410_v21 = vld [vmem:[#allocation16 + $0x910] sm:$0xff] }
0x1d8e   : > { %6629 = vmatpush.msra.mxu1 %v6443_v39 }
0x1d8f   : > { %6531 = vmatpush.msrb.mxu0 %v6426_v36  ;;  %6593 = vmatpush.msrb.mxu3 %v6417_v20  ;;  %v6436_v36 = vld [vmem:[#allocation16 + $0x9e0] sm:$0xff] }
0x1d90   : > { %6630 = vmatpush.msra.mxu1 %v6437_v30 }
0x1d91   : > { %6532 = vmatpush.msrb.mxu0 %v6420_v7  ;;  %6594 = vmatpush.msrb.mxu3 %v6411_v11  ;;  %v6425_v7 = vld [vmem:[#allocation16 + $0x988] sm:$0xff] }
0x1d93   : > { %6533 = vmatpush.msrb.mxu0 %v6414_v13 }
0x1d95   : > { %6534 = vmatpush.msrb.mxu0 %v6408_v60 }
0x1d97   : > { %6599 = vmatpush.msra.mxu0 %v6502_v18 }
0x1d99   : > { %6600 = vmatpush.msra.mxu0 %v6496_v37 }
0x1d9b   : > { %6601 = vmatpush.msra.mxu0 %v6490_v56  ;;  %v6935_v56 = vld [vmem:[#allocation19 + $0x9f8] sm:$0xff] }
0x1d9c   : > { %7025 = vmatpush.msra.mxu3 %v6935_v56  ;;  %v6929_v56 = vld [vmem:[#allocation19 + $0x9c8] sm:$0xff] }
0x1d9d   : > { %6602 = vmatpush.msra.mxu0 %v6484_v31  ;;  %v6916_v31 = vld [vmem:[#allocation19 + $0x960] sm:$0xff] }
0x1d9e   : > { %7026 = vmatpush.msra.mxu3 %v6934_v61 }
0x1d9f   : > { %6603 = vmatpush.msra.mxu0 %v6478_v27 }
0x1da0   : > { %7027 = vmatpush.msra.mxu3 %v6933_v50  ;;  %v6912_v50 = vld [vmem:[#allocation19 + $0x940] sm:$0xff] }
0x1da1   : > { %6604 = vmatpush.msra.mxu0 %v6472_v26 }
0x1da2   : > { %7028 = vmatpush.msra.mxu3 %v6932_v0 }
0x1da3   : > { %6605 = vmatpush.msra.mxu0 %v6466_v8 }
0x1da5   : > { %6606 = vmatpush.msra.mxu0 %v6460_v32 }
0x1da7   : > { %6607 = vmatpush.msra.mxu0 %v6454_v53 }
0x1da9   : > { %6608 = vmatpush.msra.mxu0 %v6448_v1 }
0x1dab   : > { %6609 = vmatpush.msra.mxu0 %v6442_v33 }
0x1dad   : > { %6610 = vmatpush.msra.mxu0 %v6436_v36 }
0x1df5   : > { %v6379_v25 = vpop.xlane.xlu1 %6378 }
0x1df6   : > { %v6380_v15 = vmul.f32 0.01, %v6379_v25  ;;  %v6430_v25 = vld [vmem:[#allocation16 + $0x9b0] sm:$0xff] }
0x1df7   : > { %6611 = vmatpush.msra.mxu0 %v6430_v25 }
0x1df8   : > { %v6381_v45 = vsub.f32 %v10395_v19, %v6380_v15  ;;  %v6452_v19 = vld [vmem:[#allocation16 + $0xa60] sm:$0xff]  ;;  %v6431_v15 = vld [vmem:[#allocation16 + $0x9b8] sm:$0xff] }
0x1df9   : > { %6567 = vmatpush.msrb.mxu2 %v6452_v19  ;;  %6631 = vmatpush.msra.mxu1 %v6431_v15  ;;  %v10414_v19 = vld [vmem:[#allocation17 + $0x12] sm:$0x3f] }
0x1dfa   : > { %v10401_v35 = vmul.f32 %v9111_v3, %v6381_v45  ;;  %v6507_v63 = vperm.slane %v10414_v19, 0  ;;  %v6508_v27 = vperm.slane %v10414_v19, 1  ;;  %v6509_v42 = vperm.slane %v10414_v19, 2  ;;  %v6915_v15 = vld [vmem:[#allocation19 + $0x958] sm:$0xff] }
0x1dfb   : > { %6568 = vmatpush.msrb.mxu2 %v6446_v46  ;;  %6632 = vmatpush.msra.mxu1 %v6425_v7  ;;  %v6510_v8 = vperm.slane %v10414_v19, 3  ;;  %v6511_v23 = vperm.slane %v10414_v19, 4 }
0x1dfc   : > { %v6383_v58 = vmul.f32 %v10401_v35, %v10401_v35 }
0x1dfd   : > { %6569 = vmatpush.msrb.mxu2 %v6440_v48  ;;  %6633 = vmatpush.msra.mxu1 %v6419_v62 }
0x1dfe   : > { %6384 = vadd.xlane.f32.xlu2 %v6383_v58  ;;  %v6424_v58 = vld [vmem:[#allocation16 + $0x980] sm:$0xff] }
0x1dff   : > { %6570 = vmatpush.msrb.mxu2 %v6434_v16  ;;  %6612 = vmatpush.msra.mxu0 %v6424_v58 }
0x1e00   : > { %6634 = vmatpush.msra.mxu1 %v6413_v9  ;;  %v6914_v9 = vld [vmem:[#allocation19 + $0x950] sm:$0xff] }
0x1e01   : > { %6571 = vmatpush.msrb.mxu2 %v6428_v17  ;;  %6613 = vmatpush.msra.mxu0 %v6418_v6 }
0x1e03   : > { %6572 = vmatpush.msrb.mxu2 %v6422_v22  ;;  %6614 = vmatpush.msra.mxu0 %v6412_v14 }
0x1e05   : > { %6573 = vmatpush.msrb.mxu2 %v6416_v5 }
0x1e07   : > { %6574 = vmatpush.msrb.mxu2 %v6410_v21 }
0x1e09   : > { %7005 = vmatpush.msra.mxu2 %v6919_v41  ;;  %v6913_v41 = vld [vmem:[#allocation19 + $0x948] sm:$0xff] }
0x1e71   : > { %v6385_v45 = vpop.xlane.xlu2 %6384 }
0x1e72   : > { %v6386_v38 = vmul.f32 0.01, %v6385_v45 }
0x1e74   : > { %v6387_v13 = vadd.f32 1e-12, %v6386_v38  ;;  %v6931_v38 = vld [vmem:[#allocation19 + $0x9d8] sm:$0xff] }
0x1e75   : > { %7029 = vmatpush.msra.mxu3 %v6931_v38 }
0x1e76   : > { %8074 = vrsqrt.f32 %v6387_v13  ;;  %vm6394_vm1 = vweird.f32 %v6387_v13 }
0x1e7c   : > { %v8075_v12 = vpop.eup %8074 }
0x1e7d   : > { %v6389_v60 = vmul.f32 %v8075_v12, %v6387_v13  ;;  %vm6395_vm13 = vweird.f32 %v8075_v12 }
0x1e7e   : > { %vm6396_vm2 = vmor %vm6394_vm1, %vm6395_vm13 }
0x1e7f   : > { %v6390_v51 = vmul.f32 %v8075_v12, %v6389_v60 }
0x1e81   : > { %v6391_v28 = vmul.f32 0.5, %v6390_v51 }
0x1e83   : > { %v6392_v49 = vsub.f32 1.5, %v6391_v28 }
0x1e85   : > { %v6393_v18 = vmul.f32 %v8075_v12, %v6392_v49 }
0x1e87   : > { %v6397_v44 = vsel %vm6396_vm2, %v8075_v12, %v6393_v18  ;;  %v6930_v12 = vld [vmem:[#allocation19 + $0x9d0] sm:$0xff] }
0x1e88   : > { %v6398_v37 = vmul.f32 %v6397_v44, %v10401_v35  ;;  %v6918_v35 = vld [vmem:[#allocation19 + $0x970] sm:$0xff]  ;;  %7030 = vmatpush.msra.mxu3 %v6930_v12  ;;  %v6925_v12 = vld [vmem:[#allocation19 + $0x9a8] sm:$0xff] }
0x1e89   : > { %7006 = vmatpush.msra.mxu2 %v6918_v35 }
0x1e8a   : > { %v6402_v57 = vmul.f32 %v7859_v2, %v6398_v37  ;;  %7031 = vmatpush.msra.mxu3 %v6929_v56  ;;  %v6907_v56 = vld [vmem:[#allocation19 + $0x918] sm:$0xff] }
0x1e8b   : > { %7007 = vmatpush.msra.mxu2 %v6917_v55 }
0x1e8c   : > { %v10406_v43 = vadd.f32 %v7860_v59, %v6402_v57 }
0x1e8d   : > { %7008 = vmatpush.msra.mxu2 %v6916_v31 }
0x1e8e   : > { %6535 = vmatmul.f32.vlgmr.msrb.gmra.mxu0 %v10406_v43  ;;  %6555 = vmatmul.f32.vlgmr.msrb.gmra.mxu1 %v10406_v43 }
0x1e8f   : > { %6575 = vmatmul.f32.vlgmr.msrb.gmra.mxu2 %v10406_v43  ;;  %6595 = vmatmul.f32.vlgmr.msrb.gmra.mxu3 %v10406_v43 }
0x1e90   : > { %7009 = vmatpush.msra.mxu2 %v6915_v15 }
0x1e92   : > { %7010 = vmatpush.msra.mxu2 %v6914_v9 }
0x1e94   : > { %7011 = vmatpush.msra.mxu2 %v6913_v41  ;;  %v6924_v41 = vld [vmem:[#allocation19 + $0x9a0] sm:$0xff] }
0x1e96   : > { %6615 = vmatmul.f32.vlgmr.msra.gmra.mxu0 %v10406_v43  ;;  %6635 = vmatmul.f32.vlgmr.msra.gmra.mxu1 %v10406_v43 }
0x1e97   : > { %7012 = vmatpush.msra.mxu2 %v6912_v50 }
0x1f0b   : > { %v6536_v52 = vpop.f32.mrf.mxu0  ;;  %v6556_v46 = vpop.f32.mrf.mxu1 }
0x1f0c   : > { %v10418_v4 = vadd.f32 %v6536_v52, %v6507_v63  ;;  %v10420_v26 = vadd.f32 %v6556_v46, %v6508_v27 }
0x1f0e   : > { %v10423_v29 = vmul.f32 0.70710677, %v10418_v4  ;;  %v10426_v48 = vmul.f32 0.70710677, %v10420_v26 }
0x1f10   : > { %v6651_v24 = vmul.f32 %v10423_v29, %v10423_v29  ;;  %v6691_v16 = vmul.f32 %v10426_v48, %v10426_v48 }
0x1f12   : > { %v10435_v32 = vmin.f32 %v6651_v24, 16.0  ;;  %v10437_v34 = vmin.f32 %v6691_v16, 16.0  ;;  %v6576_v17 = vpop.f32.mrf.mxu2  ;;  %v6596_v54 = vpop.f32.mrf.mxu3  ;;  %v6911_v24 = vld [vmem:[#allocation19 + $0x938] sm:$0xff] }
0x1f13   : > { %v10439_v53 = vadd.f32 %v6576_v17, %v6509_v42  ;;  %v10441_v40 = vadd.f32 %v6596_v54, %v6510_v8  ;;  %v6616_v22 = vpop.f32.mrf.mxu0  ;;  %v6928_v8 = vld [vmem:[#allocation19 + $0x9c0] sm:$0xff]  ;;  %7013 = vmatpush.msra.mxu2 %v6911_v24  ;;  %v6636_v50 = vpop.f32.mrf.mxu1 }
0x1f14   : > { %v6653_v47 = vmul.f32 2.1237322e-06, %v10435_v32  ;;  %v6664_v1 = vmul.f32 3.8918573e-05, %v10435_v32  ;;  %v6693_v10 = vmul.f32 2.1237322e-06, %v10437_v34  ;;  %v10450_v33 = vadd.f32 %v6616_v22, %v6511_v23  ;;  %7032 = vmatpush.msra.mxu3 %v6928_v8 }
0x1f15   : > { %v6704_v5 = vmul.f32 3.8918573e-05, %v10437_v34  ;;  %v10448_v20 = vmul.f32 0.70710677, %v10439_v53  ;;  %v10455_v25 = vmul.f32 0.70710677, %v10441_v40 }
0x1f16   : > { %v6654_v39 = vadd.f32 0.00028619796, %v6653_v47  ;;  %v6665_v21 = vadd.f32 0.001143296, %v6664_v1  ;;  %v6694_v11 = vadd.f32 0.00028619796, %v6693_v10 }
0x1f17   : > { %v6705_v36 = vadd.f32 0.001143296, %v6704_v5  ;;  %v6731_v30 = vmul.f32 %v10448_v20, %v10448_v20  ;;  %v6771_v13 = vmul.f32 %v10455_v25, %v10455_v25  ;;  %v10466_v14 = vmul.f32 0.70710677, %v10450_v33  ;;  %v6927_v22 = vld [vmem:[#allocation19 + $0x9b8] sm:$0xff] }
0x1f18   : > { %v6655_v45 = vmul.f32 %v6654_v39, %v10435_v32  ;;  %v6666_v58 = vmul.f32 %v6665_v21, %v10435_v32  ;;  %v6695_v7 = vmul.f32 %v6694_v11, %v10437_v34  ;;  %7033 = vmatpush.msra.mxu3 %v6927_v22 }
0x1f19   : > { %v6706_v6 = vmul.f32 %v6705_v36, %v10437_v34  ;;  %v10461_v62 = vmin.f32 %v6731_v30, 16.0  ;;  %v10473_v57 = vmin.f32 %v6771_v13, 16.0 }
0x1f1a   : > { %v6656_v60 = vadd.f32 0.0036580483, %v6655_v45  ;;  %v6667_v51 = vadd.f32 0.014752088, %v6666_v58  ;;  %v6696_v28 = vadd.f32 0.0036580483, %v6695_v7 }
0x1f1b   : > { %v6707_v49 = vadd.f32 0.014752088, %v6706_v6  ;;  %v6733_v18 = vmul.f32 2.1237322e-06, %v10461_v62  ;;  %v6744_v2 = vmul.f32 3.8918573e-05, %v10461_v62 }
0x1f1c   : > { %v6657_v44 = vmul.f32 %v6656_v60, %v10435_v32  ;;  %v6668_v59 = vmul.f32 %v6667_v51, %v10435_v32  ;;  %v6697_v37 = vmul.f32 %v6696_v28, %v10437_v34  ;;  %v6773_v42 = vmul.f32 2.1237322e-06, %v10473_v57  ;;  %v6910_v45 = vld [vmem:[#allocation19 + $0x930] sm:$0xff]  ;;  %v6909_v7 = vld [vmem:[#allocation19 + $0x928] sm:$0xff] }
0x1f1d   : > { %v6708_v35 = vmul.f32 %v6707_v49, %v10437_v34  ;;  %v6734_v61 = vadd.f32 0.00028619796, %v6733_v18  ;;  %v6745_v55 = vadd.f32 0.001143296, %v6744_v2  ;;  %v6784_v54 = vmul.f32 3.8918573e-05, %v10473_v57  ;;  %7014 = vmatpush.msra.mxu2 %v6910_v45 }
0x1f1e   : > { %v6658_v31 = vadd.f32 0.05243302, %v6657_v44  ;;  %v6669_v0 = vadd.f32 0.112945676, %v6668_v59  ;;  %v6698_v63 = vadd.f32 0.05243302, %v6697_v37  ;;  %v6811_v2 = vmul.f32 %v10466_v14, %v10466_v14 }
0x1f1f   : > { %v6709_v27 = vadd.f32 0.112945676, %v6708_v35  ;;  %v6735_v52 = vmul.f32 %v6734_v61, %v10461_v62  ;;  %v6746_v46 = vmul.f32 %v6745_v55, %v10461_v62  ;;  %v6774_v5 = vadd.f32 0.00028619796, %v6773_v42  ;;  %v6926_v58 = vld [vmem:[#allocation19 + $0x9b0] sm:$0xff]  ;;  %7015 = vmatpush.msra.mxu2 %v6909_v7  ;;  %v6923_v35 = vld [vmem:[#allocation19 + $0x998] sm:$0xff] }
0x1f20   : > { %v6659_v16 = vmul.f32 %v6658_v31, %v10435_v32  ;;  %v6670_v23 = vmul.f32 %v6669_v0, %v10435_v32  ;;  %v6699_v17 = vmul.f32 %v6698_v63, %v10437_v34  ;;  %v6785_v9 = vadd.f32 0.001143296, %v6784_v54  ;;  %7034 = vmatpush.msra.mxu3 %v6926_v58  ;;  %v6906_v31 = vld [vmem:[#allocation19 + $0x910] sm:$0xff]  ;;  %v6905_v42 = vld [vmem:[#allocation19 + $0x908] sm:$0xff]  ;;  %v6951_v54 = vld [vmem:[#allocation19 + $0xa78] sm:$0xff] }
0x1f21   : > { %v6710_v47 = vmul.f32 %v6709_v27, %v10437_v34  ;;  %v6736_v1 = vadd.f32 0.0036580483, %v6735_v52  ;;  %v6747_v10 = vadd.f32 0.014752088, %v6746_v46  ;;  %v6775_v13 = vmul.f32 %v6774_v5, %v10473_v57  ;;  %v6922_v0 = vld [vmem:[#allocation19 + $0x990] sm:$0xff]  ;;  %7045 = vmatpush.msrb.mxu0 %v6951_v54 }
0x1f22   : > { %v6660_v39 = vadd.f32 0.18741608, %v6659_v16  ;;  %v6671_v21 = vadd.f32 0.4994258, %v6670_v23  ;;  %v6700_v11 = vadd.f32 0.18741608, %v6699_v17  ;;  %7035 = vmatpush.msra.mxu3 %v6925_v12  ;;  %v6786_v55 = vmul.f32 %v6785_v9, %v10473_v57 }
0x1f23   : > { %v6711_v36 = vadd.f32 0.4994258, %v6710_v47  ;;  %v6737_v30 = vmul.f32 %v6736_v1, %v10461_v62  ;;  %v6748_v15 = vmul.f32 %v6747_v10, %v10461_v62  ;;  %v6512_v37 = vperm.slane %v10414_v19, 5  ;;  %v6921_v17 = vld [vmem:[#allocation19 + $0x988] sm:$0xff]  ;;  %v6904_v10 = vld [vmem:[#allocation19 + $0x900] sm:$0xff] }
0x1f24   : > { %v6661_v38 = vmul.f32 %v6660_v39, %v10435_v32  ;;  %v6672_v6 = vmul.f32 %v6671_v21, %v10435_v32  ;;  %v6701_v49 = vmul.f32 %v6700_v11, %v10437_v34  ;;  %v6908_v32 = vld [vmem:[#allocation19 + $0x920] sm:$0xff]  ;;  %7036 = vmatpush.msra.mxu3 %v6924_v41  ;;  %v10503_v19 = vmin.f32 %v6811_v2, 16.0  ;;  %v6998_v41 = vld [vmem:[#allocation19 + $0xbf0] sm:$0xff] }
0x1f25   : > { %v6712_v60 = vmul.f32 %v6711_v36, %v10437_v34  ;;  %v6749_v51 = vadd.f32 0.112945676, %v6748_v15  ;;  %v6738_v18 = vadd.f32 0.05243302, %v6737_v30  ;;  %v6776_v34 = vadd.f32 0.0036580483, %v6775_v13  ;;  %7016 = vmatpush.msra.mxu2 %v6908_v32 }
0x1f26   : > { %v10490_v28 = vadd.f32 1.0, %v6672_v6  ;;  %v6662_v61 = vadd.f32 1.1283791, %v6661_v38  ;;  %v6702_v63 = vadd.f32 1.1283791, %v6701_v49  ;;  %7037 = vmatpush.msra.mxu3 %v6923_v35  ;;  %v10505_v46 = vadd.f32 %v6636_v50, %v6512_v37  ;;  %v6920_v30 = vld [vmem:[#allocation19 + $0x980] sm:$0xff] }
0x1f27   : > { %v10495_v44 = vadd.f32 1.0, %v6712_v60  ;;  %v6750_v59 = vmul.f32 %v6749_v51, %v10461_v62  ;;  %v6739_v27 = vmul.f32 %v6738_v18, %v10461_v62  ;;  %7017 = vmatpush.msra.mxu2 %v6907_v56  ;;  %v6777_v16 = vmul.f32 %v6776_v34, %v10473_v57  ;;  %v6950_v15 = vld [vmem:[#allocation19 + $0xa70] sm:$0xff]  ;;  %v6983_v6 = vld [vmem:[#allocation19 + $0xb78] sm:$0xff]  ;;  %v6949_v49 = vld [vmem:[#allocation19 + $0xa68] sm:$0xff] }
0x1f28   : > { %8076 = vrcp.f32 %v10490_v28  ;;  %v10508_v8 = vmul.f32 %v6662_v61, %v10423_v29  ;;  %v6683_v24 = vand.u32 2147483647, %v10490_v28  ;;  %v6787_v23 = vadd.f32 0.014752088, %v6786_v55  ;;  %7038 = vmatpush.msra.mxu3 %v6922_v0  ;;  %v6967_v29 = vld [vmem:[#allocation19 + $0xaf8] sm:$0xff]  ;;  %7046 = vmatpush.msrb.mxu0 %v6950_v15  ;;  %v6966_v38 = vld [vmem:[#allocation19 + $0xaf0] sm:$0xff] }
0x1f29   : > { %8078 = vrcp.f32 %v10495_v44  ;;  %v6751_v52 = vadd.f32 0.4994258, %v6750_v59  ;;  %7018 = vmatpush.msra.mxu2 %v6906_v31  ;;  %vm6679_vm3 = vweird.f32 %v10490_v28  ;;  %v6685_v22 = vand.u32 2147483648, %v10490_v28  ;;  %7065 = vmatpush.msrb.mxu1 %v6967_v29  ;;  %v6999_v13 = vld [vmem:[#allocation19 + $0xbf8] sm:$0xff]  ;;  %v6965_v18 = vld [vmem:[#allocation19 + $0xae8] sm:$0xff]  ;;  %v6982_v37 = vld [vmem:[#allocation19 + $0xb70] sm:$0xff] }
0x1f2a   : > { %v6723_v47 = vand.u32 2147483647, %v10495_v44  ;;  %v10519_v39 = vmul.f32 %v6702_v63, %v10426_v48  ;;  %v6740_v21 = vadd.f32 0.18741608, %v6739_v27  ;;  %v6788_v11 = vmul.f32 %v6787_v23, %v10473_v57  ;;  %7039 = vmatpush.msra.mxu3 %v6921_v17  ;;  %7047 = vmatpush.msrb.mxu0 %v6949_v49  ;;  %v6948_v55 = vld [vmem:[#allocation19 + $0xa60] sm:$0xff]  ;;  %v6981_v27 = vld [vmem:[#allocation19 + $0xb68] sm:$0xff] }
0x1f2b   : > { %v6752_v1 = vmul.f32 %v6751_v52, %v10461_v62  ;;  %v6813_v36 = vmul.f32 2.1237322e-06, %v10503_v19  ;;  %7019 = vmatpush.msra.mxu2 %v6905_v42  ;;  %vm6719_vm4 = vweird.f32 %v10495_v44  ;;  %v6824_v48 = vmul.f32 3.8918573e-05, %v10503_v19  ;;  %7066 = vmatpush.msrb.mxu1 %v6966_v38  ;;  %v6964_v50 = vld [vmem:[#allocation19 + $0xae0] sm:$0xff]  ;;  %v6997_v52 = vld [vmem:[#allocation19 + $0xbe8] sm:$0xff] }
0x1f2c   : > { %vm10531_vm5 = vcmp.eq.f32.partialorder %v6683_v24, 8.507059e+37  ;;  %v6725_v60 = vand.u32 2147483648, %v10495_v44  ;;  %v6789_v51 = vadd.f32 0.112945676, %v6788_v11  ;;  %7040 = vmatpush.msra.mxu3 %v6920_v30  ;;  %v6686_v32 = vor.u32 1.1754944e-38, %v6685_v22  ;;  %7048 = vmatpush.msrb.mxu0 %v6948_v55  ;;  %v6980_v29 = vld [vmem:[#allocation19 + $0xb60] sm:$0xff] }
0x1f2d   : > { %v10528_v7 = vadd.f32 1.0, %v6752_v1  ;;  %7020 = vmatpush.msra.mxu2 %v6904_v10  ;;  %v10540_v59 = vmul.f32 0.70710677, %v10505_v46  ;;  %v6741_v35 = vmul.f32 %v6740_v21, %v10461_v62  ;;  %v6778_v61 = vadd.f32 0.05243302, %v6777_v16  ;;  %7067 = vmatpush.msrb.mxu1 %v6965_v18  ;;  %v6947_v16 = vld [vmem:[#allocation19 + $0xa58] sm:$0xff] }
0x1f2e   : > { %v10516_v5 = vpop.eup %8076  ;;  %v6790_v34 = vmul.f32 %v6789_v51, %v10473_v57  ;;  %7105 = vmatpush.msrb.mxu3 %v6999_v13  ;;  %v6814_v0 = vadd.f32 0.00028619796, %v6813_v36  ;;  %v6825_v63 = vadd.f32 0.001143296, %v6824_v48  ;;  %vm10548_vm8 = vcmp.eq.f32.partialorder %v6723_v47, 8.507059e+37  ;;  %v6963_v1 = vld [vmem:[#allocation19 + $0xad8] sm:$0xff]  ;;  %7049 = vmatpush.msrb.mxu0 %v6947_v16 }
0x1f2f   : > { %v10523_v45 = vpop.eup %8078  ;;  %v6675_v58 = vmul.f32 %v10516_v5, %v10490_v28  ;;  %8080 = vrcp.f32 %v10528_v7  ;;  %7085 = vmatpush.msrb.mxu2 %v6983_v6  ;;  %vm6680_vm6 = vweird.f32 %v10516_v5  ;;  %v6851_v22 = vmul.f32 %v10540_v59, %v10540_v59  ;;  %7068 = vmatpush.msrb.mxu1 %v6964_v50  ;;  %v6996_v47 = vld [vmem:[#allocation19 + $0xbe0] sm:$0xff]  ;;  %v6946_v15 = vld [vmem:[#allocation19 + $0xa50] sm:$0xff]  ;;  %v6995_v51 = vld [vmem:[#allocation19 + $0xbd8] sm:$0xff] }
0x1f30   : > { %v6715_v12 = vmul.f32 %v10523_v45, %v10495_v44  ;;  %vm6720_vm7 = vweird.f32 %v10523_v45  ;;  %v6791_v24 = vadd.f32 0.4994258, %v6790_v34  ;;  %7106 = vmatpush.msrb.mxu3 %v6998_v41  ;;  %v6815_v17 = vmul.f32 %v6814_v0, %v10503_v19  ;;  %vm10561_vm9 = vmor %vm6679_vm3, %vm6680_vm6  ;;  %7050 = vmatpush.msrb.mxu0 %v6946_v15  ;;  %v6960_v50 = vld [vmem:[#allocation19 + $0xac0] sm:$0xff]  ;;  %v6943_v62 = vld [vmem:[#allocation19 + $0xa38] sm:$0xff] }
0x1f31   : > { %v6676_v2 = vsub.f32 1.0, %v6675_v58  ;;  %7086 = vmatpush.msrb.mxu2 %v6982_v37  ;;  %v6826_v54 = vmul.f32 %v6825_v63, %v10503_v19  ;;  %v6726_v11 = vor.u32 1.1754944e-38, %v6725_v60  ;;  %v10566_v36 = vadd.f32 1.1283791, %v6741_v35  ;;  %v6962_v58 = vld [vmem:[#allocation19 + $0xad0] sm:$0xff]  ;;  %vm10578_vm10 = vmor %vm6719_vm4, %vm6720_vm7  ;;  %7069 = vmatpush.msrb.mxu1 %v6963_v1  ;;  %v6979_v60 = vld [vmem:[#allocation19 + $0xb58] sm:$0xff] }
0x1f32   : > { %v6716_v56 = vsub.f32 1.0, %v6715_v12  ;;  %v6792_v30 = vmul.f32 %v6791_v24, %v10473_v57  ;;  %7107 = vmatpush.msrb.mxu3 %v6997_v52  ;;  %v6779_v6 = vmul.f32 %v6778_v61, %v10473_v57  ;;  %v10583_v12 = vmin.f32 %v6851_v22, 16.0  ;;  %v6961_v37 = vld [vmem:[#allocation19 + $0xac8] sm:$0xff]  ;;  %v6959_v24 = vld [vmem:[#allocation19 + $0xab8] sm:$0xff]  ;;  %v6976_v1 = vld [vmem:[#allocation19 + $0xb40] sm:$0xff] }
0x1f33   : > { %v6677_v31 = vmul.f32 %v10516_v5, %v6676_v2  ;;  %7087 = vmatpush.msrb.mxu2 %v6981_v27  ;;  %v6827_v13 = vadd.f32 0.014752088, %v6826_v54  ;;  %v6816_v18 = vadd.f32 0.0036580483, %v6815_v17  ;;  %v6945_v2 = vld [vmem:[#allocation19 + $0xa48] sm:$0xff]  ;;  %7070 = vmatpush.msrb.mxu1 %v6962_v58  ;;  %vm6759_vm12 = vweird.f32 %v10528_v7  ;;  %v6958_v15 = vld [vmem:[#allocation19 + $0xab0] sm:$0xff] }
0x1f34   : > { %v6717_v42 = vmul.f32 %v10523_v45, %v6716_v56  ;;  %7108 = vmatpush.msrb.mxu3 %v6996_v47  ;;  %v10596_v9 = vadd.f32 1.0, %v6792_v30  ;;  %v6853_v55 = vmul.f32 2.1237322e-06, %v10583_v12  ;;  %v6780_v0 = vadd.f32 0.18741608, %v6779_v6  ;;  %7051 = vmatpush.msrb.mxu0 %v6945_v2  ;;  %v6977_v63 = vld [vmem:[#allocation19 + $0xb48] sm:$0xff] }
0x1f35   : > { %v6678_v23 = vadd.f32 %v10516_v5, %v6677_v31  ;;  %v10569_v48 = vpop.eup %8080  ;;  %7088 = vmatpush.msrb.mxu2 %v6980_v29  ;;  %v6828_v34 = vmul.f32 %v6827_v13, %v10503_v19  ;;  %v6765_v31 = vand.u32 2147483648, %v10528_v7  ;;  %7071 = vmatpush.msrb.mxu1 %v6961_v37  ;;  %v6993_v27 = vld [vmem:[#allocation19 + $0xbc8] sm:$0xff]  ;;  %v6763_v52 = vand.u32 2147483647, %v10528_v7  ;;  %v6992_v29 = vld [vmem:[#allocation19 + $0xbc0] sm:$0xff]  ;;  %v6942_v47 = vld [vmem:[#allocation19 + $0xa30] sm:$0xff] }
0x1f36   : > { %v6718_v21 = vadd.f32 %v10523_v45, %v6717_v42  ;;  %v6755_v49 = vmul.f32 %v10569_v48, %v10528_v7  ;;  %vm6760_vm11 = vweird.f32 %v10569_v48  ;;  %7109 = vmatpush.msrb.mxu3 %v6995_v51  ;;  %8082 = vrcp.f32 %v10596_v9  ;;  %v6975_v58 = vld [vmem:[#allocation19 + $0xb38] sm:$0xff]  ;;  %v6974_v2 = vld [vmem:[#allocation19 + $0xb30] sm:$0xff] }
0x1f37   : > { %v6682_v28 = vsel %vm10561_vm9, %v10516_v5, %v6678_v23  ;;  %7089 = vmatpush.msrb.mxu2 %v6979_v60  ;;  %v6817_v42 = vmul.f32 %v6816_v18, %v10503_v19  ;;  %vm10609_vm14 = vmor %vm6759_vm12, %vm6760_vm11  ;;  %v6829_v17 = vadd.f32 0.112945676, %v6828_v34  ;;  %7072 = vmatpush.msrb.mxu1 %v6960_v50  ;;  %v6854_v7 = vadd.f32 0.00028619796, %v6853_v55  ;;  %v6957_v60 = vld [vmem:[#allocation19 + $0xaa8] sm:$0xff] }
0x1f38   : > { %v6687_v5 = vsel %vm10531_vm5, %v6686_v32, %v6682_v28  ;;  %v6722_v44 = vsel %vm10578_vm10, %v10523_v45, %v6718_v21  ;;  %v6978_v45 = vld [vmem:[#allocation19 + $0xb50] sm:$0xff]  ;;  %v6756_v61 = vsub.f32 1.0, %v6755_v49  ;;  %v6766_v10 = vor.u32 1.1754944e-38, %v6765_v31  ;;  %v6991_v28 = vld [vmem:[#allocation19 + $0xbb8] sm:$0xff]  ;;  %v6989_v55 = vld [vmem:[#allocation19 + $0xba8] sm:$0xff] }
0x1f39   : > { %v6688_v41 = vmul.f32 %v6687_v5, %v10508_v8  ;;  %v6727_v56 = vsel %vm10548_vm8, %v6726_v11, %v6722_v44  ;;  %v6994_v32 = vld [vmem:[#allocation19 + $0xbd0] sm:$0xff]  ;;  %v6944_v8 = vld [vmem:[#allocation19 + $0xa40] sm:$0xff]  ;;  %7090 = vmatpush.msrb.mxu2 %v6978_v45  ;;  %v6781_v21 = vmul.f32 %v6780_v0, %v10473_v57  ;;  %v6830_v11 = vmul.f32 %v6829_v17, %v10503_v19  ;;  %v6941_v57 = vld [vmem:[#allocation19 + $0xa28] sm:$0xff] }
0x1f3a   : > { %v6728_v35 = vmul.f32 %v6727_v56, %v10519_v39  ;;  %v6757_v39 = vmul.f32 %v10569_v48, %v6756_v61  ;;  %7110 = vmatpush.msrb.mxu3 %v6994_v32  ;;  %7052 = vmatpush.msrb.mxu0 %v6944_v8  ;;  %v6864_v30 = vmul.f32 3.8918573e-05, %v10583_v12  ;;  %v6743_v38 = vmul.f32 %v10566_v36, %v10448_v20  ;;  %v6940_v56 = vld [vmem:[#allocation19 + $0xa20] sm:$0xff] }
0x1f3b   : > { %v7597_v16 = vclamps-f32 %v6688_v41, 1.0  ;;  %7091 = vmatpush.msrb.mxu2 %v6977_v63  ;;  %7073 = vmatpush.msrb.mxu1 %v6959_v24  ;;  %vm6764_vm15 = vcmp.eq.f32.partialorder %v6763_v52, 8.507059e+37  ;;  %v6818_v13 = vadd.f32 0.05243302, %v6817_v42  ;;  %v6831_v49 = vadd.f32 0.4994258, %v6830_v11 }
0x1f3c   : > { %v7598_v54 = vclamps-f32 %v6728_v35, 1.0  ;;  %v6758_v22 = vadd.f32 %v10569_v48, %v6757_v39  ;;  %7111 = vmatpush.msrb.mxu3 %v6993_v27  ;;  %7053 = vmatpush.msrb.mxu0 %v6943_v62  ;;  %v10622_v51 = vpop.eup %8082  ;;  %v6865_v18 = vadd.f32 0.001143296, %v6864_v30  ;;  %v6639_v20 = vmul.f32 0.5, %v10418_v4  ;;  %v6990_v41 = vld [vmem:[#allocation19 + $0xbb0] sm:$0xff]  ;;  %v6956_v45 = vld [vmem:[#allocation19 + $0xaa0] sm:$0xff] }
0x1f3d   : > { %7092 = vmatpush.msrb.mxu2 %v6976_v1  ;;  %v6891_v5 = vadd.f32 1.0, %v7597_v16  ;;  %7074 = vmatpush.msrb.mxu1 %v6958_v15  ;;  %v6782_v32 = vadd.f32 1.1283791, %v6781_v21  ;;  %v6832_v35 = vmul.f32 %v6831_v49, %v10503_v19  ;;  %v6855_v61 = vmul.f32 %v6854_v7, %v10583_v12  ;;  %v6973_v4 = vld [vmem:[#allocation19 + $0xb28] sm:$0xff]  ;;  %v6939_v63 = vld [vmem:[#allocation19 + $0xa18] sm:$0xff]  ;;  %v6972_v24 = vld [vmem:[#allocation19 + $0xb20] sm:$0xff] }
0x1f3e   : > { %v6762_v6 = vsel %vm10609_vm14, %v10569_v48, %v6758_v22  ;;  %7112 = vmatpush.msrb.mxu3 %v6992_v29  ;;  %7054 = vmatpush.msrb.mxu0 %v6942_v47  ;;  %v6892_v36 = vadd.f32 1.0, %v7598_v54  ;;  %v6795_v48 = vmul.f32 %v10622_v51, %v10596_v9  ;;  %v6866_v34 = vmul.f32 %v6865_v18, %v10583_v12  ;;  %v6955_v27 = vld [vmem:[#allocation19 + $0xa98] sm:$0xff]  ;;  %v6988_v17 = vld [vmem:[#allocation19 + $0xba0] sm:$0xff]  ;;  %v6938_v22 = vld [vmem:[#allocation19 + $0xa10] sm:$0xff] }
0x1f3f   : > { %v6767_v44 = vsel %vm6764_vm15, %v6766_v10, %v6762_v6  ;;  %7093 = vmatpush.msrb.mxu2 %v6975_v58  ;;  %7075 = vmatpush.msrb.mxu1 %v6957_v60  ;;  %v6640_v8 = vmul.f32 0.5, %v10420_v26  ;;  %v6805_v0 = vand.u32 2147483648, %v10596_v9  ;;  %v6897_v39 = vmul.f32 %v6891_v5, %v6639_v20  ;;  %v6954_v47 = vld [vmem:[#allocation19 + $0xa90] sm:$0xff]  ;;  %v6971_v10 = vld [vmem:[#allocation19 + $0xb18] sm:$0xff]  ;;  %v6953_v6 = vld [vmem:[#allocation19 + $0xa88] sm:$0xff] }
0x1f40   : > { %v6768_v37 = vmul.f32 %v6767_v44, %v6743_v38  ;;  %7113 = vmatpush.msrb.mxu3 %v6991_v28  ;;  %7055 = vmatpush.msrb.mxu0 %v6941_v57  ;;  %v6796_v31 = vsub.f32 1.0, %v6795_v48  ;;  %v6819_v52 = vmul.f32 %v6818_v13, %v10503_v19  ;;  %v10633_v42 = vadd.f32 1.0, %v6832_v35  ;;  %v6987_v58 = vld [vmem:[#allocation19 + $0xb98] sm:$0xff]  ;;  %v6937_v28 = vld [vmem:[#allocation19 + $0xa08] sm:$0xff]  ;;  %v6970_v13 = vld [vmem:[#allocation19 + $0xb10] sm:$0xff] }
0x1f41   : > { %7094 = vmatpush.msrb.mxu2 %v6974_v2  ;;  %v6867_v62 = vadd.f32 0.014752088, %v6866_v34  ;;  %7076 = vmatpush.msrb.mxu1 %v6956_v45  ;;  %v6898_v16 = vmul.f32 %v6892_v36, %v6640_v8  ;;  %vm6800_vm0 = vweird.f32 %v10622_v51  ;;  %v6803_v23 = vand.u32 2147483647, %v10596_v9  ;;  %v6986_v5 = vld [vmem:[#allocation19 + $0xb90] sm:$0xff]  ;;  %v6936_v44 = vld [vmem:[#allocation19 + $0xa00] sm:$0xff] }
0x1f42   : > { %v7599_v50 = vclamps-f32 %v6768_v37, 1.0  ;;  %7114 = vmatpush.msrb.mxu3 %v6990_v41  ;;  %7056 = vmatpush.msrb.mxu0 %v6940_v56  ;;  %v6797_v26 = vmul.f32 %v10622_v51, %v6796_v31  ;;  %8084 = vrcp.f32 %v10633_v42  ;;  %v6856_v54 = vadd.f32 0.0036580483, %v6855_v61  ;;  %v6969_v2 = vld [vmem:[#allocation19 + $0xb08] sm:$0xff]  ;;  %v6968_v56 = vld [vmem:[#allocation19 + $0xb00] sm:$0xff] }
0x1f43   : > { %7095 = vmatpush.msrb.mxu2 %v6973_v4  ;;  %7077 = vmatpush.msrb.mxu1 %v6955_v27  ;;  %vm6799_vm13 = vweird.f32 %v10596_v9  ;;  %v6868_v29 = vmul.f32 %v6867_v62, %v10583_v12  ;;  %v6641_v21 = vmul.f32 0.5, %v10439_v53  ;;  %v6806_v30 = vor.u32 1.1754944e-38, %v6805_v0  ;;  %v6985_v37 = vld [vmem:[#allocation19 + $0xb88] sm:$0xff] }
0x1f44   : > { %7115 = vmatpush.msrb.mxu3 %v6989_v55  ;;  %7057 = vmatpush.msrb.mxu0 %v6939_v63  ;;  %v6893_v7 = vadd.f32 1.0, %v7599_v50  ;;  %v6798_v1 = vadd.f32 %v10622_v51, %v6797_v26  ;;  %vm10645_vm1 = vmor %vm6799_vm13, %vm6800_vm0  ;;  %v6820_v15 = vadd.f32 0.18741608, %v6819_v52  ;;  %v6783_v9 = vmul.f32 %v6782_v32, %v10455_v25  ;;  %v6984_v32 = vld [vmem:[#allocation19 + $0xb80] sm:$0xff] }
0x1f45   : > { %7096 = vmatpush.msrb.mxu2 %v6972_v24  ;;  %vm6804_vm2 = vcmp.eq.f32.partialorder %v6803_v23, 8.507059e+37  ;;  %v6869_v53 = vadd.f32 0.112945676, %v6868_v29  ;;  %7041 = vmatmul.f32.vlgmr.msra.gmra.mxu3 %v6898_v16  ;;  %v6857_v60 = vmul.f32 %v6856_v54, %v10583_v12  ;;  %v6642_v35 = vmul.f32 0.5, %v10441_v40 }
0x1f46   : > { %7116 = vmatpush.msrb.mxu3 %v6988_v17  ;;  %7021 = vmatmul.f32.vlgmr.msra.gmra.mxu2 %v6897_v39  ;;  %v6802_v38 = vsel %vm10645_vm1, %v10622_v51, %v6798_v1  ;;  %v6899_v49 = vmul.f32 %v6893_v7, %v6641_v21  ;;  %v6952_v51 = vld [vmem:[#allocation19 + $0xa80] sm:$0xff]  ;;  %v6821_v36 = vmul.f32 %v6820_v15, %v10503_v19  ;;  %v6845_v55 = vand.u32 2147483648, %v10633_v42 }
0x1f47   : > { %7058 = vmatpush.msrb.mxu0 %v6938_v22  ;;  %v6807_v57 = vsel %vm6804_vm2, %v6806_v30, %v6802_v38  ;;  %7078 = vmatpush.msrb.mxu1 %v6954_v47  ;;  %v6870_v25 = vmul.f32 %v6869_v53, %v10583_v12  ;;  %v6858_v4 = vadd.f32 0.05243302, %v6857_v60  ;;  %v6843_v0 = vand.u32 2147483647, %v10633_v42 }
0x1f48   : > { %7097 = vmatpush.msrb.mxu2 %v6971_v10  ;;  %v6808_v18 = vmul.f32 %v6807_v57, %v6783_v9  ;;  %7117 = vmatpush.msrb.mxu3 %v6987_v58  ;;  %v8085_v20 = vpop.eup %8084  ;;  %v6822_v19 = vadd.f32 1.1283791, %v6821_v36  ;;  %vm6839_vm4 = vweird.f32 %v10633_v42  ;;  %v6846_v39 = vor.u32 1.1754944e-38, %v6845_v55  ;;  %v7168_v55 = vld [vmem:[#allocation25 + $0x40] sm:$0xff] }
0x1f49   : > { %7059 = vmatpush.msrb.mxu0 %v6937_v28  ;;  %7079 = vmatpush.msrb.mxu1 %v6953_v6  ;;  %v6835_v41 = vmul.f32 %v8085_v20, %v10633_v42  ;;  %v6871_v45 = vadd.f32 0.4994258, %v6870_v25  ;;  %vm6840_vm3 = vweird.f32 %v8085_v20  ;;  %v6859_v40 = vmul.f32 %v6858_v4, %v10583_v12  ;;  %v7861_v6 = vld [vmem:[#allocation20 + $0x3] ss:$0 sm:$0xff] }
0x1f4a   : > { %7098 = vmatpush.msrb.mxu2 %v6970_v13  ;;  %v7600_v48 = vclamps-f32 %v6808_v18, 1.0  ;;  %7118 = vmatpush.msrb.mxu3 %v6986_v5  ;;  %vm6841_vm5 = vmor %vm6839_vm4, %vm6840_vm3  ;;  %v6823_v52 = vmul.f32 %v6822_v19, %v10466_v14  ;;  %vm6844_vm6 = vcmp.eq.f32.partialorder %v6843_v0, 8.507059e+37  ;;  %v6643_v54 = vmul.f32 0.5, %v10450_v33  ;;  %v7170_v4 = vld [vmem:[#allocation25 + $0x50] sm:$0xff]  ;;  %v7169_v19 = vld [vmem:[#allocation25 + $0x48] sm:$0xff] }
0x1f4b   : > { %7060 = vmatpush.msrb.mxu0 %v6936_v44  ;;  %7080 = vmatpush.msrb.mxu1 %v6952_v51  ;;  %v6836_v34 = vsub.f32 1.0, %v6835_v41  ;;  %v6872_v8 = vmul.f32 %v6871_v45, %v10583_v12  ;;  %v6860_v26 = vadd.f32 0.18741608, %v6859_v40  ;;  %v6644_v9 = vmul.f32 0.5, %v10505_v46  ;;  %v7163_v0 = vld [vmem:[#allocation25 + $0x18] sm:$0xff]  ;;  %v7160_v40 = vld [vmem:[#allocation25] sm:$0xff] }
0x1f4c   : > { %7099 = vmatpush.msrb.mxu2 %v6969_v2  ;;  %v6894_v61 = vadd.f32 1.0, %v7600_v48  ;;  %7119 = vmatpush.msrb.mxu3 %v6985_v37  ;;  %v7175_v37 = vld [vmem:[#allocation25 + $0x78] sm:$0xff]  ;;  %v7174_v48 = vld [vmem:[#allocation25 + $0x70] sm:$0xff] }
0x1f4d   : > { %7061 = vmatmul.f32.vlgmr.msrb.gmra.mxu0 %v6899_v49  ;;  %v6837_v31 = vmul.f32 %v8085_v20, %v6836_v34  ;;  %v6873_v63 = vadd.f32 1.0, %v6872_v8  ;;  %v6861_v42 = vmul.f32 %v6860_v26, %v10583_v12  ;;  %v7171_v34 = vld [vmem:[#allocation25 + $0x58] sm:$0xff]  ;;  %v7210_v26 = vld [vmem:[#allocation28 + $0x60] sm:$0xff] }
0x1f4e   : > { %7100 = vmatpush.msrb.mxu2 %v6968_v56  ;;  %v6900_v50 = vmul.f32 %v6894_v61, %v6642_v35  ;;  %7120 = vmatpush.msrb.mxu3 %v6984_v32  ;;  %v7173_v61 = vld [vmem:[#allocation25 + $0x68] sm:$0xff]  ;;  %v7167_v8 = vld [vmem:[#allocation25 + $0x38] sm:$0xff] }
0x1f4f   : > { %v6838_v27 = vadd.f32 %v8085_v20, %v6837_v31  ;;  %8086 = vrcp.f32 %v6873_v63  ;;  %v6885_v47 = vand.u32 2147483648, %v6873_v63  ;;  %v6862_v10 = vadd.f32 1.1283791, %v6861_v42  ;;  %7177 = vmatpush.msra.mxu0 %v7175_v37  ;;  %v7164_v31 = vld [vmem:[#allocation25 + $0x20] sm:$0xff] }
0x1f50   : > { %7081 = vmatmul.f32.vlgmr.msrb.gmra.mxu1 %v6900_v50  ;;  %v6883_v14 = vand.u32 2147483647, %v6873_v63  ;;  %vm6879_vm8 = vweird.f32 %v6873_v63  ;;  %v7165_v50 = vld [vmem:[#allocation25 + $0x28] sm:$0xff] }
0x1f51   : > { %v6842_v62 = vsel %vm6841_vm5, %v8085_v20, %v6838_v27  ;;  %v6886_v30 = vor.u32 1.1754944e-38, %v6885_v47  ;;  %v6863_v15 = vmul.f32 %v6862_v10, %v10540_v59  ;;  %7178 = vmatpush.msra.mxu0 %v7174_v48  ;;  %v7161_v27 = vld [vmem:[#allocation25 + $0x8] sm:$0xff]  ;;  %v7204_v47 = vld [vmem:[#allocation28 + $0x30] sm:$0xff] }
0x1f52   : > { %v6847_v24 = vsel %vm6844_vm6, %v6846_v39, %v6842_v62  ;;  %vm6884_vm10 = vcmp.eq.f32.partialorder %v6883_v14, 8.507059e+37  ;;  %v7213_v39 = vld [vmem:[#allocation28 + $0x78] sm:$0xff]  ;;  %v7211_v62 = vld [vmem:[#allocation28 + $0x68] sm:$0xff]  ;;  %v7206_v42 = vld [vmem:[#allocation28 + $0x40] sm:$0xff] }
0x1f53   : > { %v6848_v16 = vmul.f32 %v6847_v24, %v6823_v52  ;;  %7179 = vmatpush.msra.mxu0 %v7173_v61  ;;  %v7212_v52 = vld [vmem:[#allocation28 + $0x70] sm:$0xff]  ;;  %7215 = vmatpush.msra.mxu1 %v7213_v39 }
0x1f55   : > { %v7601_v23 = vclamps-f32 %v6848_v16, 1.0  ;;  %v8087_v17 = vpop.eup %8086  ;;  %7216 = vmatpush.msra.mxu1 %v7212_v52 }
0x1f56   : > { %v6875_v7 = vmul.f32 %v8087_v17, %v6873_v63  ;;  %vm6880_vm7 = vweird.f32 %v8087_v17  ;;  %v7162_v63 = vld [vmem:[#allocation25 + $0x10] sm:$0xff] }
0x1f57   : > { %v6895_v22 = vadd.f32 1.0, %v7601_v23  ;;  %vm6881_vm9 = vmor %vm6879_vm8, %vm6880_vm7  ;;  %7217 = vmatpush.msra.mxu1 %v7211_v62 }
0x1f58   : > { %v6876_v29 = vsub.f32 1.0, %v6875_v7 }
0x1f59   : > { %v6901_v1 = vmul.f32 %v6895_v22, %v6643_v54  ;;  %7218 = vmatpush.msra.mxu1 %v7210_v26  ;;  %v7208_v54 = vld [vmem:[#allocation28 + $0x50] sm:$0xff]  ;;  %v7207_v22 = vld [vmem:[#allocation28 + $0x48] sm:$0xff] }
0x1f5a   : > { %v6877_v21 = vmul.f32 %v8087_v17, %v6876_v29 }
0x1f5b   : > { %7101 = vmatmul.f32.vlgmr.msrb.gmra.mxu2 %v6901_v1  ;;  %v7205_v1 = vld [vmem:[#allocation28 + $0x38] sm:$0xff] }
0x1f5c   : > { %v6878_v11 = vadd.f32 %v8087_v17, %v6877_v21  ;;  %v7203_v21 = vld [vmem:[#allocation28 + $0x28] sm:$0xff] }
0x1f5e   : > { %v6882_v58 = vsel %vm6881_vm9, %v8087_v17, %v6878_v11  ;;  %v7209_v17 = vld [vmem:[#allocation28 + $0x58] sm:$0xff] }
0x1f5f   : > { %v6887_v33 = vsel %vm6884_vm10, %v6886_v30, %v6882_v58  ;;  %7219 = vmatpush.msra.mxu1 %v7209_v17 }
0x1f60   : > { %v6888_v28 = vmul.f32 %v6887_v33, %v6863_v15  ;;  %v7862_v15 = vld [vmem:[#allocation22 + $0x3] ss:$0 sm:$0xff] }
0x1f61   : > { %7220 = vmatpush.msra.mxu1 %v7208_v54 }
0x1f62   : > { %v7602_v12 = vclamps-f32 %v6888_v28, 1.0  ;;  %v7863_v28 = vld [vmem:[#allocation23 + $0x3] ss:$0 sm:$0xff] }
0x1f63   : > { %7221 = vmatpush.msra.mxu1 %v7207_v22 }
0x1f64   : > { %v6896_v38 = vadd.f32 1.0, %v7602_v12 }
0x1f65   : > { %7222 = vmatpush.msra.mxu1 %v7206_v42 }
0x1f66   : > { %v6902_v53 = vmul.f32 %v6896_v38, %v6644_v9  ;;  %v7202_v38 = vld [vmem:[#allocation28 + $0x20] sm:$0xff] }
0x1f67   : > { %7223 = vmatpush.msra.mxu1 %v7205_v1 }
0x1f68   : > { %7121 = vmatmul.f32.vlgmr.msrb.gmra.mxu3 %v6902_v53  ;;  %v7201_v53 = vld [vmem:[#allocation28 + $0x18] sm:$0xff] }
0x1f69   : > { %7224 = vmatpush.msra.mxu1 %v7204_v47 }
0x1f6b   : > { %7225 = vmatpush.msra.mxu1 %v7203_v21 }
0x1f6d   : > { %7226 = vmatpush.msra.mxu1 %v7202_v38 }
0x1f6f   : > { %7227 = vmatpush.msra.mxu1 %v7201_v53 }
0x1fc8   : > { %v7042_v60 = vpop.f32.mrf.mxu3 }
0x1fc9   : > { %v7022_v13 = vpop.f32.mrf.mxu2 }
0x1fca   : > { %v7023_v57 = vadd.f32 %v7861_v6, %v7022_v13  ;;  %v7062_v44 = vpop.f32.mrf.mxu0  ;;  %v7200_v6 = vld [vmem:[#allocation28 + $0x10] sm:$0xff]  ;;  %v7199_v13 = vld [vmem:[#allocation28 + $0x8] sm:$0xff] }
0x1fcb   : > { %7228 = vmatpush.msra.mxu1 %v7200_v6 }
0x1fcc   : > { %v7043_v5 = vadd.f32 %v7042_v60, %v7023_v57  ;;  %v7198_v57 = vld [vmem:[#allocation28] sm:$0xff]  ;;  %v7176_v60 = vld [vmem:[#allocation26] sm:$0x1] }
0x1fcd   : > { %v7082_v18 = vpop.f32.mrf.mxu1  ;;  %7229 = vmatpush.msra.mxu1 %v7199_v13 }
0x1fce   : > { %v7063_v49 = vadd.f32 %v7062_v44, %v7043_v5 }
0x1fcf   : > { %7230 = vmatpush.msra.mxu1 %v7198_v57 }
0x1fd0   : > { %v7083_v25 = vadd.f32 %v7082_v18, %v7063_v49  ;;  %v7214_v18 = vld [vmem:[#allocation29] sm:$0x1] }
0x1fde   : > { %v7102_v59 = vpop.f32.mrf.mxu2 }
0x1fdf   : > { %v7103_v51 = vadd.f32 %v7102_v59, %v7083_v25 }
0x1feb   : > { %v7122_v2 = vpop.f32.mrf.mxu3 }
0x1fec   : > { %v7123_v20 = vadd.f32 %v7122_v2, %v7103_v51 }
0x1fee   : > { %v7125_v36 = vadd.f32 %v7123_v20, %v10406_v43  ;;  %v7172_v43 = vld [vmem:[#allocation25 + $0x60] sm:$0xff] }
0x1fef   : > { %7180 = vmatpush.msra.mxu0 %v7172_v43 }
0x1ff0   : > { %v7130_v46 = vmul.f32 %v9111_v3, %v7125_v36 }
0x1ff1   : > { %7181 = vmatpush.msra.mxu0 %v7171_v34 }
0x1ff2   : > { %7131 = vadd.xlane.f32.xlu0 %v7130_v46 }
0x1ff3   : > { %7182 = vmatpush.msra.mxu0 %v7170_v4 }
0x1ff5   : > { %7183 = vmatpush.msra.mxu0 %v7169_v19 }
0x1ff7   : > { %7184 = vmatpush.msra.mxu0 %v7168_v55 }
0x1ff9   : > { %7185 = vmatpush.msra.mxu0 %v7167_v8 }
0x2065   : > { %v7132_v41 = vpop.xlane.xlu0 %7131 }
0x2066   : > { %v7133_v56 = vmul.f32 0.01, %v7132_v41 }
0x2068   : > { %v7134_v45 = vsub.f32 %v7125_v36, %v7133_v56 }
0x206a   : > { %v10671_v32 = vmul.f32 %v9111_v3, %v7134_v45  ;;  %v7166_v3 = vld [vmem:[#allocation25 + $0x30] sm:$0xff] }
0x206b   : > { %7186 = vmatpush.msra.mxu0 %v7166_v3 }
0x206c   : > { %v7136_v35 = vmul.f32 %v10671_v32, %v10671_v32 }
0x206d   : > { %7187 = vmatpush.msra.mxu0 %v7165_v50 }
0x206e   : > { %7137 = vadd.xlane.f32.xlu1 %v7136_v35 }
0x206f   : > { %7188 = vmatpush.msra.mxu0 %v7164_v31 }
0x2071   : > { %7189 = vmatpush.msra.mxu0 %v7163_v0 }
0x2073   : > { %7190 = vmatpush.msra.mxu0 %v7162_v63 }
0x2075   : > { %7191 = vmatpush.msra.mxu0 %v7161_v27 }
0x2077   : > { %7192 = vmatpush.msra.mxu0 %v7160_v40 }
0x20e1   : > { %v7138_v24 = vpop.xlane.xlu1 %7137 }
0x20e2   : > { %v7139_v16 = vmul.f32 0.01, %v7138_v24 }
0x20e4   : > { %v7140_v23 = vadd.f32 1e-12, %v7139_v16 }
0x20e6   : > { %8088 = vrsqrt.f32 %v7140_v23  ;;  %vm7147_vm12 = vweird.f32 %v7140_v23 }
0x20ec   : > { %v8089_v7 = vpop.eup %8088 }
0x20ed   : > { %v7142_v29 = vmul.f32 %v8089_v7, %v7140_v23  ;;  %vm7148_vm11 = vweird.f32 %v8089_v7 }
0x20ee   : > { %vm7149_vm14 = vmor %vm7147_vm12, %vm7148_vm11 }
0x20ef   : > { %v7143_v10 = vmul.f32 %v8089_v7, %v7142_v29 }
0x20f1   : > { %v7144_v14 = vmul.f32 0.5, %v7143_v10 }
0x20f3   : > { %v7145_v11 = vsub.f32 1.5, %v7144_v14 }
0x20f5   : > { %v7146_v30 = vmul.f32 %v8089_v7, %v7145_v11 }
0x20f7   : > { %v7150_v58 = vsel %vm7149_vm14, %v8089_v7, %v7146_v30 }
0x20f8   : > { %v7151_v33 = vmul.f32 %v7150_v58, %v10671_v32 }
0x20fa   : > { %v7155_v12 = vmul.f32 %v7862_v15, %v7151_v33 }
0x20fc   : > { %v7159_v9 = vadd.f32 %v7863_v28, %v7155_v12 }
0x20fe   : > { %7193 = vmatmul.f32.vlgmr.msra.gmra.mxu0 %v7159_v9 }
0x217b   : > { %v7194_v5 = vpop.f32.mrf.mxu0 }
0x217c   : > { %v7195_v44 = vadd.f32 %v7194_v5, %v7176_v60 }
0x217e   : > { %8090 = vtanh.f32 %v7195_v44 }
0x2184   : > { %v8091_v49 = vpop.eup %8090 }
0x2185   : > { %7231 = vmatmul.f32.vlgmr.msra.gmra.mxu1 %v8091_v49 }
0x2202   : > { %v7232_v25 = vpop.f32.mrf.mxu1 }
0x2203   : > { %v7233_v59 = vadd.f32 %v7232_v25, %v7214_v18 }
0x2205   : > { %7235 = vst [vmem:[%s920_s7] sm:$0x1] %v7233_v59 }
0x2206   : > { %8662 = shalt.err (!%p8659_p8)
}
0x2207   : > { %7677 = dma.vmem_to_hbm [thread:$0]  (%p8912_p5), %s7248_s29, 16, %s7250_s1, %s7237_s30  }
0x2208 PF: > { %s10828_s27 = sld [smem:[#allocation46_spill]] }
0x2209   : > { %s10829_s21 = sld [smem:[#allocation43_spill]] }
0x220e   : > { %p7774_p9 = scmp.ge.s32.totalorder %s10828_s27, 2 }
0x220f   : > { %s7261_s20 = sand.u32 1, %s10829_s21  }
0x2210   : > { %p7735_p10 = pnand %p7774_p9, %p8916_p6  ;;  %s7262_s26 = scalar_lea.sflag [#allocation4], %s7261_s20 }
0x2212   : > { %p7736_p11 = pneg %p7735_p10 }
0x2214   : > { %8720 = dma.done.wait (%p7736_p11), %s7262_s26, 16  }
0x2215   : > { %8722 = vsyncadd (%p7736_p11), %s7262_s26, 4294967280  ;;  %s10831_s24 = sld [smem:[#allocation47_spill]] }
0x2216   : > { %s10832_s1 = sld [smem:[#allocation44_spill]] }
0x2217   : > { %s10833_s22 = sld [smem:[#allocation45_spill]] }
0x2218   : > { %s10834_s23 = sld [smem:[#allocation48_spill]] }
0x221b   : > { %p40_p12 = scmp.ge.s32.totalorder %s10831_s24, 4  }
0x221d   :  { %42 = sbr.rel (!%p40_p12) target bundleno = 24 (0x18), region = 247 }
0x2222   :  { %7267 = vsyncpa [#allocation3], 1 }
0x2223   :  { %7269 = vsyncpa [#allocation3 + $0x1], 1 }
0x2224   :  { %7270 = vsyncpa [#allocation6], 1 }
0x2225   :  { %7271 = vsyncpa [#allocation9], 1 }
0x2226   :  { %7272 = vsyncpa [#allocation12], 1 }
0x2227   :  { %7273 = vsyncpa [#allocation15], 1 }
0x2228   :  { %7274 = vsyncpa [#allocation18], 1 }
0x2229   :  { %7275 = vsyncpa [#allocation21], 1 }
0x222a   :  { %7276 = vsyncpa [#allocation24], 1 }
0x222b   :  { %7277 = vsyncpa [#allocation27], 1 }
0x222c   :  { %7278 = vsyncpa [#allocation30], 1 }
0x222d   :  { %7279 = vsyncpa [#allocation4], 1 }
0x222e   :  { %7281 = vsyncpa [#allocation4 + $0x1], 1 }

</bundles_post_ra>
